<compile_context>
chip_gen: v5e
topology: v5e:2x2
jax: 0.10.0
libtpu: 0.0.40
codegen_flags: <defaults>
</compile_context>

<pallas_src>
import jax
import jax.numpy as jnp
from jax.experimental import pallas as pl
from jax.experimental.pallas import tpu as pltpu

# Fixed demo configuration (PyTorch module with a (B=2, 1, 16, 16) input).
B = 2                 # batch
HIMG, WIMG = 16, 16   # input spatial size
C1, C2 = 32, 64       # conv channels
H1, W1 = HIMG, WIMG           # conv1 output spatial
H2, W2 = H1 // 2, W1 // 2     # after pool1 / conv2 spatial
H3, W3 = H2 // 2, W2 // 2     # after pool2
T = H3                        # LSTM sequence length (= H/4)
D = C2                        # LSTM input size (= channels)
HID = 128                     # LSTM hidden size
NOUT = 2                      # fc output size
MXU_DTYPE = jnp.bfloat16      # matmul operand dtype (f32 accumulation)


# ----------------------------------------------------------------------------
# Fused kernel
# ----------------------------------------------------------------------------
def _crnn_kernel(a1_ref, w1_ref, b1_ref, w2_ref, b2_ref,
                 rsel1_ref, csel1_ref, rsel2_ref, csel2_ref,
                 wih0_ref, b0_ref, wbig_ref, bbig_ref,
                 wfc_ref, bfc_ref,
                 o_ref):
    f32 = jnp.float32

    def mxu(a, b):  # bf16 MXU matmul, f32 accumulate
        return jnp.dot(a.astype(MXU_DTYPE), b.astype(MXU_DTYPE),
                       preferred_element_type=f32)

    # ---- conv1 (3x3, pad 1) + bias + ReLU: ONE matmul ----------------------
    # a1 rows = b*H1 + h, cols = dy*W1 + w (im2row built once in the wrapper).
    v1 = jnp.maximum(mxu(a1_ref[...], w1_ref[...]) + b1_ref[...], 0.0)   # (32, 512)

    # ---- pool1: height pairs (+ h-1 / h+1 shifted views for conv2) ---------
    # rsel1 is a stacked 0/1 selector: rows [0:48] pick even source rows,
    # rows [48:96] pick odd source rows; within each half the 48 rows are
    # [prev; same; next] x (b*H2 + h), boundary rows are all-zero (= padding).
    sel1 = mxu(rsel1_ref[...], v1)                      # (96, 512)
    hp_ext = jnp.maximum(sel1[:48], sel1[48:])          # (48, 512)

    # ---- pool1: width pairs via one column-selection matmul ----------------
    selw1 = mxu(hp_ext, csel1_ref[...])                 # (48, 512) = [even | odd]
    p1_ext = jnp.maximum(selw1[:, :W2 * C1], selw1[:, W2 * C1:])   # (48, 256)

    # ---- conv2 (3x3, pad 1) + bias + ReLU: ONE matmul -----------------------
    # K blocks are the dy = 0/1/2 row views (already computed above).
    a2 = jnp.concatenate([p1_ext[:B * H2],
                          p1_ext[B * H2:2 * B * H2],
                          p1_ext[2 * B * H2:]], axis=1)             # (16, 768)
    v2 = jnp.maximum(mxu(a2, w2_ref[...]) + b2_ref[...], 0.0)       # (16, 512)

    # ---- pool2: height pairs (output rows are TIME-major: t*B + b) ----------
    sel2 = mxu(rsel2_ref[...], v2)                      # (16, 512)
    hp2 = jnp.maximum(sel2[:B * T], sel2[B * T:])       # (8, 512)

    # ---- pool2: width pairs; mean over width is folded into wih0 ------------
    selw2 = mxu(hp2, csel2_ref[...])                    # (8, 512) = [even | odd]
    wmax = jnp.maximum(selw2[:, :W3 * C2], selw2[:, W3 * C2:])      # (8, 256)
    # nn.Dropout(0.3) is the identity in eval/inference mode.
    # TODO(synk): train-mode stochastic dropout masking is not modeled.

    # ---- LSTM layer-0 input projection for all timesteps (mean folded in) ---
    gx = mxu(wmax, wih0_ref[...]) + b0_ref[...]         # (T*B, 4*HID), gates (i,f,o,g)

    wbig = wbig_ref[...]                                # (2*HID, 8*HID)
    bbig = bbig_ref[...]                                # (1, 8*HID)

    def cell(gates, c):     # gate order (i, f, o, g): one sigmoid block + one tanh
        s = jax.nn.sigmoid(gates[:, :3 * HID])
        i = s[:, :HID]
        f = s[:, HID:2 * HID]
        o = s[:, 2 * HID:]
        g = jnp.tanh(gates[:, 3 * HID:])
        c_new = f * c + i * g
        return o * jnp.tanh(c_new), c_new

    h1 = jnp.zeros((B, HID), f32)
    c0 = jnp.zeros((B, HID), f32)
    c1 = jnp.zeros((B, HID), f32)
    rec0 = jnp.zeros((B, 4 * HID), f32)   # h0(t-1) @ Whh0 (zero at t=0)

    for t in range(T):        # T small & static -> unrolled
        h0, c0 = cell(gx[t * B:(t + 1) * B, :] + rec0, c0)
        # fused: [h0(t) | h1(t-1)] @ [[Wih1, Whh0], [Whh1, 0]]
        big = mxu(jnp.concatenate([h0, h1], axis=1), wbig) + bbig   # (B, 8*HID)
        rec0 = big[:, 4 * HID:]            # recurrent contribution for step t+1
        h1, c1 = cell(big[:, :4 * HID], c1)

    out = mxu(h1, wfc_ref[...]) + bfc_ref[...]                      # (B, NOUT)
    o_ref[...] = out.astype(o_ref.dtype)


# ----------------------------------------------------------------------------
# Wrapper / parameter packing (one-time glue, outside the hot path)
# ----------------------------------------------------------------------------
def _full_spec(shape):
    nd = len(shape)
    return pl.BlockSpec(shape, lambda i, _nd=nd: (0,) * _nd)


def _banded_conv_weight(w_hwio, width):
    """(3,3,Ci,Co) HWIO -> (3*width*Ci, width*Co): kernel-row-banded matrix mapping
    K = dy*(width*Ci) + w_in*Ci + ci  ->  N = w_out*Co + co; W zero-padding in band."""
    kh, kw, ci, co = w_hwio.shape
    win = jnp.arange(width)[None, :, None]
    wout = jnp.arange(width)[None, None, :]
    dx = jnp.arange(kw)[:, None, None]
    ind = (win == wout + dx - 1).astype(w_hwio.dtype)        # (kw, width, width)
    band = jnp.einsum('xab,yxio->yaibo', ind, w_hwio)        # (kh, w_in, ci, w_out, co)
    return band.reshape(kh * width * ci, width * co)


def _rsel1_stacked():
    """(96, 32) 0/1 selector: row = eo*48 + dy*16 + b*8 + h selects conv1-activation
    row b*H1 + 2*(h+dy-1) + eo (zero row if h+dy-1 is outside [0,H2))."""
    r = jnp.arange(2 * 3 * B * H2)
    eo = r // (3 * B * H2)
    dy = (r % (3 * B * H2)) // (B * H2)
    b = (r % (B * H2)) // H2
    h = r % H2
    src = h + dy - 1
    valid = (src >= 0) & (src < H2)
    col = b * H1 + 2 * src + eo
    c = jnp.arange(B * H1)
    return ((c[None, :] == col[:, None]) & valid[:, None]).astype(MXU_DTYPE)


def _rsel2_stacked():
    """(16, 16) 0/1 selector: row = eo*8 + t*B + b selects conv2-activation row
    b*H2 + 2*t + eo  (output rows are time-major)."""
    r = jnp.arange(2 * B * T)
    eo = r // (B * T)
    tb = r % (B * T)
    t = tb // B
    b = tb % B
    col = b * H2 + 2 * t + eo
    c = jnp.arange(B * H2)
    return (c[None, :] == col[:, None]).astype(MXU_DTYPE)


def _csel_stacked(width, ch):
    """(width*ch, width*ch) 0/1 column selector [even | odd] for width-pair pooling."""
    lin = jnp.arange(width * ch)
    w_in, c_in = lin // ch, lin % ch
    lout = jnp.arange((width // 2) * ch)
    j, c = lout // ch, lout % ch
    same_c = c_in[:, None] == c[None, :]
    even = same_c & (w_in[:, None] == 2 * j[None, :])
    odd = same_c & (w_in[:, None] == 2 * j[None, :] + 1)
    return jnp.concatenate([even, odd], axis=1).astype(MXU_DTYPE)


def _reorder_gates(w):
    """PyTorch gate order (i,f,g,o) -> packed order (i,f,o,g) along last axis."""
    i, f, g, o = jnp.split(w, 4, axis=-1)
    return jnp.concatenate([i, f, o, g], axis=-1)


def pack_params(p):
    f32 = jnp.float32
    # mean-over-width matrix folded into the LSTM layer-0 input weight
    avg = jnp.tile(jnp.eye(D, dtype=f32), (W3, 1)) / float(W3)      # (W3*C2, D)
    wih0_r = _reorder_gates(p["wih0"].astype(f32))
    whh0_r = _reorder_gates(p["whh0"].astype(f32))
    wih1_r = _reorder_gates(p["wih1"].astype(f32))
    whh1_r = _reorder_gates(p["whh1"].astype(f32))
    # fused recurrence weight: [h0 | h1] @ [[Wih1, Whh0], [Whh1, 0]]
    wbig = jnp.zeros((2 * HID, 8 * HID), f32)
    wbig = wbig.at[:HID, :4 * HID].set(wih1_r)
    wbig = wbig.at[HID:, :4 * HID].set(whh1_r)
    wbig = wbig.at[:HID, 4 * HID:].set(whh0_r)
    bbig = jnp.concatenate([_reorder_gates(p["b1"].astype(f32)),
                            jnp.zeros((1, 4 * HID), f32)], axis=1)
    return dict(
        w1=_banded_conv_weight(p["w_conv1"], W1).astype(MXU_DTYPE),      # (48, 512)
        b1=jnp.tile(p["b_conv1"], W1).reshape(1, -1).astype(f32),
        w2=_banded_conv_weight(p["w_conv2"], W2).astype(MXU_DTYPE),      # (768, 512)
        b2=jnp.tile(p["b_conv2"], W2).reshape(1, -1).astype(f32),
        rsel1=_rsel1_stacked(),                                          # (96, 32)
        csel1=_csel_stacked(W1, C1),                                     # (512, 512)
        rsel2=_rsel2_stacked(),                                          # (16, 16)
        csel2=_csel_stacked(W2, C2),                                     # (512, 512)
        wih0=(avg @ wih0_r).astype(MXU_DTYPE),                           # (256, 512)
        b0=_reorder_gates(p["b0"].astype(f32)),
        wbig=wbig.astype(MXU_DTYPE),                                     # (256, 1024)
        bbig=bbig,
        wfc=p["wfc"].astype(MXU_DTYPE),
        bfc=p["bfc"].astype(f32),
    )


def crnn_forward(x_nchw, packed):
    assert x_nchw.shape == (B, 1, HIMG, WIMG), x_nchw.shape
    # Cin = 1 -> per-image (H, W) plane.  Build the conv1 im2row once (tiny):
    # rows = b*H1 + h, cols = dy*W1 + w, with H zero-padding; W padding lives in w1.
    x = x_nchw.astype(jnp.float32).reshape(B, HIMG, WIMG)
    xpad = jnp.pad(x, ((0, 0), (1, 1), (0, 0)))                          # (B, H+2, W)
    a1 = jnp.concatenate([xpad[:, d:d + H1, :] for d in range(3)],
                         axis=-1).reshape(B * H1, 3 * W1)                # (32, 48)

    args = (a1, packed["w1"], packed["b1"], packed["w2"], packed["b2"],
            packed["rsel1"], packed["csel1"], packed["rsel2"], packed["csel2"],
            packed["wih0"], packed["b0"], packed["wbig"], packed["bbig"],
            packed["wfc"], packed["bfc"])

    return pl.pallas_call(
        _crnn_kernel,
        out_shape=jax.ShapeDtypeStruct((B, NOUT), jnp.float32),
        grid=(1,),
        in_specs=[_full_spec(a.shape) for a in args],
        out_specs=_full_spec((B, NOUT)),
        compiler_params=pltpu.CompilerParams(dimension_semantics=("arbitrary",)),
    )(*args)


# ----------------------------------------------------------------------------
# Deterministic synthetic parameters (shapes follow the PyTorch module)
# ----------------------------------------------------------------------------
def init_params(key):
    ks = jax.random.split(key, 16)

    def u(k, shape, fan_in):
        s = 1.0 / jnp.sqrt(float(fan_in))
        return jax.random.uniform(k, shape, jnp.float32, -s, s)

    return {
        "w_conv1": u(ks[0], (3, 3, 1, C1), 9),                 # HWIO
        "b_conv1": u(ks[1], (C1,), 9),
        "w_conv2": u(ks[2], (3, 3, C1, C2), 9 * C1),
        "b_conv2": u(ks[3], (C2,), 9 * C1),
        # LSTM layer 0 (64 -> 128); stored transposed (in, 4H), PyTorch gates [i,f,g,o]
        "wih0": u(ks[4], (D, 4 * HID), HID),
        "whh0": u(ks[5], (HID, 4 * HID), HID),
        "b0": (u(ks[6], (1, 4 * HID), HID) + u(ks[7], (1, 4 * HID), HID)),   # b_ih+b_hh
        # LSTM layer 1 (128 -> 128)
        "wih1": u(ks[8], (HID, 4 * HID), HID),
        "whh1": u(ks[9], (HID, 4 * HID), HID),
        "b1": (u(ks[10], (1, 4 * HID), HID) + u(ks[11], (1, 4 * HID), HID)),
        # fc: Linear(128, 2), stored transposed (128, 2)
        "wfc": u(ks[12], (HID, NOUT), HID),
        "bfc": u(ks[13], (1, NOUT), HID),
    }


if __name__ == "__main__":
    key = jax.random.PRNGKey(0)
    pkey, xkey = jax.random.split(key)
    params = init_params(pkey)
    packed = pack_params(params)       # one-time weight repacking

    # PyTorch-style NCHW input: (batch=2, channels=1, H=16, W=16)
    x = jax.random.normal(xkey, (B, 1, HIMG, WIMG), jnp.float32)

    fwd = jax.jit(crnn_forward)
    out = fwd(x, packed)
    jax.block_until_ready(out)
    assert out.shape == (B, NOUT), out.shape
    assert jnp.all(jnp.isfinite(out))
    print("KERNEL_OK")
</pallas_src>

<mosaic_0001>
module attributes {stable_mosaic.version = 11 : i64} {
  func.func @_crnn_kernel(%arg0: i32, %arg1: memref<32x48xf32, #tpu.memory_space<vmem>>, %arg2: memref<48x512xbf16, #tpu.memory_space<vmem>>, %arg3: memref<1x512xf32, #tpu.memory_space<vmem>>, %arg4: memref<768x512xbf16, #tpu.memory_space<vmem>>, %arg5: memref<1x512xf32, #tpu.memory_space<vmem>>, %arg6: memref<96x32xbf16, #tpu.memory_space<vmem>>, %arg7: memref<512x512xbf16, #tpu.memory_space<vmem>>, %arg8: memref<16x16xbf16, #tpu.memory_space<vmem>>, %arg9: memref<512x512xbf16, #tpu.memory_space<vmem>>, %arg10: memref<256x512xbf16, #tpu.memory_space<vmem>>, %arg11: memref<1x512xf32, #tpu.memory_space<vmem>>, %arg12: memref<256x1024xbf16, #tpu.memory_space<vmem>>, %arg13: memref<1x1024xf32, #tpu.memory_space<vmem>>, %arg14: memref<128x2xbf16, #tpu.memory_space<vmem>>, %arg15: memref<1x2xf32, #tpu.memory_space<vmem>>, %arg16: memref<2x2xf32, #tpu.memory_space<vmem>>) attributes {dimension_semantics = [#tpu.dimension_semantics<arbitrary>], iteration_bounds = array<i64: 1>, scalar_prefetch = 0 : i64, scratch_operands = 0 : i64, tpu.core_type = #tpu.core_type<tc>, window_params = [{pipeline_mode = #tpu.pipeline_mode<synchronous>, transform_indices = @transform_0, window_bounds = array<i64: 32, 48>}, {pipeline_mode = #tpu.pipeline_mode<synchronous>, transform_indices = @transform_1, window_bounds = array<i64: 48, 512>}, {pipeline_mode = #tpu.pipeline_mode<synchronous>, transform_indices = @transform_2, window_bounds = array<i64: 1, 512>}, {pipeline_mode = #tpu.pipeline_mode<synchronous>, transform_indices = @transform_3, window_bounds = array<i64: 768, 512>}, {pipeline_mode = #tpu.pipeline_mode<synchronous>, transform_indices = @transform_4, window_bounds = array<i64: 1, 512>}, {pipeline_mode = #tpu.pipeline_mode<synchronous>, transform_indices = @transform_5, window_bounds = array<i64: 96, 32>}, {pipeline_mode = #tpu.pipeline_mode<synchronous>, transform_indices = @transform_6, window_bounds = array<i64: 512, 512>}, {pipeline_mode = #tpu.pipeline_mode<synchronous>, transform_indices = @transform_7, window_bounds = array<i64: 16, 16>}, {pipeline_mode = #tpu.pipeline_mode<synchronous>, transform_indices = @transform_8, window_bounds = array<i64: 512, 512>}, {pipeline_mode = #tpu.pipeline_mode<synchronous>, transform_indices = @transform_9, window_bounds = array<i64: 256, 512>}, {pipeline_mode = #tpu.pipeline_mode<synchronous>, transform_indices = @transform_10, window_bounds = array<i64: 1, 512>}, {pipeline_mode = #tpu.pipeline_mode<synchronous>, transform_indices = @transform_11, window_bounds = array<i64: 256, 1024>}, {pipeline_mode = #tpu.pipeline_mode<synchronous>, transform_indices = @transform_12, window_bounds = array<i64: 1, 1024>}, {pipeline_mode = #tpu.pipeline_mode<synchronous>, transform_indices = @transform_13, window_bounds = array<i64: 128, 2>}, {pipeline_mode = #tpu.pipeline_mode<synchronous>, transform_indices = @transform_14, window_bounds = array<i64: 1, 2>}, {pipeline_mode = #tpu.pipeline_mode<synchronous>, transform_indices = @transform_15, window_bounds = array<i64: 2, 2>}]} {
    %c0 = arith.constant 0 : index
    %c0_0 = arith.constant 0 : index
    %0 = vector.load %arg1[%c0, %c0_0] : memref<32x48xf32, #tpu.memory_space<vmem>>, vector<32x48xf32>
    %c0_1 = arith.constant 0 : index
    %c0_2 = arith.constant 0 : index
    %1 = vector.load %arg2[%c0_1, %c0_2] : memref<48x512xbf16, #tpu.memory_space<vmem>>, vector<48x512xbf16>
    %2 = arith.truncf %0 : vector<32x48xf32> to vector<32x48xbf16>
    %cst = arith.constant dense<0.000000e+00> : vector<32x512xf32>
    %3 = tpu.matmul %2, %1, %cst {dimension_numbers = #tpu.dot_dimension_numbers<[1], [0], [0], [1], [0, 0, 1, 1], [], []>} : vector<32x48xbf16>, vector<48x512xbf16>, vector<32x512xf32> -> vector<32x512xf32>
    %c0_3 = arith.constant 0 : index
    %c0_4 = arith.constant 0 : index
    %4 = vector.load %arg3[%c0_3, %c0_4] : memref<1x512xf32, #tpu.memory_space<vmem>>, vector<1x512xf32>
    %5 = vector.broadcast %4 : vector<1x512xf32> to vector<32x512xf32>
    %6 = arith.addf %3, %5 : vector<32x512xf32>
    %cst_5 = arith.constant 0.000000e+00 : f32
    %7 = vector.broadcast %cst_5 : f32 to vector<32x512xf32>
    %8 = arith.maximumf %6, %7 : vector<32x512xf32>
    %c0_6 = arith.constant 0 : index
    %c0_7 = arith.constant 0 : index
    %9 = vector.load %arg6[%c0_6, %c0_7] : memref<96x32xbf16, #tpu.memory_space<vmem>>, vector<96x32xbf16>
    %10 = arith.truncf %8 : vector<32x512xf32> to vector<32x512xbf16>
    %cst_8 = arith.constant dense<0.000000e+00> : vector<96x512xf32>
    %11 = tpu.matmul %9, %10, %cst_8 {dimension_numbers = #tpu.dot_dimension_numbers<[1], [0], [0], [1], [0, 0, 1, 1], [], []>} : vector<96x32xbf16>, vector<32x512xbf16>, vector<96x512xf32> -> vector<96x512xf32>
    %12 = vector.extract_strided_slice %11 {offsets = [0, 0], sizes = [48, 512], strides = [1, 1]} : vector<96x512xf32> to vector<48x512xf32>
    %13 = vector.extract_strided_slice %11 {offsets = [48, 0], sizes = [48, 512], strides = [1, 1]} : vector<96x512xf32> to vector<48x512xf32>
    %14 = arith.maximumf %12, %13 : vector<48x512xf32>
    %c0_9 = arith.constant 0 : index
    %c0_10 = arith.constant 0 : index
    %15 = vector.load %arg7[%c0_9, %c0_10] : memref<512x512xbf16, #tpu.memory_space<vmem>>, vector<512x512xbf16>
    %16 = arith.truncf %14 : vector<48x512xf32> to vector<48x512xbf16>
    %cst_11 = arith.constant dense<0.000000e+00> : vector<48x512xf32>
    %17 = tpu.matmul %16, %15, %cst_11 {dimension_numbers = #tpu.dot_dimension_numbers<[1], [0], [0], [1], [0, 0, 1, 1], [], []>} : vector<48x512xbf16>, vector<512x512xbf16>, vector<48x512xf32> -> vector<48x512xf32>
    %18 = vector.extract_strided_slice %17 {offsets = [0, 0], sizes = [48, 256], strides = [1, 1]} : vector<48x512xf32> to vector<48x256xf32>
    %19 = vector.extract_strided_slice %17 {offsets = [0, 256], sizes = [48, 256], strides = [1, 1]} : vector<48x512xf32> to vector<48x256xf32>
    %20 = arith.maximumf %18, %19 : vector<48x256xf32>
    %21 = vector.extract_strided_slice %20 {offsets = [0, 0], sizes = [16, 256], strides = [1, 1]} : vector<48x256xf32> to vector<16x256xf32>
    %22 = vector.extract_strided_slice %20 {offsets = [16, 0], sizes = [16, 256], strides = [1, 1]} : vector<48x256xf32> to vector<16x256xf32>
    %23 = vector.extract_strided_slice %20 {offsets = [32, 0], sizes = [16, 256], strides = [1, 1]} : vector<48x256xf32> to vector<16x256xf32>
    %24 = tpu.concatenate %21, %22, %23 in 1 : vector<16x256xf32>, vector<16x256xf32>, vector<16x256xf32> -> vector<16x768xf32>
    %c0_12 = arith.constant 0 : index
    %c0_13 = arith.constant 0 : index
    %25 = vector.load %arg4[%c0_12, %c0_13] : memref<768x512xbf16, #tpu.memory_space<vmem>>, vector<768x512xbf16>
    %26 = arith.truncf %24 : vector<16x768xf32> to vector<16x768xbf16>
    %cst_14 = arith.constant dense<0.000000e+00> : vector<16x512xf32>
    %27 = tpu.matmul %26, %25, %cst_14 {dimension_numbers = #tpu.dot_dimension_numbers<[1], [0], [0], [1], [0, 0, 1, 1], [], []>} : vector<16x768xbf16>, vector<768x512xbf16>, vector<16x512xf32> -> vector<16x512xf32>
    %c0_15 = arith.constant 0 : index
    %c0_16 = arith.constant 0 : index
    %28 = vector.load %arg5[%c0_15, %c0_16] : memref<1x512xf32, #tpu.memory_space<vmem>>, vector<1x512xf32>
    %29 = vector.broadcast %28 : vector<1x512xf32> to vector<16x512xf32>
    %30 = arith.addf %27, %29 : vector<16x512xf32>
    %cst_17 = arith.constant 0.000000e+00 : f32
    %31 = vector.broadcast %cst_17 : f32 to vector<16x512xf32>
    %32 = arith.maximumf %30, %31 : vector<16x512xf32>
    %c0_18 = arith.constant 0 : index
    %c0_19 = arith.constant 0 : index
    %33 = vector.load %arg8[%c0_18, %c0_19] : memref<16x16xbf16, #tpu.memory_space<vmem>>, vector<16x16xbf16>
    %34 = arith.truncf %32 : vector<16x512xf32> to vector<16x512xbf16>
    %cst_20 = arith.constant dense<0.000000e+00> : vector<16x512xf32>
    %35 = tpu.matmul %33, %34, %cst_20 {dimension_numbers = #tpu.dot_dimension_numbers<[1], [0], [0], [1], [0, 0, 1, 1], [], []>} : vector<16x16xbf16>, vector<16x512xbf16>, vector<16x512xf32> -> vector<16x512xf32>
    %36 = vector.extract_strided_slice %35 {offsets = [0, 0], sizes = [8, 512], strides = [1, 1]} : vector<16x512xf32> to vector<8x512xf32>
    %37 = vector.extract_strided_slice %35 {offsets = [8, 0], sizes = [8, 512], strides = [1, 1]} : vector<16x512xf32> to vector<8x512xf32>
    %38 = arith.maximumf %36, %37 : vector<8x512xf32>
    %c0_21 = arith.constant 0 : index
    %c0_22 = arith.constant 0 : index
    %39 = vector.load %arg9[%c0_21, %c0_22] : memref<512x512xbf16, #tpu.memory_space<vmem>>, vector<512x512xbf16>
    %40 = arith.truncf %38 : vector<8x512xf32> to vector<8x512xbf16>
    %cst_23 = arith.constant dense<0.000000e+00> : vector<8x512xf32>
    %41 = tpu.matmul %40, %39, %cst_23 {dimension_numbers = #tpu.dot_dimension_numbers<[1], [0], [0], [1], [0, 0, 1, 1], [], []>} : vector<8x512xbf16>, vector<512x512xbf16>, vector<8x512xf32> -> vector<8x512xf32>
    %42 = vector.extract_strided_slice %41 {offsets = [0, 0], sizes = [8, 256], strides = [1, 1]} : vector<8x512xf32> to vector<8x256xf32>
    %43 = vector.extract_strided_slice %41 {offsets = [0, 256], sizes = [8, 256], strides = [1, 1]} : vector<8x512xf32> to vector<8x256xf32>
    %44 = arith.maximumf %42, %43 : vector<8x256xf32>
    %c0_24 = arith.constant 0 : index
    %c0_25 = arith.constant 0 : index
    %45 = vector.load %arg10[%c0_24, %c0_25] : memref<256x512xbf16, #tpu.memory_space<vmem>>, vector<256x512xbf16>
    %46 = arith.truncf %44 : vector<8x256xf32> to vector<8x256xbf16>
    %cst_26 = arith.constant dense<0.000000e+00> : vector<8x512xf32>
    %47 = tpu.matmul %46, %45, %cst_26 {dimension_numbers = #tpu.dot_dimension_numbers<[1], [0], [0], [1], [0, 0, 1, 1], [], []>} : vector<8x256xbf16>, vector<256x512xbf16>, vector<8x512xf32> -> vector<8x512xf32>
    %c0_27 = arith.constant 0 : index
    %c0_28 = arith.constant 0 : index
    %48 = vector.load %arg11[%c0_27, %c0_28] : memref<1x512xf32, #tpu.memory_space<vmem>>, vector<1x512xf32>
    %49 = vector.broadcast %48 : vector<1x512xf32> to vector<8x512xf32>
    %50 = arith.addf %47, %49 : vector<8x512xf32>
    %c0_29 = arith.constant 0 : index
    %c0_30 = arith.constant 0 : index
    %51 = vector.load %arg12[%c0_29, %c0_30] : memref<256x1024xbf16, #tpu.memory_space<vmem>>, vector<256x1024xbf16>
    %c0_31 = arith.constant 0 : index
    %c0_32 = arith.constant 0 : index
    %52 = vector.load %arg13[%c0_31, %c0_32] : memref<1x1024xf32, #tpu.memory_space<vmem>>, vector<1x1024xf32>
    %cst_33 = arith.constant 0.000000e+00 : f32
    %53 = vector.broadcast %cst_33 : f32 to vector<2x128xf32>
    %cst_34 = arith.constant 0.000000e+00 : f32
    %54 = vector.broadcast %cst_34 : f32 to vector<2x128xf32>
    %cst_35 = arith.constant 0.000000e+00 : f32
    %55 = vector.broadcast %cst_35 : f32 to vector<2x128xf32>
    %cst_36 = arith.constant 0.000000e+00 : f32
    %56 = vector.broadcast %cst_36 : f32 to vector<2x512xf32>
    %57 = vector.extract_strided_slice %50 {offsets = [0, 0], sizes = [2, 512], strides = [1, 1]} : vector<8x512xf32> to vector<2x512xf32>
    %58 = arith.addf %57, %56 : vector<2x512xf32>
    %59 = vector.extract_strided_slice %58 {offsets = [0, 0], sizes = [2, 384], strides = [1, 1]} : vector<2x512xf32> to vector<2x384xf32>
    %60 = arith.negf %59 : vector<2x384xf32>
    %61 = math.exp %60 : vector<2x384xf32>
    %cst_37 = arith.constant 1.000000e+00 : f32
    %62 = vector.broadcast %cst_37 : f32 to vector<2x384xf32>
    %63 = arith.addf %62, %61 : vector<2x384xf32>
    %64 = arith.divf %62, %63 : vector<2x384xf32>
    %65 = vector.extract_strided_slice %64 {offsets = [0, 0], sizes = [2, 128], strides = [1, 1]} : vector<2x384xf32> to vector<2x128xf32>
    %66 = vector.extract_strided_slice %64 {offsets = [0, 128], sizes = [2, 128], strides = [1, 1]} : vector<2x384xf32> to vector<2x128xf32>
    %67 = vector.extract_strided_slice %64 {offsets = [0, 256], sizes = [2, 128], strides = [1, 1]} : vector<2x384xf32> to vector<2x128xf32>
    %68 = vector.extract_strided_slice %58 {offsets = [0, 384], sizes = [2, 128], strides = [1, 1]} : vector<2x512xf32> to vector<2x128xf32>
    %69 = math.tanh %68 : vector<2x128xf32>
    %70 = arith.mulf %66, %54 : vector<2x128xf32>
    %71 = arith.mulf %65, %69 : vector<2x128xf32>
    %72 = arith.addf %70, %71 : vector<2x128xf32>
    %73 = math.tanh %72 : vector<2x128xf32>
    %74 = arith.mulf %67, %73 : vector<2x128xf32>
    %75 = tpu.concatenate %74, %53 in 1 : vector<2x128xf32>, vector<2x128xf32> -> vector<2x256xf32>
    %76 = arith.truncf %75 : vector<2x256xf32> to vector<2x256xbf16>
    %cst_38 = arith.constant dense<0.000000e+00> : vector<2x1024xf32>
    %77 = tpu.matmul %76, %51, %cst_38 {dimension_numbers = #tpu.dot_dimension_numbers<[1], [0], [0], [1], [0, 0, 1, 1], [], []>} : vector<2x256xbf16>, vector<256x1024xbf16>, vector<2x1024xf32> -> vector<2x1024xf32>
    %78 = vector.broadcast %52 : vector<1x1024xf32> to vector<2x1024xf32>
    %79 = arith.addf %77, %78 : vector<2x1024xf32>
    %80 = vector.extract_strided_slice %79 {offsets = [0, 512], sizes = [2, 512], strides = [1, 1]} : vector<2x1024xf32> to vector<2x512xf32>
    %81 = vector.extract_strided_slice %79 {offsets = [0, 0], sizes = [2, 512], strides = [1, 1]} : vector<2x1024xf32> to vector<2x512xf32>
    %82 = vector.extract_strided_slice %81 {offsets = [0, 0], sizes = [2, 384], strides = [1, 1]} : vector<2x512xf32> to vector<2x384xf32>
    %83 = arith.negf %82 : vector<2x384xf32>
    %84 = math.exp %83 : vector<2x384xf32>
    %cst_39 = arith.constant 1.000000e+00 : f32
    %85 = vector.broadcast %cst_39 : f32 to vector<2x384xf32>
    %86 = arith.addf %85, %84 : vector<2x384xf32>
    %87 = arith.divf %85, %86 : vector<2x384xf32>
    %88 = vector.extract_strided_slice %87 {offsets = [0, 0], sizes = [2, 128], strides = [1, 1]} : vector<2x384xf32> to vector<2x128xf32>
    %89 = vector.extract_strided_slice %87 {offsets = [0, 128], sizes = [2, 128], strides = [1, 1]} : vector<2x384xf32> to vector<2x128xf32>
    %90 = vector.extract_strided_slice %87 {offsets = [0, 256], sizes = [2, 128], strides = [1, 1]} : vector<2x384xf32> to vector<2x128xf32>
    %91 = vector.extract_strided_slice %81 {offsets = [0, 384], sizes = [2, 128], strides = [1, 1]} : vector<2x512xf32> to vector<2x128xf32>
    %92 = math.tanh %91 : vector<2x128xf32>
    %93 = arith.mulf %89, %55 : vector<2x128xf32>
    %94 = arith.mulf %88, %92 : vector<2x128xf32>
    %95 = arith.addf %93, %94 : vector<2x128xf32>
    %96 = math.tanh %95 : vector<2x128xf32>
    %97 = arith.mulf %90, %96 : vector<2x128xf32>
    %98 = vector.extract_strided_slice %50 {offsets = [2, 0], sizes = [2, 512], strides = [1, 1]} : vector<8x512xf32> to vector<2x512xf32>
    %99 = arith.addf %98, %80 : vector<2x512xf32>
    %100 = vector.extract_strided_slice %99 {offsets = [0, 0], sizes = [2, 384], strides = [1, 1]} : vector<2x512xf32> to vector<2x384xf32>
    %101 = arith.negf %100 : vector<2x384xf32>
    %102 = math.exp %101 : vector<2x384xf32>
    %cst_40 = arith.constant 1.000000e+00 : f32
    %103 = vector.broadcast %cst_40 : f32 to vector<2x384xf32>
    %104 = arith.addf %103, %102 : vector<2x384xf32>
    %105 = arith.divf %103, %104 : vector<2x384xf32>
    %106 = vector.extract_strided_slice %105 {offsets = [0, 0], sizes = [2, 128], strides = [1, 1]} : vector<2x384xf32> to vector<2x128xf32>
    %107 = vector.extract_strided_slice %105 {offsets = [0, 128], sizes = [2, 128], strides = [1, 1]} : vector<2x384xf32> to vector<2x128xf32>
    %108 = vector.extract_strided_slice %105 {offsets = [0, 256], sizes = [2, 128], strides = [1, 1]} : vector<2x384xf32> to vector<2x128xf32>
    %109 = vector.extract_strided_slice %99 {offsets = [0, 384], sizes = [2, 128], strides = [1, 1]} : vector<2x512xf32> to vector<2x128xf32>
    %110 = math.tanh %109 : vector<2x128xf32>
    %111 = arith.mulf %107, %72 : vector<2x128xf32>
    %112 = arith.mulf %106, %110 : vector<2x128xf32>
    %113 = arith.addf %111, %112 : vector<2x128xf32>
    %114 = math.tanh %113 : vector<2x128xf32>
    %115 = arith.mulf %108, %114 : vector<2x128xf32>
    %116 = tpu.concatenate %115, %97 in 1 : vector<2x128xf32>, vector<2x128xf32> -> vector<2x256xf32>
    %117 = arith.truncf %116 : vector<2x256xf32> to vector<2x256xbf16>
    %cst_41 = arith.constant dense<0.000000e+00> : vector<2x1024xf32>
    %118 = tpu.matmul %117, %51, %cst_41 {dimension_numbers = #tpu.dot_dimension_numbers<[1], [0], [0], [1], [0, 0, 1, 1], [], []>} : vector<2x256xbf16>, vector<256x1024xbf16>, vector<2x1024xf32> -> vector<2x1024xf32>
    %119 = vector.broadcast %52 : vector<1x1024xf32> to vector<2x1024xf32>
    %120 = arith.addf %118, %119 : vector<2x1024xf32>
    %121 = vector.extract_strided_slice %120 {offsets = [0, 512], sizes = [2, 512], strides = [1, 1]} : vector<2x1024xf32> to vector<2x512xf32>
    %122 = vector.extract_strided_slice %120 {offsets = [0, 0], sizes = [2, 512], strides = [1, 1]} : vector<2x1024xf32> to vector<2x512xf32>
    %123 = vector.extract_strided_slice %122 {offsets = [0, 0], sizes = [2, 384], strides = [1, 1]} : vector<2x512xf32> to vector<2x384xf32>
    %124 = arith.negf %123 : vector<2x384xf32>
    %125 = math.exp %124 : vector<2x384xf32>
    %cst_42 = arith.constant 1.000000e+00 : f32
    %126 = vector.broadcast %cst_42 : f32 to vector<2x384xf32>
    %127 = arith.addf %126, %125 : vector<2x384xf32>
    %128 = arith.divf %126, %127 : vector<2x384xf32>
    %129 = vector.extract_strided_slice %128 {offsets = [0, 0], sizes = [2, 128], strides = [1, 1]} : vector<2x384xf32> to vector<2x128xf32>
    %130 = vector.extract_strided_slice %128 {offsets = [0, 128], sizes = [2, 128], strides = [1, 1]} : vector<2x384xf32> to vector<2x128xf32>
    %131 = vector.extract_strided_slice %128 {offsets = [0, 256], sizes = [2, 128], strides = [1, 1]} : vector<2x384xf32> to vector<2x128xf32>
    %132 = vector.extract_strided_slice %122 {offsets = [0, 384], sizes = [2, 128], strides = [1, 1]} : vector<2x512xf32> to vector<2x128xf32>
    %133 = math.tanh %132 : vector<2x128xf32>
    %134 = arith.mulf %130, %95 : vector<2x128xf32>
    %135 = arith.mulf %129, %133 : vector<2x128xf32>
    %136 = arith.addf %134, %135 : vector<2x128xf32>
    %137 = math.tanh %136 : vector<2x128xf32>
    %138 = arith.mulf %131, %137 : vector<2x128xf32>
    %139 = vector.extract_strided_slice %50 {offsets = [4, 0], sizes = [2, 512], strides = [1, 1]} : vector<8x512xf32> to vector<2x512xf32>
    %140 = arith.addf %139, %121 : vector<2x512xf32>
    %141 = vector.extract_strided_slice %140 {offsets = [0, 0], sizes = [2, 384], strides = [1, 1]} : vector<2x512xf32> to vector<2x384xf32>
    %142 = arith.negf %141 : vector<2x384xf32>
    %143 = math.exp %142 : vector<2x384xf32>
    %cst_43 = arith.constant 1.000000e+00 : f32
    %144 = vector.broadcast %cst_43 : f32 to vector<2x384xf32>
    %145 = arith.addf %144, %143 : vector<2x384xf32>
    %146 = arith.divf %144, %145 : vector<2x384xf32>
    %147 = vector.extract_strided_slice %146 {offsets = [0, 0], sizes = [2, 128], strides = [1, 1]} : vector<2x384xf32> to vector<2x128xf32>
    %148 = vector.extract_strided_slice %146 {offsets = [0, 128], sizes = [2, 128], strides = [1, 1]} : vector<2x384xf32> to vector<2x128xf32>
    %149 = vector.extract_strided_slice %146 {offsets = [0, 256], sizes = [2, 128], strides = [1, 1]} : vector<2x384xf32> to vector<2x128xf32>
    %150 = vector.extract_strided_slice %140 {offsets = [0, 384], sizes = [2, 128], strides = [1, 1]} : vector<2x512xf32> to vector<2x128xf32>
    %151 = math.tanh %150 : vector<2x128xf32>
    %152 = arith.mulf %148, %113 : vector<2x128xf32>
    %153 = arith.mulf %147, %151 : vector<2x128xf32>
    %154 = arith.addf %152, %153 : vector<2x128xf32>
    %155 = math.tanh %154 : vector<2x128xf32>
    %156 = arith.mulf %149, %155 : vector<2x128xf32>
    %157 = tpu.concatenate %156, %138 in 1 : vector<2x128xf32>, vector<2x128xf32> -> vector<2x256xf32>
    %158 = arith.truncf %157 : vector<2x256xf32> to vector<2x256xbf16>
    %cst_44 = arith.constant dense<0.000000e+00> : vector<2x1024xf32>
    %159 = tpu.matmul %158, %51, %cst_44 {dimension_numbers = #tpu.dot_dimension_numbers<[1], [0], [0], [1], [0, 0, 1, 1], [], []>} : vector<2x256xbf16>, vector<256x1024xbf16>, vector<2x1024xf32> -> vector<2x1024xf32>
    %160 = vector.broadcast %52 : vector<1x1024xf32> to vector<2x1024xf32>
    %161 = arith.addf %159, %160 : vector<2x1024xf32>
    %162 = vector.extract_strided_slice %161 {offsets = [0, 512], sizes = [2, 512], strides = [1, 1]} : vector<2x1024xf32> to vector<2x512xf32>
    %163 = vector.extract_strided_slice %161 {offsets = [0, 0], sizes = [2, 512], strides = [1, 1]} : vector<2x1024xf32> to vector<2x512xf32>
    %164 = vector.extract_strided_slice %163 {offsets = [0, 0], sizes = [2, 384], strides = [1, 1]} : vector<2x512xf32> to vector<2x384xf32>
    %165 = arith.negf %164 : vector<2x384xf32>
    %166 = math.exp %165 : vector<2x384xf32>
    %cst_45 = arith.constant 1.000000e+00 : f32
    %167 = vector.broadcast %cst_45 : f32 to vector<2x384xf32>
    %168 = arith.addf %167, %166 : vector<2x384xf32>
    %169 = arith.divf %167, %168 : vector<2x384xf32>
    %170 = vector.extract_strided_slice %169 {offsets = [0, 0], sizes = [2, 128], strides = [1, 1]} : vector<2x384xf32> to vector<2x128xf32>
    %171 = vector.extract_strided_slice %169 {offsets = [0, 128], sizes = [2, 128], strides = [1, 1]} : vector<2x384xf32> to vector<2x128xf32>
    %172 = vector.extract_strided_slice %169 {offsets = [0, 256], sizes = [2, 128], strides = [1, 1]} : vector<2x384xf32> to vector<2x128xf32>
    %173 = vector.extract_strided_slice %163 {offsets = [0, 384], sizes = [2, 128], strides = [1, 1]} : vector<2x512xf32> to vector<2x128xf32>
    %174 = math.tanh %173 : vector<2x128xf32>
    %175 = arith.mulf %171, %136 : vector<2x128xf32>
    %176 = arith.mulf %170, %174 : vector<2x128xf32>
    %177 = arith.addf %175, %176 : vector<2x128xf32>
    %178 = math.tanh %177 : vector<2x128xf32>
    %179 = arith.mulf %172, %178 : vector<2x128xf32>
    %180 = vector.extract_strided_slice %50 {offsets = [6, 0], sizes = [2, 512], strides = [1, 1]} : vector<8x512xf32> to vector<2x512xf32>
    %181 = arith.addf %180, %162 : vector<2x512xf32>
    %182 = vector.extract_strided_slice %181 {offsets = [0, 0], sizes = [2, 384], strides = [1, 1]} : vector<2x512xf32> to vector<2x384xf32>
    %183 = arith.negf %182 : vector<2x384xf32>
    %184 = math.exp %183 : vector<2x384xf32>
    %cst_46 = arith.constant 1.000000e+00 : f32
    %185 = vector.broadcast %cst_46 : f32 to vector<2x384xf32>
    %186 = arith.addf %185, %184 : vector<2x384xf32>
    %187 = arith.divf %185, %186 : vector<2x384xf32>
    %188 = vector.extract_strided_slice %187 {offsets = [0, 0], sizes = [2, 128], strides = [1, 1]} : vector<2x384xf32> to vector<2x128xf32>
    %189 = vector.extract_strided_slice %187 {offsets = [0, 128], sizes = [2, 128], strides = [1, 1]} : vector<2x384xf32> to vector<2x128xf32>
    %190 = vector.extract_strided_slice %187 {offsets = [0, 256], sizes = [2, 128], strides = [1, 1]} : vector<2x384xf32> to vector<2x128xf32>
    %191 = vector.extract_strided_slice %181 {offsets = [0, 384], sizes = [2, 128], strides = [1, 1]} : vector<2x512xf32> to vector<2x128xf32>
    %192 = math.tanh %191 : vector<2x128xf32>
    %193 = arith.mulf %189, %154 : vector<2x128xf32>
    %194 = arith.mulf %188, %192 : vector<2x128xf32>
    %195 = arith.addf %193, %194 : vector<2x128xf32>
    %196 = math.tanh %195 : vector<2x128xf32>
    %197 = arith.mulf %190, %196 : vector<2x128xf32>
    %198 = tpu.concatenate %197, %179 in 1 : vector<2x128xf32>, vector<2x128xf32> -> vector<2x256xf32>
    %199 = arith.truncf %198 : vector<2x256xf32> to vector<2x256xbf16>
    %cst_47 = arith.constant dense<0.000000e+00> : vector<2x1024xf32>
    %200 = tpu.matmul %199, %51, %cst_47 {dimension_numbers = #tpu.dot_dimension_numbers<[1], [0], [0], [1], [0, 0, 1, 1], [], []>} : vector<2x256xbf16>, vector<256x1024xbf16>, vector<2x1024xf32> -> vector<2x1024xf32>
    %201 = vector.broadcast %52 : vector<1x1024xf32> to vector<2x1024xf32>
    %202 = arith.addf %200, %201 : vector<2x1024xf32>
    %203 = vector.extract_strided_slice %202 {offsets = [0, 0], sizes = [2, 512], strides = [1, 1]} : vector<2x1024xf32> to vector<2x512xf32>
    %204 = vector.extract_strided_slice %203 {offsets = [0, 0], sizes = [2, 384], strides = [1, 1]} : vector<2x512xf32> to vector<2x384xf32>
    %205 = arith.negf %204 : vector<2x384xf32>
    %206 = math.exp %205 : vector<2x384xf32>
    %cst_48 = arith.constant 1.000000e+00 : f32
    %207 = vector.broadcast %cst_48 : f32 to vector<2x384xf32>
    %208 = arith.addf %207, %206 : vector<2x384xf32>
    %209 = arith.divf %207, %208 : vector<2x384xf32>
    %210 = vector.extract_strided_slice %209 {offsets = [0, 0], sizes = [2, 128], strides = [1, 1]} : vector<2x384xf32> to vector<2x128xf32>
    %211 = vector.extract_strided_slice %209 {offsets = [0, 128], sizes = [2, 128], strides = [1, 1]} : vector<2x384xf32> to vector<2x128xf32>
    %212 = vector.extract_strided_slice %209 {offsets = [0, 256], sizes = [2, 128], strides = [1, 1]} : vector<2x384xf32> to vector<2x128xf32>
    %213 = vector.extract_strided_slice %203 {offsets = [0, 384], sizes = [2, 128], strides = [1, 1]} : vector<2x512xf32> to vector<2x128xf32>
    %214 = math.tanh %213 : vector<2x128xf32>
    %215 = arith.mulf %211, %177 : vector<2x128xf32>
    %216 = arith.mulf %210, %214 : vector<2x128xf32>
    %217 = arith.addf %215, %216 : vector<2x128xf32>
    %218 = math.tanh %217 : vector<2x128xf32>
    %219 = arith.mulf %212, %218 : vector<2x128xf32>
    %c0_49 = arith.constant 0 : index
    %c0_50 = arith.constant 0 : index
    %220 = vector.load %arg14[%c0_49, %c0_50] : memref<128x2xbf16, #tpu.memory_space<vmem>>, vector<128x2xbf16>
    %221 = arith.truncf %219 : vector<2x128xf32> to vector<2x128xbf16>
    %cst_51 = arith.constant dense<0.000000e+00> : vector<2x2xf32>
    %222 = tpu.matmul %221, %220, %cst_51 {dimension_numbers = #tpu.dot_dimension_numbers<[1], [0], [0], [1], [0, 0, 1, 1], [], []>} : vector<2x128xbf16>, vector<128x2xbf16>, vector<2x2xf32> -> vector<2x2xf32>
    %c0_52 = arith.constant 0 : index
    %c0_53 = arith.constant 0 : index
    %223 = vector.load %arg15[%c0_52, %c0_53] : memref<1x2xf32, #tpu.memory_space<vmem>>, vector<1x2xf32>
    %224 = vector.broadcast %223 : vector<1x2xf32> to vector<2x2xf32>
    %225 = arith.addf %222, %224 : vector<2x2xf32>
    %c0_54 = arith.constant 0 : index
    %c0_55 = arith.constant 0 : index
    %226 = vector.load %arg16[%c0_54, %c0_55] : memref<2x2xf32, #tpu.memory_space<vmem>>, vector<2x2xf32>
    tpu.vector_store %arg16[%c0_54, %c0_55], %225 {strides = array<i32>} : memref<2x2xf32, #tpu.memory_space<vmem>>, vector<2x2xf32>,
    return
  }
  func.func @transform_0(%arg0: i32) -> (i32, i32) {
    %c0_i32 = arith.constant 0 : i32
    %c0_i32_0 = arith.constant 0 : i32
    %c0_i32_1 = arith.constant 0 : i32
    return %c0_i32, %c0_i32_0 : i32, i32
  }
  func.func @transform_1(%arg0: i32) -> (i32, i32) {
    %c0_i32 = arith.constant 0 : i32
    %c0_i32_0 = arith.constant 0 : i32
    %c0_i32_1 = arith.constant 0 : i32
    return %c0_i32, %c0_i32_0 : i32, i32
  }
  func.func @transform_2(%arg0: i32) -> (i32, i32) {
    %c0_i32 = arith.constant 0 : i32
    %c0_i32_0 = arith.constant 0 : i32
    %c0_i32_1 = arith.constant 0 : i32
    return %c0_i32, %c0_i32_0 : i32, i32
  }
  func.func @transform_3(%arg0: i32) -> (i32, i32) {
    %c0_i32 = arith.constant 0 : i32
    %c0_i32_0 = arith.constant 0 : i32
    %c0_i32_1 = arith.constant 0 : i32
    return %c0_i32, %c0_i32_0 : i32, i32
  }
  func.func @transform_4(%arg0: i32) -> (i32, i32) {
    %c0_i32 = arith.constant 0 : i32
    %c0_i32_0 = arith.constant 0 : i32
    %c0_i32_1 = arith.constant 0 : i32
    return %c0_i32, %c0_i32_0 : i32, i32
  }
  func.func @transform_5(%arg0: i32) -> (i32, i32) {
    %c0_i32 = arith.constant 0 : i32
    %c0_i32_0 = arith.constant 0 : i32
    %c0_i32_1 = arith.constant 0 : i32
    return %c0_i32, %c0_i32_0 : i32, i32
  }
  func.func @transform_6(%arg0: i32) -> (i32, i32) {
    %c0_i32 = arith.constant 0 : i32
    %c0_i32_0 = arith.constant 0 : i32
    %c0_i32_1 = arith.constant 0 : i32
    return %c0_i32, %c0_i32_0 : i32, i32
  }
  func.func @transform_7(%arg0: i32) -> (i32, i32) {
    %c0_i32 = arith.constant 0 : i32
    %c0_i32_0 = arith.constant 0 : i32
    %c0_i32_1 = arith.constant 0 : i32
    return %c0_i32, %c0_i32_0 : i32, i32
  }
  func.func @transform_8(%arg0: i32) -> (i32, i32) {
    %c0_i32 = arith.constant 0 : i32
    %c0_i32_0 = arith.constant 0 : i32
    %c0_i32_1 = arith.constant 0 : i32
    return %c0_i32, %c0_i32_0 : i32, i32
  }
  func.func @transform_9(%arg0: i32) -> (i32, i32) {
    %c0_i32 = arith.constant 0 : i32
    %c0_i32_0 = arith.constant 0 : i32
    %c0_i32_1 = arith.constant 0 : i32
    return %c0_i32, %c0_i32_0 : i32, i32
  }
  func.func @transform_10(%arg0: i32) -> (i32, i32) {
    %c0_i32 = arith.constant 0 : i32
    %c0_i32_0 = arith.constant 0 : i32
    %c0_i32_1 = arith.constant 0 : i32
    return %c0_i32, %c0_i32_0 : i32, i32
  }
  func.func @transform_11(%arg0: i32) -> (i32, i32) {
    %c0_i32 = arith.constant 0 : i32
    %c0_i32_0 = arith.constant 0 : i32
    %c0_i32_1 = arith.constant 0 : i32
    return %c0_i32, %c0_i32_0 : i32, i32
  }
  func.func @transform_12(%arg0: i32) -> (i32, i32) {
    %c0_i32 = arith.constant 0 : i32
    %c0_i32_0 = arith.constant 0 : i32
    %c0_i32_1 = arith.constant 0 : i32
    return %c0_i32, %c0_i32_0 : i32, i32
  }
  func.func @transform_13(%arg0: i32) -> (i32, i32) {
    %c0_i32 = arith.constant 0 : i32
    %c0_i32_0 = arith.constant 0 : i32
    %c0_i32_1 = arith.constant 0 : i32
    return %c0_i32, %c0_i32_0 : i32, i32
  }
  func.func @transform_14(%arg0: i32) -> (i32, i32) {
    %c0_i32 = arith.constant 0 : i32
    %c0_i32_0 = arith.constant 0 : i32
    %c0_i32_1 = arith.constant 0 : i32
    return %c0_i32, %c0_i32_0 : i32, i32
  }
  func.func @transform_15(%arg0: i32) -> (i32, i32) {
    %c0_i32 = arith.constant 0 : i32
    %c0_i32_0 = arith.constant 0 : i32
    %c0_i32_1 = arith.constant 0 : i32
    return %c0_i32, %c0_i32_0 : i32, i32
  }
}

</mosaic_0001>

<bundles_post_ra>
// kernel: crnn_forward.1
= control target key start
LH: loop header
LB: loop body
LE: loop exit
PB: predicated region body
PF: predicated region fallthrough
CT: control target
= control target key end

     0   :  { %20 = vsyncpa [#allocation3], 0  ;;  %s12352_s0 = inlined_call_operand.vmem [shape: f32[32,48], index: 0, kind: input, shape index: {}]   ;;  %s12353_s1 = inlined_call_operand.vmem [shape: bf16[48,512], index: 1, kind: input, shape index: {}]   ;;  %s12354_s2 = inlined_call_operand.vmem [shape: f32[1,512], index: 2, kind: input, shape index: {}]   ;;  %s12355_s3 = inlined_call_operand.hbm [shape: bf16[768,512], index: 3, kind: input, shape index: {}]   ;;  %s12356_s4 = inlined_call_operand.vmem [shape: f32[1,512], index: 4, kind: input, shape index: {}]   ;;  %s12357_s5 = inlined_call_operand.vmem [shape: bf16[96,32], index: 5, kind: input, shape index: {}]   ;;  %s12358_s6 = inlined_call_operand.hbm [shape: bf16[512,512], index: 6, kind: input, shape index: {}]   ;;  %s12359_s7 = inlined_call_operand.vmem [shape: bf16[16,16], index: 7, kind: input, shape index: {}]   ;;  %s12360_s8 = inlined_call_operand.hbm [shape: bf16[512,512], index: 8, kind: input, shape index: {}]   ;;  %s12361_s9 = inlined_call_operand.hbm [shape: bf16[256,512], index: 9, kind: input, shape index: {}]   ;;  %s12362_s10 = inlined_call_operand.vmem [shape: f32[1,512], index: 10, kind: input, shape index: {}]   ;;  %s12363_s11 = inlined_call_operand.hbm [shape: bf16[256,1024], index: 11, kind: input, shape index: {}]   ;;  %s12364_s12 = inlined_call_operand.vmem [shape: f32[1,1024], index: 12, kind: input, shape index: {}]   ;;  %s12365_s13 = inlined_call_operand.vmem [shape: bf16[128,2], index: 13, kind: input, shape index: {}]   ;;  %s12366_s14 = inlined_call_operand.vmem [shape: f32[1,2], index: 14, kind: input, shape index: {}]   ;;  %s12367_s15 = inlined_call_operand.hbm [shape: f32[2,2], index: 15, kind: output, shape index: {}]  }
   0x1   :  { %21 = vsyncpa [#allocation6], 0 }
   0x2   :  { %22 = vsyncpa [#allocation9], 0 }
   0x3   :  { %23 = vsyncpa [#allocation4], 0  ;;  %s51_s20 = sshll.u32 %s12358_s6, 4  ;;  %s10718_s21 = smov [#allocation5]   ;;  %s52_s20 = int_to_ptr.hbm [resolvable:$true] %s51_s20 }
   0x4   :  { %s53_s22 = sshll.u32 %s10718_s21, 4  ;;  %s79_s25 = sshll.u32 %s12361_s9, 4  ;;  %s54_s22 = int_to_ptr.vmem [resolvable:$true] %s53_s22  ;;  %s80_s25 = int_to_ptr.hbm [resolvable:$true] %s79_s25 }
   0x5   :  { %s10719_s26 = smov 256   ;;  %s10720_s27 = smov 16  }
   0x6   :  { %59 = dma.hbm_to_vmem [thread:$0]  %s52_s20, 16384, %s54_s22, [#allocation6], %s10719_s26, %s10719_s26, %s10720_s27  }
   0x7   :  { %s10721_s28 = smov [#allocation8]   ;;  %s34_s17 = sshll.u32 %s12355_s3, 4  ;;  %s35_s17 = int_to_ptr.hbm [resolvable:$true] %s34_s17 }
   0x8   :  { %s81_s29 = sshll.u32 %s10721_s28, 4  ;;  %s66_s19 = sshll.u32 %s12360_s8, 4  ;;  %s82_s29 = int_to_ptr.vmem [resolvable:$true] %s81_s29  ;;  %s67_s19 = int_to_ptr.hbm [resolvable:$true] %s66_s19 }
   0x9   :  { %87 = dma.hbm_to_vmem [thread:$0]  %s80_s25, 8192, %s82_s29, [#allocation9], %s10719_s26, %s10719_s26, %s10720_s27  }
   0xa   :  { %s10722_s21 = smov [#allocation2]   ;;  %s10723_s9 = smov [#allocation7]  }
   0xb   :  { %s36_s23 = sshll.u32 %s10722_s21, 4  ;;  %s68_s20 = sshll.u32 %s10723_s9, 4  ;;  %s37_s23 = int_to_ptr.vmem [resolvable:$true] %s36_s23  ;;  %s69_s20 = int_to_ptr.vmem [resolvable:$true] %s68_s20 }
   0xc   :  { %42 = dma.hbm_to_vmem [thread:$0]  %s35_s17, 24576, %s37_s23, [#allocation3], %s10719_s26, %s10719_s26, %s10720_s27  }
   0xd   :  { %s94_s28 = sshll.u32 %s12363_s11, 4  ;;  %s10724_s3 = smov [#allocation10]   ;;  %s95_s28 = int_to_ptr.hbm [resolvable:$true] %s94_s28 }
   0xe   :  { %74 = dma.hbm_to_vmem [thread:$0]  %s67_s19, 16384, %s69_s20, [#allocation6], %s10719_s26, %s10719_s26, %s10720_s27  }
   0xf   :  { %s96_s25 = sshll.u32 %s10724_s3, 4  ;;  %s10725_s29 = smov 512   ;;  %s97_s25 = int_to_ptr.vmem [resolvable:$true] %s96_s25 }
  0x10   :  { %s10726_s30 = smov 32  }
  0x11   :  { %102 = dma.hbm_to_vmem [thread:$0]  %s95_s28, 16384, %s97_s25, [#allocation9], %s10725_s29, %s10725_s29, %s10726_s30  }
  0x12   :  { %10710 = dma.done.wait [#allocation3], 24576  }
  0x13   :  { %10711 = vsyncadd [#allocation3], 4294942720 }
  0x14   :  { %10712 = dma.done.wait [#allocation6], 32768  }
  0x15   :  { %10713 = vsyncadd [#allocation6], 4294934528 }
  0x16   :  { %10714 = dma.done.wait [#allocation9], 24576  }
  0x17   :  { %10715 = vsyncadd [#allocation9], 4294942720  ;;  %v7062_v0 = vld [vmem:[%s12353_s1 + $0x40] sm:$0xf]  ;;  %v9766_v1 = vld [vmem:[%s12353_s1 + $0x4c] sm:$0xf0] }
  0x18   :  { %v7070_v2 = vld [vmem:[%s12353_s1 + $0x48] sm:$0xf]  ;;  %v7063_v3 = vor.u32 %v9766_v1, %v7062_v0  ;;  %v9767_v4 = vld [vmem:[%s12353_s1 + $0x54] sm:$0xf0]  ;;  %v9765_v5 = vld [vmem:[%s12353_s1 + $0x4c] sm:$0xf] }
  0x19   :  { %v7072_v6 = vld [vmem:[%s12353_s1 + $0x58] sm:$0xf0]  ;;  %v7071_v7 = vor.u32 %v9767_v4, %v7070_v2  ;;  %v7046_v9 = vld [vmem:[%s12353_s1 + $0x20] sm:$0xf]  ;;  %v9762_v10 = vld [vmem:[%s12353_s1 + $0x2c] sm:$0xf0] }
  0x1a   :  { %v7075_v8 = vor.u32 %v9765_v5, %v7072_v6  ;;  %v7054_v11 = vld [vmem:[%s12353_s1 + $0x28] sm:$0xf]  ;;  %10423 = vmatpush.bf16.msra.mxu1 %v7063_v3  ;;  %230 = vmatpush.bf16.msra.mxu0 %v7063_v3  ;;  %v7047_v12 = vor.u32 %v9762_v10, %v7046_v9  ;;  %v9763_v13 = vld [vmem:[%s12353_s1 + $0x34] sm:$0xf0]  ;;  %v9761_v14 = vld [vmem:[%s12353_s1 + $0x2c] sm:$0xf] }
  0x1b   :  { %v7056_v15 = vld [vmem:[%s12353_s1 + $0x38] sm:$0xf0]  ;;  %268 = vmatpush.bf16.msra.mxu2 %v7071_v7  ;;  %v7055_v16 = vor.u32 %v9763_v13, %v7054_v11  ;;  %v7030_v18 = vld [vmem:[%s12353_s1] sm:$0xf]  ;;  %v9758_v19 = vld [vmem:[%s12353_s1 + $0xc] sm:$0xf0] }
  0x1c   :  { %287 = vmatpush.bf16.msra.mxu3 %v7075_v8  ;;  %v7059_v17 = vor.u32 %v9761_v14, %v7056_v15  ;;  %v7038_v20 = vld [vmem:[%s12353_s1 + $0x8] sm:$0xf]  ;;  %v9759_v21 = vld [vmem:[%s12353_s1 + $0x14] sm:$0xf0]  ;;  %v9757_v22 = vld [vmem:[%s12353_s1 + $0xc] sm:$0xf]  ;;  %v7031_v25 = vor.u32 %v9758_v19, %v7030_v18 }
  0x1d   :  { %v7040_v23 = vld [vmem:[%s12353_s1 + $0x18] sm:$0xf0]  ;;  %v132_v24 = vld [vmem:[%s12352_s0 + $0x10] sm:$0xff]  ;;  %v9764_v27 = vld [vmem:[%s12353_s1 + $0x44] sm:$0xf]  ;;  %v7039_v29 = vor.u32 %v9759_v21, %v7038_v20  ;;  %vm218_vm0 = vcmask 392192  }
  0x1e   :  { %10424 = vmatpush.bf16.msra.mxu1 %v7047_v12  ;;  %231 = vmatpush.bf16.msra.mxu0 %v7047_v12  ;;  %v133_v26 = vld [vmem:[%s12352_s0 + $0x18] sm:$0xff]  ;;  %v7064_v28 = vld [vmem:[%s12353_s1 + $0x50] sm:$0xf0]  ;;  %v7043_v30 = vor.u32 %v9757_v22, %v7040_v23  ;;  %v130_v31 = vld [vmem:[%s12352_s0] sm:$0xff]  ;;  %vm367_vm1 = vcmask 261120   ;;  %vm3265_vm2 = vcmask 130048  }
  0x1f   :  { %269 = vmatpush.bf16.msra.mxu2 %v7055_v16  ;;  %v131_v32 = vld [vmem:[%s12352_s0 + $0x8] sm:$0xff]  ;;  %v7067_v33 = vor.u32 %v9764_v27, %v7064_v28  ;;  %v147_v34 = vpack.c.bf16 %v133_v26, %v132_v24  ;;  %v9760_v35 = vld [vmem:[%s12353_s1 + $0x24] sm:$0xf]  ;;  %v7048_v36 = vld [vmem:[%s12353_s1 + $0x30] sm:$0xf0]  ;;  %s10728_s26 = smov [#allocation11]  }
  0x20   :  { %288 = vmatpush.bf16.msra.mxu3 %v7059_v17  ;;  %v146_v37 = vpack.c.bf16 %v131_v32, %v130_v31  ;;  %v7051_v38 = vor.u32 %v9760_v35, %v7048_v36  ;;  %v9756_v39 = vld [vmem:[%s12353_s1 + $0x4] sm:$0xf]  ;;  %v7032_v40 = vld [vmem:[%s12353_s1 + $0x10] sm:$0xf0]  ;;  %v148_v42 = vld [vmem:[%s12354_s2] sm:$0xf] }
  0x21   :  { %v7035_v41 = vor.u32 %v9756_v39, %v7032_v40  ;;  %v150_v45 = vperm.slane %v148_v42, 0  ;;  %v9768_v63 = vld [vmem:[%s12357_s5] sm:$0xff]  ;;  %v152_v3 = vperm.slane %v148_v42, 2  ;;  %v153_v4 = vperm.slane %v148_v42, 3  ;;  %v9769_v20 = vld [vmem:[%s12357_s5 + $0x8] sm:$0xff]  ;;  %s7014_s27 = sshll.u32 %s10728_s26, 4  ;;  %s7015_s27 = int_to_ptr.vmem [resolvable:$true] %s7014_s27 }
  0x22   :  { %10425 = vmatpush.bf16.msra.mxu1 %v7031_v25  ;;  %232 = vmatpush.bf16.msra.mxu0 %v7031_v25  ;;  %v151_v25 = vperm.slane %v148_v42, 1  ;;  %v9771_v42 = vld [vmem:[%s12357_s5 + $0x18] sm:$0xff]  ;;  %s7016_s18 = sshll.u32 %s12367_s15, 4  ;;  %s7017_s18 = int_to_ptr.hbm [resolvable:$true] %s7016_s18 }
  0x23   :  { %270 = vmatpush.bf16.msra.mxu2 %v7039_v29 }
  0x24   :  { %289 = vmatpush.bf16.msra.mxu3 %v7043_v30 }
  0x25   :  { %7077 = vmatmul.msk.bf16.vlgmr.msra.gmra.mxu1 %vm218_vm0, %v147_v34  ;;  %7076 = vmatmul.msk.bf16.vlgmr.msra.gmra.mxu0 %vm218_vm0, %v146_v37 }
  0x26   :  { %249 = vmatpush.bf16.msrb.mxu1 %v7067_v33  ;;  %7080 = vmatmul.msk.bf16.vlgmr.msra.gmra.mxu2 %vm218_vm0, %v146_v37 }
  0x27   :  { %7082 = vmatmul.msk.bf16.vlgmr.msra.gmra.mxu3 %vm218_vm0, %v146_v37 }
  0x2a   :  { %250 = vmatpush.bf16.msrb.mxu1 %v7051_v38 }
  0x2e   :  { %251 = vmatpush.bf16.msrb.mxu1 %v7035_v41  ;;  %v9770_v41 = vld [vmem:[%s12357_s5 + $0x10] sm:$0xff] }
  0x35   :  { %7078 = vmatmul.msk.bf16.vlgmr.msrb.gmra.mxu1 %vm218_vm0, %v146_v37 }
  0x36   :  { %7081 = vmatmul.msk.bf16.gmra.mxu2 %vm218_vm0, %v147_v34 }
  0x37   :  { %7083 = vmatmul.msk.bf16.gmra.mxu3 %vm218_vm0, %v147_v34 }
  0x45   :  { %7079 = vmatmul.msk.bf16.gmra.mxu1 %vm218_vm0, %v147_v34 }
  0xa2   :  { %v239_v43 = vpop.f32.mrf.mxu1  ;;  %v234_v44 = vpop.f32.mrf.mxu0 }
  0xa3   :  { %v240_v46 = vadd.f32 %v239_v43, %v150_v45  ;;  %v235_v47 = vadd.f32 %v234_v44, %v150_v45  ;;  %v9772_v43 = vld [vmem:[%s12357_s5 + $0x20] sm:$0xff]  ;;  %v9773_v44 = vld [vmem:[%s12357_s5 + $0x28] sm:$0xff] }
  0xa5   :  { %v309_v54 = vmax.f32 %v240_v46, 0.0  ;;  %v301_v55 = vmax.f32 %v235_v47, 0.0  ;;  %v9804_v46 = vld [vmem:[#allocation5 + $0xec] sm:$0xf0] }
  0xa9   :  { %v272_v48 = vpop.f32.mrf.mxu2 }
  0xaa   :  { %v291_v49 = vpop.f32.mrf.mxu3  ;;  %v241_v50 = vpop.f32.mrf.mxu1  ;;  %v273_v14 = vadd.f32 %v272_v48, %v152_v3 }
  0xab   :  { %v236_v51 = vpop.f32.mrf.mxu0  ;;  %v242_v52 = vadd.f32 %v241_v50, %v150_v45  ;;  %v292_v15 = vadd.f32 %v291_v49, %v153_v4  ;;  %v7230_v49 = vld [vmem:[#allocation5 + $0xc0] sm:$0xf]  ;;  %v9800_v50 = vld [vmem:[#allocation5 + $0xcc] sm:$0xf0] }
  0xac   :  { %v237_v53 = vadd.f32 %v236_v51, %v150_v45  ;;  %v303_v26 = vmax.f32 %v273_v14, 0.0  ;;  %v7246_v45 = vld [vmem:[#allocation5 + $0xe0] sm:$0xf]  ;;  %v7231_v51 = vor.u32 %v9800_v50, %v7230_v49 }
  0xad   :  { %v313_v56 = vmax.f32 %v242_v52, 0.0  ;;  %v304_v27 = vmax.f32 %v292_v15, 0.0  ;;  %v7247_v47 = vor.u32 %v9804_v46, %v7246_v45  ;;  %v7214_v52 = vld [vmem:[#allocation5 + $0xa0] sm:$0xf]  ;;  %v9888_v45 = vld [vmem:[#allocation5 + $0x38c] sm:$0xf0] }
  0xae   :  { %v305_v57 = vmax.f32 %v237_v53, 0.0  ;;  %v9796_v53 = vld [vmem:[#allocation5 + $0xac] sm:$0xf0]  ;;  %v7374_v15 = vld [vmem:[#allocation5 + $0x1e0] sm:$0xf] }
  0xaf   :  { %v333_v58 = vpack.c.bf16 %v313_v56, %v309_v54  ;;  %v7215_v54 = vor.u32 %v9796_v53, %v7214_v52  ;;  %v7198_v56 = vld [vmem:[#allocation5 + $0x80] sm:$0xf] }
  0xb0   :  { %v329_v61 = vpack.c.bf16 %v305_v57, %v301_v55  ;;  %v9792_v57 = vld [vmem:[#allocation5 + $0x8c] sm:$0xf0]  ;;  %v7326_v50 = vld [vmem:[#allocation5 + $0x180] sm:$0xf] }
  0xb1   :  { %v274_v59 = vpop.f32.mrf.mxu2  ;;  %392 = vmatpush.bf16.msrb.mxu0 %v333_v58  ;;  %v7199_v58 = vor.u32 %v9792_v57, %v7198_v56  ;;  %v7438_v52 = vld [vmem:[#allocation5 + $0x260] sm:$0xf]  ;;  %v9852_v56 = vld [vmem:[#allocation5 + $0x26c] sm:$0xf0] }
  0xb2   :  { %v293_v60 = vpop.f32.mrf.mxu3  ;;  %v253_v62 = vpop.f32.mrf.mxu1  ;;  %v275_v9 = vadd.f32 %v274_v59, %v152_v3  ;;  %v7182_v59 = vld [vmem:[#allocation5 + $0x60] sm:$0xf] }
  0xb3   :  { %v294_v10 = vadd.f32 %v293_v60, %v153_v4  ;;  %v254_v34 = vadd.f32 %v253_v62, %v151_v25  ;;  %v9788_v60 = vld [vmem:[#allocation5 + $0x6c] sm:$0xf0]  ;;  %v7166_v62 = vld [vmem:[#allocation5 + $0x40] sm:$0xf] }
  0xb4   :  { %v307_v21 = vmax.f32 %v275_v9, 0.0  ;;  %v7566_v57 = vld [vmem:[#allocation5 + $0x360] sm:$0xf] }
  0xb5   :  { %393 = vmatpush.bf16.msrb.mxu0 %v329_v61  ;;  %v308_v22 = vmax.f32 %v294_v10, 0.0  ;;  %v302_v39 = vmax.f32 %v254_v34, 0.0  ;;  %v7183_v61 = vor.u32 %v9788_v60, %v7182_v59  ;;  %v9868_v10 = vld [vmem:[#allocation5 + $0x2ec] sm:$0xf0]  ;;  %v7439_v59 = vor.u32 %v9852_v56, %v7438_v52  ;;  %v9790_v52 = vld [vmem:[#allocation5 + $0x84] sm:$0xf] }
  0xb6   :  { %v331_v30 = vpack.c.bf16 %v307_v21, %v303_v26  ;;  %v9864_v21 = vld [vmem:[#allocation5 + $0x2cc] sm:$0xf0] }
  0xb7   :  { %v332_v31 = vpack.c.bf16 %v308_v22, %v304_v27  ;;  %v7614_v22 = vld [vmem:[#allocation5 + $0x3c0] sm:$0xf]  ;;  %v9892_v34 = vld [vmem:[#allocation5 + $0x3ac] sm:$0xf0] }
  0xb8   :  { %7108 = vmatmul.msk.bf16.vlgmr.msrb.gmra.mxu0 %vm367_vm1, %v9768_v63  ;;  %v7358_v27 = vld [vmem:[#allocation5 + $0x1c0] sm:$0xf] }
  0xb9   :  { %v277_v0 = vpop.f32.mrf.mxu2  ;;  %1346 = vmatpush.bf16.msra.mxu0 %v7247_v47 }
  0xba   :  { %v296_v1 = vpop.f32.mrf.mxu3  ;;  %v255_v2 = vpop.f32.mrf.mxu1  ;;  %v278_v5 = vadd.f32 %v277_v0, %v152_v3 }
  0xbb   :  { %v297_v6 = vadd.f32 %v296_v1, %v153_v4  ;;  %v256_v32 = vadd.f32 %v255_v2, %v151_v25  ;;  %v7150_v2 = vld [vmem:[#allocation5 + $0x20] sm:$0xf] }
  0xbc   :  { %v311_v16 = vmax.f32 %v278_v5, 0.0  ;;  %v7134_v5 = vld [vmem:[#allocation5] sm:$0xf] }
  0xbd   :  { %v312_v17 = vmax.f32 %v297_v6, 0.0  ;;  %v306_v37 = vmax.f32 %v256_v32, 0.0  ;;  %1347 = vmatpush.bf16.msra.mxu0 %v7231_v51  ;;  %v9776_v6 = vld [vmem:[#allocation5 + $0xc] sm:$0xf0] }
  0xbe   :  { %v7135_v9 = vor.u32 %v9776_v6, %v7134_v5  ;;  %v9860_v32 = vld [vmem:[#allocation5 + $0x2ac] sm:$0xf0]  ;;  %v7550_v5 = vld [vmem:[#allocation5 + $0x340] sm:$0xf] }
  0xbf   :  { %v330_v40 = vpack.c.bf16 %v306_v37, %v302_v39  ;;  %v7342_v37 = vld [vmem:[#allocation5 + $0x1a0] sm:$0xf]  ;;  %v9824_v51 = vld [vmem:[#allocation5 + $0x18c] sm:$0xf0] }
  0xc0   :  { %v7454_v39 = vld [vmem:[#allocation5 + $0x280] sm:$0xf]  ;;  %v9880_v6 = vld [vmem:[#allocation5 + $0x34c] sm:$0xf0] }
  0xc1   :  { %v279_v7 = vpop.f32.mrf.mxu2  ;;  %1348 = vmatpush.bf16.msra.mxu0 %v7215_v54  ;;  %v7327_v54 = vor.u32 %v9824_v51, %v7326_v50  ;;  %v7262_v50 = vld [vmem:[#allocation5 + $0x100] sm:$0xf]  ;;  %v9808_v51 = vld [vmem:[#allocation5 + $0x10c] sm:$0xf0] }
  0xc2   :  { %v298_v8 = vpop.f32.mrf.mxu3  ;;  %v280_v11 = vadd.f32 %v279_v7, %v152_v3  ;;  %v258_v13 = vpop.f32.mrf.mxu1  ;;  %v9780_v3 = vld [vmem:[#allocation5 + $0x2c] sm:$0xf0]  ;;  %v7502_v7 = vld [vmem:[#allocation5 + $0x2e0] sm:$0xf]  ;;  %v7263_v56 = vor.u32 %v9808_v51, %v7262_v50  ;;  %v9830_v51 = vld [vmem:[#allocation5 + $0x1c4] sm:$0xf] }
  0xc3   :  { %v299_v12 = vadd.f32 %v298_v8, %v153_v4  ;;  %v259_v28 = vadd.f32 %v258_v13, %v151_v25  ;;  %v7151_v4 = vor.u32 %v9780_v3, %v7150_v2  ;;  %v7503_v13 = vor.u32 %v9868_v10, %v7502_v7  ;;  %v9802_v10 = vld [vmem:[#allocation5 + $0xe4] sm:$0xf] }
  0xc4   :  { %v315_v18 = vmax.f32 %v280_v11, 0.0  ;;  %v7630_v11 = vld [vmem:[#allocation5 + $0x3e0] sm:$0xf] }
  0xc5   :  { %v316_v19 = vmax.f32 %v299_v12, 0.0  ;;  %v310_v35 = vmax.f32 %v259_v28, 0.0  ;;  %1349 = vmatpush.bf16.msra.mxu0 %v7199_v58  ;;  %v9900_v12 = vld [vmem:[#allocation5 + $0x3ec] sm:$0xf0] }
  0xc6   :  { %v335_v23 = vpack.c.bf16 %v315_v18, %v311_v16  ;;  %v7631_v14 = vor.u32 %v9900_v12, %v7630_v11  ;;  %v9836_v16 = vld [vmem:[#allocation5 + $0x1ec] sm:$0xf0]  ;;  %v7248_v11 = vld [vmem:[#allocation5 + $0xf0] sm:$0xf0] }
  0xc7   :  { %v336_v24 = vpack.c.bf16 %v316_v19, %v312_v17  ;;  %v7486_v17 = vld [vmem:[#allocation5 + $0x2c0] sm:$0xf]  ;;  %v9832_v28 = vld [vmem:[#allocation5 + $0x1cc] sm:$0xf0]  ;;  %v7251_v12 = vor.u32 %v9802_v10, %v7248_v11  ;;  %v9778_v10 = vld [vmem:[#allocation5 + $0x24] sm:$0xf] }
  0xc8   :  { %470 = vmatpush.bf16.msrb.mxu2 %v335_v23  ;;  %7109 = vmatmul.msk.bf16.gmra.mxu0 %vm367_vm1, %v9769_v20  ;;  %v9896_v23 = vld [vmem:[#allocation5 + $0x3cc] sm:$0xf0]  ;;  %v7152_v11 = vld [vmem:[#allocation5 + $0x30] sm:$0xf0] }
  0xc9   :  { %509 = vmatpush.bf16.msrb.mxu3 %v336_v24  ;;  %1350 = vmatpush.bf16.msra.mxu0 %v7183_v61  ;;  %v7487_v24 = vor.u32 %v9864_v21, %v7486_v17  ;;  %v9884_v58 = vld [vmem:[#allocation5 + $0x36c] sm:$0xf0]  ;;  %v7310_v61 = vld [vmem:[#allocation5 + $0x160] sm:$0xf] }
  0xca   :  { %v260_v29 = vpop.f32.mrf.mxu1  ;;  %v7567_v60 = vor.u32 %v9884_v58, %v7566_v57  ;;  %v9844_v21 = vld [vmem:[#allocation5 + $0x22c] sm:$0xf0]  ;;  %v7200_v57 = vld [vmem:[#allocation5 + $0x90] sm:$0xf0] }
  0xcb   :  { %v261_v33 = vadd.f32 %v260_v29, %v151_v25  ;;  %v7615_v25 = vor.u32 %v9896_v23, %v7614_v22  ;;  %v7470_v29 = vld [vmem:[#allocation5 + $0x2a0] sm:$0xf]  ;;  %v9876_v23 = vld [vmem:[#allocation5 + $0x32c] sm:$0xf0] }
  0xcc   :  { %471 = vmatpush.bf16.msrb.mxu2 %v331_v30  ;;  %v7534_v22 = vld [vmem:[#allocation5 + $0x320] sm:$0xf] }
  0xcd   :  { %510 = vmatpush.bf16.msrb.mxu3 %v332_v31  ;;  %v314_v36 = vmax.f32 %v261_v33, 0.0  ;;  %v7359_v31 = vor.u32 %v9832_v28, %v7358_v27  ;;  %v7598_v33 = vld [vmem:[#allocation5 + $0x3a0] sm:$0xf]  ;;  %v9798_v27 = vld [vmem:[#allocation5 + $0xc4] sm:$0xf] }
  0xce   :  { %v7232_v28 = vld [vmem:[#allocation5 + $0xd0] sm:$0xf0] }
  0xcf   :  { %v334_v38 = vpack.c.bf16 %v314_v36, %v310_v35  ;;  %7120 = vmatmul.msk.bf16.vlgmr.msrb.gmra.mxu2 %vm367_vm1, %v9768_v63  ;;  %v7471_v35 = vor.u32 %v9860_v32, %v7470_v29  ;;  %v7599_v36 = vor.u32 %v9892_v34, %v7598_v33  ;;  %v7235_v29 = vor.u32 %v9798_v27, %v7232_v28  ;;  %v9812_v32 = vld [vmem:[#allocation5 + $0x12c] sm:$0xf0]  ;;  %v7390_v33 = vld [vmem:[#allocation5 + $0x200] sm:$0xf]  ;;  %v7632_v27 = vld [vmem:[#allocation5 + $0x3f0] sm:$0xf0] }
  0xd0   :  { %7126 = vmatmul.msk.bf16.vlgmr.msrb.gmra.mxu3 %vm367_vm1, %v9768_v63  ;;  %1394 = vmatpush.bf16.msra.mxu2 %v7503_v13 }
  0xd1   :  { %431 = vmatpush.bf16.msra.mxu1 %v334_v38  ;;  %1418 = vmatpush.bf16.msra.mxu3 %v7631_v14  ;;  %v9828_v38 = vld [vmem:[#allocation5 + $0x1ac] sm:$0xf0]  ;;  %v7294_v14 = vld [vmem:[#allocation5 + $0x140] sm:$0xf] }
  0xd4   :  { %1395 = vmatpush.bf16.msra.mxu2 %v7487_v24 }
  0xd5   :  { %432 = vmatpush.bf16.msra.mxu1 %v330_v40  ;;  %1419 = vmatpush.bf16.msra.mxu3 %v7615_v25  ;;  %v7535_v25 = vor.u32 %v9876_v23, %v7534_v22 }
  0xd8   :  { %7114 = vmatmul.msk.bf16.vlgmr.msra.gmra.mxu1 %vm367_vm1, %v9768_v63  ;;  %7110 = vmatmul.msk.bf16.gmra.mxu0 %vm367_vm1, %v9770_v41  ;;  %v9784_v63 = vld [vmem:[#allocation5 + $0x4c] sm:$0xf0] }
  0xd9   :  { %v7167_v1 = vor.u32 %v9784_v63, %v7166_v62  ;;  %1396 = vmatpush.bf16.msra.mxu2 %v7471_v35  ;;  %1420 = vmatpush.bf16.msra.mxu3 %v7599_v36  ;;  %v9820_v62 = vld [vmem:[#allocation5 + $0x16c] sm:$0xf0]  ;;  %v7422_v63 = vld [vmem:[#allocation5 + $0x240] sm:$0xf] }
  0xda   :  { %v7311_v3 = vor.u32 %v9820_v62, %v7310_v61  ;;  %v9786_v62 = vld [vmem:[#allocation5 + $0x64] sm:$0xf] }
  0xdb   :  { %1351 = vmatpush.bf16.msra.mxu0 %v7167_v1 }
  0xdf   :  { %7121 = vmatmul.msk.bf16.gmra.mxu2 %vm367_vm1, %v9769_v20  ;;  %1352 = vmatpush.bf16.msra.mxu0 %v7151_v4  ;;  %v9848_v4 = vld [vmem:[#allocation5 + $0x24c] sm:$0xf0] }
  0xe0   :  { %7127 = vmatmul.msk.bf16.gmra.mxu3 %vm367_vm1, %v9769_v20  ;;  %v7423_v7 = vor.u32 %v9848_v4, %v7422_v63  ;;  %v7184_v63 = vld [vmem:[#allocation5 + $0x70] sm:$0xf0] }
  0xe3   :  { %1353 = vmatpush.bf16.msra.mxu0 %v7135_v9  ;;  %v7551_v9 = vor.u32 %v9880_v6, %v7550_v5  ;;  %v7187_v5 = vor.u32 %v9786_v62, %v7184_v63 }
  0xe7   :  { %1442 = vmatpush.bf16.msrb.mxu0 %v7251_v12 }
  0xe8   :  { %7115 = vmatmul.msk.bf16.gmra.mxu1 %vm367_vm1, %v9769_v20  ;;  %7111 = vmatmul.msk.bf16.gmra.mxu0 %vm367_vm1, %v9771_v42  ;;  %v7375_v20 = vor.u32 %v9836_v16, %v7374_v15  ;;  %v9816_v15 = vld [vmem:[#allocation5 + $0x14c] sm:$0xf0]  ;;  %v7406_v16 = vld [vmem:[#allocation5 + $0x220] sm:$0xf] }
  0xe9   :  { %v7407_v24 = vor.u32 %v9844_v21, %v7406_v16  ;;  %v9866_v21 = vld [vmem:[#allocation5 + $0x2e4] sm:$0xf] }
  0xea   :  { %1370 = vmatpush.bf16.msrb.mxu1 %v7375_v20  ;;  %v7295_v20 = vor.u32 %v9816_v15, %v7294_v14  ;;  %v7155_v15 = vor.u32 %v9778_v10, %v7152_v11 }
  0xeb   :  { %1443 = vmatpush.bf16.msrb.mxu0 %v7235_v29 }
  0xee   :  { %1371 = vmatpush.bf16.msrb.mxu1 %v7359_v31  ;;  %v7278_v31 = vld [vmem:[#allocation5 + $0x120] sm:$0xf] }
  0xef   :  { %7122 = vmatmul.msk.bf16.gmra.mxu2 %vm367_vm1, %v9770_v41  ;;  %v7279_v36 = vor.u32 %v9812_v32, %v7278_v31 }
  0xf0   :  { %7128 = vmatmul.msk.bf16.gmra.mxu3 %vm367_vm1, %v9770_v41 }
  0xf8   :  { %7116 = vmatmul.msk.bf16.gmra.mxu1 %vm367_vm1, %v9770_v41  ;;  %7112 = vmatmul.msk.bf16.gmra.mxu0 %vm367_vm1, %v9772_v43 }
  0xff   :  { %7123 = vmatmul.msk.bf16.gmra.mxu2 %vm367_vm1, %v9771_v42 }
 0x100   :  { %7129 = vmatmul.msk.bf16.gmra.mxu3 %vm367_vm1, %v9771_v42 }
 0x108   :  { %7117 = vmatmul.msk.bf16.gmra.mxu1 %vm367_vm1, %v9771_v42  ;;  %7113 = vmatmul.msk.bf16.gmra.mxu0 %vm367_vm1, %v9773_v44  ;;  %v7343_v42 = vor.u32 %v9828_v38, %v7342_v37  ;;  %v9840_v37 = vld [vmem:[#allocation5 + $0x20c] sm:$0xf0]  ;;  %v7518_v38 = vld [vmem:[#allocation5 + $0x300] sm:$0xf] }
 0x10a   :  { %1372 = vmatpush.bf16.msrb.mxu1 %v7343_v42  ;;  %v7391_v42 = vor.u32 %v9840_v37, %v7390_v33  ;;  %v7376_v37 = vld [vmem:[#allocation5 + $0x1f0] sm:$0xf0] }
 0x10e   :  { %1373 = vmatpush.bf16.msrb.mxu1 %v7327_v54 }
 0x10f   :  { %7124 = vmatmul.msk.bf16.gmra.mxu2 %vm367_vm1, %v9772_v43 }
 0x110   :  { %7130 = vmatmul.msk.bf16.gmra.mxu3 %vm367_vm1, %v9772_v43 }
 0x112   :  { %1374 = vmatpush.bf16.msrb.mxu1 %v7311_v3 }
 0x116   :  { %1375 = vmatpush.bf16.msrb.mxu1 %v7295_v20  ;;  %v7136_v20 = vld [vmem:[#allocation5 + $0x10] sm:$0xf0] }
 0x118   :  { %7118 = vmatmul.msk.bf16.gmra.mxu1 %vm367_vm1, %v9772_v43  ;;  %v9856_v43 = vld [vmem:[#allocation5 + $0x28c] sm:$0xf0] }
 0x119   :  { %v7455_v46 = vor.u32 %v9856_v43, %v7454_v39  ;;  %v9872_v39 = vld [vmem:[#allocation5 + $0x30c] sm:$0xf0] }
 0x11a   :  { %v7519_v43 = vor.u32 %v9872_v39, %v7518_v38  ;;  %1376 = vmatpush.bf16.msrb.mxu1 %v7279_v36  ;;  %v9834_v36 = vld [vmem:[#allocation5 + $0x1e4] sm:$0xf] }
 0x11b   :  { %1397 = vmatpush.bf16.msra.mxu2 %v7455_v46  ;;  %v9862_v38 = vld [vmem:[#allocation5 + $0x2c4] sm:$0xf] }
 0x11e   :  { %1377 = vmatpush.bf16.msrb.mxu1 %v7263_v56 }
 0x11f   :  { %7125 = vmatmul.msk.bf16.gmra.mxu2 %vm367_vm1, %v9773_v44 }
 0x120   :  { %7131 = vmatmul.msk.bf16.gmra.mxu3 %vm367_vm1, %v9773_v44  ;;  %1398 = vmatpush.bf16.msra.mxu2 %v7439_v59 }
 0x124   :  { %1399 = vmatpush.bf16.msra.mxu2 %v7423_v7  ;;  %v9782_v7 = vld [vmem:[#allocation5 + $0x44] sm:$0xf] }
 0x128   :  { %7119 = vmatmul.msk.bf16.gmra.mxu1 %vm367_vm1, %v9773_v44  ;;  %v7582_v44 = vld [vmem:[#allocation5 + $0x380] sm:$0xf]  ;;  %1400 = vmatpush.bf16.msra.mxu2 %v7407_v24  ;;  %v7504_v24 = vld [vmem:[#allocation5 + $0x2f0] sm:$0xf0] }
 0x129   :  { %v7583_v47 = vor.u32 %v9888_v45, %v7582_v44  ;;  %v9794_v44 = vld [vmem:[#allocation5 + $0xa4] sm:$0xf]  ;;  %v7216_v45 = vld [vmem:[#allocation5 + $0xb0] sm:$0xf0]  ;;  %v7507_v31 = vor.u32 %v9866_v21, %v7504_v24 }
 0x12a   :  { %v7219_v46 = vor.u32 %v9794_v44, %v7216_v45  ;;  %v7488_v44 = vld [vmem:[#allocation5 + $0x2d0] sm:$0xf0]  ;;  %v9894_v45 = vld [vmem:[#allocation5 + $0x3c4] sm:$0xf] }
 0x12b   :  { %1421 = vmatpush.bf16.msra.mxu3 %v7583_v47  ;;  %v7584_v21 = vld [vmem:[#allocation5 + $0x390] sm:$0xf0] }
 0x12c   :  { %1401 = vmatpush.bf16.msra.mxu2 %v7391_v42  ;;  %1444 = vmatpush.bf16.msrb.mxu0 %v7219_v46  ;;  %v7616_v46 = vld [vmem:[#allocation5 + $0x3d0] sm:$0xf0] }
 0x12f   :  { %1422 = vmatpush.bf16.msra.mxu3 %v7567_v60  ;;  %v7203_v60 = vor.u32 %v9790_v52, %v7200_v57  ;;  %v7360_v52 = vld [vmem:[#allocation5 + $0x1d0] sm:$0xf0] }
 0x130   :  { %1490 = vmatpush.bf16.msrb.mxu2 %v7507_v31  ;;  %v7363_v57 = vor.u32 %v9830_v51, %v7360_v52  ;;  %v9850_v31 = vld [vmem:[#allocation5 + $0x264] sm:$0xf]  ;;  %v7424_v51 = vld [vmem:[#allocation5 + $0x250] sm:$0xf0] }
 0x131   :  { %1445 = vmatpush.bf16.msrb.mxu0 %v7203_v60  ;;  %v7600_v60 = vld [vmem:[#allocation5 + $0x3b0] sm:$0xf0]  ;;  %v9878_v52 = vld [vmem:[#allocation5 + $0x344] sm:$0xf] }
 0x133   :  { %1423 = vmatpush.bf16.msra.mxu3 %v7551_v9 }
 0x135   :  { %v10961_v48 = vpop.f32.mrf.mxu0  ;;  %1446 = vmatpush.bf16.msrb.mxu0 %v7187_v5  ;;  %v9826_v5 = vld [vmem:[#allocation5 + $0x1a4] sm:$0xf] }
 0x137   :  { %1424 = vmatpush.bf16.msra.mxu3 %v7535_v25  ;;  %v9898_v25 = vld [vmem:[#allocation5 + $0x3e4] sm:$0xf] }
 0x138   :  { %v7635_v32 = vor.u32 %v9898_v25, %v7632_v27 }
 0x13b   :  { %1425 = vmatpush.bf16.msra.mxu3 %v7519_v43  ;;  %v7379_v43 = vor.u32 %v9834_v36, %v7376_v37 }
 0x13d   :  { %v10963_v55 = vpop.f32.mrf.mxu0  ;;  %1466 = vmatpush.bf16.msra.mxu1 %v7379_v43 }
 0x13f   :  { %1514 = vmatpush.bf16.msrb.mxu3 %v7635_v32 }
 0x141   :  { %1467 = vmatpush.bf16.msra.mxu1 %v7363_v57 }
 0x145   :  { %v10965_v0 = vpop.f32.mrf.mxu0 }
 0x14d   :  { %v10967_v8 = vpop.f32.mrf.mxu0 }
 0x152   :  { %v10969_v18 = vpop.f32.mrf.mxu2 }
 0x153   :  { %v10971_v19 = vpop.f32.mrf.mxu3 }
 0x155   :  { %v10973_v26 = vpop.f32.mrf.mxu1  ;;  %v10975_v30 = vpop.f32.mrf.mxu0 }
 0x15a   :  { %v10977_v40 = vpop.f32.mrf.mxu2 }
 0x15b   :  { %v10979_v41 = vpop.f32.mrf.mxu3 }
 0x15d   :  { %v10981_v49 = vpop.f32.mrf.mxu1  ;;  %v10983_v53 = vpop.f32.mrf.mxu0 }
 0x162   :  { %v10985_v1 = vpop.f32.mrf.mxu2 }
 0x163   :  { %v10987_v2 = vpop.f32.mrf.mxu3 }
 0x165   :  { %v10989_v13 = vpop.f32.mrf.mxu1  ;;  %v410_v17 = vpop.f32.mrf.mxu0 }
 0x166   :  { %v542_v58 = vmax.f32 %v10961_v48, %v410_v17  ;;  %v7168_v48 = vld [vmem:[#allocation5 + $0x50] sm:$0xf0]  ;;  %v9774_v17 = vld [vmem:[#allocation5 + $0x4] sm:$0xf] }
 0x167   :  { %v7139_v23 = vor.u32 %v9774_v17, %v7136_v20  ;;  %v7456_v17 = vld [vmem:[#allocation5 + $0x290] sm:$0xf0]  ;;  %v9886_v20 = vld [vmem:[#allocation5 + $0x384] sm:$0xf] }
 0x168   :  { %v7587_v25 = vor.u32 %v9886_v20, %v7584_v21  ;;  %v9801_v20 = vld [vmem:[#allocation5 + $0xd4] sm:$0xf0]  ;;  %v9810_v21 = vld [vmem:[#allocation5 + $0x124] sm:$0xf] }
 0x16a   :  { %v10991_v34 = vpop.f32.mrf.mxu2 }
 0x16b   :  { %v10993_v35 = vpop.f32.mrf.mxu3 }
 0x16d   :  { %v10995_v47 = vpop.f32.mrf.mxu1  ;;  %v412_v54 = vpop.f32.mrf.mxu0 }
 0x16e   :  { %v546_v59 = vmax.f32 %v10963_v55, %v412_v54  ;;  %v7171_v55 = vor.u32 %v9782_v7, %v7168_v48  ;;  %v9858_v54 = vld [vmem:[#allocation5 + $0x2a4] sm:$0xf]  ;;  %v7344_v7 = vld [vmem:[#allocation5 + $0x1b0] sm:$0xf0] }
 0x16f   :  { %v9854_v48 = vld [vmem:[#allocation5 + $0x284] sm:$0xf] }
 0x170   :  { %v10999_v61 = vpack.c.bf16 %v546_v59, %v542_v58  ;;  %1447 = vmatpush.bf16.msrb.mxu0 %v7171_v55  ;;  %v7472_v58 = vld [vmem:[#allocation5 + $0x2b0] sm:$0xf0]  ;;  %v9890_v59 = vld [vmem:[#allocation5 + $0x3a4] sm:$0xf]  ;;  %v7459_v24 = vor.u32 %v9854_v48, %v7456_v17 }
 0x171   :  { %v7475_v62 = vor.u32 %v9858_v54, %v7472_v58  ;;  %v7603_v63 = vor.u32 %v9890_v59, %v7600_v60  ;;  %v7552_v54 = vld [vmem:[#allocation5 + $0x350] sm:$0xf0]  ;;  %v7254_v58 = vld [vmem:[#allocation5 + $0xe8] sm:$0xf]  ;;  %v9805_v59 = vld [vmem:[#allocation5 + $0xf4] sm:$0xf0] }
 0x172   :  { %v11001_v3 = vpop.f32.mrf.mxu2  ;;  %1354 = vmatmul.bf16.vlgmr.msra.gmra.mxu0 %v10999_v61  ;;  %v7555_v57 = vor.u32 %v9878_v52, %v7552_v54  ;;  %v9814_v60 = vld [vmem:[#allocation5 + $0x144] sm:$0xf]  ;;  %v9789_v54 = vld [vmem:[#allocation5 + $0x74] sm:$0xf0] }
 0x173   :  { %v11003_v4 = vpop.f32.mrf.mxu3 }
 0x174   :  { %1448 = vmatpush.bf16.msrb.mxu0 %v7155_v15  ;;  %v7347_v15 = vor.u32 %v9826_v5, %v7344_v7  ;;  %v9842_v5 = vld [vmem:[#allocation5 + $0x224] sm:$0xf]  ;;  %v7408_v7 = vld [vmem:[#allocation5 + $0x230] sm:$0xf0] }
 0x175   :  { %v11006_v6 = vpop.f32.mrf.mxu1  ;;  %v415_v9 = vpop.f32.mrf.mxu0 }
 0x176   :  { %v550_v28 = vmax.f32 %v10965_v0, %v415_v9  ;;  %v7491_v0 = vor.u32 %v9862_v38, %v7488_v44  ;;  %1468 = vmatpush.bf16.msra.mxu1 %v7347_v15  ;;  %v7440_v38 = vld [vmem:[#allocation5 + $0x270] sm:$0xf0]  ;;  %v7238_v15 = vld [vmem:[#allocation5 + $0xc8] sm:$0xf] }
 0x177   :  { %v7443_v44 = vor.u32 %v9850_v31, %v7440_v38  ;;  %v7222_v31 = vld [vmem:[#allocation5 + $0xa8] sm:$0xf] }
 0x178   :  { %1449 = vmatpush.bf16.msrb.mxu0 %v7139_v23  ;;  %1491 = vmatpush.bf16.msrb.mxu2 %v7491_v0  ;;  %v9846_v0 = vld [vmem:[#allocation5 + $0x244] sm:$0xf] }
 0x17a   :  { %v11008_v12 = vpop.f32.mrf.mxu2 }
 0x17b   :  { %v11010_v14 = vpop.f32.mrf.mxu3 }
 0x17c   :  { %1492 = vmatpush.bf16.msrb.mxu2 %v7475_v62  ;;  %v7255_v62 = vor.u32 %v9805_v59, %v7254_v58  ;;  %v9785_v58 = vld [vmem:[#allocation5 + $0x54] sm:$0xf0] }
 0x17d   :  { %v11012_v16 = vpop.f32.mrf.mxu1  ;;  %v417_v22 = vpop.f32.mrf.mxu0 }
 0x17e   :  { %v554_v29 = vmax.f32 %v10967_v8, %v417_v22  ;;  %v7619_v8 = vor.u32 %v9894_v45, %v7616_v46  ;;  %1538 = vmatpush.bf16.msra.mxu0 %v7255_v62  ;;  %v7158_v62 = vld [vmem:[#allocation5 + $0x28] sm:$0xf] }
 0x180   :  { %v11016_v33 = vpack.c.bf16 %v554_v29, %v550_v28  ;;  %1515 = vmatpush.bf16.msrb.mxu3 %v7619_v8  ;;  %1493 = vmatpush.bf16.msrb.mxu2 %v7459_v24  ;;  %v7328_v29 = vld [vmem:[#allocation5 + $0x190] sm:$0xf0]  ;;  %v9838_v24 = vld [vmem:[#allocation5 + $0x204] sm:$0xf] }
 0x182   :  { %v488_v39 = vpop.f32.mrf.mxu2  ;;  %1359 = vmatmul.bf16.gmra.mxu0 %v11016_v33 }
 0x183   :  { %v527_v42 = vpop.f32.mrf.mxu3  ;;  %v544_v9 = vmax.f32 %v10969_v18, %v488_v39  ;;  %v9882_v39 = vld [vmem:[#allocation5 + $0x364] sm:$0xf] }
 0x184   :  { %1516 = vmatpush.bf16.msrb.mxu3 %v7603_v63  ;;  %v545_v55 = vmax.f32 %v10971_v19, %v527_v42  ;;  %v9822_v19 = vld [vmem:[#allocation5 + $0x184] sm:$0xf]  ;;  %v7568_v42 = vld [vmem:[#allocation5 + $0x370] sm:$0xf0]  ;;  %1494 = vmatpush.bf16.msrb.mxu2 %v7443_v44 }
 0x185   :  { %v449_v50 = vpop.f32.mrf.mxu1  ;;  %v420_v56 = vpop.f32.mrf.mxu0  ;;  %v7331_v37 = vor.u32 %v9822_v19, %v7328_v29  ;;  %v7571_v45 = vor.u32 %v9882_v39, %v7568_v42  ;;  %v7296_v63 = vld [vmem:[#allocation5 + $0x150] sm:$0xf0] }
 0x186   :  { %v558_v32 = vmax.f32 %v10975_v30, %v420_v56  ;;  %v543_v36 = vmax.f32 %v10973_v26, %v449_v50  ;;  %v9818_v26 = vld [vmem:[#allocation5 + $0x164] sm:$0xf]  ;;  %v7427_v56 = vor.u32 %v9846_v0, %v7424_v51  ;;  %v7520_v29 = vld [vmem:[#allocation5 + $0x310] sm:$0xf0]  ;;  %v7206_v51 = vld [vmem:[#allocation5 + $0x88] sm:$0xf] }
 0x187   :  { %1469 = vmatpush.bf16.msra.mxu1 %v7331_v37  ;;  %v9806_v0 = vld [vmem:[#allocation5 + $0x104] sm:$0xf] }
 0x188   :  { %1517 = vmatpush.bf16.msrb.mxu3 %v7587_v25  ;;  %1495 = vmatpush.bf16.msrb.mxu2 %v7427_v56  ;;  %v7392_v25 = vld [vmem:[#allocation5 + $0x210] sm:$0xf0] }
 0x18a   :  { %v490_v10 = vpop.f32.mrf.mxu2 }
 0x18b   :  { %v529_v11 = vpop.f32.mrf.mxu3  ;;  %v548_v22 = vmax.f32 %v10977_v40, %v490_v10  ;;  %v9874_v10 = vld [vmem:[#allocation5 + $0x324] sm:$0xf] }
 0x18c   :  { %v549_v23 = vmax.f32 %v10979_v41, %v529_v11  ;;  %1518 = vmatpush.bf16.msrb.mxu3 %v7571_v45  ;;  %v7536_v11 = vld [vmem:[#allocation5 + $0x330] sm:$0xf0] }
 0x18d   :  { %v11023_v27 = vpack.c.bf16 %v548_v22, %v544_v9  ;;  %v451_v18 = vpop.f32.mrf.mxu1  ;;  %v422_v40 = vpop.f32.mrf.mxu0  ;;  %v7299_v9 = vor.u32 %v9814_v60, %v7296_v63  ;;  %v7539_v17 = vor.u32 %v9874_v10, %v7536_v11  ;;  %v7280_v22 = vld [vmem:[#allocation5 + $0x130] sm:$0xf0]  ;;  %v9781_v63 = vld [vmem:[#allocation5 + $0x34] sm:$0xf0] }
 0x18e   :  { %v11025_v28 = vpack.c.bf16 %v549_v23, %v545_v55  ;;  %v547_v41 = vmax.f32 %v10981_v49, %v451_v18  ;;  %v562_v43 = vmax.f32 %v10983_v53, %v422_v40  ;;  %v7312_v49 = vld [vmem:[#allocation5 + $0x170] sm:$0xf0]  ;;  %v7411_v55 = vor.u32 %v9842_v5, %v7408_v7  ;;  %v9870_v18 = vld [vmem:[#allocation5 + $0x304] sm:$0xf] }
 0x18f   :  { %1402 = vmatmul.bf16.vlgmr.msra.gmra.mxu2 %v11023_v27  ;;  %v7315_v53 = vor.u32 %v9818_v26, %v7312_v49  ;;  %v7239_v23 = vor.u32 %v9801_v20, %v7238_v15  ;;  %v7283_v19 = vor.u32 %v9810_v21, %v7280_v22  ;;  %v7523_v40 = vor.u32 %v9870_v18, %v7520_v29  ;;  %v7142_v21 = vld [vmem:[#allocation5 + $0x8] sm:$0xf]  ;;  %v9777_v22 = vld [vmem:[#allocation5 + $0x14] sm:$0xf0] }
 0x190   :  { %1426 = vmatmul.bf16.vlgmr.msra.gmra.mxu3 %v11025_v28  ;;  %v11033_v46 = vpack.c.bf16 %v547_v41, %v543_v36  ;;  %v11035_v30 = vpack.c.bf16 %v562_v43, %v558_v32  ;;  %v9797_v32 = vld [vmem:[#allocation5 + $0xb4] sm:$0xf0]  ;;  %1496 = vmatpush.bf16.msrb.mxu2 %v7411_v55  ;;  %v7395_v36 = vor.u32 %v9838_v24, %v7392_v25 }
 0x191   :  { %1470 = vmatpush.bf16.msra.mxu1 %v7315_v53  ;;  %1519 = vmatpush.bf16.msrb.mxu3 %v7555_v57  ;;  %v7223_v38 = vor.u32 %v9797_v32, %v7222_v31  ;;  %v7264_v53 = vld [vmem:[#allocation5 + $0x110] sm:$0xf0]  ;;  %v9869_v18 = vld [vmem:[#allocation5 + $0x2f4] sm:$0xf0]  ;;  %v7382_v31 = vld [vmem:[#allocation5 + $0x1e8] sm:$0xf] }
 0x192   :  { %v493_v8 = vpop.f32.mrf.mxu2  ;;  %1378 = vmatmul.bf16.vlgmr.msrb.gmra.mxu1 %v11033_v46  ;;  %1364 = vmatmul.bf16.gmra.mxu0 %v11035_v30  ;;  %v9837_v32 = vld [vmem:[#allocation5 + $0x1f4] sm:$0xf0] }
 0x193   :  { %v532_v50 = vpop.f32.mrf.mxu3  ;;  %1539 = vmatpush.bf16.msra.mxu0 %v7239_v23  ;;  %v552_v39 = vmax.f32 %v10985_v1, %v493_v8  ;;  %v7510_v23 = vld [vmem:[#allocation5 + $0x2e8] sm:$0xf] }
 0x194   :  { %v553_v42 = vmax.f32 %v10987_v2, %v532_v50  ;;  %1497 = vmatpush.bf16.msrb.mxu2 %v7395_v36  ;;  %v7267_v2 = vor.u32 %v9806_v0, %v7264_v53  ;;  %v7190_v50 = vld [vmem:[#allocation5 + $0x68] sm:$0xf]  ;;  %v9865_v36 = vld [vmem:[#allocation5 + $0x2d4] sm:$0xf0] }
 0x195   :  { %v454_v48 = vpop.f32.mrf.mxu1  ;;  %1471 = vmatpush.bf16.msra.mxu1 %v7299_v9  ;;  %1520 = vmatpush.bf16.msrb.mxu3 %v7539_v17  ;;  %v7606_v0 = vld [vmem:[#allocation5 + $0x3a8] sm:$0xf]  ;;  %v9893_v53 = vld [vmem:[#allocation5 + $0x3b4] sm:$0xf0] }
 0x196   :  { %v551_v52 = vmax.f32 %v10989_v13, %v454_v48  ;;  %v7191_v13 = vor.u32 %v9789_v54, %v7190_v50  ;;  %v7159_v48 = vor.u32 %v9781_v63, %v7158_v62  ;;  %v7590_v50 = vld [vmem:[#allocation5 + $0x388] sm:$0xf]  ;;  %v9889_v54 = vld [vmem:[#allocation5 + $0x394] sm:$0xf0] }
 0x197   :  { %1540 = vmatpush.bf16.msra.mxu0 %v7223_v38  ;;  %v9853_v62 = vld [vmem:[#allocation5 + $0x274] sm:$0xf0]  ;;  %v7574_v63 = vld [vmem:[#allocation5 + $0x368] sm:$0xf] }
 0x199   :  { %1472 = vmatpush.bf16.msra.mxu1 %v7283_v19  ;;  %1521 = vmatpush.bf16.msrb.mxu3 %v7523_v40  ;;  %v9901_v19 = vld [vmem:[#allocation5 + $0x3f4] sm:$0xf0]  ;;  %v7622_v40 = vld [vmem:[#allocation5 + $0x3c8] sm:$0xf] }
 0x19a   :  { %v495_v41 = vpop.f32.mrf.mxu2 }
 0x19b   :  { %v534_v37 = vpop.f32.mrf.mxu3  ;;  %v556_v43 = vmax.f32 %v10991_v34, %v495_v41  ;;  %v9793_v34 = vld [vmem:[#allocation5 + $0x94] sm:$0xf0] }
 0x19c   :  { %v557_v44 = vmax.f32 %v10993_v35, %v534_v37  ;;  %v7207_v35 = vor.u32 %v9793_v34, %v7206_v51  ;;  %v9897_v41 = vld [vmem:[#allocation5 + $0x3d4] sm:$0xf0]  ;;  %v7462_v34 = vld [vmem:[#allocation5 + $0x288] sm:$0xf] }
 0x19d   :  { %v11043_v45 = vpack.c.bf16 %v556_v43, %v552_v39  ;;  %v456_v49 = vpop.f32.mrf.mxu1  ;;  %1473 = vmatpush.bf16.msra.mxu1 %v7267_v2  ;;  %v7623_v38 = vor.u32 %v9897_v41, %v7622_v40  ;;  %v7366_v39 = vld [vmem:[#allocation5 + $0x1c8] sm:$0xf]  ;;  %v9829_v2 = vld [vmem:[#allocation5 + $0x1b4] sm:$0xf0]  ;;  %v7240_v41 = vld [vmem:[#allocation5 + $0xd8] sm:$0xf0] }
 0x19e   :  { %v11045_v26 = vpack.c.bf16 %v557_v44, %v553_v42  ;;  %v555_v1 = vmax.f32 %v10995_v47, %v456_v49  ;;  %1541 = vmatpush.bf16.msra.mxu0 %v7207_v35  ;;  %v7174_v47 = vld [vmem:[#allocation5 + $0x48] sm:$0xf]  ;;  %v9833_v42 = vld [vmem:[#allocation5 + $0x1d4] sm:$0xf0] }
 0x19f   :  { %1407 = vmatmul.bf16.gmra.mxu2 %v11043_v45  ;;  %v7175_v60 = vor.u32 %v9785_v58, %v7174_v47  ;;  %v7478_v43 = vld [vmem:[#allocation5 + $0x2a8] sm:$0xf]  ;;  %v7367_v44 = vor.u32 %v9833_v42, %v7366_v39  ;;  %v9861_v49 = vld [vmem:[#allocation5 + $0x2b4] sm:$0xf0] }
 0x1a0   :  { %1431 = vmatmul.bf16.gmra.mxu3 %v11045_v26  ;;  %v11051_v8 = vpack.c.bf16 %v555_v1, %v551_v52  ;;  %v7479_v51 = vor.u32 %v9861_v49, %v7478_v43  ;;  %v7607_v52 = vor.u32 %v9893_v53, %v7606_v0  ;;  %v7350_v1 = vld [vmem:[#allocation5 + $0x1a8] sm:$0xf]  ;;  %v9857_v35 = vld [vmem:[#allocation5 + $0x294] sm:$0xf0]  ;;  %v9795_v53 = vld [vmem:[#allocation5 + $0xac] sm:$0xf] }
 0x1a1   :  { %v7334_v47 = vld [vmem:[#allocation5 + $0x188] sm:$0xf]  ;;  %v9825_v58 = vld [vmem:[#allocation5 + $0x194] sm:$0xf0] }
 0x1a2   :  { %v498_v56 = vpop.f32.mrf.mxu2  ;;  %1383 = vmatmul.bf16.gmra.mxu1 %v11051_v8  ;;  %1450 = vmatmul.bf16.vlgmr.msrb.gmra.mxu0 %v10999_v61  ;;  %v7398_v42 = vld [vmem:[#allocation5 + $0x208] sm:$0xf]  ;;  %v9841_v43 = vld [vmem:[#allocation5 + $0x214] sm:$0xf0] }
 0x1a3   :  { %v537_v57 = vpop.f32.mrf.mxu3  ;;  %1542 = vmatpush.bf16.msra.mxu0 %v7191_v13  ;;  %v560_v9 = vmax.f32 %v11001_v3, %v498_v56  ;;  %v7143_v3 = vor.u32 %v9777_v22, %v7142_v21  ;;  %v7351_v56 = vor.u32 %v9829_v2, %v7350_v1  ;;  %v7591_v13 = vor.u32 %v9889_v54, %v7590_v50  ;;  %v7558_v21 = vld [vmem:[#allocation5 + $0x348] sm:$0xf]  ;;  %v9881_v22 = vld [vmem:[#allocation5 + $0x354] sm:$0xf0]  ;;  %v9791_v50 = vld [vmem:[#allocation5 + $0x8c] sm:$0xf] }
 0x1a4   :  { %v561_v55 = vmax.f32 %v11003_v4, %v537_v57  ;;  %v7638_v4 = vld [vmem:[#allocation5 + $0x3e8] sm:$0xf]  ;;  %v7463_v57 = vor.u32 %v9857_v35, %v7462_v34  ;;  %v9873_v0 = vld [vmem:[#allocation5 + $0x314] sm:$0xf0] }
 0x1a5   :  { %v459_v59 = vpop.f32.mrf.mxu1  ;;  %v7270_v34 = vld [vmem:[#allocation5 + $0x108] sm:$0xf]  ;;  %v9809_v35 = vld [vmem:[#allocation5 + $0x114] sm:$0xf0] }
 0x1a6   :  { %v559_v24 = vmax.f32 %v11006_v6, %v459_v59  ;;  %v7494_v6 = vld [vmem:[#allocation5 + $0x2c8] sm:$0xf]  ;;  %v7271_v54 = vor.u32 %v9809_v35, %v7270_v34  ;;  %v7336_v34 = vld [vmem:[#allocation5 + $0x198] sm:$0xf0]  ;;  %v9851_v35 = vld [vmem:[#allocation5 + $0x26c] sm:$0xf] }
 0x1a7   :  { %1543 = vmatpush.bf16.msra.mxu0 %v7175_v60  ;;  %v7495_v37 = vor.u32 %v9865_v36, %v7494_v6  ;;  %v7446_v59 = vld [vmem:[#allocation5 + $0x268] sm:$0xf]  ;;  %v7335_v60 = vor.u32 %v9825_v58, %v7334_v47  ;;  %v9799_v36 = vld [vmem:[#allocation5 + $0xcc] sm:$0xf]  ;;  %v7192_v47 = vld [vmem:[#allocation5 + $0x78] sm:$0xf0] }
 0x1a8   :  { %v7542_v6 = vld [vmem:[#allocation5 + $0x328] sm:$0xf]  ;;  %v7243_v39 = vor.u32 %v9799_v36, %v7240_v41  ;;  %v9891_v41 = vld [vmem:[#allocation5 + $0x3ac] sm:$0xf] }
 0x1aa   :  { %v500_v5 = vpop.f32.mrf.mxu2 }
 0x1ab   :  { %v539_v7 = vpop.f32.mrf.mxu3  ;;  %v564_v10 = vmax.f32 %v11008_v12, %v500_v5  ;;  %1544 = vmatpush.bf16.msra.mxu0 %v7159_v48  ;;  %v7511_v12 = vor.u32 %v9869_v18, %v7510_v23  ;;  %v9885_v5 = vld [vmem:[#allocation5 + $0x374] sm:$0xf0]  ;;  %v7302_v18 = vld [vmem:[#allocation5 + $0x148] sm:$0xf] }
 0x1ac   :  { %v565_v11 = vmax.f32 %v11010_v14, %v539_v7  ;;  %v7639_v14 = vor.u32 %v9901_v19, %v7638_v4  ;;  %v7447_v7 = vor.u32 %v9853_v62, %v7446_v59  ;;  %v7575_v48 = vor.u32 %v9885_v5, %v7574_v63  ;;  %v9817_v19 = vld [vmem:[#allocation5 + $0x154] sm:$0xf0]  ;;  %v9783_v59 = vld [vmem:[#allocation5 + $0x4c] sm:$0xf]  ;;  %v7160_v5 = vld [vmem:[#allocation5 + $0x38] sm:$0xf0] }
 0x1ad   :  { %v11059_v15 = vpack.c.bf16 %v564_v10, %v560_v9  ;;  %v461_v20 = vpop.f32.mrf.mxu1  ;;  %1586 = vmatpush.bf16.msra.mxu2 %v7511_v12  ;;  %v7318_v9 = vld [vmem:[#allocation5 + $0x168] sm:$0xf]  ;;  %v9779_v63 = vld [vmem:[#allocation5 + $0x2c] sm:$0xf] }
 0x1ae   :  { %v11061_v17 = vpack.c.bf16 %v565_v11, %v561_v55  ;;  %v563_v25 = vmax.f32 %v11012_v16, %v461_v20  ;;  %1610 = vmatpush.bf16.msra.mxu3 %v7639_v14  ;;  %v7383_v16 = vor.u32 %v9837_v32, %v7382_v31  ;;  %v9821_v55 = vld [vmem:[#allocation5 + $0x174] sm:$0xf0]  ;;  %v7430_v10 = vld [vmem:[#allocation5 + $0x248] sm:$0xf]  ;;  %v7303_v31 = vor.u32 %v9817_v19, %v7302_v18  ;;  %v9895_v19 = vld [vmem:[#allocation5 + $0x3cc] sm:$0xf] }
 0x1af   :  { %1412 = vmatmul.bf16.gmra.mxu2 %v11059_v15  ;;  %1545 = vmatpush.bf16.msra.mxu0 %v7143_v3  ;;  %v7319_v11 = vor.u32 %v9821_v55, %v7318_v9  ;;  %v9849_v20 = vld [vmem:[#allocation5 + $0x254] sm:$0xf0]  ;;  %v7256_v3 = vld [vmem:[#allocation5 + $0xf8] sm:$0xf0]  ;;  %v7414_v12 = vld [vmem:[#allocation5 + $0x228] sm:$0xf] }
 0x1b0   :  { %1436 = vmatmul.bf16.gmra.mxu3 %v11061_v17  ;;  %v11067_v29 = vpack.c.bf16 %v563_v25, %v559_v24  ;;  %1562 = vmatpush.bf16.msrb.mxu1 %v7383_v16  ;;  %v7431_v23 = vor.u32 %v9849_v20, %v7430_v10  ;;  %v7559_v24 = vor.u32 %v9881_v22, %v7558_v21  ;;  %v9803_v25 = vld [vmem:[#allocation5 + $0xec] sm:$0xf]  ;;  %v9845_v14 = vld [vmem:[#allocation5 + $0x234] sm:$0xf0]  ;;  %v7144_v9 = vld [vmem:[#allocation5 + $0x18] sm:$0xf0] }
 0x1b1   :  { %1587 = vmatpush.bf16.msra.mxu2 %v7495_v37  ;;  %v7259_v4 = vor.u32 %v9803_v25, %v7256_v3  ;;  %v7415_v32 = vor.u32 %v9845_v14, %v7414_v12  ;;  %v9877_v16 = vld [vmem:[#allocation5 + $0x334] sm:$0xf0]  ;;  %v7286_v37 = vld [vmem:[#allocation5 + $0x128] sm:$0xf]  ;;  %v9867_v55 = vld [vmem:[#allocation5 + $0x2ec] sm:$0xf] }
 0x1b2   :  { %1388 = vmatmul.bf16.gmra.mxu1 %v11067_v29  ;;  %1455 = vmatmul.bf16.gmra.mxu0 %v11016_v33  ;;  %v7543_v40 = vor.u32 %v9877_v16, %v7542_v6  ;;  %v9899_v20 = vld [vmem:[#allocation5 + $0x3ec] sm:$0xf]  ;;  %v7640_v21 = vld [vmem:[#allocation5 + $0x3f8] sm:$0xf0] }
 0x1b3   :  { %1611 = vmatpush.bf16.msra.mxu3 %v7623_v38  ;;  %1634 = vmatpush.bf16.msrb.mxu0 %v7259_v4  ;;  %v9813_v38 = vld [vmem:[#allocation5 + $0x134] sm:$0xf0]  ;;  %v7384_v25 = vld [vmem:[#allocation5 + $0x1f8] sm:$0xf0]  ;;  %v9863_v3 = vld [vmem:[#allocation5 + $0x2cc] sm:$0xf] }
 0x1b4   :  { %1563 = vmatpush.bf16.msrb.mxu1 %v7367_v44  ;;  %v7526_v44 = vld [vmem:[#allocation5 + $0x308] sm:$0xf]  ;;  %v7287_v49 = vor.u32 %v9813_v38, %v7286_v37  ;;  %v7496_v4 = vld [vmem:[#allocation5 + $0x2d8] sm:$0xf0]  ;;  %v9859_v16 = vld [vmem:[#allocation5 + $0x2ac] sm:$0xf] }
 0x1b5   :  { %1588 = vmatpush.bf16.msra.mxu2 %v7479_v51  ;;  %v7224_v51 = vld [vmem:[#allocation5 + $0xb8] sm:$0xf0]  ;;  %v7527_v1 = vor.u32 %v9873_v0, %v7526_v44  ;;  %v7499_v14 = vor.u32 %v9863_v3, %v7496_v4  ;;  %v9855_v44 = vld [vmem:[#allocation5 + $0x28c] sm:$0xf] }
 0x1b6   :  { %v7227_v2 = vor.u32 %v9795_v53, %v7224_v51  ;;  %v7624_v12 = vld [vmem:[#allocation5 + $0x3d8] sm:$0xf0]  ;;  %v9887_v53 = vld [vmem:[#allocation5 + $0x38c] sm:$0xf] }
 0x1b7   :  { %1612 = vmatpush.bf16.msra.mxu3 %v7607_v52  ;;  %v7399_v52 = vor.u32 %v9841_v43, %v7398_v42  ;;  %1635 = vmatpush.bf16.msrb.mxu0 %v7243_v39  ;;  %v7368_v6 = vld [vmem:[#allocation5 + $0x1d8] sm:$0xf0]  ;;  %v9827_v42 = vld [vmem:[#allocation5 + $0x1ac] sm:$0xf] }
 0x1b8   :  { %1564 = vmatpush.bf16.msrb.mxu1 %v7351_v56  ;;  %v7208_v56 = vld [vmem:[#allocation5 + $0x98] sm:$0xf0]  ;;  %v9811_v4 = vld [vmem:[#allocation5 + $0x12c] sm:$0xf] }
 0x1b9   :  { %1589 = vmatpush.bf16.msra.mxu2 %v7463_v57  ;;  %v7211_v57 = vor.u32 %v9791_v50, %v7208_v56  ;;  %v7608_v37 = vld [vmem:[#allocation5 + $0x3b8] sm:$0xf0]  ;;  %v9883_v56 = vld [vmem:[#allocation5 + $0x36c] sm:$0xf] }
 0x1ba   :  { %v7611_v39 = vor.u32 %v9891_v41, %v7608_v37  ;;  %v7352_v43 = vld [vmem:[#allocation5 + $0x1b8] sm:$0xf0] }
 0x1bb   :  { %1613 = vmatpush.bf16.msra.mxu3 %v7591_v13  ;;  %1636 = vmatpush.bf16.msrb.mxu0 %v7227_v2  ;;  %v9787_v13 = vld [vmem:[#allocation5 + $0x6c] sm:$0xf]  ;;  %v7464_v0 = vld [vmem:[#allocation5 + $0x298] sm:$0xf0] }
 0x1bc   :  { %1565 = vmatpush.bf16.msrb.mxu1 %v7335_v60  ;;  %v7195_v58 = vor.u32 %v9787_v13, %v7192_v47  ;;  %v7176_v60 = vld [vmem:[#allocation5 + $0x58] sm:$0xf0]  ;;  %v9823_v2 = vld [vmem:[#allocation5 + $0x18c] sm:$0xf] }
 0x1bd   :  { %1590 = vmatpush.bf16.msra.mxu2 %v7447_v7  ;;  %v7179_v62 = vor.u32 %v9783_v59, %v7176_v60  ;;  %v7163_v7 = vor.u32 %v9779_v63, %v7160_v5  ;;  %v7592_v51 = vld [vmem:[#allocation5 + $0x398] sm:$0xf0]  ;;  %v7339_v50 = vor.u32 %v9823_v2, %v7336_v34  ;;  %v9819_v59 = vld [vmem:[#allocation5 + $0x16c] sm:$0xf] }
 0x1be   :  { %v7320_v60 = vld [vmem:[#allocation5 + $0x178] sm:$0xf0] }
 0x1bf   :  { %1498 = vmatmul.bf16.vlgmr.msrb.gmra.mxu2 %v11023_v27  ;;  %1614 = vmatpush.bf16.msra.mxu3 %v7575_v48  ;;  %v9775_v48 = vld [vmem:[#allocation5 + $0xc] sm:$0xf]  ;;  %v7323_v63 = vor.u32 %v9819_v59, %v7320_v60  ;;  %v7432_v5 = vld [vmem:[#allocation5 + $0x258] sm:$0xf0] }
 0x1c0   :  { %1522 = vmatmul.bf16.vlgmr.msrb.gmra.mxu3 %v11025_v28  ;;  %1566 = vmatpush.bf16.msrb.mxu1 %v7319_v11  ;;  %v7147_v10 = vor.u32 %v9775_v48, %v7144_v9  ;;  %v7512_v11 = vld [vmem:[#allocation5 + $0x2f8] sm:$0xf0] }
 0x1c1   :  { %1591 = vmatpush.bf16.msra.mxu2 %v7431_v23  ;;  %1637 = vmatpush.bf16.msrb.mxu0 %v7211_v57  ;;  %v7515_v22 = vor.u32 %v9867_v55, %v7512_v11  ;;  %v7643_v23 = vor.u32 %v9899_v20, %v7640_v21  ;;  %v7576_v57 = vld [vmem:[#allocation5 + $0x378] sm:$0xf0]  ;;  %v9843_v20 = vld [vmem:[#allocation5 + $0x22c] sm:$0xf] }
 0x1c2   :  { %1474 = vmatmul.bf16.vlgmr.msra.gmra.mxu1 %v11033_v46  ;;  %1460 = vmatmul.bf16.gmra.mxu0 %v11035_v30  ;;  %v7579_v47 = vor.u32 %v9883_v56, %v7576_v57  ;;  %v7560_v48 = vld [vmem:[#allocation5 + $0x358] sm:$0xf0] }
 0x1c3   :  { %1615 = vmatpush.bf16.msra.mxu3 %v7559_v24  ;;  %v9835_v24 = vld [vmem:[#allocation5 + $0x1ec] sm:$0xf]  ;;  %v7304_v11 = vld [vmem:[#allocation5 + $0x158] sm:$0xf0] }
 0x1c4   :  { %1567 = vmatpush.bf16.msrb.mxu1 %v7303_v31  ;;  %v7387_v18 = vor.u32 %v9835_v24, %v7384_v25  ;;  %v7627_v31 = vor.u32 %v9895_v19, %v7624_v12  ;;  %v7544_v24 = vld [vmem:[#allocation5 + $0x338] sm:$0xf0]  ;;  %v9839_v12 = vld [vmem:[#allocation5 + $0x20c] sm:$0xf] }
 0x1c5   :  { %1592 = vmatpush.bf16.msra.mxu2 %v7415_v32  ;;  %1638 = vmatpush.bf16.msrb.mxu0 %v7195_v58  ;;  %v9831_v32 = vld [vmem:[#allocation5 + $0x1cc] sm:$0xf]  ;;  %v7288_v19 = vld [vmem:[#allocation5 + $0x138] sm:$0xf0] }
 0x1c6   :  { %v7371_v36 = vor.u32 %v9831_v32, %v7368_v6  ;;  %v9871_v32 = vld [vmem:[#allocation5 + $0x30c] sm:$0xf]  ;;  %v7528_v6 = vld [vmem:[#allocation5 + $0x318] sm:$0xf0] }
 0x1c7   :  { %1616 = vmatpush.bf16.msra.mxu3 %v7543_v40  ;;  %v7480_v40 = vld [vmem:[#allocation5 + $0x2b8] sm:$0xf0] }
 0x1c8   :  { %1568 = vmatpush.bf16.msrb.mxu1 %v7287_v49  ;;  %v7483_v38 = vor.u32 %v9859_v16, %v7480_v40  ;;  %v7355_v49 = vor.u32 %v9827_v42, %v7352_v43  ;;  %v9807_v40 = vld [vmem:[#allocation5 + $0x10c] sm:$0xf]  ;;  %v7272_v41 = vld [vmem:[#allocation5 + $0x118] sm:$0xf0] }
 0x1c9   :  { %1593 = vmatpush.bf16.msra.mxu2 %v7399_v52  ;;  %1639 = vmatpush.bf16.msrb.mxu0 %v7179_v62  ;;  %v7467_v52 = vor.u32 %v9855_v44, %v7464_v0  ;;  %v9847_v62 = vld [vmem:[#allocation5 + $0x24c] sm:$0xf]  ;;  %v7275_v37 = vor.u32 %v9807_v40, %v7272_v41  ;;  %v9912_v40 = vld [vmem:[#allocation2 + $0x4c] sm:$0xf0] }
 0x1ca   :  { %v7435_v9 = vor.u32 %v9847_v62, %v7432_v5  ;;  %v7742_v62 = vld [vmem:[#allocation2 + $0xc0] sm:$0xf] }
 0x1cb   :  { %1617 = vmatpush.bf16.msra.mxu3 %v7527_v1  ;;  %v7595_v1 = vor.u32 %v9887_v53, %v7592_v51 }
 0x1cc   :  { %1569 = vmatpush.bf16.msrb.mxu1 %v7271_v54  ;;  %v7448_v54 = vld [vmem:[#allocation5 + $0x278] sm:$0xf0] }
 0x1cd   :  { %1640 = vmatpush.bf16.msrb.mxu0 %v7163_v7  ;;  %1682 = vmatpush.bf16.msrb.mxu2 %v7515_v22  ;;  %v7451_v13 = vor.u32 %v9851_v35, %v7448_v54  ;;  %v9879_v7 = vld [vmem:[#allocation5 + $0x34c] sm:$0xf]  ;;  %v7416_v22 = vld [vmem:[#allocation5 + $0x238] sm:$0xf0] }
 0x1ce   :  { %v7563_v55 = vor.u32 %v9879_v7, %v7560_v48  ;;  %v7419_v25 = vor.u32 %v9843_v20, %v7416_v22  ;;  %v7726_v48 = vld [vmem:[#allocation2 + $0xa0] sm:$0xf] }
 0x1cf   :  { %1503 = vmatmul.bf16.gmra.mxu2 %v11043_v45  ;;  %1706 = vmatpush.bf16.msrb.mxu3 %v7643_v23  ;;  %v9875_v23 = vld [vmem:[#allocation5 + $0x32c] sm:$0xf]  ;;  %v7710_v22 = vld [vmem:[#allocation2 + $0x80] sm:$0xf] }
 0x1d0   :  { %1527 = vmatmul.bf16.gmra.mxu3 %v11045_v26  ;;  %1658 = vmatpush.bf16.msra.mxu1 %v7387_v18  ;;  %v7547_v3 = vor.u32 %v9875_v23, %v7544_v24  ;;  %v9996_v24 = vld [vmem:[#allocation2 + $0x2ec] sm:$0xf0] }
 0x1d1   :  { %1641 = vmatpush.bf16.msrb.mxu0 %v7147_v10  ;;  %1683 = vmatpush.bf16.msrb.mxu2 %v7499_v14  ;;  %v9815_v10 = vld [vmem:[#allocation5 + $0x14c] sm:$0xf]  ;;  %v7291_v14 = vor.u32 %v9811_v4, %v7288_v19  ;;  %v7694_v4 = vld [vmem:[#allocation2 + $0x60] sm:$0xf]  ;;  %v9916_v19 = vld [vmem:[#allocation2 + $0x6c] sm:$0xf0] }
 0x1d2   :  { %1479 = vmatmul.bf16.gmra.mxu1 %v11051_v8  ;;  %1546 = vmatmul.bf16.vlgmr.msra.gmra.mxu0 %v10999_v61  ;;  %v7307_v21 = vor.u32 %v9815_v10, %v7304_v11 }
 0x1d3   :  { %1707 = vmatpush.bf16.msrb.mxu3 %v7627_v31  ;;  %v7400_v31 = vld [vmem:[#allocation5 + $0x218] sm:$0xf0] }
 0x1d4   :  { %1659 = vmatpush.bf16.msra.mxu1 %v7371_v36  ;;  %v7403_v16 = vor.u32 %v9839_v12, %v7400_v31  ;;  %v7531_v36 = vor.u32 %v9871_v32, %v7528_v6  ;;  %v7998_v31 = vld [vmem:[#allocation2 + $0x2c0] sm:$0xf]  ;;  %v9992_v32 = vld [vmem:[#allocation2 + $0x2cc] sm:$0xf0] }
 0x1d5   :  { %1684 = vmatpush.bf16.msrb.mxu2 %v7483_v38 }
 0x1d7   :  { %1708 = vmatpush.bf16.msrb.mxu3 %v7611_v39 }
 0x1d8   :  { %1660 = vmatpush.bf16.msra.mxu1 %v7355_v49 }
 0x1d9   :  { %1685 = vmatpush.bf16.msrb.mxu2 %v7467_v52 }
 0x1db   :  { %1709 = vmatpush.bf16.msrb.mxu3 %v7595_v1 }
 0x1dc   :  { %1661 = vmatpush.bf16.msra.mxu1 %v7339_v50 }
 0x1dd   :  { %1686 = vmatpush.bf16.msrb.mxu2 %v7451_v13 }
 0x1df   :  { %1508 = vmatmul.bf16.gmra.mxu2 %v11059_v15  ;;  %1710 = vmatpush.bf16.msrb.mxu3 %v7579_v47 }
 0x1e0   :  { %1532 = vmatmul.bf16.gmra.mxu3 %v11061_v17  ;;  %1662 = vmatpush.bf16.msra.mxu1 %v7323_v63  ;;  %v9928_v63 = vld [vmem:[#allocation2 + $0xcc] sm:$0xf0] }
 0x1e1   :  { %1687 = vmatpush.bf16.msrb.mxu2 %v7435_v9  ;;  %v9924_v9 = vld [vmem:[#allocation2 + $0xac] sm:$0xf0] }
 0x1e2   :  { %1484 = vmatmul.bf16.gmra.mxu1 %v11067_v29  ;;  %1551 = vmatmul.bf16.gmra.mxu0 %v11016_v33  ;;  %v7727_v11 = vor.u32 %v9924_v9, %v7726_v48 }
 0x1e3   :  { %1711 = vmatpush.bf16.msrb.mxu3 %v7563_v55 }
 0x1e4   :  { %1663 = vmatpush.bf16.msra.mxu1 %v7307_v21 }
 0x1e5   :  { %1688 = vmatpush.bf16.msrb.mxu2 %v7419_v25 }
 0x1e7   :  { %1712 = vmatpush.bf16.msrb.mxu3 %v7547_v3 }
 0x1e8   :  { %1664 = vmatpush.bf16.msra.mxu1 %v7291_v14  ;;  %v7695_v14 = vor.u32 %v9916_v19, %v7694_v4 }
 0x1e9   :  { %1689 = vmatpush.bf16.msrb.mxu2 %v7403_v16  ;;  %v7999_v16 = vor.u32 %v9992_v32, %v7998_v31  ;;  %v10052_v31 = vld [vmem:[#allocation2 + $0x4ac] sm:$0xf0] }
 0x1eb   :  { %1713 = vmatpush.bf16.msrb.mxu3 %v7531_v36  ;;  %v7678_v36 = vld [vmem:[#allocation2 + $0x40] sm:$0xf] }
 0x1ec   :  { %1665 = vmatpush.bf16.msra.mxu1 %v7275_v37  ;;  %v7679_v41 = vor.u32 %v9912_v40, %v7678_v36  ;;  %v7982_v37 = vld [vmem:[#allocation2 + $0x2a0] sm:$0xf] }
 0x1ef   :  { %1594 = vmatmul.bf16.vlgmr.msra.gmra.mxu2 %v11023_v27  ;;  %v1355_v58 = vpop.f32.mrf.mxu0 }
 0x1f0   :  { %1618 = vmatmul.bf16.vlgmr.msra.gmra.mxu3 %v11025_v28 }
 0x1f2   :  { %1570 = vmatmul.bf16.vlgmr.msrb.gmra.mxu1 %v11033_v46  ;;  %1556 = vmatmul.bf16.gmra.mxu0 %v11035_v30 }
 0x1f7   :  { %v11087_v18 = vpop.f32.mrf.mxu0 }
 0x1ff   :  { %1599 = vmatmul.bf16.gmra.mxu2 %v11043_v45  ;;  %v1360_v38 = vpop.f32.mrf.mxu0 }
 0x200   :  { %1623 = vmatmul.bf16.gmra.mxu3 %v11045_v26 }
 0x202   :  { %1575 = vmatmul.bf16.gmra.mxu1 %v11051_v8  ;;  %1642 = vmatmul.bf16.vlgmr.msrb.gmra.mxu0 %v10999_v61 }
 0x207   :  { %v11093_v39 = vpop.f32.mrf.mxu0 }
 0x20f   :  { %1604 = vmatmul.bf16.gmra.mxu2 %v11059_v15  ;;  %v1379_v42 = vpop.f32.mrf.mxu1  ;;  %v1365_v43 = vpop.f32.mrf.mxu0 }
 0x210   :  { %1628 = vmatmul.bf16.gmra.mxu3 %v11061_v17  ;;  %v1380_v44 = vadd.f32 %v1379_v42, %v1355_v58  ;;  %v7758_v58 = vld [vmem:[#allocation2 + $0xe0] sm:$0xf] }
 0x212   :  { %v1403_v49 = vpop.f32.mrf.mxu2  ;;  %1580 = vmatmul.bf16.gmra.mxu1 %v11067_v29  ;;  %1647 = vmatmul.bf16.gmra.mxu0 %v11016_v33 }
 0x213   :  { %v1427_v0 = vpop.f32.mrf.mxu3  ;;  %v1404_v53 = vadd.f32 %v1403_v49, %v1380_v44  ;;  %v7662_v49 = vld [vmem:[#allocation2 + $0x20] sm:$0xf] }
 0x215   :  { %v11099_v51 = vadd.f32 %v1427_v0, %v1404_v53  ;;  %v9908_v0 = vld [vmem:[#allocation2 + $0x2c] sm:$0xf0] }
 0x217   :  { %v11101_v52 = vpop.f32.mrf.mxu1  ;;  %v11103_v61 = vpop.f32.mrf.mxu0 }
 0x21a   :  { %v11105_v1 = vpop.f32.mrf.mxu2 }
 0x21b   :  { %v11107_v2 = vpop.f32.mrf.mxu3 }
 0x21f   :  { %1690 = vmatmul.bf16.vlgmr.msrb.gmra.mxu2 %v11023_v27  ;;  %v1384_v34 = vpop.f32.mrf.mxu1  ;;  %v1451_v50 = vpop.f32.mrf.mxu0  ;;  %v9932_v27 = vld [vmem:[#allocation2 + $0xec] sm:$0xf0] }
 0x220   :  { %1714 = vmatmul.bf16.vlgmr.msrb.gmra.mxu3 %v11025_v28  ;;  %v1385_v35 = vadd.f32 %v1384_v34, %v1360_v38  ;;  %v7759_v60 = vor.u32 %v9932_v27, %v7758_v58  ;;  %v9988_v38 = vld [vmem:[#allocation2 + $0x2ac] sm:$0xf0] }
 0x221   :  { %v9904_v27 = vld [vmem:[#allocation2 + $0xc] sm:$0xf0] }
 0x222   :  { %v1408_v54 = vpop.f32.mrf.mxu2  ;;  %1666 = vmatmul.bf16.vlgmr.msra.gmra.mxu1 %v11033_v46  ;;  %1652 = vmatmul.bf16.gmra.mxu0 %v11035_v30  ;;  %v7743_v46 = vor.u32 %v9928_v63, %v7742_v62  ;;  %v7950_v62 = vld [vmem:[#allocation2 + $0x260] sm:$0xf]  ;;  %v9980_v63 = vld [vmem:[#allocation2 + $0x26c] sm:$0xf0] }
 0x223   :  { %v1432_v56 = vpop.f32.mrf.mxu3  ;;  %v1409_v33 = vadd.f32 %v1408_v54, %v1385_v35  ;;  %2910 = vmatpush.bf16.msra.mxu0 %v7759_v60  ;;  %v7663_v35 = vor.u32 %v9908_v0, %v7662_v49  ;;  %v7966_v54 = vld [vmem:[#allocation2 + $0x280] sm:$0xf]  ;;  %v9930_v49 = vld [vmem:[#allocation2 + $0xe4] sm:$0xf]  ;;  %v7760_v0 = vld [vmem:[#allocation2 + $0xf0] sm:$0xf0] }
 0x225   :  { %v11113_v57 = vadd.f32 %v1432_v56, %v1409_v33  ;;  %v9984_v56 = vld [vmem:[#allocation2 + $0x28c] sm:$0xf0] }
 0x226   :  { %v7967_v58 = vor.u32 %v9984_v56, %v7966_v54  ;;  %v10044_v54 = vld [vmem:[#allocation2 + $0x46c] sm:$0xf0] }
 0x227   :  { %v11115_v13 = vpop.f32.mrf.mxu1  ;;  %v11117_v47 = vpop.f32.mrf.mxu0  ;;  %2911 = vmatpush.bf16.msra.mxu0 %v7743_v46  ;;  %v8270_v46 = vld [vmem:[#allocation2 + $0x4e0] sm:$0xf] }
 0x22a   :  { %v11119_v59 = vpop.f32.mrf.mxu2 }
 0x22b   :  { %v11121_v28 = vpop.f32.mrf.mxu3  ;;  %2912 = vmatpush.bf16.msra.mxu0 %v7727_v11  ;;  %v9976_v11 = vld [vmem:[#allocation2 + $0x24c] sm:$0xf0] }
 0x22f   :  { %1695 = vmatmul.bf16.gmra.mxu2 %v11043_v45  ;;  %v1389_v30 = vpop.f32.mrf.mxu1  ;;  %v11125_v7 = vpop.f32.mrf.mxu0  ;;  %v9920_v45 = vld [vmem:[#allocation2 + $0x8c] sm:$0xf0] }
 0x230   :  { %1719 = vmatmul.bf16.gmra.mxu3 %v11045_v26  ;;  %v1390_v5 = vadd.f32 %v1389_v30, %v1365_v43  ;;  %v7711_v23 = vor.u32 %v9920_v45, %v7710_v22  ;;  %v8014_v26 = vld [vmem:[#allocation2 + $0x2e0] sm:$0xf]  ;;  %v7983_v43 = vor.u32 %v9988_v38, %v7982_v37  ;;  %v10056_v45 = vld [vmem:[#allocation2 + $0x4cc] sm:$0xf0] }
 0x231   :  { %v8015_v3 = vor.u32 %v9996_v24, %v8014_v26  ;;  %v7918_v26 = vld [vmem:[#allocation2 + $0x220] sm:$0xf]  ;;  %v9972_v24 = vld [vmem:[#allocation2 + $0x22c] sm:$0xf0] }
 0x232   :  { %v1413_v55 = vpop.f32.mrf.mxu2  ;;  %1671 = vmatmul.bf16.gmra.mxu1 %v11051_v8  ;;  %2913 = vmatpush.bf16.msra.mxu0 %v7711_v23  ;;  %v9968_v37 = vld [vmem:[#allocation2 + $0x20c] sm:$0xf0]  ;;  %v8222_v38 = vld [vmem:[#allocation2 + $0x480] sm:$0xf] }
 0x233   :  { %v1437_v10 = vpop.f32.mrf.mxu3  ;;  %v1414_v20 = vadd.f32 %v1413_v55, %v1390_v5  ;;  %2938 = vmatpush.bf16.msra.mxu2 %v8015_v3  ;;  %v10060_v5 = vld [vmem:[#allocation2 + $0x4ec] sm:$0xf0]  ;;  %v8238_v3 = vld [vmem:[#allocation2 + $0x4a0] sm:$0xf] }
 0x234   :  { %v8271_v48 = vor.u32 %v10060_v5, %v8270_v46 }
 0x235   :  { %v11128_v21 = vadd.f32 %v1437_v10, %v1414_v20  ;;  %v7934_v10 = vld [vmem:[#allocation2 + $0x240] sm:$0xf] }
 0x236   :  { %2914 = vmatpush.bf16.msra.mxu0 %v7695_v14  ;;  %v8254_v20 = vld [vmem:[#allocation2 + $0x4c0] sm:$0xf]  ;;  %v7935_v22 = vor.u32 %v9976_v11, %v7934_v10  ;;  %v7919_v14 = vor.u32 %v9972_v24, %v7918_v26  ;;  %v10040_v10 = vld [vmem:[#allocation2 + $0x44c] sm:$0xf0] }
 0x237   :  { %v11130_v25 = vpop.f32.mrf.mxu1  ;;  %v11136_v6 = vpop.f32.mrf.mxu0  ;;  %2939 = vmatpush.bf16.msra.mxu2 %v7999_v16  ;;  %v8255_v23 = vor.u32 %v10056_v45, %v8254_v20  ;;  %v8239_v16 = vor.u32 %v10052_v31, %v8238_v3  ;;  %v9922_v20 = vld [vmem:[#allocation2 + $0xa4] sm:$0xf]  ;;  %v9960_v26 = vld [vmem:[#allocation2 + $0x1cc] sm:$0xf0]  ;;  %v8174_v3 = vld [vmem:[#allocation2 + $0x420] sm:$0xf] }
 0x23a   :  { %v11132_v12 = vpop.f32.mrf.mxu2  ;;  %2915 = vmatpush.bf16.msra.mxu0 %v7679_v41  ;;  %v7902_v41 = vld [vmem:[#allocation2 + $0x200] sm:$0xf] }
 0x23b   :  { %v11134_v8 = vpop.f32.mrf.mxu3  ;;  %2940 = vmatpush.bf16.msra.mxu2 %v7983_v43  ;;  %v7903_v43 = vor.u32 %v9968_v37, %v7902_v41  ;;  %v7854_v41 = vld [vmem:[#allocation2 + $0x1a0] sm:$0xf]  ;;  %v9956_v37 = vld [vmem:[#allocation2 + $0x1ac] sm:$0xf0] }
 0x23e   :  { %2916 = vmatpush.bf16.msra.mxu0 %v7663_v35 }
 0x23f   :  { %1700 = vmatmul.bf16.gmra.mxu2 %v11059_v15  ;;  %v1475_v42 = vpop.f32.mrf.mxu1  ;;  %v11141_v15 = vpop.f32.mrf.mxu0 }
 0x240   :  { %1724 = vmatmul.bf16.gmra.mxu3 %v11061_v17  ;;  %v1476_v44 = vadd.f32 %v1475_v42, %v1451_v50  ;;  %2941 = vmatpush.bf16.msra.mxu2 %v7967_v58  ;;  %v7646_v50 = vld [vmem:[#allocation2] sm:$0xf]  ;;  %v9926_v58 = vld [vmem:[#allocation2 + $0xc4] sm:$0xf] }
 0x241   :  { %v7647_v60 = vor.u32 %v9904_v27, %v7646_v50  ;;  %v7744_v50 = vld [vmem:[#allocation2 + $0xd0] sm:$0xf0] }
 0x242   :  { %v1499_v53 = vpop.f32.mrf.mxu2  ;;  %1676 = vmatmul.bf16.gmra.mxu1 %v11067_v29  ;;  %v7951_v29 = vor.u32 %v9980_v63, %v7950_v62  ;;  %v7747_v27 = vor.u32 %v9926_v58, %v7744_v50  ;;  %v7886_v62 = vld [vmem:[#allocation2 + $0x1e0] sm:$0xf]  ;;  %v9964_v63 = vld [vmem:[#allocation2 + $0x1ec] sm:$0xf0] }
 0x243   :  { %v1523_v34 = vpop.f32.mrf.mxu3  ;;  %v1500_v33 = vadd.f32 %v1499_v53, %v1476_v44  ;;  %2917 = vmatpush.bf16.msra.mxu0 %v7647_v60  ;;  %v10048_v44 = vld [vmem:[#allocation2 + $0x48c] sm:$0xf0]  ;;  %v7887_v5 = vor.u32 %v9964_v63, %v7886_v62  ;;  %v7838_v58 = vld [vmem:[#allocation2 + $0x180] sm:$0xf] }
 0x244   :  { %2942 = vmatpush.bf16.msra.mxu2 %v7951_v29  ;;  %v8223_v53 = vor.u32 %v10048_v44, %v8222_v38  ;;  %v8158_v44 = vld [vmem:[#allocation2 + $0x400] sm:$0xf]  ;;  %v9952_v50 = vld [vmem:[#allocation2 + $0x18c] sm:$0xf0] }
 0x245   :  { %v11143_v17 = vadd.f32 %v1523_v34, %v1500_v33  ;;  %v7763_v34 = vor.u32 %v9930_v49, %v7760_v0  ;;  %2924 = vmatpush.bf16.msrb.mxu1 %v7887_v5  ;;  %v10032_v49 = vld [vmem:[#allocation2 + $0x40c] sm:$0xf0]  ;;  %v8142_v62 = vld [vmem:[#allocation2 + $0x3e0] sm:$0xf] }
 0x246   :  { %v10028_v63 = vld [vmem:[#allocation2 + $0x3ec] sm:$0xf0] }
 0x247   :  { %v11145_v30 = vpop.f32.mrf.mxu1  ;;  %2966 = vmatpush.bf16.msrb.mxu0 %v8271_v48  ;;  %v11151_v4 = vpop.f32.mrf.mxu0  ;;  %v8190_v48 = vld [vmem:[#allocation2 + $0x440] sm:$0xf] }
 0x248   :  { %2943 = vmatpush.bf16.msra.mxu2 %v7935_v22  ;;  %v8191_v11 = vor.u32 %v10040_v10, %v8190_v48  ;;  %v7728_v22 = vld [vmem:[#allocation2 + $0xb0] sm:$0xf0]  ;;  %v8143_v48 = vor.u32 %v10028_v63, %v8142_v62  ;;  %v9910_v10 = vld [vmem:[#allocation2 + $0x44] sm:$0xf]  ;;  %v8094_v62 = vld [vmem:[#allocation2 + $0x380] sm:$0xf] }
 0x249   :  { %v7731_v45 = vor.u32 %v9922_v20, %v7728_v22  ;;  %v7822_v22 = vld [vmem:[#allocation2 + $0x160] sm:$0xf]  ;;  %v10016_v63 = vld [vmem:[#allocation2 + $0x38c] sm:$0xf0] }
 0x24a   :  { %v11147_v9 = vpop.f32.mrf.mxu2  ;;  %2952 = vmatpush.bf16.msra.mxu3 %v8143_v48  ;;  %v8095_v48 = vor.u32 %v10016_v63, %v8094_v62  ;;  %v10004_v62 = vld [vmem:[#allocation2 + $0x32c] sm:$0xf0]  ;;  %v8366_v63 = vld [vmem:[#allocation2 + $0x5a0] sm:$0xf] }
 0x24b   :  { %v11149_v55 = vpop.f32.mrf.mxu3  ;;  %2967 = vmatpush.bf16.msrb.mxu0 %v8255_v23  ;;  %v7870_v23 = vld [vmem:[#allocation2 + $0x1c0] sm:$0xf] }
 0x24c   :  { %2944 = vmatpush.bf16.msra.mxu2 %v7919_v14  ;;  %v7871_v24 = vor.u32 %v9960_v26, %v7870_v23 }
 0x24e   :  { %2925 = vmatpush.bf16.msrb.mxu1 %v7871_v24 }
 0x24f   :  { %v1480_v19 = vpop.f32.mrf.mxu1  ;;  %2968 = vmatpush.bf16.msrb.mxu0 %v8239_v16  ;;  %v11158_v60 = vpop.f32.mrf.mxu0  ;;  %v7712_v16 = vld [vmem:[#allocation2 + $0x90] sm:$0xf0] }
 0x250   :  { %v1481_v32 = vadd.f32 %v1480_v19, %v11125_v7  ;;  %2945 = vmatpush.bf16.msra.mxu2 %v7903_v43  ;;  %v8206_v7 = vld [vmem:[#allocation2 + $0x460] sm:$0xf]  ;;  %v10036_v19 = vld [vmem:[#allocation2 + $0x42c] sm:$0xf0]  ;;  %v7855_v43 = vor.u32 %v9956_v37, %v7854_v41 }
 0x251   :  { %v8207_v33 = vor.u32 %v10044_v54, %v8206_v7  ;;  %v8175_v31 = vor.u32 %v10036_v19, %v8174_v3  ;;  %v9914_v7 = vld [vmem:[#allocation2 + $0x64] sm:$0xf]  ;;  %v7696_v54 = vld [vmem:[#allocation2 + $0x70] sm:$0xf0]  ;;  %v8126_v3 = vld [vmem:[#allocation2 + $0x3c0] sm:$0xf] }
 0x252   :  { %v1504_v36 = vpop.f32.mrf.mxu2  ;;  %2926 = vmatpush.bf16.msrb.mxu1 %v7855_v43  ;;  %v10024_v19 = vld [vmem:[#allocation2 + $0x3cc] sm:$0xf0] }
 0x253   :  { %v1528_v40 = vpop.f32.mrf.mxu3  ;;  %v1505_v42 = vadd.f32 %v1504_v36, %v1481_v32  ;;  %2969 = vmatpush.bf16.msrb.mxu0 %v8223_v53  ;;  %v9918_v32 = vld [vmem:[#allocation2 + $0x84] sm:$0xf]  ;;  %v9944_v41 = vld [vmem:[#allocation2 + $0x14c] sm:$0xf0] }
 0x254   :  { %2994 = vmatpush.bf16.msrb.mxu2 %v7763_v34  ;;  %v8159_v34 = vor.u32 %v10032_v49, %v8158_v44  ;;  %v9902_v49 = vld [vmem:[#allocation2 + $0x4] sm:$0xf] }
 0x255   :  { %v11154_v35 = vadd.f32 %v1528_v40, %v1505_v42  ;;  %v7715_v40 = vor.u32 %v9918_v32, %v7712_v16  ;;  %v7664_v32 = vld [vmem:[#allocation2 + $0x30] sm:$0xf0] }
 0x257   :  { %v11156_v56 = vpop.f32.mrf.mxu1  ;;  %2970 = vmatpush.bf16.msrb.mxu0 %v8207_v33  ;;  %v11165_v0 = vpop.f32.mrf.mxu0  ;;  %v7699_v33 = vor.u32 %v9914_v7, %v7696_v54 }
 0x258   :  { %2995 = vmatpush.bf16.msrb.mxu2 %v7747_v27  ;;  %v7839_v27 = vor.u32 %v9952_v50, %v7838_v58  ;;  %v9940_v58 = vld [vmem:[#allocation2 + $0x12c] sm:$0xf0] }
 0x25a   :  { %v11160_v46 = vpop.f32.mrf.mxu2  ;;  %2927 = vmatpush.bf16.msrb.mxu1 %v7839_v27 }
 0x25b   :  { %v11162_v29 = vpop.f32.mrf.mxu3  ;;  %2971 = vmatpush.bf16.msrb.mxu0 %v8191_v11  ;;  %v7680_v11 = vld [vmem:[#allocation2 + $0x50] sm:$0xf0] }
 0x25c   :  { %2996 = vmatpush.bf16.msrb.mxu2 %v7731_v45  ;;  %v7683_v20 = vor.u32 %v9910_v10, %v7680_v11  ;;  %v9948_v45 = vld [vmem:[#allocation2 + $0x16c] sm:$0xf0]  ;;  %v1382_v10 = vadd.f32 %v11101_v52, %v11087_v18  ;;  %v7774_v11 = vld [vmem:[#allocation2 + $0x100] sm:$0xf] }
 0x25d   :  { %v7823_v24 = vor.u32 %v9948_v45, %v7822_v22 }
 0x25f   :  { %v1485_v14 = vpop.f32.mrf.mxu1  ;;  %2972 = vmatpush.bf16.msrb.mxu0 %v8175_v31  ;;  %v9906_v31 = vld [vmem:[#allocation2 + $0x24] sm:$0xf]  ;;  %2928 = vmatpush.bf16.msrb.mxu1 %v7823_v24 }
 0x260   :  { %v1486_v36 = vadd.f32 %v1485_v14, %v11141_v15  ;;  %2997 = vmatpush.bf16.msrb.mxu2 %v7715_v40  ;;  %v8127_v14 = vor.u32 %v10024_v19, %v8126_v3  ;;  %v7667_v16 = vor.u32 %v9906_v31, %v7664_v32  ;;  %v7806_v40 = vld [vmem:[#allocation2 + $0x140] sm:$0xf] }
 0x261   :  { %v7807_v37 = vor.u32 %v9944_v41, %v7806_v40  ;;  %v8078_v19 = vld [vmem:[#allocation2 + $0x360] sm:$0xf]  ;;  %v1406_v40 = vadd.f32 %v11105_v1, %v1382_v10 }
 0x262   :  { %v1509_v38 = vpop.f32.mrf.mxu2  ;;  %2953 = vmatpush.bf16.msra.mxu3 %v8127_v14  ;;  %v10012_v14 = vld [vmem:[#allocation2 + $0x36c] sm:$0xf0]  ;;  %v8398_v31 = vld [vmem:[#allocation2 + $0x5e0] sm:$0xf] }
 0x263   :  { %v1533_v42 = vpop.f32.mrf.mxu3  ;;  %v1510_v53 = vadd.f32 %v1509_v38, %v1486_v36  ;;  %2973 = vmatpush.bf16.msrb.mxu0 %v8159_v34  ;;  %v11175_v36 = vpop.f32.mrf.mxu0  ;;  %v8110_v38 = vld [vmem:[#allocation2 + $0x3a0] sm:$0xf]  ;;  %2929 = vmatpush.bf16.msrb.mxu1 %v7807_v37  ;;  %v8079_v32 = vor.u32 %v10012_v14, %v8078_v19 }
 0x264   :  { %2998 = vmatpush.bf16.msrb.mxu2 %v7699_v33  ;;  %v7790_v33 = vld [vmem:[#allocation2 + $0x120] sm:$0xf] }
 0x265   :  { %v11167_v15 = vadd.f32 %v1533_v42, %v1510_v53  ;;  %v10020_v42 = vld [vmem:[#allocation2 + $0x3ac] sm:$0xf0]  ;;  %v7648_v53 = vld [vmem:[#allocation2 + $0x10] sm:$0xf0]  ;;  %v7791_v27 = vor.u32 %v9940_v58, %v7790_v33 }
 0x266   :  { %v8111_v44 = vor.u32 %v10020_v42, %v8110_v38  ;;  %v7651_v34 = vor.u32 %v9902_v49, %v7648_v53  ;;  %v8062_v42 = vld [vmem:[#allocation2 + $0x340] sm:$0xf]  ;;  %v10088_v53 = vld [vmem:[#allocation2 + $0x5cc] sm:$0xf0]  ;;  %v8016_v33 = vld [vmem:[#allocation2 + $0x2f0] sm:$0xf0] }
 0x267   :  { %v11169_v5 = vpop.f32.mrf.mxu1  ;;  %2930 = vmatpush.bf16.msrb.mxu1 %v7791_v27 }
 0x268   :  { %2999 = vmatpush.bf16.msrb.mxu2 %v7683_v20  ;;  %2954 = vmatpush.bf16.msra.mxu3 %v8111_v44  ;;  %v9936_v20 = vld [vmem:[#allocation2 + $0x10c] sm:$0xf0]  ;;  %v8382_v44 = vld [vmem:[#allocation2 + $0x5c0] sm:$0xf] }
 0x269   :  { %v7775_v3 = vor.u32 %v9936_v20, %v7774_v11  ;;  %v8383_v58 = vor.u32 %v10088_v53, %v8382_v44  ;;  %v10084_v11 = vld [vmem:[#allocation2 + $0x5ac] sm:$0xf0]  ;;  %v8334_v53 = vld [vmem:[#allocation2 + $0x560] sm:$0xf] }
 0x26a   :  { %v11171_v23 = vpop.f32.mrf.mxu2 }
 0x26b   :  { %v11173_v26 = vpop.f32.mrf.mxu3  ;;  %v11180_v22 = vpop.f32.mrf.mxu0  ;;  %2931 = vmatpush.bf16.msrb.mxu1 %v7775_v3  ;;  %v8367_v3 = vor.u32 %v10084_v11, %v8366_v63  ;;  %v8318_v11 = vld [vmem:[#allocation2 + $0x540] sm:$0xf] }
 0x26c   :  { %3000 = vmatpush.bf16.msrb.mxu2 %v7667_v16  ;;  %2955 = vmatpush.bf16.msra.mxu3 %v8095_v48  ;;  %v10092_v16 = vld [vmem:[#allocation2 + $0x5ec] sm:$0xf0] }
 0x26d   :  { %v8399_v18 = vor.u32 %v10092_v16, %v8398_v31  ;;  %v8030_v31 = vld [vmem:[#allocation2 + $0x300] sm:$0xf] }
 0x26f   :  { %v1571_v43 = vpop.f32.mrf.mxu1  ;;  %2980 = vmatpush.bf16.msra.mxu1 %v8399_v18  ;;  %v10080_v18 = vld [vmem:[#allocation2 + $0x58c] sm:$0xf0] }
 0x270   :  { %3001 = vmatpush.bf16.msrb.mxu2 %v7651_v34  ;;  %v1572_v50 = vadd.f32 %v1571_v43, %v11158_v60  ;;  %2956 = vmatpush.bf16.msra.mxu3 %v8079_v32  ;;  %v10008_v43 = vld [vmem:[#allocation2 + $0x34c] sm:$0xf0]  ;;  %v1430_v34 = vadd.f32 %v11107_v2, %v1406_v40  ;;  %v9990_v2 = vld [vmem:[#allocation2 + $0x2c4] sm:$0xf]  ;;  %v8350_v32 = vld [vmem:[#allocation2 + $0x580] sm:$0xf] }
 0x271   :  { %v8063_v49 = vor.u32 %v10008_v43, %v8062_v42  ;;  %v7984_v42 = vld [vmem:[#allocation2 + $0x2b0] sm:$0xf0]  ;;  %v8351_v43 = vor.u32 %v10080_v18, %v8350_v32  ;;  %v9978_v32 = vld [vmem:[#allocation2 + $0x264] sm:$0xf] }
 0x272   :  { %v1595_v7 = vpop.f32.mrf.mxu2 }
 0x273   :  { %v1619_v54 = vpop.f32.mrf.mxu3  ;;  %v1596_v45 = vadd.f32 %v1595_v7, %v1572_v50  ;;  %v9994_v7 = vld [vmem:[#allocation2 + $0x2e4] sm:$0xf]  ;;  %2981 = vmatpush.bf16.msra.mxu1 %v8383_v58  ;;  %v11186_v20 = vpop.f32.mrf.mxu0 }
 0x274   :  { %2957 = vmatpush.bf16.msra.mxu3 %v8063_v49  ;;  %v8019_v48 = vor.u32 %v9994_v7, %v8016_v33  ;;  %v9958_v58 = vld [vmem:[#allocation2 + $0x1c4] sm:$0xf] }
 0x275   :  { %v1620_v37 = vadd.f32 %v1619_v54, %v1596_v45  ;;  %v8046_v54 = vld [vmem:[#allocation2 + $0x320] sm:$0xf] }
 0x276   :  { %v8047_v10 = vor.u32 %v10004_v62, %v8046_v54 }
 0x277   :  { %v1573_v24 = vpop.f32.mrf.mxu1  ;;  %v1730_v1 = vmax.f32 %v11099_v51, %v1620_v37  ;;  %2982 = vmatpush.bf16.msra.mxu1 %v8367_v3  ;;  %v1387_v37 = vadd.f32 %v11115_v13, %v11093_v39  ;;  %v9982_v13 = vld [vmem:[#allocation2 + $0x284] sm:$0xf] }
 0x278   :  { %v1574_v60 = vadd.f32 %v1573_v24, %v11165_v0  ;;  %v8000_v24 = vld [vmem:[#allocation2 + $0x2d0] sm:$0xf0]  ;;  %2958 = vmatpush.bf16.msra.mxu3 %v8047_v10 }
 0x279   :  { %v8003_v16 = vor.u32 %v9990_v2, %v8000_v24  ;;  %v1411_v39 = vadd.f32 %v11119_v59, %v1387_v37  ;;  %v10058_v24 = vld [vmem:[#allocation2 + $0x4e4] sm:$0xf]  ;;  %v10068_v37 = vld [vmem:[#allocation2 + $0x52c] sm:$0xf0] }
 0x27a   :  { %v1597_v52 = vpop.f32.mrf.mxu2 }
 0x27b   :  { %v1621_v41 = vpop.f32.mrf.mxu3  ;;  %v1598_v38 = vadd.f32 %v1597_v52, %v1574_v60  ;;  %v10000_v60 = vld [vmem:[#allocation2 + $0x30c] sm:$0xf0]  ;;  %v9962_v52 = vld [vmem:[#allocation2 + $0x1e4] sm:$0xf]  ;;  %2983 = vmatpush.bf16.msra.mxu1 %v8351_v43  ;;  %v11196_v63 = vpop.f32.mrf.mxu0  ;;  %v1435_v59 = vadd.f32 %v11121_v28, %v1411_v39  ;;  %v7840_v28 = vld [vmem:[#allocation2 + $0x190] sm:$0xf0] }
 0x27c   :  { %v8031_v40 = vor.u32 %v10000_v60, %v8030_v31  ;;  %v8272_v60 = vld [vmem:[#allocation2 + $0x4f0] sm:$0xf0]  ;;  %v10054_v43 = vld [vmem:[#allocation2 + $0x4c4] sm:$0xf]  ;;  %v10064_v39 = vld [vmem:[#allocation2 + $0x50c] sm:$0xf0] }
 0x27d   :  { %v1622_v0 = vadd.f32 %v1621_v41, %v1598_v38  ;;  %v7888_v41 = vld [vmem:[#allocation2 + $0x1f0] sm:$0xf0]  ;;  %v9986_v38 = vld [vmem:[#allocation2 + $0x2a4] sm:$0xf] }
 0x27e   :  { %v7891_v44 = vor.u32 %v9962_v52, %v7888_v41  ;;  %2959 = vmatpush.bf16.msra.mxu3 %v8031_v40  ;;  %v7987_v7 = vor.u32 %v9986_v38, %v7984_v42  ;;  %v8302_v41 = vld [vmem:[#allocation2 + $0x520] sm:$0xf]  ;;  %v8275_v38 = vor.u32 %v10058_v24, %v8272_v60  ;;  %v10046_v60 = vld [vmem:[#allocation2 + $0x484] sm:$0xf] }
 0x27f   :  { %v1732_v50 = vmax.f32 %v1430_v34, %v1622_v0  ;;  %v1576_v27 = vpop.f32.mrf.mxu1  ;;  %v10076_v34 = vld [vmem:[#allocation2 + $0x56c] sm:$0xf0] }
 0x280   :  { %v1577_v51 = vadd.f32 %v1576_v27, %v11175_v36  ;;  %v8335_v33 = vor.u32 %v10076_v34, %v8334_v53  ;;  %v8256_v53 = vld [vmem:[#allocation2 + $0x4d0] sm:$0xf0]  ;;  %v9974_v34 = vld [vmem:[#allocation2 + $0x244] sm:$0xf] }
 0x281   :  { %v11188_v45 = vpack.c.bf16 %v1732_v50, %v1730_v1  ;;  %v7872_v1 = vld [vmem:[#allocation2 + $0x1d0] sm:$0xf0] }
 0x282   :  { %v1600_v19 = vpop.f32.mrf.mxu2  ;;  %3008 = vmatpush.bf16.msrb.mxu3 %v7891_v44  ;;  %v7968_v50 = vld [vmem:[#allocation2 + $0x290] sm:$0xf0]  ;;  %v7875_v27 = vor.u32 %v9958_v58, %v7872_v1  ;;  %2984 = vmatpush.bf16.msra.mxu1 %v8335_v33  ;;  %v8303_v44 = vor.u32 %v10068_v37, %v8302_v41  ;;  %v8286_v1 = vld [vmem:[#allocation2 + $0x500] sm:$0xf] }
 0x283   :  { %v1624_v14 = vpop.f32.mrf.mxu3  ;;  %2918 = vmatmul.bf16.vlgmr.msra.gmra.mxu0 %v11188_v45  ;;  %v1601_v36 = vadd.f32 %v1600_v19, %v1577_v51  ;;  %v7971_v2 = vor.u32 %v9982_v13, %v7968_v50  ;;  %v9954_v19 = vld [vmem:[#allocation2 + $0x1a4] sm:$0xf]  ;;  %v7856_v51 = vld [vmem:[#allocation2 + $0x1b0] sm:$0xf0]  ;;  %v8259_v13 = vor.u32 %v10054_v43, %v8256_v53 }
 0x284   :  { %3022 = vmatpush.bf16.msra.mxu0 %v8019_v48  ;;  %v7859_v40 = vor.u32 %v9954_v19, %v7856_v51  ;;  %v10042_v43 = vld [vmem:[#allocation2 + $0x464] sm:$0xf] }
 0x285   :  { %v1625_v48 = vadd.f32 %v1624_v14, %v1601_v36  ;;  %v9950_v36 = vld [vmem:[#allocation2 + $0x184] sm:$0xf] }
 0x286   :  { %3009 = vmatpush.bf16.msrb.mxu3 %v7875_v27  ;;  %v10050_v27 = vld [vmem:[#allocation2 + $0x4a4] sm:$0xf] }
 0x287   :  { %v1578_v49 = vpop.f32.mrf.mxu1  ;;  %v1734_v14 = vmax.f32 %v11113_v57, %v1625_v48  ;;  %v7824_v48 = vld [vmem:[#allocation2 + $0x170] sm:$0xf0] }
 0x288   :  { %v1579_v0 = vadd.f32 %v1578_v49, %v11180_v22  ;;  %3023 = vmatpush.bf16.msra.mxu0 %v8003_v16  ;;  %v10072_v22 = vld [vmem:[#allocation2 + $0x54c] sm:$0xf0]  ;;  %v7952_v16 = vld [vmem:[#allocation2 + $0x270] sm:$0xf0] }
 0x289   :  { %v8319_v3 = vor.u32 %v10072_v22, %v8318_v11  ;;  %v7955_v42 = vor.u32 %v9978_v32, %v7952_v16  ;;  %v1643_v11 = vpop.f32.mrf.mxu0  ;;  %v8240_v22 = vld [vmem:[#allocation2 + $0x4b0] sm:$0xf0]  ;;  %v9942_v32 = vld [vmem:[#allocation2 + $0x144] sm:$0xf] }
 0x28a   :  { %v1602_v54 = vpop.f32.mrf.mxu2  ;;  %3010 = vmatpush.bf16.msrb.mxu3 %v7859_v40  ;;  %v7808_v16 = vld [vmem:[#allocation2 + $0x150] sm:$0xf0]  ;;  %v9966_v40 = vld [vmem:[#allocation2 + $0x204] sm:$0xf] }
 0x28b   :  { %v1626_v62 = vpop.f32.mrf.mxu3  ;;  %v1603_v10 = vadd.f32 %v1602_v54, %v1579_v0  ;;  %2985 = vmatpush.bf16.msra.mxu1 %v8319_v3  ;;  %v7936_v0 = vld [vmem:[#allocation2 + $0x250] sm:$0xf0]  ;;  %v8287_v54 = vor.u32 %v10064_v39, %v8286_v1 }
 0x28c   :  { %3024 = vmatpush.bf16.msra.mxu0 %v7987_v7  ;;  %v7843_v7 = vor.u32 %v9950_v36, %v7840_v28  ;;  %v7939_v50 = vor.u32 %v9974_v34, %v7936_v0  ;;  %v7792_v36 = vld [vmem:[#allocation2 + $0x130] sm:$0xf0]  ;;  %v7766_v34 = vld [vmem:[#allocation2 + $0xe8] sm:$0xf]  ;;  %v9933_v0 = vld [vmem:[#allocation2 + $0xf4] sm:$0xf0] }
 0x28d   :  { %v1627_v31 = vadd.f32 %v1626_v62, %v1603_v10  ;;  %v9946_v62 = vld [vmem:[#allocation2 + $0x164] sm:$0xf]  ;;  %v1392_v10 = vadd.f32 %v11130_v25, %v11103_v61  ;;  %v8224_v25 = vld [vmem:[#allocation2 + $0x490] sm:$0xf0] }
 0x28e   :  { %3011 = vmatpush.bf16.msrb.mxu3 %v7843_v7  ;;  %v7827_v24 = vor.u32 %v9946_v62, %v7824_v48  ;;  %v7750_v48 = vld [vmem:[#allocation2 + $0xc8] sm:$0xf] }
 0x28f   :  { %v1736_v18 = vmax.f32 %v1435_v59, %v1627_v31  ;;  %v1581_v52 = vpop.f32.mrf.mxu1  ;;  %2986 = vmatpush.bf16.msra.mxu1 %v8303_v44  ;;  %v8243_v59 = vor.u32 %v10050_v27, %v8240_v22  ;;  %v1416_v61 = vadd.f32 %v11132_v12, %v1392_v10  ;;  %v9938_v44 = vld [vmem:[#allocation2 + $0x124] sm:$0xf]  ;;  %v8208_v12 = vld [vmem:[#allocation2 + $0x470] sm:$0xf0]  ;;  %v9929_v10 = vld [vmem:[#allocation2 + $0xd4] sm:$0xf0] }
 0x290   :  { %3025 = vmatpush.bf16.msra.mxu0 %v7971_v2  ;;  %v1582_v58 = vadd.f32 %v1581_v52, %v11186_v20  ;;  %v9970_v2 = vld [vmem:[#allocation2 + $0x224] sm:$0xf]  ;;  %v7920_v20 = vld [vmem:[#allocation2 + $0x230] sm:$0xf0]  ;;  %v7795_v7 = vor.u32 %v9938_v44, %v7792_v36  ;;  %v8211_v39 = vor.u32 %v10042_v43, %v8208_v12 }
 0x291   :  { %v11200_v49 = vpack.c.bf16 %v1736_v18, %v1734_v14  ;;  %v7923_v31 = vor.u32 %v9970_v2, %v7920_v20  ;;  %v7904_v14 = vld [vmem:[#allocation2 + $0x210] sm:$0xf0]  ;;  %v7811_v18 = vor.u32 %v9942_v32, %v7808_v16  ;;  %v1440_v28 = vadd.f32 %v11134_v8, %v1416_v61  ;;  %v9934_v27 = vld [vmem:[#allocation2 + $0x104] sm:$0xf] }
 0x292   :  { %v1605_v57 = vpop.f32.mrf.mxu2  ;;  %3012 = vmatpush.bf16.msrb.mxu3 %v7827_v24  ;;  %v8192_v8 = vld [vmem:[#allocation2 + $0x450] sm:$0xf0] }
 0x293   :  { %v1629_v33 = vpop.f32.mrf.mxu3  ;;  %2946 = vmatmul.bf16.vlgmr.msra.gmra.mxu2 %v11200_v49  ;;  %v1606_v3 = vadd.f32 %v1605_v57, %v1582_v58  ;;  %2987 = vmatpush.bf16.msra.mxu1 %v8287_v54  ;;  %v1645_v57 = vpop.f32.mrf.mxu0  ;;  %v7776_v54 = vld [vmem:[#allocation2 + $0x110] sm:$0xf0] }
 0x294   :  { %3050 = vmatpush.bf16.msra.mxu2 %v8275_v38  ;;  %3026 = vmatpush.bf16.msra.mxu0 %v7955_v42  ;;  %v7907_v42 = vor.u32 %v9966_v40, %v7904_v14  ;;  %v7779_v22 = vor.u32 %v9934_v27, %v7776_v54  ;;  %v10030_v40 = vld [vmem:[#allocation2 + $0x404] sm:$0xf]  ;;  %v7686_v54 = vld [vmem:[#allocation2 + $0x48] sm:$0xf] }
 0x295   :  { %v1630_v37 = vadd.f32 %v1629_v33, %v1606_v3  ;;  %v7751_v3 = vor.u32 %v9929_v10, %v7750_v48  ;;  %v7990_v48 = vld [vmem:[#allocation2 + $0x2a8] sm:$0xf] }
 0x296   :  { %3013 = vmatpush.bf16.msrb.mxu3 %v7811_v18 }
 0x297   :  { %v1583_v19 = vpop.f32.mrf.mxu1  ;;  %v1738_v58 = vmax.f32 %v11128_v21, %v1630_v37  ;;  %v9921_v37 = vld [vmem:[#allocation2 + $0x94] sm:$0xf0] }
 0x298   :  { %3051 = vmatpush.bf16.msra.mxu2 %v8259_v13  ;;  %v1584_v51 = vadd.f32 %v1583_v19, %v11196_v63  ;;  %3027 = vmatpush.bf16.msra.mxu0 %v7939_v50  ;;  %v8227_v63 = vor.u32 %v10046_v60, %v8224_v25  ;;  %v7767_v13 = vor.u32 %v9933_v0, %v7766_v34  ;;  %v10038_v50 = vld [vmem:[#allocation2 + $0x444] sm:$0xf]  ;;  %v9925_v60 = vld [vmem:[#allocation2 + $0xb4] sm:$0xf0]  ;;  %v7702_v34 = vld [vmem:[#allocation2 + $0x68] sm:$0xf] }
 0x299   :  { %v8195_v21 = vor.u32 %v10038_v50, %v8192_v8  ;;  %v10034_v19 = vld [vmem:[#allocation2 + $0x424] sm:$0xf]  ;;  %v8006_v0 = vld [vmem:[#allocation2 + $0x2c8] sm:$0xf]  ;;  %v9913_v8 = vld [vmem:[#allocation2 + $0x54] sm:$0xf0] }
 0x29a   :  { %v1607_v52 = vpop.f32.mrf.mxu2  ;;  %3014 = vmatpush.bf16.msrb.mxu3 %v7795_v7  ;;  %v9993_v7 = vld [vmem:[#allocation2 + $0x2d4] sm:$0xf0] }
 0x29b   :  { %v1631_v41 = vpop.f32.mrf.mxu3  ;;  %v1608_v38 = vadd.f32 %v1607_v52, %v1584_v51  ;;  %v1478_v51 = vadd.f32 %v11145_v30, %v11117_v47  ;;  %v1648_v18 = vpop.f32.mrf.mxu0  ;;  %v8160_v52 = vld [vmem:[#allocation2 + $0x410] sm:$0xf0]  ;;  %v8022_v30 = vld [vmem:[#allocation2 + $0x2e8] sm:$0xf]  ;;  %v8007_v27 = vor.u32 %v9993_v7, %v8006_v0 }
 0x29c   :  { %3052 = vmatpush.bf16.msra.mxu2 %v8243_v59  ;;  %3028 = vmatpush.bf16.msra.mxu0 %v7923_v31  ;;  %v8176_v59 = vld [vmem:[#allocation2 + $0x430] sm:$0xf0]  ;;  %v7734_v31 = vld [vmem:[#allocation2 + $0xa8] sm:$0xf]  ;;  %v8163_v44 = vor.u32 %v10030_v40, %v8160_v52 }
 0x29d   :  { %v1632_v53 = vadd.f32 %v1631_v41, %v1608_v38  ;;  %v8179_v61 = vor.u32 %v10034_v19, %v8176_v59  ;;  %v7735_v25 = vor.u32 %v9925_v60, %v7734_v31  ;;  %v1502_v14 = vadd.f32 %v11147_v9, %v1478_v51  ;;  %v7718_v41 = vld [vmem:[#allocation2 + $0x88] sm:$0xf]  ;;  %v9917_v9 = vld [vmem:[#allocation2 + $0x74] sm:$0xf0] }
 0x29e   :  { %3015 = vmatpush.bf16.msrb.mxu3 %v7779_v22  ;;  %v7719_v36 = vor.u32 %v9921_v37, %v7718_v41  ;;  %v7687_v19 = vor.u32 %v9913_v8, %v7686_v54  ;;  %v7670_v31 = vld [vmem:[#allocation2 + $0x28] sm:$0xf]  ;;  %v9909_v60 = vld [vmem:[#allocation2 + $0x34] sm:$0xf0] }
 0x29f   :  { %v1740_v33 = vmax.f32 %v1440_v28, %v1632_v53  ;;  %v1667_v1 = vpop.f32.mrf.mxu1  ;;  %v1526_v28 = vadd.f32 %v11149_v55, %v1502_v14  ;;  %v7654_v41 = vld [vmem:[#allocation2 + $0x8] sm:$0xf]  ;;  %v9905_v37 = vld [vmem:[#allocation2 + $0x14] sm:$0xf0] }
 0x2a0   :  { %3053 = vmatpush.bf16.msra.mxu2 %v8227_v63  ;;  %3029 = vmatpush.bf16.msra.mxu0 %v7907_v42  ;;  %v1668_v24 = vadd.f32 %v1667_v1, %v1643_v11  ;;  %v9997_v63 = vld [vmem:[#allocation2 + $0x2f4] sm:$0xf0] }
 0x2a1   :  { %v11210_v62 = vpack.c.bf16 %v1740_v33, %v1738_v58  ;;  %v8023_v12 = vor.u32 %v9997_v63, %v8022_v30  ;;  %v8144_v58 = vld [vmem:[#allocation2 + $0x3f0] sm:$0xf0]  ;;  %v9981_v63 = vld [vmem:[#allocation2 + $0x274] sm:$0xf0] }
 0x2a2   :  { %v1691_v2 = vpop.f32.mrf.mxu2 }
 0x2a3   :  { %v1715_v20 = vpop.f32.mrf.mxu3  ;;  %2974 = vmatmul.bf16.vlgmr.msrb.gmra.mxu0 %v11210_v62  ;;  %3002 = vmatmul.bf16.vlgmr.msrb.gmra.mxu2 %v11188_v45  ;;  %v1692_v32 = vadd.f32 %v1691_v2, %v1668_v24  ;;  %v9989_v2 = vld [vmem:[#allocation2 + $0x2b4] sm:$0xf0]  ;;  %v8128_v24 = vld [vmem:[#allocation2 + $0x3d0] sm:$0xf0] }
 0x2a4   :  { %3054 = vmatpush.bf16.msra.mxu2 %v8211_v39  ;;  %3078 = vmatpush.bf16.msrb.mxu0 %v7767_v13  ;;  %v7703_v13 = vor.u32 %v9917_v9, %v7702_v34  ;;  %v7991_v51 = vor.u32 %v9989_v2, %v7990_v48  ;;  %v8080_v48 = vld [vmem:[#allocation2 + $0x370] sm:$0xf0] }
 0x2a5   :  { %v1716_v42 = vadd.f32 %v1715_v20, %v1692_v32  ;;  %v10022_v20 = vld [vmem:[#allocation2 + $0x3c4] sm:$0xf]  ;;  %v7974_v32 = vld [vmem:[#allocation2 + $0x288] sm:$0xf] }
 0x2a6   :  { %v8131_v59 = vor.u32 %v10022_v20, %v8128_v24  ;;  %v10086_v24 = vld [vmem:[#allocation2 + $0x5c4] sm:$0xf] }
 0x2a7   :  { %v1669_v16 = vpop.f32.mrf.mxu1  ;;  %v1731_v33 = vmax.f32 %v11143_v17, %v1716_v42  ;;  %v8278_v42 = vld [vmem:[#allocation2 + $0x4e8] sm:$0xf] }
 0x2a8   :  { %3055 = vmatpush.bf16.msra.mxu2 %v8195_v21  ;;  %3079 = vmatpush.bf16.msrb.mxu0 %v7751_v3  ;;  %v1670_v11 = vadd.f32 %v1669_v16, %v1645_v57  ;;  %v10026_v57 = vld [vmem:[#allocation2 + $0x3e4] sm:$0xf]  ;;  %v1650_v21 = vpop.f32.mrf.mxu0  ;;  %v1483_v3 = vadd.f32 %v11156_v56, %v11136_v6  ;;  %v9985_v16 = vld [vmem:[#allocation2 + $0x294] sm:$0xf0]  ;;  %v7671_v56 = vor.u32 %v9909_v60, %v7670_v31 }
 0x2a9   :  { %v8147_v55 = vor.u32 %v10026_v57, %v8144_v58  ;;  %v10090_v57 = vld [vmem:[#allocation2 + $0x5e4] sm:$0xf]  ;;  %v8400_v58 = vld [vmem:[#allocation2 + $0x5f0] sm:$0xf0]  ;;  %v10053_v31 = vld [vmem:[#allocation2 + $0x4b4] sm:$0xf0] }
 0x2aa   :  { %v1693_v38 = vpop.f32.mrf.mxu2  ;;  %v1507_v14 = vadd.f32 %v11160_v46, %v1483_v3 }
 0x2ab   :  { %v1717_v47 = vpop.f32.mrf.mxu3  ;;  %v1694_v43 = vadd.f32 %v1693_v38, %v1670_v11  ;;  %v10018_v11 = vld [vmem:[#allocation2 + $0x3a4] sm:$0xf]  ;;  %v7958_v38 = vld [vmem:[#allocation2 + $0x268] sm:$0xf] }
 0x2ac   :  { %3056 = vmatpush.bf16.msra.mxu2 %v8179_v61  ;;  %3080 = vmatpush.bf16.msrb.mxu0 %v7735_v25  ;;  %v8112_v61 = vld [vmem:[#allocation2 + $0x3b0] sm:$0xf0]  ;;  %v1531_v46 = vadd.f32 %v11162_v29, %v1507_v14  ;;  %v7959_v0 = vor.u32 %v9981_v63, %v7958_v38  ;;  %v10010_v29 = vld [vmem:[#allocation2 + $0x364] sm:$0xf]  ;;  %v9931_v38 = vld [vmem:[#allocation2 + $0xec] sm:$0xf] }
 0x2ad   :  { %v1718_v53 = vadd.f32 %v1717_v47, %v1694_v43  ;;  %v8115_v52 = vor.u32 %v10018_v11, %v8112_v61  ;;  %v10061_v43 = vld [vmem:[#allocation2 + $0x4f4] sm:$0xf0]  ;;  %v10082_v61 = vld [vmem:[#allocation2 + $0x5a4] sm:$0xf] }
 0x2ae   :  { %v8279_v7 = vor.u32 %v10061_v43, %v8278_v42  ;;  %v7768_v42 = vld [vmem:[#allocation2 + $0xf8] sm:$0xf0]  ;;  %v10002_v43 = vld [vmem:[#allocation2 + $0x324] sm:$0xf] }
 0x2af   :  { %v1733_v1 = vmax.f32 %v1526_v28, %v1718_v53  ;;  %v1672_v39 = vpop.f32.mrf.mxu1  ;;  %v10014_v28 = vld [vmem:[#allocation2 + $0x384] sm:$0xf]  ;;  %v8096_v53 = vld [vmem:[#allocation2 + $0x390] sm:$0xf0] }
 0x2b0   :  { %3057 = vmatpush.bf16.msra.mxu2 %v8163_v44  ;;  %3081 = vmatpush.bf16.msrb.mxu0 %v7719_v36  ;;  %v1673_v17 = vadd.f32 %v1672_v39, %v1648_v18  ;;  %v7975_v18 = vor.u32 %v9985_v16, %v7974_v32  ;;  %v1653_v34 = vpop.f32.mrf.mxu0  ;;  %v9977_v39 = vld [vmem:[#allocation2 + $0x254] sm:$0xf0]  ;;  %v10006_v32 = vld [vmem:[#allocation2 + $0x344] sm:$0xf]  ;;  %v8064_v16 = vld [vmem:[#allocation2 + $0x350] sm:$0xf0] }
 0x2b1   :  { %v11219_v50 = vpack.c.bf16 %v1733_v1, %v1731_v33  ;;  %v7942_v33 = vld [vmem:[#allocation2 + $0x248] sm:$0xf]  ;;  %v8099_v1 = vor.u32 %v10014_v28, %v8096_v53 }
 0x2b2   :  { %v1696_v10 = vpop.f32.mrf.mxu2  ;;  %v7943_v2 = vor.u32 %v9977_v39, %v7942_v33  ;;  %v7752_v39 = vld [vmem:[#allocation2 + $0xd8] sm:$0xf0] }
 0x2b3   :  { %v1720_v22 = vpop.f32.mrf.mxu3  ;;  %2932 = vmatmul.bf16.vlgmr.msrb.gmra.mxu1 %v11219_v50  ;;  %3030 = vmatmul.bf16.vlgmr.msra.gmra.mxu0 %v11200_v49  ;;  %v1697_v25 = vadd.f32 %v1696_v10, %v1673_v17  ;;  %v8403_v10 = vor.u32 %v10090_v57, %v8400_v58  ;;  %v7926_v17 = vld [vmem:[#allocation2 + $0x228] sm:$0xf]  ;;  %v10045_v57 = vld [vmem:[#allocation2 + $0x474] sm:$0xf0]  ;;  %v9927_v58 = vld [vmem:[#allocation2 + $0xcc] sm:$0xf] }
 0x2b4   :  { %3106 = vmatpush.bf16.msrb.mxu2 %v8023_v12  ;;  %3082 = vmatpush.bf16.msrb.mxu0 %v7703_v13  ;;  %v7655_v12 = vor.u32 %v9905_v37, %v7654_v41  ;;  %v8262_v13 = vld [vmem:[#allocation2 + $0x4c8] sm:$0xf]  ;;  %v10049_v37 = vld [vmem:[#allocation2 + $0x494] sm:$0xf0] }
 0x2b5   :  { %3058 = vmatmul.bf16.vlgmr.msra.gmra.mxu2 %v11210_v62  ;;  %3036 = vmatpush.bf16.msrb.mxu1 %v8147_v55  ;;  %v1721_v44 = vadd.f32 %v1720_v22, %v1697_v25  ;;  %v1488_v25 = vadd.f32 %v11169_v5, %v11151_v4  ;;  %v8230_v41 = vld [vmem:[#allocation2 + $0x488] sm:$0xf] }
 0x2b6   :  { %v8231_v53 = vor.u32 %v10049_v37, %v8230_v41  ;;  %v10066_v41 = vld [vmem:[#allocation2 + $0x524] sm:$0xf] }
 0x2b7   :  { %v1674_v40 = vpop.f32.mrf.mxu1  ;;  %v1735_v55 = vmax.f32 %v11154_v35, %v1721_v44  ;;  %v9973_v35 = vld [vmem:[#allocation2 + $0x234] sm:$0xf0]  ;;  %v8048_v44 = vld [vmem:[#allocation2 + $0x330] sm:$0xf0] }
 0x2b8   :  { %3107 = vmatpush.bf16.msrb.mxu2 %v8007_v27  ;;  %3083 = vmatpush.bf16.msrb.mxu0 %v7687_v19  ;;  %v1675_v6 = vadd.f32 %v1674_v40, %v1650_v21  ;;  %v10057_v27 = vld [vmem:[#allocation2 + $0x4d4] sm:$0xf0]  ;;  %v8384_v21 = vld [vmem:[#allocation2 + $0x5d0] sm:$0xf0]  ;;  %v7927_v40 = vor.u32 %v9973_v35, %v7926_v17  ;;  %v8198_v17 = vld [vmem:[#allocation2 + $0x448] sm:$0xf] }
 0x2b9   :  { %3037 = vmatpush.bf16.msrb.mxu1 %v8131_v59  ;;  %v8263_v20 = vor.u32 %v10057_v27, %v8262_v13  ;;  %v8246_v59 = vld [vmem:[#allocation2 + $0x4a8] sm:$0xf]  ;;  %v8387_v11 = vor.u32 %v10086_v24, %v8384_v21  ;;  %v9998_v13 = vld [vmem:[#allocation2 + $0x304] sm:$0xf]  ;;  %v8032_v27 = vld [vmem:[#allocation2 + $0x310] sm:$0xf0]  ;;  %v7755_v24 = vor.u32 %v9927_v58, %v7752_v39 }
 0x2ba   :  { %v1698_v47 = vpop.f32.mrf.mxu2  ;;  %v8247_v14 = vor.u32 %v10053_v31, %v8246_v59  ;;  %v8035_v21 = vor.u32 %v9998_v13, %v8032_v27  ;;  %v9923_v35 = vld [vmem:[#allocation2 + $0xac] sm:$0xf]  ;;  %v7736_v59 = vld [vmem:[#allocation2 + $0xb8] sm:$0xf0]  ;;  %v8150_v58 = vld [vmem:[#allocation2 + $0x3e8] sm:$0xf] }
 0x2bb   :  { %v1722_v30 = vpop.f32.mrf.mxu3  ;;  %v1699_v36 = vadd.f32 %v1698_v47, %v1675_v6  ;;  %v8368_v6 = vld [vmem:[#allocation2 + $0x5b0] sm:$0xf0]  ;;  %v1655_v47 = vpop.f32.mrf.mxu0  ;;  %v7688_v39 = vld [vmem:[#allocation2 + $0x58] sm:$0xf0]  ;;  %v9991_v13 = vld [vmem:[#allocation2 + $0x2cc] sm:$0xf] }
 0x2bc   :  { %3108 = vmatpush.bf16.msrb.mxu2 %v7991_v51  ;;  %3084 = vmatpush.bf16.msrb.mxu0 %v7671_v56  ;;  %v8083_v51 = vor.u32 %v10010_v29, %v8080_v48  ;;  %v7910_v56 = vld [vmem:[#allocation2 + $0x208] sm:$0xf]  ;;  %v8371_v5 = vor.u32 %v10082_v61, %v8368_v6  ;;  %v9919_v6 = vld [vmem:[#allocation2 + $0x8c] sm:$0xf]  ;;  %v8008_v27 = vld [vmem:[#allocation2 + $0x2d8] sm:$0xf0] }
 0x2bd   :  { %v1723_v9 = vadd.f32 %v1722_v30, %v1699_v36  ;;  %3038 = vmatpush.bf16.msrb.mxu1 %v8115_v52  ;;  %v8067_v52 = vor.u32 %v10006_v32, %v8064_v16  ;;  %v1512_v36 = vadd.f32 %v11171_v23, %v1488_v25  ;;  %v7878_v61 = vld [vmem:[#allocation2 + $0x1c8] sm:$0xf]  ;;  %v9961_v25 = vld [vmem:[#allocation2 + $0x1d4] sm:$0xf0] }
 0x2bf   :  { %v1737_v54 = vmax.f32 %v1531_v46, %v1723_v9  ;;  %v1677_v8 = vpop.f32.mrf.mxu1  ;;  %v10078_v46 = vld [vmem:[#allocation2 + $0x584] sm:$0xf]  ;;  %v7771_v9 = vor.u32 %v9931_v38, %v7768_v42  ;;  %v8304_v38 = vld [vmem:[#allocation2 + $0x530] sm:$0xf0]  ;;  %v8166_v42 = vld [vmem:[#allocation2 + $0x408] sm:$0xf] }
 0x2c0   :  { %3109 = vmatpush.bf16.msrb.mxu2 %v7975_v18  ;;  %3085 = vmatpush.bf16.msrb.mxu0 %v7655_v12  ;;  %v1678_v60 = vadd.f32 %v1677_v8, %v1653_v34  ;;  %v9969_v18 = vld [vmem:[#allocation2 + $0x214] sm:$0xf0]  ;;  %v8352_v12 = vld [vmem:[#allocation2 + $0x590] sm:$0xf0]  ;;  %v1536_v8 = vadd.f32 %v11173_v26, %v1512_v36  ;;  %v8024_v36 = vld [vmem:[#allocation2 + $0x2f8] sm:$0xf0] }
 0x2c1   :  { %v11229_v22 = vpack.c.bf16 %v1737_v54, %v1735_v55  ;;  %3039 = vmatpush.bf16.msrb.mxu1 %v8099_v1  ;;  %v7911_v28 = vor.u32 %v9969_v18, %v7910_v56  ;;  %v8355_v23 = vor.u32 %v10078_v46, %v8352_v12  ;;  %v10074_v54 = vld [vmem:[#allocation2 + $0x564] sm:$0xf]  ;;  %v7720_v56 = vld [vmem:[#allocation2 + $0x98] sm:$0xf0] }
 0x2c2   :  { %v1701_v3 = vpop.f32.mrf.mxu2  ;;  %v10062_v46 = vld [vmem:[#allocation2 + $0x504] sm:$0xf] }
 0x2c3   :  { %v1725_v19 = vpop.f32.mrf.mxu3  ;;  %2960 = vmatmul.bf16.vlgmr.msra.gmra.mxu3 %v11229_v22  ;;  %3086 = vmatmul.bf16.vlgmr.msrb.gmra.mxu0 %v11188_v45  ;;  %v1702_v30 = vadd.f32 %v1701_v3, %v1678_v60  ;;  %v10041_v3 = vld [vmem:[#allocation2 + $0x454] sm:$0xf0]  ;;  %v10070_v60 = vld [vmem:[#allocation2 + $0x544] sm:$0xf] }
 0x2c4   :  { %3110 = vmatpush.bf16.msrb.mxu2 %v7959_v0  ;;  %3134 = vmatpush.bf16.msra.mxu0 %v8279_v7  ;;  %v8051_v0 = vor.u32 %v10002_v43, %v8048_v44  ;;  %v8214_v7 = vld [vmem:[#allocation2 + $0x468] sm:$0xf]  ;;  %v8199_v16 = vor.u32 %v10041_v3, %v8198_v17  ;;  %v10033_v43 = vld [vmem:[#allocation2 + $0x414] sm:$0xf0]  ;;  %v9915_v44 = vld [vmem:[#allocation2 + $0x6c] sm:$0xf] }
 0x2c5   :  { %3064 = vmatpush.bf16.msra.mxu3 %v8403_v10  ;;  %3040 = vmatpush.bf16.msrb.mxu1 %v8083_v51  ;;  %v1726_v33 = vadd.f32 %v1725_v19, %v1702_v30  ;;  %v8215_v48 = vor.u32 %v10045_v57, %v8214_v7  ;;  %v8336_v10 = vld [vmem:[#allocation2 + $0x570] sm:$0xf0]  ;;  %v9957_v30 = vld [vmem:[#allocation2 + $0x1b4] sm:$0xf0]  ;;  %v8167_v12 = vor.u32 %v10033_v43, %v8166_v42  ;;  %v9987_v17 = vld [vmem:[#allocation2 + $0x2ac] sm:$0xf] }
 0x2c6   :  { %v8339_v26 = vor.u32 %v10074_v54, %v8336_v10  ;;  %v8011_v10 = vor.u32 %v9991_v13, %v8008_v27  ;;  %v7992_v3 = vld [vmem:[#allocation2 + $0x2b8] sm:$0xf0]  ;;  %v8070_v27 = vld [vmem:[#allocation2 + $0x348] sm:$0xf] }
 0x2c7   :  { %v1679_v63 = vpop.f32.mrf.mxu1  ;;  %v1739_v19 = vmax.f32 %v11167_v15, %v1726_v33  ;;  %v8182_v15 = vld [vmem:[#allocation2 + $0x428] sm:$0xf]  ;;  %v10029_v33 = vld [vmem:[#allocation2 + $0x3f4] sm:$0xf0]  ;;  %v7960_v42 = vld [vmem:[#allocation2 + $0x278] sm:$0xf0] }
 0x2c8   :  { %3111 = vmatpush.bf16.msrb.mxu2 %v7943_v2  ;;  %3135 = vmatpush.bf16.msra.mxu0 %v8263_v20  ;;  %v1680_v4 = vadd.f32 %v1679_v63, %v1655_v47  ;;  %v7894_v2 = vld [vmem:[#allocation2 + $0x1e8] sm:$0xf]  ;;  %v9965_v20 = vld [vmem:[#allocation2 + $0x1f4] sm:$0xf0]  ;;  %v7723_v63 = vor.u32 %v9919_v6, %v7720_v56  ;;  %v8151_v54 = vor.u32 %v10029_v33, %v8150_v58  ;;  %v8280_v6 = vld [vmem:[#allocation2 + $0x4f8] sm:$0xf0] }
 0x2c9   :  { %3065 = vmatpush.bf16.msra.mxu3 %v8387_v11  ;;  %3041 = vmatpush.bf16.msrb.mxu1 %v8067_v52  ;;  %v7895_v31 = vor.u32 %v9965_v20, %v7894_v2  ;;  %v8320_v11 = vld [vmem:[#allocation2 + $0x550] sm:$0xf0]  ;;  %v7879_v52 = vor.u32 %v9961_v25, %v7878_v61  ;;  %v7862_v47 = vld [vmem:[#allocation2 + $0x1a8] sm:$0xf]  ;;  %v10025_v20 = vld [vmem:[#allocation2 + $0x3d4] sm:$0xf0] }
 0x2ca   :  { %v1703_v34 = vpop.f32.mrf.mxu2  ;;  %v8323_v18 = vor.u32 %v10070_v60, %v8320_v11  ;;  %v8134_v2 = vld [vmem:[#allocation2 + $0x3c8] sm:$0xf]  ;;  %v9903_v11 = vld [vmem:[#allocation2 + $0xc] sm:$0xf]  ;;  %v7656_v61 = vld [vmem:[#allocation2 + $0x18] sm:$0xf0] }
 0x2cb   :  { %v1704_v1 = vadd.f32 %v1703_v34, %v1680_v4  ;;  %v1727_v55 = vpop.f32.mrf.mxu3  ;;  %v7704_v4 = vld [vmem:[#allocation2 + $0x78] sm:$0xf0]  ;;  %v8288_v34 = vld [vmem:[#allocation2 + $0x510] sm:$0xf0]  ;;  %v8118_v60 = vld [vmem:[#allocation2 + $0x3a8] sm:$0xf] }
 0x2cc   :  { %3112 = vmatpush.bf16.msrb.mxu2 %v7927_v40  ;;  %3136 = vmatpush.bf16.msra.mxu0 %v8247_v14  ;;  %v7739_v40 = vor.u32 %v9923_v35, %v7736_v59  ;;  %v10037_v14 = vld [vmem:[#allocation2 + $0x434] sm:$0xf0]  ;;  %v7707_v7 = vor.u32 %v9915_v44, %v7704_v4  ;;  %v7814_v35 = vld [vmem:[#allocation2 + $0x148] sm:$0xf]  ;;  %v9983_v25 = vld [vmem:[#allocation2 + $0x28c] sm:$0xf] }
 0x2cd   :  { %3066 = vmatpush.bf16.msra.mxu3 %v8371_v5  ;;  %v1728_v29 = vadd.f32 %v1727_v55, %v1704_v1  ;;  %3042 = vmatpush.bf16.msrb.mxu1 %v8051_v0  ;;  %v8183_v37 = vor.u32 %v10037_v14, %v8182_v15  ;;  %v9995_v5 = vld [vmem:[#allocation2 + $0x2ec] sm:$0xf]  ;;  %v9953_v0 = vld [vmem:[#allocation2 + $0x194] sm:$0xf0]  ;;  %v8291_v55 = vor.u32 %v10062_v46, %v8288_v34  ;;  %v8264_v4 = vld [vmem:[#allocation2 + $0x4d8] sm:$0xf0] }
 0x2ce   :  { %v8027_v57 = vor.u32 %v9995_v5, %v8024_v36  ;;  %v9911_v1 = vld [vmem:[#allocation2 + $0x4c] sm:$0xf]  ;;  %v9945_v59 = vld [vmem:[#allocation2 + $0x154] sm:$0xf0]  ;;  %v7782_v36 = vld [vmem:[#allocation2 + $0x108] sm:$0xf] }
 0x2cf   :  { %v1741_v51 = vmax.f32 %v1536_v8, %v1728_v29  ;;  %v7830_v8 = vld [vmem:[#allocation2 + $0x168] sm:$0xf]  ;;  %v9949_v29 = vld [vmem:[#allocation2 + $0x174] sm:$0xf0]  ;;  %v7815_v15 = vor.u32 %v9945_v59, %v7814_v35  ;;  %v10059_v14 = vld [vmem:[#allocation2 + $0x4ec] sm:$0xf] }
 0x2d0   :  { %3113 = vmatpush.bf16.msrb.mxu2 %v7911_v28  ;;  %3137 = vmatpush.bf16.msra.mxu0 %v8231_v53  ;;  %v8307_v28 = vor.u32 %v10066_v41, %v8304_v38  ;;  %v7863_v53 = vor.u32 %v9957_v30, %v7862_v47  ;;  %v7659_v41 = vor.u32 %v9903_v11, %v7656_v61  ;;  %v8102_v38 = vld [vmem:[#allocation2 + $0x388] sm:$0xf]  ;;  %v10017_v47 = vld [vmem:[#allocation2 + $0x394] sm:$0xf0]  ;;  %v10055_v44 = vld [vmem:[#allocation2 + $0x4cc] sm:$0xf] }
 0x2d1   :  { %3067 = vmatpush.bf16.msra.mxu3 %v8355_v23  ;;  %v11239_v32 = vpack.c.bf16 %v1741_v51, %v1739_v19  ;;  %3043 = vmatpush.bf16.msrb.mxu1 %v8035_v21  ;;  %v7672_v21 = vld [vmem:[#allocation2 + $0x38] sm:$0xf0]  ;;  %v7831_v19 = vor.u32 %v9949_v29, %v7830_v8  ;;  %v8135_v51 = vor.u32 %v10025_v20, %v8134_v2  ;;  %v8406_v34 = vld [vmem:[#allocation2 + $0x5e8] sm:$0xf]  ;;  %v10051_v33 = vld [vmem:[#allocation2 + $0x4ac] sm:$0xf] }
 0x2d2   :  { %v8283_v30 = vor.u32 %v10059_v14, %v8280_v6  ;;  %v8103_v5 = vor.u32 %v10017_v47, %v8102_v38  ;;  %v10089_v8 = vld [vmem:[#allocation2 + $0x5d4] sm:$0xf0]  ;;  %v10047_v2 = vld [vmem:[#allocation2 + $0x48c] sm:$0xf]  ;;  %v8232_v20 = vld [vmem:[#allocation2 + $0x498] sm:$0xf0] }
 0x2d3   :  { %3114 = vmatmul.bf16.vlgmr.msrb.gmra.mxu2 %v11200_v49  ;;  %2988 = vmatmul.bf16.vlgmr.msra.gmra.mxu1 %v11239_v32  ;;  %v8235_v35 = vor.u32 %v10047_v2, %v8232_v20  ;;  %v9967_v59 = vld [vmem:[#allocation2 + $0x20c] sm:$0xf]  ;;  %v8038_v61 = vld [vmem:[#allocation2 + $0x308] sm:$0xf]  ;;  %v10081_v14 = vld [vmem:[#allocation2 + $0x594] sm:$0xf0] }
 0x2d4   :  { %3162 = vmatpush.bf16.msra.mxu2 %v7771_v9  ;;  %3138 = vmatpush.bf16.msra.mxu0 %v8215_v48  ;;  %v7846_v9 = vld [vmem:[#allocation2 + $0x188] sm:$0xf]  ;;  %v7691_v48 = vor.u32 %v9911_v1, %v7688_v39  ;;  %v8248_v1 = vld [vmem:[#allocation2 + $0x4b8] sm:$0xf0] }
 0x2d5   :  { %3016 = vmatmul.bf16.vlgmr.msrb.gmra.mxu3 %v11219_v50  ;;  %3092 = vmatpush.bf16.msra.mxu1 %v7895_v31  ;;  %v7847_v23 = vor.u32 %v9953_v0, %v7846_v9  ;;  %v7995_v31 = vor.u32 %v9987_v17, %v7992_v3  ;;  %v10093_v9 = vld [vmem:[#allocation2 + $0x5f4] sm:$0xf0]  ;;  %v8267_v0 = vor.u32 %v10055_v44, %v8264_v4  ;;  %v7880_v44 = vld [vmem:[#allocation2 + $0x1d8] sm:$0xf0]  ;;  %v10035_v4 = vld [vmem:[#allocation2 + $0x42c] sm:$0xf] }
 0x2d6   :  { %3068 = vmatpush.bf16.msra.mxu3 %v8339_v26  ;;  %v8407_v13 = vor.u32 %v10093_v9, %v8406_v34  ;;  %v8251_v29 = vor.u32 %v10051_v33, %v8248_v1  ;;  %v10005_v3 = vld [vmem:[#allocation2 + $0x334] sm:$0xf0]  ;;  %v9955_v34 = vld [vmem:[#allocation2 + $0x1ac] sm:$0xf]  ;;  %v7864_v9 = vld [vmem:[#allocation2 + $0x1b8] sm:$0xf0] }
 0x2d7   :  { %v8310_v33 = vld [vmem:[#allocation2 + $0x528] sm:$0xf]  ;;  %v10069_v1 = vld [vmem:[#allocation2 + $0x534] sm:$0xf0] }
 0x2d8   :  { %3163 = vmatpush.bf16.msra.mxu2 %v7755_v24  ;;  %3139 = vmatpush.bf16.msra.mxu0 %v8199_v16  ;;  %v9907_v24 = vld [vmem:[#allocation2 + $0x2c] sm:$0xf]  ;;  %v10021_v16 = vld [vmem:[#allocation2 + $0x3b4] sm:$0xf0] }
 0x2d9   :  { %3093 = vmatpush.bf16.msra.mxu1 %v7879_v52  ;;  %v7675_v26 = vor.u32 %v9907_v24, %v7672_v21  ;;  %v8119_v56 = vor.u32 %v10021_v16, %v8118_v60  ;;  %v9941_v52 = vld [vmem:[#allocation2 + $0x134] sm:$0xf0]  ;;  %v8216_v60 = vld [vmem:[#allocation2 + $0x478] sm:$0xf0] }
 0x2da   :  { %3069 = vmatpush.bf16.msra.mxu3 %v8323_v18  ;;  %v7798_v18 = vld [vmem:[#allocation2 + $0x128] sm:$0xf] }
 0x2db   :  { %v7799_v43 = vor.u32 %v9941_v52, %v7798_v18  ;;  %v7896_v18 = vld [vmem:[#allocation2 + $0x1f8] sm:$0xf0]  ;;  %v10039_v52 = vld [vmem:[#allocation2 + $0x44c] sm:$0xf] }
 0x2dc   :  { %3164 = vmatpush.bf16.msra.mxu2 %v7739_v40  ;;  %3140 = vmatpush.bf16.msra.mxu0 %v8183_v37  ;;  %v7976_v40 = vld [vmem:[#allocation2 + $0x298] sm:$0xf0] }
 0x2dd   :  { %3094 = vmatpush.bf16.msra.mxu1 %v7863_v53  ;;  %v7979_v37 = vor.u32 %v9983_v25, %v7976_v40  ;;  %v8086_v53 = vld [vmem:[#allocation2 + $0x368] sm:$0xf]  ;;  %v10001_v40 = vld [vmem:[#allocation2 + $0x314] sm:$0xf0] }
 0x2de   :  { %3070 = vmatpush.bf16.msra.mxu3 %v8307_v28  ;;  %v9937_v28 = vld [vmem:[#allocation2 + $0x114] sm:$0xf0] }
 0x2df   :  { %v7783_v58 = vor.u32 %v9937_v28, %v7782_v36 }
 0x2e0   :  { %3165 = vmatpush.bf16.msra.mxu2 %v7723_v63  ;;  %3141 = vmatpush.bf16.msra.mxu0 %v8167_v12  ;;  %v9979_v63 = vld [vmem:[#allocation2 + $0x26c] sm:$0xf]  ;;  %v10013_v12 = vld [vmem:[#allocation2 + $0x374] sm:$0xf0] }
 0x2e1   :  { %3095 = vmatpush.bf16.msra.mxu1 %v7847_v23  ;;  %v7963_v46 = vor.u32 %v9979_v63, %v7960_v42  ;;  %v8087_v39 = vor.u32 %v10013_v12, %v8086_v53  ;;  %v10009_v23 = vld [vmem:[#allocation2 + $0x354] sm:$0xf0]  ;;  %v8326_v53 = vld [vmem:[#allocation2 + $0x548] sm:$0xf] }
 0x2e2   :  { %3071 = vmatpush.bf16.msra.mxu3 %v8291_v55  ;;  %v8071_v24 = vor.u32 %v10009_v23, %v8070_v27  ;;  %v10077_v63 = vld [vmem:[#allocation2 + $0x574] sm:$0xf0]  ;;  %v8311_v27 = vor.u32 %v10069_v1, %v8310_v33  ;;  %v8294_v23 = vld [vmem:[#allocation2 + $0x508] sm:$0xf]  ;;  %v8328_v33 = vld [vmem:[#allocation2 + $0x558] sm:$0xf0] }
 0x2e3   :  { %3142 = vmatmul.bf16.vlgmr.msra.gmra.mxu0 %v11210_v62  ;;  %3044 = vmatmul.bf16.vlgmr.msrb.gmra.mxu1 %v11229_v22 }
 0x2e4   :  { %3166 = vmatpush.bf16.msra.mxu2 %v7707_v7  ;;  %3190 = vmatpush.bf16.msrb.mxu0 %v8027_v57  ;;  %v9975_v7 = vld [vmem:[#allocation2 + $0x24c] sm:$0xf]  ;;  %v7944_v57 = vld [vmem:[#allocation2 + $0x258] sm:$0xf0] }
 0x2e5   :  { %3072 = vmatmul.bf16.vlgmr.msra.gmra.mxu3 %v11239_v32  ;;  %3096 = vmatpush.bf16.msra.mxu1 %v7831_v19  ;;  %v7947_v55 = vor.u32 %v9975_v7, %v7944_v57  ;;  %v8374_v19 = vld [vmem:[#allocation2 + $0x5a8] sm:$0xf]  ;;  %v8168_v7 = vld [vmem:[#allocation2 + $0x418] sm:$0xf0] }
 0x2e6   :  { %3120 = vmatpush.bf16.msrb.mxu3 %v8151_v54  ;;  %v8390_v54 = vld [vmem:[#allocation2 + $0x5c8] sm:$0xf] }
 0x2e7   :  { %v8391_v21 = vor.u32 %v10089_v8, %v8390_v54  ;;  %v10065_v54 = vld [vmem:[#allocation2 + $0x514] sm:$0xf0]  ;;  %v9947_v8 = vld [vmem:[#allocation2 + $0x16c] sm:$0xf] }
 0x2e8   :  { %3167 = vmatpush.bf16.msra.mxu2 %v7691_v48  ;;  %3191 = vmatpush.bf16.msrb.mxu0 %v8011_v10  ;;  %v9971_v48 = vld [vmem:[#allocation2 + $0x22c] sm:$0xf]  ;;  %v7928_v10 = vld [vmem:[#allocation2 + $0x238] sm:$0xf0]  ;;  %v8295_v2 = vor.u32 %v10065_v54, %v8294_v23 }
 0x2e9   :  { %3097 = vmatpush.bf16.msra.mxu1 %v7815_v15  ;;  %v7931_v17 = vor.u32 %v9971_v48, %v7928_v10  ;;  %v8358_v15 = vld [vmem:[#allocation2 + $0x588] sm:$0xf]  ;;  %v10027_v48 = vld [vmem:[#allocation2 + $0x3ec] sm:$0xf]  ;;  %v8152_v10 = vld [vmem:[#allocation2 + $0x3f8] sm:$0xf0] }
 0x2ea   :  { %3121 = vmatpush.bf16.msrb.mxu3 %v8135_v51  ;;  %v10085_v51 = vld [vmem:[#allocation2 + $0x5b4] sm:$0xf0]  ;;  %v8359_v38 = vor.u32 %v10081_v14, %v8358_v15  ;;  %v8408_v15 = vld [vmem:[#allocation2 + $0x5f8] sm:$0xf0] }
 0x2eb   :  { %v8375_v11 = vor.u32 %v10085_v51, %v8374_v19 }
 0x2ec   :  { %3168 = vmatpush.bf16.msra.mxu2 %v7675_v26  ;;  %3192 = vmatpush.bf16.msrb.mxu0 %v7995_v31  ;;  %v7912_v26 = vld [vmem:[#allocation2 + $0x218] sm:$0xf0]  ;;  %v10043_v31 = vld [vmem:[#allocation2 + $0x46c] sm:$0xf] }
 0x2ed   :  { %3098 = vmatpush.bf16.msra.mxu1 %v7799_v43  ;;  %v7915_v25 = vor.u32 %v9967_v59, %v7912_v26  ;;  %v8219_v6 = vor.u32 %v10043_v31, %v8216_v60  ;;  %v9959_v43 = vld [vmem:[#allocation2 + $0x1cc] sm:$0xf]  ;;  %v7800_v59 = vld [vmem:[#allocation2 + $0x138] sm:$0xf0] }
 0x2ee   :  { %3122 = vmatpush.bf16.msrb.mxu3 %v8119_v56  ;;  %v9963_v56 = vld [vmem:[#allocation2 + $0x1ec] sm:$0xf]  ;;  %v7883_v28 = vor.u32 %v9959_v43, %v7880_v44  ;;  %v8120_v31 = vld [vmem:[#allocation2 + $0x3b8] sm:$0xf0] }
 0x2ef   :  { %v7899_v47 = vor.u32 %v9963_v56, %v7896_v18  ;;  %v10019_v26 = vld [vmem:[#allocation2 + $0x3ac] sm:$0xf]  ;;  %v8376_v43 = vld [vmem:[#allocation2 + $0x5b8] sm:$0xf0] }
 0x2f0   :  { %3169 = vmatpush.bf16.msra.mxu2 %v7659_v41  ;;  %3193 = vmatpush.bf16.msrb.mxu0 %v7979_v37  ;;  %v8200_v41 = vld [vmem:[#allocation2 + $0x458] sm:$0xf0]  ;;  %v8039_v37 = vor.u32 %v10001_v40, %v8038_v61  ;;  %v8123_v60 = vor.u32 %v10019_v26, %v8120_v31  ;;  %v10015_v61 = vld [vmem:[#allocation2 + $0x38c] sm:$0xf] }
 0x2f1   :  { %3099 = vmatpush.bf16.msra.mxu1 %v7783_v58  ;;  %v8203_v42 = vor.u32 %v10039_v52, %v8200_v41  ;;  %v7867_v58 = vor.u32 %v9955_v34, %v7864_v9  ;;  %v10091_v40 = vld [vmem:[#allocation2 + $0x5ec] sm:$0xf]  ;;  %v8088_v52 = vld [vmem:[#allocation2 + $0x378] sm:$0xf0] }
 0x2f2   :  { %3123 = vmatpush.bf16.msrb.mxu3 %v8103_v5  ;;  %v8184_v5 = vld [vmem:[#allocation2 + $0x438] sm:$0xf0]  ;;  %v8411_v56 = vor.u32 %v10091_v40, %v8408_v15  ;;  %v10011_v18 = vld [vmem:[#allocation2 + $0x36c] sm:$0xf] }
 0x2f3   :  { %3170 = vmatmul.bf16.vlgmr.msra.gmra.mxu2 %v11188_v45  ;;  %v8054_v45 = vld [vmem:[#allocation2 + $0x328] sm:$0xf]  ;;  %v8187_v12 = vor.u32 %v10035_v4, %v8184_v5  ;;  %v10087_v41 = vld [vmem:[#allocation2 + $0x5cc] sm:$0xf]  ;;  %v8040_v9 = vld [vmem:[#allocation2 + $0x318] sm:$0xf0] }
 0x2f4   :  { %3218 = vmatpush.bf16.msrb.mxu2 %v8283_v30  ;;  %3194 = vmatpush.bf16.msrb.mxu0 %v7963_v46  ;;  %v8055_v16 = vor.u32 %v10005_v3, %v8054_v45  ;;  %v8342_v30 = vld [vmem:[#allocation2 + $0x568] sm:$0xf]  ;;  %v10073_v46 = vld [vmem:[#allocation2 + $0x554] sm:$0xf0]  ;;  %v7816_v45 = vld [vmem:[#allocation2 + $0x158] sm:$0xf0] }
 0x2f5   :  { %3148 = vmatpush.bf16.msrb.mxu1 %v8407_v13  ;;  %v8343_v36 = vor.u32 %v10077_v63, %v8342_v30  ;;  %v8327_v57 = vor.u32 %v10073_v46, %v8326_v53  ;;  %v7848_v13 = vld [vmem:[#allocation2 + $0x198] sm:$0xf0]  ;;  %v10007_v30 = vld [vmem:[#allocation2 + $0x34c] sm:$0xf] }
 0x2f6   :  { %3124 = vmatpush.bf16.msrb.mxu3 %v8087_v39  ;;  %3100 = vmatmul.bf16.vlgmr.msra.gmra.mxu1 %v11219_v50  ;;  %v9951_v39 = vld [vmem:[#allocation2 + $0x18c] sm:$0xf]  ;;  %v8136_v3 = vld [vmem:[#allocation2 + $0x3d8] sm:$0xf0] }
 0x2f7   :  { %v8072_v63 = vld [vmem:[#allocation2 + $0x358] sm:$0xf0]  ;;  %v10003_v5 = vld [vmem:[#allocation2 + $0x32c] sm:$0xf] }
 0x2f8   :  { %3219 = vmatpush.bf16.msrb.mxu2 %v8267_v0  ;;  %3195 = vmatpush.bf16.msrb.mxu0 %v7947_v55  ;;  %v10031_v0 = vld [vmem:[#allocation2 + $0x40c] sm:$0xf]  ;;  %v7851_v55 = vor.u32 %v9951_v39, %v7848_v13  ;;  %v8075_v44 = vor.u32 %v10007_v30, %v8072_v63  ;;  %v8360_v53 = vld [vmem:[#allocation2 + $0x598] sm:$0xf0] }
 0x2f9   :  { %3149 = vmatpush.bf16.msrb.mxu1 %v8391_v21  ;;  %v9943_v21 = vld [vmem:[#allocation2 + $0x14c] sm:$0xf]  ;;  %v8312_v39 = vld [vmem:[#allocation2 + $0x538] sm:$0xf0] }
 0x2fa   :  { %3125 = vmatpush.bf16.msrb.mxu3 %v8071_v24  ;;  %v8155_v24 = vor.u32 %v10027_v48, %v8152_v10  ;;  %v7819_v19 = vor.u32 %v9943_v21, %v7816_v45  ;;  %v9999_v34 = vld [vmem:[#allocation2 + $0x30c] sm:$0xf]  ;;  %v11258_v10 = vld [vmem:[%s12356_s4] sm:$0xf] }
 0x2fc   :  { %3220 = vmatpush.bf16.msrb.mxu2 %v8251_v29  ;;  %3196 = vmatpush.bf16.msrb.mxu0 %v7931_v17  ;;  %v7832_v29 = vld [vmem:[#allocation2 + $0x178] sm:$0xf0]  ;;  %v10023_v17 = vld [vmem:[#allocation2 + $0x3cc] sm:$0xf] }
 0x2fd   :  { %3150 = vmatpush.bf16.msrb.mxu1 %v8375_v11  ;;  %v7835_v20 = vor.u32 %v9947_v8, %v7832_v29  ;;  %v8139_v51 = vor.u32 %v10023_v17, %v8136_v3  ;;  %v7784_v11 = vld [vmem:[#allocation2 + $0x118] sm:$0xf0] }
 0x2fe   :  { %3126 = vmatpush.bf16.msrb.mxu3 %v8055_v16  ;;  %v9935_v16 = vld [vmem:[#allocation2 + $0x10c] sm:$0xf] }
 0x2ff   :  { %v7787_v14 = vor.u32 %v9935_v16, %v7784_v11 }
 0x300   :  { %3221 = vmatpush.bf16.msrb.mxu2 %v8235_v35  ;;  %3197 = vmatpush.bf16.msrb.mxu0 %v7915_v25  ;;  %v9939_v35 = vld [vmem:[#allocation2 + $0x12c] sm:$0xf]  ;;  %v8104_v25 = vld [vmem:[#allocation2 + $0x398] sm:$0xf0]  ;;  %v2919_v54 = vpop.f32.mrf.mxu0 }
 0x301   :  { %3151 = vmatpush.bf16.msrb.mxu1 %v8359_v38  ;;  %v8091_v38 = vor.u32 %v10011_v18, %v8088_v52 }
 0x302   :  { %3127 = vmatpush.bf16.msrb.mxu3 %v8039_v37  ;;  %v8392_v37 = vld [vmem:[#allocation2 + $0x5d8] sm:$0xf0] }
 0x303   :  { %3198 = vmatmul.bf16.vlgmr.msrb.gmra.mxu0 %v11200_v49  ;;  %v8171_v49 = vor.u32 %v10031_v0, %v8168_v7  ;;  %v10075_v0 = vld [vmem:[#allocation2 + $0x56c] sm:$0xf]  ;;  %v8344_v7 = vld [vmem:[#allocation2 + $0x578] sm:$0xf0] }
 0x304   :  { %3222 = vmatpush.bf16.msrb.mxu2 %v8219_v6  ;;  %v8107_v6 = vor.u32 %v10015_v61, %v8104_v25 }
 0x305   :  { %3128 = vmatmul.bf16.vlgmr.msrb.gmra.mxu3 %v11229_v22  ;;  %3152 = vmatpush.bf16.msrb.mxu1 %v8343_v36  ;;  %v8056_v36 = vld [vmem:[#allocation2 + $0x338] sm:$0xf0] }
 0x306   :  { %3176 = vmatpush.bf16.msra.mxu3 %v7899_v47  ;;  %v8395_v47 = vor.u32 %v10087_v41, %v8392_v37  ;;  %v8059_v46 = vor.u32 %v10003_v5, %v8056_v36 }
 0x308   :  { %3223 = vmatpush.bf16.msrb.mxu2 %v8203_v42  ;;  %v10083_v42 = vld [vmem:[#allocation2 + $0x5ac] sm:$0xf]  ;;  %v2921_v48 = vpop.f32.mrf.mxu0 }
 0x309   :  { %3153 = vmatpush.bf16.msrb.mxu1 %v8327_v57  ;;  %v8379_v4 = vor.u32 %v10083_v42, %v8376_v43  ;;  %v8043_v57 = vor.u32 %v9999_v34, %v8040_v9 }
 0x30a   :  { %3177 = vmatpush.bf16.msra.mxu3 %v7883_v28  ;;  %v10079_v28 = vld [vmem:[#allocation2 + $0x58c] sm:$0xf] }
 0x30c   :  { %3224 = vmatpush.bf16.msrb.mxu2 %v8187_v12  ;;  %v8363_v12 = vor.u32 %v10079_v28, %v8360_v53 }
 0x30d   :  { %3154 = vmatpush.bf16.msrb.mxu1 %v8311_v27  ;;  %v10063_v27 = vld [vmem:[#allocation2 + $0x50c] sm:$0xf] }
 0x30e   :  { %3178 = vmatpush.bf16.msra.mxu3 %v7867_v58  ;;  %v10071_v58 = vld [vmem:[#allocation2 + $0x54c] sm:$0xf] }
 0x30f   :  { %v8331_v1 = vor.u32 %v10071_v58, %v8328_v33 }
 0x310   :  { %3225 = vmatpush.bf16.msrb.mxu2 %v8171_v49  ;;  %v10067_v49 = vld [vmem:[#allocation2 + $0x52c] sm:$0xf] }
 0x311   :  { %3155 = vmatpush.bf16.msrb.mxu1 %v8295_v2  ;;  %v8315_v13 = vor.u32 %v10067_v49, %v8312_v39 }
 0x312   :  { %3179 = vmatpush.bf16.msra.mxu3 %v7851_v55  ;;  %v8296_v55 = vld [vmem:[#allocation2 + $0x518] sm:$0xf0] }
 0x313   :  { %3226 = vmatmul.bf16.vlgmr.msrb.gmra.mxu2 %v11210_v62  ;;  %v7803_v62 = vor.u32 %v9939_v35, %v7800_v59  ;;  %v8299_v23 = vor.u32 %v10063_v27, %v8296_v55  ;;  %v1944_v27 = vperm.slane %v11258_v10, 2 }
 0x314   :  { %3156 = vmatmul.bf16.vlgmr.msrb.gmra.mxu1 %v11239_v32 }
 0x315   :  { %3204 = vmatpush.bf16.msra.mxu1 %v8155_v24 }
 0x316   :  { %3180 = vmatpush.bf16.msra.mxu3 %v7835_v20  ;;  %v2947_v8 = vpop.f32.mrf.mxu2 }
 0x319   :  { %3205 = vmatpush.bf16.msra.mxu1 %v8139_v51 }
 0x31a   :  { %3181 = vmatpush.bf16.msra.mxu3 %v7819_v19 }
 0x31d   :  { %3206 = vmatpush.bf16.msra.mxu1 %v8123_v60 }
 0x31e   :  { %3182 = vmatpush.bf16.msra.mxu3 %v7803_v62  ;;  %v2949_v2 = vpop.f32.mrf.mxu2 }
 0x320   :  { %v2975_v24 = vpop.f32.mrf.mxu0 }
 0x321   :  { %3207 = vmatpush.bf16.msra.mxu1 %v8107_v6  ;;  %v1943_v6 = vperm.slane %v11258_v10, 1 }
 0x322   :  { %3183 = vmatpush.bf16.msra.mxu3 %v7787_v14 }
 0x325   :  { %3184 = vmatmul.bf16.vlgmr.msra.gmra.mxu3 %v11219_v50  ;;  %3208 = vmatpush.bf16.msra.mxu1 %v8091_v38  ;;  %v8347_v50 = vor.u32 %v10075_v0, %v8344_v7 }
 0x326   :  { %3232 = vmatpush.bf16.msrb.mxu3 %v8411_v56  ;;  %v3003_v51 = vpop.f32.mrf.mxu2 }
 0x327   :  { %v3004_v38 = vadd.f32 %v3003_v51, %v1943_v6 }
 0x328   :  { %v2977_v62 = vpop.f32.mrf.mxu0 }
 0x329   :  { %3209 = vmatpush.bf16.msra.mxu1 %v8075_v44 }
 0x32a   :  { %3233 = vmatpush.bf16.msrb.mxu3 %v8395_v47 }
 0x32d   :  { %3210 = vmatpush.bf16.msra.mxu1 %v8059_v46 }
 0x32e   :  { %3234 = vmatpush.bf16.msrb.mxu3 %v8379_v4  ;;  %v3005_v40 = vpop.f32.mrf.mxu2 }
 0x32f   :  { %v3006_v30 = vadd.f32 %v3005_v40, %v1943_v6  ;;  %v10125_v40 = vld [vmem:[#allocation7 + $0xec] sm:$0xf0] }
 0x330   :  { %v2933_v29 = vpop.f32.mrf.mxu1  ;;  %v3031_v52 = vpop.f32.mrf.mxu0  ;;  %v10157_v6 = vld [vmem:[#allocation7 + $0x1ec] sm:$0xf0] }
 0x331   :  { %3211 = vmatpush.bf16.msra.mxu1 %v8043_v57 }
 0x332   :  { %3235 = vmatpush.bf16.msrb.mxu3 %v8363_v12  ;;  %v11265_v12 = vld [vmem:[%s12359_s7] sm:$0xff] }
 0x334   :  { %3212 = vmatmul.bf16.vlgmr.msra.gmra.mxu1 %v11229_v22  ;;  %v1942_v22 = vperm.slane %v11258_v10, 0 }
 0x336   :  { %3236 = vmatpush.bf16.msrb.mxu3 %v8347_v50  ;;  %v2920_v45 = vadd.f32 %v2919_v54, %v1942_v22  ;;  %v2922_v17 = vadd.f32 %v2921_v48, %v1942_v22 }
 0x338   :  { %v2935_v21 = vpop.f32.mrf.mxu1  ;;  %v2934_v3 = vadd.f32 %v2933_v29, %v2920_v45  ;;  %v3059_v42 = vpop.f32.mrf.mxu2 }
 0x339   :  { %v2936_v19 = vadd.f32 %v2935_v21, %v2922_v17  ;;  %v3033_v4 = vpop.f32.mrf.mxu0 }
 0x33a   :  { %3237 = vmatpush.bf16.msrb.mxu3 %v8331_v1 }
 0x33b   :  { %v2950_v31 = vadd.f32 %v2949_v2, %v2936_v19 }
 0x33e   :  { %3238 = vmatpush.bf16.msrb.mxu3 %v8315_v13 }
 0x340   :  { %v3061_v9 = vpop.f32.mrf.mxu2 }
 0x341   :  { %v3087_v49 = vpop.f32.mrf.mxu0 }
 0x342   :  { %3239 = vmatpush.bf16.msrb.mxu3 %v8299_v23 }
 0x345   :  { %3240 = vmatmul.bf16.vlgmr.msrb.gmra.mxu3 %v11239_v32  ;;  %v2948_v32 = vadd.f32 %v2947_v8, %v2934_v3  ;;  %v3088_v8 = vadd.f32 %v3087_v49, %v1944_v27 }
 0x346   :  { %v2961_v20 = vpop.f32.mrf.mxu3 }
 0x347   :  { %v2962_v26 = vadd.f32 %v2961_v20, %v2948_v32 }
 0x349   :  { %v2976_v16 = vadd.f32 %v2975_v24, %v2962_v26  ;;  %v3089_v13 = vpop.f32.mrf.mxu0 }
 0x34a   :  { %v3090_v29 = vadd.f32 %v3089_v13, %v1944_v27 }
 0x34e   :  { %v2963_v35 = vpop.f32.mrf.mxu3 }
 0x34f   :  { %v2964_v60 = vadd.f32 %v2963_v35, %v2950_v31 }
 0x350   :  { %v2989_v59 = vpop.f32.mrf.mxu1 }
 0x351   :  { %v2990_v61 = vadd.f32 %v2989_v59, %v2976_v16  ;;  %v2978_v25 = vadd.f32 %v2977_v62, %v2964_v60 }
 0x353   :  { %v3246_v56 = vmax.f32 %v2990_v61, 0.0 }
 0x356   :  { %v3115_v55 = vpop.f32.mrf.mxu2 }
 0x358   :  { %v3017_v11 = vpop.f32.mrf.mxu3  ;;  %v2991_v15 = vpop.f32.mrf.mxu1 }
 0x359   :  { %v2992_v14 = vadd.f32 %v2991_v15, %v2978_v25  ;;  %v3018_v63 = vadd.f32 %v3017_v11, %v3004_v38  ;;  %v8534_v25 = vld [vmem:[#allocation7 + $0xe0] sm:$0xf]  ;;  %v10153_v38 = vld [vmem:[#allocation7 + $0x1cc] sm:$0xf0] }
 0x35a   :  { %v8662_v15 = vld [vmem:[#allocation7 + $0x1e0] sm:$0xf] }
 0x35b   :  { %v3250_v18 = vmax.f32 %v2992_v14, 0.0  ;;  %v3032_v44 = vadd.f32 %v3031_v52, %v3018_v63  ;;  %v8535_v14 = vor.u32 %v10125_v40, %v8534_v25 }
 0x35d   :  { %v3256_v41 = vpack.c.bf16 %v3250_v18, %v3246_v56  ;;  %v8518_v56 = vld [vmem:[#allocation7 + $0xc0] sm:$0xf]  ;;  %v10121_v18 = vld [vmem:[#allocation7 + $0xcc] sm:$0xf0] }
 0x35e   :  { %v3117_v20 = vpop.f32.mrf.mxu2  ;;  %v8519_v63 = vor.u32 %v10121_v18, %v8518_v56  ;;  %v8566_v56 = vld [vmem:[#allocation7 + $0x120] sm:$0xf] }
 0x35f   :  { %3276 = vmatpush.bf16.msra.mxu0 %v3256_v41  ;;  %v8663_v41 = vor.u32 %v10157_v6, %v8662_v15  ;;  %v10101_v6 = vld [vmem:[#allocation7 + $0x2c] sm:$0xf0] }
 0x360   :  { %v3019_v37 = vpop.f32.mrf.mxu3  ;;  %v3045_v47 = vpop.f32.mrf.mxu1 }
 0x361   :  { %v3020_v43 = vadd.f32 %v3019_v37, %v3006_v30  ;;  %v3046_v36 = vadd.f32 %v3045_v47, %v3032_v44  ;;  %v3143_v2 = vpop.f32.mrf.mxu0  ;;  %v8646_v37 = vld [vmem:[#allocation7 + $0x1c0] sm:$0xf]  ;;  %v1945_v47 = vperm.slane %v11258_v10, 3 }
 0x362   :  { %8416 = vmatmul.msk.bf16.vlgmr.msra.gmra.mxu0 %vm3265_vm2, %v11265_v12  ;;  %v8502_v44 = vld [vmem:[#allocation7 + $0xa0] sm:$0xf] }
 0x363   :  { %v3034_v28 = vadd.f32 %v3033_v4, %v3020_v43  ;;  %v3060_v34 = vadd.f32 %v3059_v42, %v3046_v36  ;;  %4101 = vmatpush.bf16.msrb.mxu0 %v8535_v14  ;;  %v8647_v43 = vor.u32 %v10153_v38, %v8646_v37  ;;  %v10117_v4 = vld [vmem:[#allocation7 + $0xac] sm:$0xf0]  ;;  %v8438_v14 = vld [vmem:[#allocation7 + $0x20] sm:$0xf] }
 0x364   :  { %v10149_v36 = vld [vmem:[#allocation7 + $0x1ac] sm:$0xf0]  ;;  %v8726_v38 = vld [vmem:[#allocation7 + $0x260] sm:$0xf] }
 0x365   :  { %v10133_v37 = vld [vmem:[#allocation7 + $0x12c] sm:$0xf0] }
 0x367   :  { %4102 = vmatpush.bf16.msrb.mxu0 %v8519_v63 }
 0x368   :  { %v3073_v5 = vpop.f32.mrf.mxu3  ;;  %v3047_v53 = vpop.f32.mrf.mxu1 }
 0x369   :  { %v3048_v46 = vadd.f32 %v3047_v53, %v3034_v28  ;;  %v3074_v0 = vadd.f32 %v3073_v5, %v3060_v34  ;;  %v3145_v35 = vpop.f32.mrf.mxu0  ;;  %v8630_v5 = vld [vmem:[#allocation7 + $0x1a0] sm:$0xf] }
 0x36a   :  { %v8631_v34 = vor.u32 %v10149_v36, %v8630_v5  ;;  %v8550_v5 = vld [vmem:[#allocation7 + $0x100] sm:$0xf] }
 0x36b   :  { %v3062_v7 = vadd.f32 %v3061_v9, %v3048_v46  ;;  %v3247_v58 = vmax.f32 %v3074_v0, 0.0  ;;  %v8503_v46 = vor.u32 %v10117_v4, %v8502_v44  ;;  %v8486_v9 = vld [vmem:[#allocation7 + $0x80] sm:$0xf]  ;;  %v10113_v0 = vld [vmem:[#allocation7 + $0x8c] sm:$0xf0] }
 0x36c   :  { %v8487_v13 = vor.u32 %v10113_v0, %v8486_v9  ;;  %v8422_v44 = vld [vmem:[#allocation7] sm:$0xf]  ;;  %v10097_v4 = vld [vmem:[#allocation7 + $0xc] sm:$0xf0]  ;;  %v8536_v9 = vld [vmem:[#allocation7 + $0xf0] sm:$0xf0] }
 0x36d   :  { %4103 = vmatpush.bf16.msrb.mxu0 %v8503_v46  ;;  %v10129_v46 = vld [vmem:[#allocation7 + $0x10c] sm:$0xf0]  ;;  %v10155_v0 = vld [vmem:[#allocation7 + $0x1e4] sm:$0xf] }
 0x370   :  { %v3075_v57 = vpop.f32.mrf.mxu3 }
 0x371   :  { %v3076_v50 = vadd.f32 %v3075_v57, %v3062_v7  ;;  %v8614_v7 = vld [vmem:[#allocation7 + $0x180] sm:$0xf]  ;;  %4104 = vmatpush.bf16.msrb.mxu0 %v8487_v13  ;;  %v8648_v13 = vld [vmem:[#allocation7 + $0x1d0] sm:$0xf0] }
 0x373   :  { %v3251_v33 = vmax.f32 %v3076_v50, 0.0  ;;  %v3101_v39 = vpop.f32.mrf.mxu1  ;;  %v10145_v50 = vld [vmem:[#allocation7 + $0x18c] sm:$0xf0] }
 0x374   :  { %v3102_v48 = vadd.f32 %v3101_v39, %v3088_v8  ;;  %v8615_v27 = vor.u32 %v10145_v50, %v8614_v7  ;;  %v8664_v7 = vld [vmem:[#allocation7 + $0x1f0] sm:$0xf0]  ;;  %v8551_v50 = vor.u32 %v10129_v46, %v8550_v5  ;;  %v10127_v5 = vld [vmem:[#allocation7 + $0x104] sm:$0xf] }
 0x375   :  { %v3257_v1 = vpack.c.bf16 %v3251_v33, %v3247_v58  ;;  %v8790_v58 = vld [vmem:[#allocation7 + $0x2e0] sm:$0xf]  ;;  %v10189_v33 = vld [vmem:[#allocation7 + $0x2ec] sm:$0xf0] }
 0x376   :  { %v3116_v24 = vadd.f32 %v3115_v55, %v3102_v48  ;;  %v3171_v11 = vpop.f32.mrf.mxu2  ;;  %v8791_v49 = vor.u32 %v10189_v33, %v8790_v58  ;;  %v8470_v55 = vld [vmem:[#allocation7 + $0x60] sm:$0xf]  ;;  %v8667_v33 = vor.u32 %v10155_v0, %v8664_v7 }
 0x377   :  { %3290 = vmatpush.bf16.msrb.mxu1 %v3257_v1  ;;  %v3172_v53 = vadd.f32 %v3171_v11, %v1945_v47  ;;  %v8598_v48 = vld [vmem:[#allocation7 + $0x160] sm:$0xf]  ;;  %v10177_v11 = vld [vmem:[#allocation7 + $0x28c] sm:$0xf0] }
 0x37a   :  { %8417 = vmatmul.msk.bf16.vlgmr.msrb.gmra.mxu1 %vm3265_vm2, %v11265_v12 }
 0x37b   :  { %v3103_v54 = vpop.f32.mrf.mxu1  ;;  %4114 = vmatpush.bf16.msra.mxu1 %v8663_v41 }
 0x37c   :  { %v3104_v22 = vadd.f32 %v3103_v54, %v3090_v29  ;;  %v8774_v54 = vld [vmem:[#allocation7 + $0x2c0] sm:$0xf] }
 0x37e   :  { %v3118_v3 = vadd.f32 %v3117_v20, %v3104_v22  ;;  %v3173_v52 = vpop.f32.mrf.mxu2  ;;  %v10185_v22 = vld [vmem:[#allocation7 + $0x2cc] sm:$0xf0] }
 0x37f   :  { %4115 = vmatpush.bf16.msra.mxu1 %v8647_v43  ;;  %v3174_v10 = vadd.f32 %v3173_v52, %v1945_v47  ;;  %v10173_v47 = vld [vmem:[#allocation7 + $0x26c] sm:$0xf0]  ;;  %v8567_v43 = vor.u32 %v10133_v37, %v8566_v56  ;;  %v8440_v56 = vld [vmem:[#allocation7 + $0x30] sm:$0xf0] }
 0x380   :  { %v3199_v30 = vpop.f32.mrf.mxu0  ;;  %v8727_v36 = vor.u32 %v10173_v47, %v8726_v38  ;;  %v10161_v37 = vld [vmem:[#allocation7 + $0x20c] sm:$0xf0]  ;;  %v10187_v47 = vld [vmem:[#allocation7 + $0x2e4] sm:$0xf] }
 0x383   :  { %4116 = vmatpush.bf16.msra.mxu1 %v8631_v34  ;;  %v10123_v34 = vld [vmem:[#allocation7 + $0xe4] sm:$0xf] }
 0x384   :  { %v8539_v58 = vor.u32 %v10123_v34, %v8536_v9  ;;  %v10179_v34 = vld [vmem:[#allocation7 + $0x2a4] sm:$0xf]  ;;  %v8760_v9 = vld [vmem:[#allocation7 + $0x2b0] sm:$0xf0] }
 0x387   :  { %4117 = vmatpush.bf16.msra.mxu1 %v8615_v27 }
 0x388   :  { %v3129_v23 = vpop.f32.mrf.mxu3  ;;  %v3201_v8 = vpop.f32.mrf.mxu0 }
 0x389   :  { %v3130_v17 = vadd.f32 %v3129_v23, %v3116_v24  ;;  %v10109_v23 = vld [vmem:[#allocation7 + $0x6c] sm:$0xf0] }
 0x38b   :  { %v3144_v51 = vadd.f32 %v3143_v2, %v3130_v17  ;;  %v10141_v2 = vld [vmem:[#allocation7 + $0x16c] sm:$0xf0] }
 0x390   :  { %v3131_v21 = vpop.f32.mrf.mxu3 }
 0x391   :  { %v3157_v45 = vpop.f32.mrf.mxu1  ;;  %v3132_v19 = vadd.f32 %v3131_v21, %v3118_v3  ;;  %v8775_v21 = vor.u32 %v10185_v22, %v8774_v54  ;;  %v8504_v54 = vld [vmem:[#allocation7 + $0xb0] sm:$0xf0]  ;;  %v10111_v22 = vld [vmem:[#allocation7 + $0x84] sm:$0xf] }
 0x392   :  { %v3158_v32 = vadd.f32 %v3157_v45, %v3144_v51  ;;  %v8758_v45 = vld [vmem:[#allocation7 + $0x2a0] sm:$0xf]  ;;  %v10181_v51 = vld [vmem:[#allocation7 + $0x2ac] sm:$0xf0] }
 0x393   :  { %v3146_v59 = vadd.f32 %v3145_v35, %v3132_v19  ;;  %v8471_v19 = vor.u32 %v10109_v23, %v8470_v55  ;;  %v8599_v35 = vor.u32 %v10141_v2, %v8598_v48  ;;  %v10115_v23 = vld [vmem:[#allocation7 + $0xa4] sm:$0xf] }
 0x394   :  { %v3248_v62 = vmax.f32 %v3158_v32, 0.0  ;;  %v8454_v32 = vld [vmem:[#allocation7 + $0x40] sm:$0xf]  ;;  %v8507_v48 = vor.u32 %v10115_v23, %v8504_v54  ;;  %v8526_v23 = vld [vmem:[#allocation7 + $0xc8] sm:$0xf] }
 0x395   :  { %4105 = vmatpush.bf16.msrb.mxu0 %v8471_v19  ;;  %4118 = vmatpush.bf16.msra.mxu1 %v8599_v35  ;;  %v8694_v35 = vld [vmem:[#allocation7 + $0x220] sm:$0xf]  ;;  %v10122_v54 = vld [vmem:[#allocation7 + $0xd4] sm:$0xf0] }
 0x396   :  { %v3227_v1 = vpop.f32.mrf.mxu2 }
 0x399   :  { %v3159_v26 = vpop.f32.mrf.mxu1 }
 0x39a   :  { %v3160_v31 = vadd.f32 %v3159_v26, %v3146_v59  ;;  %v10105_v59 = vld [vmem:[#allocation7 + $0x4c] sm:$0xf0]  ;;  %v8582_v26 = vld [vmem:[#allocation7 + $0x140] sm:$0xf] }
 0x39b   :  { %v8455_v25 = vor.u32 %v10105_v59, %v8454_v32  ;;  %v10165_v32 = vld [vmem:[#allocation7 + $0x22c] sm:$0xf0]  ;;  %v8472_v59 = vld [vmem:[#allocation7 + $0x70] sm:$0xf0] }
 0x39c   :  { %v3252_v60 = vmax.f32 %v3160_v31, 0.0  ;;  %v8759_v31 = vor.u32 %v10181_v51, %v8758_v45  ;;  %v8710_v45 = vld [vmem:[#allocation7 + $0x240] sm:$0xf]  ;;  %v10107_v51 = vld [vmem:[#allocation7 + $0x64] sm:$0xf] }
 0x39d   :  { %4106 = vmatpush.bf16.msrb.mxu0 %v8455_v25  ;;  %v10135_v25 = vld [vmem:[#allocation7 + $0x144] sm:$0xf] }
 0x39e   :  { %v3258_v16 = vpack.c.bf16 %v3252_v60, %v3248_v62  ;;  %v10137_v60 = vld [vmem:[#allocation7 + $0x14c] sm:$0xf0]  ;;  %v3229_v40 = vpop.f32.mrf.mxu2 }
 0x39f   :  { %v8583_v15 = vor.u32 %v10137_v60, %v8582_v26  ;;  %v10139_v26 = vld [vmem:[#allocation7 + $0x164] sm:$0xf]  ;;  %v8475_v60 = vor.u32 %v10107_v51, %v8472_v59 }
 0x3a0   :  { %3304 = vmatpush.bf16.msra.mxu2 %v3258_v16  ;;  %v8742_v16 = vld [vmem:[#allocation7 + $0x280] sm:$0xf]  ;;  %v10171_v59 = vld [vmem:[#allocation7 + $0x264] sm:$0xf] }
 0x3a1   :  { %v8743_v18 = vor.u32 %v10177_v11, %v8742_v16  ;;  %4119 = vmatpush.bf16.msra.mxu1 %v8583_v15  ;;  %v10103_v11 = vld [vmem:[#allocation7 + $0x44] sm:$0xf] }
 0x3a3   :  { %8418 = vmatmul.msk.bf16.vlgmr.msra.gmra.mxu2 %vm3265_vm2, %v11265_v12 }
 0x3a4   :  { %4127 = vmatpush.bf16.msrb.mxu2 %v8791_v49  ;;  %v8520_v49 = vld [vmem:[#allocation7 + $0xd0] sm:$0xf0] }
 0x3a5   :  { %4120 = vmatpush.bf16.msra.mxu1 %v8567_v43 }
 0x3a8   :  { %v3185_v61 = vpop.f32.mrf.mxu3  ;;  %4128 = vmatpush.bf16.msrb.mxu2 %v8775_v21  ;;  %v8616_v21 = vld [vmem:[#allocation7 + $0x190] sm:$0xf0] }
 0x3a9   :  { %v3186_v57 = vadd.f32 %v3185_v61, %v3172_v53  ;;  %4121 = vmatpush.bf16.msra.mxu1 %v8551_v50  ;;  %v10175_v50 = vld [vmem:[#allocation7 + $0x284] sm:$0xf] }
 0x3ab   :  { %v3200_v29 = vadd.f32 %v3199_v30, %v3186_v57  ;;  %v8423_v57 = vor.u32 %v10097_v4, %v8422_v44  ;;  %v10095_v44 = vld [vmem:[#allocation7 + $0x4] sm:$0xf]  ;;  %v8424_v4 = vld [vmem:[#allocation7 + $0x10] sm:$0xf0] }
 0x3ac   :  { %4129 = vmatpush.bf16.msrb.mxu2 %v8759_v31  ;;  %v8600_v31 = vld [vmem:[#allocation7 + $0x170] sm:$0xf0]  ;;  %v8427_v0 = vor.u32 %v10095_v44, %v8424_v4  ;;  %v10163_v44 = vld [vmem:[#allocation7 + $0x224] sm:$0xf] }
 0x3ad   :  { %4166 = vmatpush.bf16.msrb.mxu1 %v8667_v33  ;;  %v8603_v16 = vor.u32 %v10139_v26, %v8600_v31  ;;  %v8728_v26 = vld [vmem:[#allocation7 + $0x270] sm:$0xf0] }
 0x3ae   :  { %v8731_v31 = vor.u32 %v10171_v59, %v8728_v26  ;;  %v8696_v4 = vld [vmem:[#allocation7 + $0x230] sm:$0xf0]  ;;  %v8838_v59 = vld [vmem:[#allocation7 + $0x340] sm:$0xf]  ;;  %v10201_v26 = vld [vmem:[#allocation7 + $0x34c] sm:$0xf0] }
 0x3b0   :  { %v3187_v28 = vpop.f32.mrf.mxu3  ;;  %4130 = vmatpush.bf16.msrb.mxu2 %v8743_v18  ;;  %v10131_v18 = vld [vmem:[#allocation7 + $0x124] sm:$0xf] }
 0x3b1   :  { %v3213_v42 = vpop.f32.mrf.mxu1  ;;  %v3188_v39 = vadd.f32 %v3187_v28, %v3174_v10 }
 0x3b2   :  { %v3214_v17 = vadd.f32 %v3213_v42, %v3200_v29  ;;  %v8439_v42 = vor.u32 %v10101_v6, %v8438_v14  ;;  %v8632_v29 = vld [vmem:[#allocation7 + $0x1b0] sm:$0xf0]  ;;  %v10099_v6 = vld [vmem:[#allocation7 + $0x24] sm:$0xf] }
 0x3b3   :  { %v3202_v3 = vadd.f32 %v3201_v8, %v3188_v39  ;;  %v10151_v39 = vld [vmem:[#allocation7 + $0x1c4] sm:$0xf] }
 0x3b4   :  { %v3228_v61 = vadd.f32 %v3227_v1, %v3214_v17  ;;  %4107 = vmatpush.bf16.msrb.mxu0 %v8439_v42  ;;  %4131 = vmatpush.bf16.msrb.mxu2 %v8727_v36  ;;  %v10119_v1 = vld [vmem:[#allocation7 + $0xc4] sm:$0xf]  ;;  %v8651_v55 = vor.u32 %v10151_v39, %v8648_v13  ;;  %v10169_v17 = vld [vmem:[#allocation7 + $0x24c] sm:$0xf0]  ;;  %v8443_v42 = vor.u32 %v10099_v6, %v8440_v56  ;;  %v8552_v36 = vld [vmem:[#allocation7 + $0x110] sm:$0xf0] }
 0x3b5   :  { %v8523_v27 = vor.u32 %v10119_v1, %v8520_v49  ;;  %v10147_v8 = vld [vmem:[#allocation7 + $0x1a4] sm:$0xf]  ;;  %v8555_v7 = vor.u32 %v10127_v5, %v8552_v36  ;;  %v8542_v1 = vld [vmem:[#allocation7 + $0xe8] sm:$0xf]  ;;  %v10126_v49 = vld [vmem:[#allocation7 + $0xf4] sm:$0xf0]  ;;  %v8699_v5 = vor.u32 %v10163_v44, %v8696_v4 }
 0x3b6   :  { %4167 = vmatpush.bf16.msrb.mxu1 %v8651_v55  ;;  %v8635_v2 = vor.u32 %v10147_v8, %v8632_v29  ;;  %v8527_v29 = vor.u32 %v10122_v54, %v8526_v23  ;;  %v10167_v6 = vld [vmem:[#allocation7 + $0x244] sm:$0xf]  ;;  %v8712_v56 = vld [vmem:[#allocation7 + $0x250] sm:$0xf0]  ;;  %v10098_v54 = vld [vmem:[#allocation7 + $0x14] sm:$0xf0] }
 0x3b7   :  { %v8920_v44 = vld [vmem:[#allocation7 + $0x3f0] sm:$0xf0]  ;;  %v10108_v4 = vld [vmem:[#allocation7 + $0x6c] sm:$0xf] }
 0x3b8   :  { %4108 = vmatpush.bf16.msrb.mxu0 %v8423_v57  ;;  %v8763_v57 = vor.u32 %v10179_v34, %v8760_v9  ;;  %v8606_v34 = vld [vmem:[#allocation7 + $0x168] sm:$0xf]  ;;  %v10142_v9 = vld [vmem:[#allocation7 + $0x174] sm:$0xf0] }
 0x3b9   :  { %v3215_v20 = vpop.f32.mrf.mxu1 }
 0x3ba   :  { %v3216_v62 = vadd.f32 %v3215_v20, %v3202_v3  ;;  %v8488_v20 = vld [vmem:[#allocation7 + $0x90] sm:$0xf0]  ;;  %4168 = vmatpush.bf16.msrb.mxu1 %v8635_v2  ;;  %v10118_v2 = vld [vmem:[#allocation7 + $0xb4] sm:$0xf0] }
 0x3bb   :  { %v8491_v3 = vor.u32 %v10111_v22, %v8488_v20  ;;  %v8670_v22 = vld [vmem:[#allocation7 + $0x1e8] sm:$0xf] }
 0x3bc   :  { %v3230_v41 = vadd.f32 %v3229_v40, %v3216_v62  ;;  %4153 = vmatpush.bf16.msra.mxu0 %v8539_v58  ;;  %v8695_v62 = vor.u32 %v10165_v32, %v8694_v35  ;;  %v8584_v40 = vld [vmem:[#allocation7 + $0x150] sm:$0xf0]  ;;  %v10154_v32 = vld [vmem:[#allocation7 + $0x1d4] sm:$0xf0] }
 0x3bd   :  { %v8587_v14 = vor.u32 %v10135_v25, %v8584_v40  ;;  %v8744_v58 = vld [vmem:[#allocation7 + $0x290] sm:$0xf0]  ;;  %v10150_v25 = vld [vmem:[#allocation7 + $0x1b4] sm:$0xf0] }
 0x3be   :  { %v8747_v33 = vor.u32 %v10175_v50, %v8744_v58  ;;  %v8680_v50 = vld [vmem:[#allocation7 + $0x210] sm:$0xf0] }
 0x3c0   :  { %4154 = vmatpush.bf16.msra.mxu0 %v8523_v27  ;;  %v8543_v27 = vor.u32 %v10126_v49, %v8542_v1  ;;  %v8870_v1 = vld [vmem:[#allocation7 + $0x380] sm:$0xf]  ;;  %v10209_v49 = vld [vmem:[#allocation7 + $0x38c] sm:$0xf0] }
 0x3c1   :  { %v8871_v23 = vor.u32 %v10209_v49, %v8870_v1  ;;  %v8798_v49 = vld [vmem:[#allocation7 + $0x2e8] sm:$0xf] }
 0x3c4   :  { %4155 = vmatpush.bf16.msra.mxu0 %v8507_v48  ;;  %v8510_v48 = vld [vmem:[#allocation7 + $0xa8] sm:$0xf] }
 0x3c5   :  { %v8511_v20 = vor.u32 %v10118_v2, %v8510_v48  ;;  %v8544_v48 = vld [vmem:[#allocation7 + $0xf8] sm:$0xf0] }
 0x3c8   :  { %v3241_v24 = vpop.f32.mrf.mxu3  ;;  %4156 = vmatpush.bf16.msra.mxu0 %v8491_v3 }
 0x3c9   :  { %v3242_v52 = vadd.f32 %v3241_v24, %v3228_v61  ;;  %v10143_v24 = vld [vmem:[#allocation7 + $0x184] sm:$0xf]  ;;  %v8456_v61 = vld [vmem:[#allocation7 + $0x50] sm:$0xf0] }
 0x3ca   :  { %v8619_v19 = vor.u32 %v10143_v24, %v8616_v21  ;;  %v8459_v15 = vor.u32 %v10103_v11, %v8456_v61  ;;  %v10158_v24 = vld [vmem:[#allocation7 + $0x1f4] sm:$0xf0]  ;;  %v8494_v21 = vld [vmem:[#allocation7 + $0x88] sm:$0xf] }
 0x3cb   :  { %v3249_v28 = vmax.f32 %v3242_v52, 0.0  ;;  %v8568_v52 = vld [vmem:[#allocation7 + $0x130] sm:$0xf0]  ;;  %v8671_v3 = vor.u32 %v10158_v24, %v8670_v22  ;;  %v8638_v61 = vld [vmem:[#allocation7 + $0x1a8] sm:$0xf] }
 0x3cc   :  { %4169 = vmatpush.bf16.msrb.mxu1 %v8619_v19  ;;  %4157 = vmatpush.bf16.msra.mxu0 %v8475_v60  ;;  %v8571_v43 = vor.u32 %v10131_v18, %v8568_v52  ;;  %v8654_v19 = vld [vmem:[#allocation7 + $0x1c8] sm:$0xf]  ;;  %v10221_v60 = vld [vmem:[#allocation7 + $0x3ec] sm:$0xf0]  ;;  %v8902_v18 = vld [vmem:[#allocation7 + $0x3c0] sm:$0xf]  ;;  %v8715_v52 = vor.u32 %v10167_v6, %v8712_v56 }
 0x3cd   :  { %v8655_v11 = vor.u32 %v10154_v32, %v8654_v19  ;;  %v8854_v24 = vld [vmem:[#allocation7 + $0x360] sm:$0xf]  ;;  %v8558_v32 = vld [vmem:[#allocation7 + $0x108] sm:$0xf] }
 0x3d0   :  { %v3243_v30 = vpop.f32.mrf.mxu3  ;;  %4170 = vmatpush.bf16.msrb.mxu1 %v8603_v16  ;;  %4158 = vmatpush.bf16.msra.mxu0 %v8459_v15  ;;  %v8478_v16 = vld [vmem:[#allocation7 + $0x68] sm:$0xf]  ;;  %v10110_v15 = vld [vmem:[#allocation7 + $0x74] sm:$0xf0] }
 0x3d1   :  { %v3244_v63 = vadd.f32 %v3243_v30, %v3230_v41  ;;  %v8678_v41 = vld [vmem:[#allocation7 + $0x200] sm:$0xf]  ;;  %v8792_v30 = vld [vmem:[#allocation7 + $0x2f0] sm:$0xf0] }
 0x3d2   :  { %v8679_v38 = vor.u32 %v10161_v37, %v8678_v41  ;;  %v10217_v41 = vld [vmem:[#allocation7 + $0x3cc] sm:$0xf0]  ;;  %v8462_v37 = vld [vmem:[#allocation7 + $0x48] sm:$0xf] }
 0x3d3   :  { %v3253_v53 = vmax.f32 %v3244_v63, 0.0  ;;  %v8795_v63 = vor.u32 %v10187_v47, %v8792_v30  ;;  %v8903_v47 = vor.u32 %v10217_v41, %v8902_v18  ;;  %v8639_v30 = vor.u32 %v10150_v25, %v8638_v61  ;;  %v8672_v61 = vld [vmem:[#allocation7 + $0x1f8] sm:$0xf0]  ;;  %v10112_v18 = vld [vmem:[#allocation7 + $0x8c] sm:$0xf] }
 0x3d4   :  { %4171 = vmatpush.bf16.msrb.mxu1 %v8587_v14  ;;  %4159 = vmatpush.bf16.msra.mxu0 %v8443_v42  ;;  %v8479_v14 = vor.u32 %v10110_v15, %v8478_v16  ;;  %v8512_v16 = vld [vmem:[#allocation7 + $0xb8] sm:$0xf0]  ;;  %v8822_v15 = vld [vmem:[#allocation7 + $0x320] sm:$0xf]  ;;  %v10152_v41 = vld [vmem:[#allocation7 + $0x1cc] sm:$0xf] }
 0x3d5   :  { %v3259_v10 = vpack.c.bf16 %v3253_v53, %v3249_v28  ;;  %v10183_v28 = vld [vmem:[#allocation7 + $0x2c4] sm:$0xf]  ;;  %v8776_v53 = vld [vmem:[#allocation7 + $0x2d0] sm:$0xf0] }
 0x3d6   :  { %v8779_v46 = vor.u32 %v10183_v28, %v8776_v53  ;;  %v8886_v28 = vld [vmem:[#allocation7 + $0x3a0] sm:$0xf]  ;;  %v10213_v53 = vld [vmem:[#allocation7 + $0x3ac] sm:$0xf0] }
 0x3d7   :  { %3318 = vmatpush.bf16.msra.mxu3 %v3259_v10 }
 0x3d8   :  { %4172 = vmatpush.bf16.msrb.mxu1 %v8571_v43  ;;  %4160 = vmatpush.bf16.msra.mxu0 %v8427_v0  ;;  %v10146_v43 = vld [vmem:[#allocation7 + $0x194] sm:$0xf0]  ;;  %v8887_v0 = vor.u32 %v10213_v53, %v8886_v28  ;;  %v8480_v53 = vld [vmem:[#allocation7 + $0x78] sm:$0xf0] }
 0x3da   :  { %8419 = vmatmul.msk.bf16.vlgmr.msra.gmra.mxu3 %vm3265_vm2, %v11265_v12  ;;  %v8711_v12 = vor.u32 %v10169_v17, %v8710_v45  ;;  %v10114_v45 = vld [vmem:[#allocation7 + $0x94] sm:$0xf0] }
 0x3db   :  { %v8495_v51 = vor.u32 %v10114_v45, %v8494_v21  ;;  %v10205_v21 = vld [vmem:[#allocation7 + $0x36c] sm:$0xf0]  ;;  %v10134_v45 = vld [vmem:[#allocation7 + $0x134] sm:$0xf0] }
 0x3dc   :  { %4132 = vmatpush.bf16.msrb.mxu2 %v8711_v12  ;;  %4173 = vmatpush.bf16.msrb.mxu1 %v8555_v7  ;;  %v10102_v7 = vld [vmem:[#allocation7 + $0x34] sm:$0xf0] }
 0x3df   :  { %v3278_v10 = vpop.f32.mrf.mxu0 }
 0x3e0   :  { %4133 = vmatpush.bf16.msrb.mxu2 %v8695_v62  ;;  %v8918_v62 = vld [vmem:[#allocation7 + $0x3e0] sm:$0xf] }
 0x3e1   :  { %v8919_v40 = vor.u32 %v10221_v60, %v8918_v62  ;;  %v8839_v62 = vor.u32 %v10201_v26, %v8838_v59  ;;  %v10116_v60 = vld [vmem:[#allocation7 + $0xac] sm:$0xf]  ;;  %v8592_v26 = vld [vmem:[#allocation7 + $0x158] sm:$0xf0] }
 0x3e2   :  { %v8515_v25 = vor.u32 %v10116_v60, %v8512_v16  ;;  %v10136_v59 = vld [vmem:[#allocation7 + $0x14c] sm:$0xf] }
 0x3e3   :  { %4140 = vmatpush.bf16.msrb.mxu3 %v8919_v40 }
 0x3e4   :  { %4134 = vmatpush.bf16.msrb.mxu2 %v8679_v38  ;;  %v10106_v38 = vld [vmem:[#allocation7 + $0x54] sm:$0xf0] }
 0x3e5   :  { %v8463_v42 = vor.u32 %v10106_v38, %v8462_v37  ;;  %v8656_v37 = vld [vmem:[#allocation7 + $0x1d8] sm:$0xf0] }
 0x3e7   :  { %v3280_v39 = vpop.f32.mrf.mxu0  ;;  %4141 = vmatpush.bf16.msrb.mxu3 %v8903_v47  ;;  %v8806_v47 = vld [vmem:[#allocation7 + $0x300] sm:$0xf] }
 0x3e8   :  { %4179 = vmatpush.bf16.msra.mxu2 %v8795_v63  ;;  %v3325_v13 = vmax.f32 %v3278_v10, %v3280_v39  ;;  %v8622_v63 = vld [vmem:[#allocation7 + $0x188] sm:$0xf] }
 0x3e9   :  { %v8623_v36 = vor.u32 %v10146_v43, %v8622_v63  ;;  %v8430_v39 = vld [vmem:[#allocation7 + $0x8] sm:$0xf]  ;;  %v8659_v63 = vor.u32 %v10152_v41, %v8656_v37  ;;  %v10219_v43 = vld [vmem:[#allocation7 + $0x3e4] sm:$0xf] }
 0x3ea   :  { %v11277_v55 = vpack.c.bf16 %v3325_v13, %v3325_v13  ;;  %v8590_v13 = vld [vmem:[#allocation7 + $0x148] sm:$0xf]  ;;  %v8923_v28 = vor.u32 %v10219_v43, %v8920_v44  ;;  %v10199_v37 = vld [vmem:[#allocation7 + $0x344] sm:$0xf] }
 0x3eb   :  { %4142 = vmatpush.bf16.msrb.mxu3 %v8887_v0  ;;  %v10215_v0 = vld [vmem:[#allocation7 + $0x3c4] sm:$0xf] }
 0x3ec   :  { %4180 = vmatpush.bf16.msra.mxu2 %v8779_v46  ;;  %4109 = vmatmul.bf16.vlgmr.msrb.gmra.mxu0 %v11277_v55  ;;  %v8446_v46 = vld [vmem:[#allocation7 + $0x28] sm:$0xf] }
 0x3ed   :  { %4205 = vmatpush.bf16.msrb.mxu0 %v8543_v27  ;;  %v8447_v10 = vor.u32 %v10102_v7, %v8446_v46  ;;  %v10138_v27 = vld [vmem:[#allocation7 + $0x154] sm:$0xf0]  ;;  %v8904_v7 = vld [vmem:[#allocation7 + $0x3d0] sm:$0xf0] }
 0x3ee   :  { %v8591_v22 = vor.u32 %v10138_v27, %v8590_v13  ;;  %v10211_v27 = vld [vmem:[#allocation7 + $0x3a4] sm:$0xf] }
 0x3ef   :  { %4143 = vmatpush.bf16.msrb.mxu3 %v8871_v23  ;;  %v8888_v23 = vld [vmem:[#allocation7 + $0x3b0] sm:$0xf0] }
 0x3f0   :  { %4181 = vmatpush.bf16.msra.mxu2 %v8763_v57  ;;  %v10159_v57 = vld [vmem:[#allocation7 + $0x204] sm:$0xf] }
 0x3f1   :  { %4206 = vmatpush.bf16.msrb.mxu0 %v8527_v29  ;;  %v8683_v58 = vor.u32 %v10159_v57, %v8680_v50  ;;  %v10124_v29 = vld [vmem:[#allocation7 + $0xec] sm:$0xf]  ;;  %v8624_v50 = vld [vmem:[#allocation7 + $0x198] sm:$0xf0] }
 0x3f2   :  { %v8547_v2 = vor.u32 %v10124_v29, %v8544_v48  ;;  %v10144_v57 = vld [vmem:[#allocation7 + $0x18c] sm:$0xf]  ;;  %v8608_v29 = vld [vmem:[#allocation7 + $0x178] sm:$0xf0]  ;;  %v8891_v48 = vor.u32 %v10211_v27, %v8888_v23 }
 0x3f3   :  { %v8627_v13 = vor.u32 %v10144_v57, %v8624_v50  ;;  %v8702_v57 = vld [vmem:[#allocation7 + $0x228] sm:$0xf]  ;;  %v10166_v50 = vld [vmem:[#allocation7 + $0x234] sm:$0xf0]  ;;  %v10184_v23 = vld [vmem:[#allocation7 + $0x2cc] sm:$0xf] }
 0x3f4   :  { %4182 = vmatpush.bf16.msra.mxu2 %v8747_v33  ;;  %v8607_v33 = vor.u32 %v10142_v9, %v8606_v34  ;;  %v8483_v34 = vor.u32 %v10108_v4, %v8480_v53  ;;  %v10195_v4 = vld [vmem:[#allocation7 + $0x324] sm:$0xf] }
 0x3f5   :  { %4207 = vmatpush.bf16.msrb.mxu0 %v8511_v20  ;;  %v8574_v20 = vld [vmem:[#allocation7 + $0x128] sm:$0xf] }
 0x3f7   :  { %v3292_v8 = vpop.f32.mrf.mxu1 }
 0x3f8   :  { %4183 = vmatpush.bf16.msra.mxu2 %v8731_v31  ;;  %v10130_v31 = vld [vmem:[#allocation7 + $0x114] sm:$0xf0] }
 0x3f9   :  { %4208 = vmatpush.bf16.msrb.mxu0 %v8495_v51  ;;  %v8575_v51 = vor.u32 %v10134_v45, %v8574_v20  ;;  %v8559_v40 = vor.u32 %v10130_v31, %v8558_v32  ;;  %v10186_v45 = vld [vmem:[#allocation7 + $0x2d4] sm:$0xf0] }
 0x3fc   :  { %4161 = vmatmul.bf16.vlgmr.msra.gmra.mxu0 %v11277_v55  ;;  %4184 = vmatpush.bf16.msra.mxu2 %v8715_v52  ;;  %v8496_v52 = vld [vmem:[#allocation7 + $0x98] sm:$0xf0] }
 0x3fd   :  { %4209 = vmatpush.bf16.msrb.mxu0 %v8479_v14  ;;  %v10197_v14 = vld [vmem:[#allocation7 + $0x32c] sm:$0xf0]  ;;  %v8499_v38 = vor.u32 %v10112_v18, %v8496_v52  ;;  %v8750_v52 = vld [vmem:[#allocation7 + $0x288] sm:$0xf] }
 0x3fe   :  { %v8823_v56 = vor.u32 %v10197_v14, %v8822_v15  ;;  %v10182_v15 = vld [vmem:[#allocation7 + $0x2b4] sm:$0xf0]  ;;  %v10132_v14 = vld [vmem:[#allocation7 + $0x12c] sm:$0xf] }
 0x3ff   :  { %v3294_v17 = vpop.f32.mrf.mxu1 }
 0x400   :  { %v3326_v12 = vmax.f32 %v3292_v8, %v3294_v17  ;;  %4185 = vmatpush.bf16.msra.mxu2 %v8699_v5  ;;  %v8431_v8 = vor.u32 %v10098_v54, %v8430_v39  ;;  %v8855_v17 = vor.u32 %v10205_v21, %v8854_v24  ;;  %v10148_v5 = vld [vmem:[#allocation7 + $0x1ac] sm:$0xf]  ;;  %v10190_v39 = vld [vmem:[#allocation7 + $0x2f4] sm:$0xf0]  ;;  %v8782_v21 = vld [vmem:[#allocation7 + $0x2c8] sm:$0xf] }
 0x401   :  { %4210 = vmatpush.bf16.msrb.mxu0 %v8463_v42  ;;  %v10100_v54 = vld [vmem:[#allocation7 + $0x2c] sm:$0xf]  ;;  %v8783_v16 = vor.u32 %v10186_v45, %v8782_v21  ;;  %v8736_v45 = vld [vmem:[#allocation7 + $0x278] sm:$0xf0] }
 0x402   :  { %v11280_v35 = vpack.c.bf16 %v3326_v12, %v3326_v12  ;;  %v10120_v12 = vld [vmem:[#allocation7 + $0xcc] sm:$0xf]  ;;  %4144 = vmatpush.bf16.msrb.mxu3 %v8855_v17  ;;  %v8799_v17 = vor.u32 %v10190_v39, %v8798_v49  ;;  %v8800_v39 = vld [vmem:[#allocation7 + $0x2f8] sm:$0xf0] }
 0x403   :  { %v10188_v49 = vld [vmem:[#allocation7 + $0x2ec] sm:$0xf] }
 0x404   :  { %4122 = vmatmul.bf16.vlgmr.msra.gmra.mxu1 %v11280_v35  ;;  %4186 = vmatpush.bf16.msra.mxu2 %v8683_v58  ;;  %v8907_v58 = vor.u32 %v10215_v0, %v8904_v7  ;;  %v8718_v0 = vld [vmem:[#allocation7 + $0x248] sm:$0xf]  ;;  %v10170_v7 = vld [vmem:[#allocation7 + $0x254] sm:$0xf0]  ;;  %v8803_v27 = vor.u32 %v10188_v49, %v8800_v39  ;;  %v10172_v21 = vld [vmem:[#allocation7 + $0x26c] sm:$0xf] }
 0x405   :  { %4218 = vmatpush.bf16.msra.mxu1 %v8671_v3  ;;  %4211 = vmatpush.bf16.msrb.mxu0 %v8447_v10  ;;  %v8528_v3 = vld [vmem:[#allocation7 + $0xd8] sm:$0xf0]  ;;  %v10104_v10 = vld [vmem:[#allocation7 + $0x4c] sm:$0xf] }
 0x406   :  { %v8531_v19 = vor.u32 %v10120_v12, %v8528_v3  ;;  %4145 = vmatpush.bf16.msrb.mxu3 %v8839_v62  ;;  %v10207_v3 = vld [vmem:[#allocation7 + $0x384] sm:$0xf]  ;;  %v8432_v62 = vld [vmem:[#allocation7 + $0x18] sm:$0xf0]  ;;  %v10208_v39 = vld [vmem:[#allocation7 + $0x38c] sm:$0xf] }
 0x409   :  { %4219 = vmatpush.bf16.msra.mxu1 %v8655_v11  ;;  %4212 = vmatpush.bf16.msrb.mxu0 %v8431_v8  ;;  %v10156_v11 = vld [vmem:[#allocation7 + $0x1ec] sm:$0xf] }
 0x40a   :  { %v8675_v6 = vor.u32 %v10156_v11, %v8672_v61  ;;  %4146 = vmatpush.bf16.msrb.mxu3 %v8823_v56  ;;  %v10140_v8 = vld [vmem:[#allocation7 + $0x16c] sm:$0xf]  ;;  %v8766_v11 = vld [vmem:[#allocation7 + $0x2a8] sm:$0xf]  ;;  %v8595_v61 = vor.u32 %v10136_v59, %v8592_v26  ;;  %v8720_v59 = vld [vmem:[#allocation7 + $0x258] sm:$0xf0] }
 0x40b   :  { %v8611_v12 = vor.u32 %v10140_v8, %v8608_v29  ;;  %v8767_v18 = vor.u32 %v10182_v15, %v8766_v11  ;;  %v8768_v29 = vld [vmem:[#allocation7 + $0x2b8] sm:$0xf0]  ;;  %v10218_v11 = vld [vmem:[#allocation7 + $0x3d4] sm:$0xf0] }
 0x40c   :  { %4213 = vmatmul.bf16.vlgmr.msrb.gmra.mxu0 %v11277_v55 }
 0x40d   :  { %4220 = vmatpush.bf16.msra.mxu1 %v8639_v30  ;;  %4257 = vmatpush.bf16.msra.mxu0 %v8547_v2  ;;  %v10193_v30 = vld [vmem:[#allocation7 + $0x30c] sm:$0xf0]  ;;  %v8448_v2 = vld [vmem:[#allocation7 + $0x38] sm:$0xf0] }
 0x40e   :  { %v8807_v42 = vor.u32 %v10193_v30, %v8806_v47  ;;  %v8451_v20 = vor.u32 %v10100_v54, %v8448_v2  ;;  %v10178_v47 = vld [vmem:[#allocation7 + $0x294] sm:$0xf0]  ;;  %v10128_v30 = vld [vmem:[#allocation7 + $0x10c] sm:$0xf]  ;;  %v8784_v54 = vld [vmem:[#allocation7 + $0x2d8] sm:$0xf0] }
 0x40f   :  { %v8751_v43 = vor.u32 %v10178_v47, %v8750_v52  ;;  %v8787_v8 = vor.u32 %v10184_v23, %v8784_v54  ;;  %v10204_v54 = vld [vmem:[#allocation7 + $0x36c] sm:$0xf] }
 0x410   :  { %4147 = vmatpush.bf16.msrb.mxu3 %v8807_v42 }
 0x411   :  { %4221 = vmatpush.bf16.msra.mxu1 %v8623_v36  ;;  %4258 = vmatpush.bf16.msra.mxu0 %v8531_v19  ;;  %v8640_v36 = vld [vmem:[#allocation7 + $0x1b8] sm:$0xf0]  ;;  %v8872_v19 = vld [vmem:[#allocation7 + $0x390] sm:$0xf0] }
 0x412   :  { %v8643_v9 = vor.u32 %v10148_v5, %v8640_v36  ;;  %v8875_v31 = vor.u32 %v10207_v3, %v8872_v19  ;;  %v8824_v5 = vld [vmem:[#allocation7 + $0x330] sm:$0xf0]  ;;  %v8734_v36 = vld [vmem:[#allocation7 + $0x268] sm:$0xf]  ;;  %v10222_v3 = vld [vmem:[#allocation7 + $0x3f4] sm:$0xf0] }
 0x413   :  { %v8827_v53 = vor.u32 %v10195_v4, %v8824_v5  ;;  %v8830_v5 = vld [vmem:[#allocation7 + $0x328] sm:$0xf] }
 0x414   :  { %4174 = vmatmul.bf16.vlgmr.msrb.gmra.mxu1 %v11280_v35  ;;  %4192 = vmatpush.bf16.msra.mxu3 %v8923_v28  ;;  %v10174_v28 = vld [vmem:[#allocation7 + $0x274] sm:$0xf0] }
 0x415   :  { %4222 = vmatpush.bf16.msra.mxu1 %v8607_v33  ;;  %4259 = vmatpush.bf16.msra.mxu0 %v8515_v25  ;;  %v8464_v33 = vld [vmem:[#allocation7 + $0x58] sm:$0xf0]  ;;  %v10203_v25 = vld [vmem:[#allocation7 + $0x364] sm:$0xf] }
 0x416   :  { %v8467_v1 = vor.u32 %v10104_v10, %v8464_v33  ;;  %v8719_v10 = vor.u32 %v10170_v7, %v8718_v0  ;;  %v8686_v33 = vld [vmem:[#allocation7 + $0x208] sm:$0xf] }
 0x418   :  { %4193 = vmatpush.bf16.msra.mxu3 %v8907_v58  ;;  %v8703_v58 = vor.u32 %v10166_v50, %v8702_v57  ;;  %v10212_v50 = vld [vmem:[#allocation7 + $0x3ac] sm:$0xf] }
 0x419   :  { %4223 = vmatpush.bf16.msra.mxu1 %v8591_v22  ;;  %4260 = vmatpush.bf16.msra.mxu0 %v8499_v38  ;;  %v8840_v38 = vld [vmem:[#allocation7 + $0x350] sm:$0xf0] }
 0x41a   :  { %v8843_v42 = vor.u32 %v10199_v37, %v8840_v38  ;;  %v8878_v37 = vld [vmem:[#allocation7 + $0x388] sm:$0xf]  ;;  %v10210_v38 = vld [vmem:[#allocation7 + $0x394] sm:$0xf0] }
 0x41b   :  { %v8879_v47 = vor.u32 %v10210_v38, %v8878_v37  ;;  %v9048_v37 = vld [vmem:[#allocation8 + $0xf0] sm:$0xf0]  ;;  %v9030_v38 = vld [vmem:[#allocation8 + $0xc0] sm:$0xf] }
 0x41c   :  { %4194 = vmatpush.bf16.msra.mxu3 %v8891_v48 }
 0x41d   :  { %4224 = vmatpush.bf16.msra.mxu1 %v8575_v51  ;;  %4261 = vmatpush.bf16.msra.mxu0 %v8483_v34  ;;  %v10096_v51 = vld [vmem:[#allocation7 + $0xc] sm:$0xf]  ;;  %v10191_v34 = vld [vmem:[#allocation7 + $0x304] sm:$0xf] }
 0x41e   :  { %v8435_v60 = vor.u32 %v10096_v51, %v8432_v62  ;;  %v10168_v51 = vld [vmem:[#allocation7 + $0x24c] sm:$0xf] }
 0x420   :  { %4195 = vmatpush.bf16.msra.mxu3 %v8875_v31 }
 0x421   :  { %4225 = vmatpush.bf16.msra.mxu1 %v8559_v40  ;;  %4262 = vmatpush.bf16.msra.mxu0 %v8467_v1  ;;  %v8856_v40 = vld [vmem:[#allocation7 + $0x370] sm:$0xf0]  ;;  %v10162_v1 = vld [vmem:[#allocation7 + $0x214] sm:$0xf0] }
 0x422   :  { %v8859_v56 = vor.u32 %v10203_v25, %v8856_v40  ;;  %v8704_v25 = vld [vmem:[#allocation7 + $0x238] sm:$0xf0] }
 0x424   :  { %4226 = vmatmul.bf16.vlgmr.msra.gmra.mxu1 %v11280_v35  ;;  %4196 = vmatpush.bf16.msra.mxu3 %v8859_v56  ;;  %v10160_v56 = vld [vmem:[#allocation7 + $0x20c] sm:$0xf] }
 0x425   :  { %4270 = vmatpush.bf16.msrb.mxu1 %v8675_v6  ;;  %4263 = vmatpush.bf16.msra.mxu0 %v8451_v20  ;;  %v8576_v6 = vld [vmem:[#allocation7 + $0x138] sm:$0xf0] }
 0x426   :  { %v3306_v46 = vpop.f32.mrf.mxu2  ;;  %v8579_v41 = vor.u32 %v10132_v14, %v8576_v6  ;;  %v8752_v20 = vld [vmem:[#allocation7 + $0x298] sm:$0xf0]  ;;  %v8894_v14 = vld [vmem:[#allocation7 + $0x3a8] sm:$0xf]  ;;  %v10214_v6 = vld [vmem:[#allocation7 + $0x3b4] sm:$0xf0] }
 0x427   :  { %v8895_v52 = vor.u32 %v10214_v6, %v8894_v14 }
 0x428   :  { %4197 = vmatpush.bf16.msra.mxu3 %v8843_v42 }
 0x429   :  { %4271 = vmatpush.bf16.msrb.mxu1 %v8659_v63  ;;  %4264 = vmatpush.bf16.msra.mxu0 %v8435_v60  ;;  %v8560_v63 = vld [vmem:[#allocation7 + $0x118] sm:$0xf0]  ;;  %v8723_v60 = vor.u32 %v10168_v51, %v8720_v59 }
 0x42a   :  { %v8563_v44 = vor.u32 %v10128_v30, %v8560_v63  ;;  %v8862_v30 = vld [vmem:[#allocation7 + $0x368] sm:$0xf]  ;;  %v10206_v63 = vld [vmem:[#allocation7 + $0x374] sm:$0xf0] }
 0x42b   :  { %v8863_v42 = vor.u32 %v10206_v63, %v8862_v30  ;;  %v10247_v63 = vld [vmem:[#allocation8 + $0xc4] sm:$0xf] }
 0x42c   :  { %4265 = vmatmul.bf16.vlgmr.msra.gmra.mxu0 %v11277_v55  ;;  %4198 = vmatpush.bf16.msra.mxu3 %v8827_v53  ;;  %v8814_v53 = vld [vmem:[#allocation7 + $0x308] sm:$0xf] }
 0x42d   :  { %4272 = vmatpush.bf16.msrb.mxu1 %v8643_v9  ;;  %v8808_v9 = vld [vmem:[#allocation7 + $0x310] sm:$0xf0] }
 0x42e   :  { %v3308_v22 = vpop.f32.mrf.mxu2  ;;  %v8811_v55 = vor.u32 %v10191_v34, %v8808_v9  ;;  %v10220_v34 = vld [vmem:[#allocation7 + $0x3ec] sm:$0xf]  ;;  %v8928_v9 = vld [vmem:[#allocation7 + $0x3f8] sm:$0xf0] }
 0x42f   :  { %v3327_v24 = vmax.f32 %v3306_v46, %v3308_v22  ;;  %v8735_v46 = vor.u32 %v10174_v28, %v8734_v36  ;;  %v10176_v22 = vld [vmem:[#allocation7 + $0x28c] sm:$0xf]  ;;  %v10198_v36 = vld [vmem:[#allocation7 + $0x334] sm:$0xf0]  ;;  %v8931_v7 = vor.u32 %v10220_v34, %v8928_v9 }
 0x430   :  { %4199 = vmatpush.bf16.msra.mxu3 %v8811_v55  ;;  %v8831_v28 = vor.u32 %v10198_v36, %v8830_v5  ;;  %v10216_v55 = vld [vmem:[#allocation7 + $0x3cc] sm:$0xf] }
 0x431   :  { %4273 = vmatpush.bf16.msrb.mxu1 %v8627_v13  ;;  %v11287_v32 = vpack.c.bf16 %v3327_v24, %v3327_v24  ;;  %v8687_v13 = vor.u32 %v10162_v1, %v8686_v33  ;;  %v8755_v24 = vor.u32 %v10176_v22, %v8752_v20 }
 0x433   :  { %4135 = vmatmul.bf16.vlgmr.msrb.gmra.mxu2 %v11287_v32 }
 0x434   :  { %4231 = vmatpush.bf16.msrb.mxu2 %v8799_v17  ;;  %v8739_v17 = vor.u32 %v10172_v21, %v8736_v45  ;;  %v8832_v21 = vld [vmem:[#allocation7 + $0x338] sm:$0xf0] }
 0x435   :  { %4274 = vmatpush.bf16.msrb.mxu1 %v8611_v12  ;;  %v8926_v12 = vld [vmem:[#allocation7 + $0x3e8] sm:$0xf] }
 0x436   :  { %v8927_v31 = vor.u32 %v10222_v3, %v8926_v12  ;;  %v10192_v3 = vld [vmem:[#allocation7 + $0x30c] sm:$0xf] }
 0x438   :  { %4232 = vmatpush.bf16.msrb.mxu2 %v8783_v16  ;;  %v8910_v16 = vld [vmem:[#allocation7 + $0x3c8] sm:$0xf] }
 0x439   :  { %4275 = vmatpush.bf16.msrb.mxu1 %v8595_v61  ;;  %v10164_v61 = vld [vmem:[#allocation7 + $0x22c] sm:$0xf]  ;;  %v8911_v40 = vor.u32 %v10218_v11, %v8910_v16 }
 0x43a   :  { %v8707_v15 = vor.u32 %v10164_v61, %v8704_v25 }
 0x43c   :  { %4233 = vmatpush.bf16.msrb.mxu2 %v8767_v18  ;;  %v8688_v18 = vld [vmem:[#allocation7 + $0x218] sm:$0xf0] }
 0x43d   :  { %4276 = vmatpush.bf16.msrb.mxu1 %v8579_v41  ;;  %v8691_v41 = vor.u32 %v10160_v56, %v8688_v18  ;;  %v9046_v56 = vld [vmem:[#allocation8 + $0xe0] sm:$0xf]  ;;  %v10253_v18 = vld [vmem:[#allocation8 + $0xec] sm:$0xf0] }
 0x440   :  { %4234 = vmatpush.bf16.msrb.mxu2 %v8751_v43  ;;  %v8846_v43 = vld [vmem:[#allocation7 + $0x348] sm:$0xf] }
 0x441   :  { %4277 = vmatpush.bf16.msrb.mxu1 %v8563_v44  ;;  %v10202_v44 = vld [vmem:[#allocation7 + $0x354] sm:$0xf0] }
 0x442   :  { %v8847_v4 = vor.u32 %v10202_v44, %v8846_v43 }
 0x443   :  { %4187 = vmatmul.bf16.vlgmr.msra.gmra.mxu2 %v11287_v32 }
 0x444   :  { %4278 = vmatmul.bf16.vlgmr.msrb.gmra.mxu1 %v11280_v35  ;;  %4235 = vmatpush.bf16.msrb.mxu2 %v8735_v46  ;;  %v10180_v35 = vld [vmem:[#allocation7 + $0x2ac] sm:$0xf]  ;;  %v10194_v46 = vld [vmem:[#allocation7 + $0x314] sm:$0xf0] }
 0x445   :  { %v8771_v48 = vor.u32 %v10180_v35, %v8768_v29  ;;  %v8815_v0 = vor.u32 %v10194_v46, %v8814_v53  ;;  %v10245_v53 = vld [vmem:[#allocation8 + $0xac] sm:$0xf0]  ;;  %v10243_v46 = vld [vmem:[#allocation8 + $0xa4] sm:$0xf] }
 0x448   :  { %4236 = vmatpush.bf16.msrb.mxu2 %v8719_v10 }
 0x44c   :  { %4237 = vmatpush.bf16.msrb.mxu2 %v8703_v58  ;;  %v8896_v58 = vld [vmem:[#allocation7 + $0x3b8] sm:$0xf0] }
 0x44d   :  { %v8899_v49 = vor.u32 %v10212_v50, %v8896_v58 }
 0x450   :  { %4238 = vmatpush.bf16.msrb.mxu2 %v8687_v13  ;;  %v8880_v13 = vld [vmem:[#allocation7 + $0x398] sm:$0xf0] }
 0x451   :  { %v8883_v23 = vor.u32 %v10208_v39, %v8880_v13  ;;  %v10235_v39 = vld [vmem:[#allocation8 + $0x64] sm:$0xf] }
 0x453   :  { %4239 = vmatmul.bf16.vlgmr.msrb.gmra.mxu2 %v11287_v32 }
 0x454   :  { %4283 = vmatpush.bf16.msra.mxu2 %v8803_v27 }
 0x458   :  { %4284 = vmatpush.bf16.msra.mxu2 %v8787_v8  ;;  %v8864_v8 = vld [vmem:[#allocation7 + $0x378] sm:$0xf0] }
 0x459   :  { %v8867_v29 = vor.u32 %v10204_v54, %v8864_v8  ;;  %v8966_v54 = vld [vmem:[#allocation8 + $0x40] sm:$0xf]  ;;  %v10233_v8 = vld [vmem:[#allocation8 + $0x4c] sm:$0xf0] }
 0x45c   :  { %4285 = vmatpush.bf16.msra.mxu2 %v8771_v48  ;;  %v10200_v48 = vld [vmem:[#allocation7 + $0x34c] sm:$0xf] }
 0x45d   :  { %v3320_v2 = vpop.f32.mrf.mxu3 }
 0x460   :  { %4286 = vmatpush.bf16.msra.mxu2 %v8755_v24  ;;  %v10196_v24 = vld [vmem:[#allocation7 + $0x32c] sm:$0xf] }
 0x461   :  { %v8835_v12 = vor.u32 %v10196_v24, %v8832_v21  ;;  %v10229_v24 = vld [vmem:[#allocation8 + $0x2c] sm:$0xf0]  ;;  %v10227_v21 = vld [vmem:[#allocation8 + $0x24] sm:$0xf] }
 0x464   :  { %4287 = vmatpush.bf16.msra.mxu2 %v8739_v17 }
 0x465   :  { %v3322_v19 = vpop.f32.mrf.mxu3 }
 0x466   :  { %v3328_v26 = vmax.f32 %v3320_v2, %v3322_v19  ;;  %v8848_v2 = vld [vmem:[#allocation7 + $0x358] sm:$0xf0] }
 0x467   :  { %v8851_v20 = vor.u32 %v10200_v48, %v8848_v2  ;;  %v8816_v19 = vld [vmem:[#allocation7 + $0x318] sm:$0xf0]  ;;  %v8968_v48 = vld [vmem:[#allocation8 + $0x50] sm:$0xf0] }
 0x468   :  { %v11294_v62 = vpack.c.bf16 %v3328_v26, %v3328_v26  ;;  %4288 = vmatpush.bf16.msra.mxu2 %v8723_v60  ;;  %v8819_v59 = vor.u32 %v10192_v3, %v8816_v19  ;;  %v8934_v3 = vld [vmem:[#allocation8] sm:$0xf]  ;;  %v10225_v19 = vld [vmem:[#allocation8 + $0xc] sm:$0xf0] }
 0x469   :  { %v4110_v10 = vpop.f32.mrf.mxu0 }
 0x46a   :  { %4148 = vmatmul.bf16.vlgmr.msrb.gmra.mxu3 %v11294_v62 }
 0x46b   :  { %4244 = vmatpush.bf16.msrb.mxu3 %v8927_v31 }
 0x46c   :  { %4289 = vmatpush.bf16.msra.mxu2 %v8707_v15 }
 0x46f   :  { %4245 = vmatpush.bf16.msrb.mxu3 %v8911_v40 }
 0x470   :  { %4290 = vmatpush.bf16.msra.mxu2 %v8691_v41  ;;  %v9047_v41 = vor.u32 %v10253_v18, %v9046_v56  ;;  %v10254_v18 = vld [vmem:[#allocation8 + $0xf4] sm:$0xf0] }
 0x471   :  { %v4112_v27 = vpop.f32.mrf.mxu0 }
 0x472   :  { %4707 = vmatpush.bf16.msrb.mxu0 %v9047_v41  ;;  %v8984_v27 = vld [vmem:[#allocation8 + $0x70] sm:$0xf0]  ;;  %v9056_v41 = vld [vmem:[#allocation8 + $0xf8] sm:$0xf0] }
 0x473   :  { %4246 = vmatpush.bf16.msrb.mxu3 %v8895_v52  ;;  %4291 = vmatmul.bf16.vlgmr.msra.gmra.mxu2 %v11287_v32  ;;  %v8912_v32 = vld [vmem:[#allocation7 + $0x3d8] sm:$0xf0]  ;;  %v10251_v52 = vld [vmem:[#allocation8 + $0xe4] sm:$0xf] }
 0x474   :  { %v8915_v57 = vor.u32 %v10216_v55, %v8912_v32  ;;  %v9051_v30 = vor.u32 %v10251_v52, %v9048_v37  ;;  %v10241_v55 = vld [vmem:[#allocation8 + $0x8c] sm:$0xf0]  ;;  %v10252_v52 = vld [vmem:[#allocation8 + $0xec] sm:$0xf] }
 0x476   :  { %4733 = vmatpush.bf16.msrb.mxu2 %v9051_v30  ;;  %v10279_v30 = vld [vmem:[#allocation8 + $0x1c4] sm:$0xf] }
 0x477   :  { %4247 = vmatpush.bf16.msrb.mxu3 %v8879_v47  ;;  %v10249_v47 = vld [vmem:[#allocation8 + $0xcc] sm:$0xf0] }
 0x478   :  { %v9031_v44 = vor.u32 %v10249_v47, %v9030_v38  ;;  %v9059_v38 = vor.u32 %v10252_v52, %v9056_v41  ;;  %v9158_v47 = vld [vmem:[#allocation8 + $0x1c0] sm:$0xf]  ;;  %v8974_v52 = vld [vmem:[#allocation8 + $0x48] sm:$0xf]  ;;  %v10234_v41 = vld [vmem:[#allocation8 + $0x54] sm:$0xf0] }
 0x479   :  { %v4162_v22 = vpop.f32.mrf.mxu0 }
 0x47a   :  { %4200 = vmatmul.bf16.vlgmr.msra.gmra.mxu3 %v11294_v62  ;;  %4708 = vmatpush.bf16.msrb.mxu0 %v9031_v44  ;;  %v9038_v44 = vld [vmem:[#allocation8 + $0xc8] sm:$0xf] }
 0x47b   :  { %4248 = vmatpush.bf16.msrb.mxu3 %v8863_v42  ;;  %v9032_v42 = vld [vmem:[#allocation8 + $0xd0] sm:$0xf0] }
 0x47f   :  { %4249 = vmatpush.bf16.msrb.mxu3 %v8847_v4  ;;  %v9035_v4 = vor.u32 %v10247_v63, %v9032_v42  ;;  %v9160_v42 = vld [vmem:[#allocation8 + $0x1d0] sm:$0xf0] }
 0x481   :  { %v4123_v33 = vpop.f32.mrf.mxu1  ;;  %v4164_v51 = vpop.f32.mrf.mxu0  ;;  %4734 = vmatpush.bf16.msrb.mxu2 %v9035_v4  ;;  %v10250_v4 = vld [vmem:[#allocation8 + $0xd4] sm:$0xf0] }
 0x482   :  { %v4124_v1 = vadd.f32 %v4123_v33, %v4110_v10  ;;  %v10239_v10 = vld [vmem:[#allocation8 + $0x84] sm:$0xf]  ;;  %v9174_v51 = vld [vmem:[#allocation8 + $0x1e0] sm:$0xf] }
 0x483   :  { %4250 = vmatpush.bf16.msrb.mxu3 %v8831_v28  ;;  %v9014_v28 = vld [vmem:[#allocation8 + $0xa0] sm:$0xf] }
 0x484   :  { %v9015_v9 = vor.u32 %v10245_v53, %v9014_v28  ;;  %v9039_v28 = vor.u32 %v10250_v4, %v9038_v44  ;;  %v10248_v53 = vld [vmem:[#allocation8 + $0xcc] sm:$0xf]  ;;  %v10259_v44 = vld [vmem:[#allocation8 + $0x124] sm:$0xf]  ;;  %v9080_v4 = vld [vmem:[#allocation8 + $0x130] sm:$0xf0] }
 0x486   :  { %4709 = vmatpush.bf16.msrb.mxu0 %v9015_v9 }
 0x487   :  { %4251 = vmatpush.bf16.msrb.mxu3 %v8815_v0  ;;  %v9016_v0 = vld [vmem:[#allocation8 + $0xb0] sm:$0xf0] }
 0x488   :  { %v9019_v32 = vor.u32 %v10243_v46, %v9016_v0  ;;  %v9040_v46 = vld [vmem:[#allocation8 + $0xd8] sm:$0xf0]  ;;  %v10277_v0 = vld [vmem:[#allocation8 + $0x1ac] sm:$0xf0] }
 0x489   :  { %v4125_v35 = vpop.f32.mrf.mxu1  ;;  %v4214_v31 = vpop.f32.mrf.mxu0  ;;  %v9043_v9 = vor.u32 %v10248_v53, %v9040_v46  ;;  %v10228_v53 = vld [vmem:[#allocation8 + $0x2c] sm:$0xf] }
 0x48a   :  { %4252 = vmatmul.bf16.vlgmr.msrb.gmra.mxu3 %v11294_v62  ;;  %4735 = vmatpush.bf16.msrb.mxu2 %v9019_v32  ;;  %v10231_v35 = vld [vmem:[#allocation8 + $0x44] sm:$0xf] }
 0x48b   :  { %4296 = vmatpush.bf16.msra.mxu3 %v8931_v7  ;;  %v8998_v7 = vld [vmem:[#allocation8 + $0x80] sm:$0xf]  ;;  %v8971_v2 = vor.u32 %v10231_v35, %v8968_v48  ;;  %v9006_v35 = vld [vmem:[#allocation8 + $0x88] sm:$0xf] }
 0x48c   :  { %v8999_v50 = vor.u32 %v10241_v55, %v8998_v7  ;;  %v10275_v7 = vld [vmem:[#allocation8 + $0x1a4] sm:$0xf]  ;;  %v9144_v55 = vld [vmem:[#allocation8 + $0x1b0] sm:$0xf0] }
 0x48e   :  { %4710 = vmatpush.bf16.msrb.mxu0 %v8999_v50  ;;  %v10246_v50 = vld [vmem:[#allocation8 + $0xb4] sm:$0xf0] }
 0x48f   :  { %4297 = vmatpush.bf16.msra.mxu3 %v8915_v57  ;;  %v9000_v57 = vld [vmem:[#allocation8 + $0x90] sm:$0xf0] }
 0x490   :  { %v9003_v58 = vor.u32 %v10239_v10, %v9000_v57  ;;  %v9147_v10 = vor.u32 %v10275_v7, %v9144_v55  ;;  %v9022_v57 = vld [vmem:[#allocation8 + $0xa8] sm:$0xf]  ;;  %v9083_v7 = vor.u32 %v10259_v44, %v9080_v4  ;;  %v10257_v55 = vld [vmem:[#allocation8 + $0x10c] sm:$0xf0]  ;;  %v9120_v4 = vld [vmem:[#allocation8 + $0x178] sm:$0xf0] }
 0x491   :  { %v4175_v45 = vpop.f32.mrf.mxu1  ;;  %v4216_v11 = vpop.f32.mrf.mxu0 }
 0x492   :  { %v4176_v17 = vadd.f32 %v4175_v45, %v4162_v22  ;;  %4736 = vmatpush.bf16.msrb.mxu2 %v9003_v58  ;;  %v10244_v58 = vld [vmem:[#allocation8 + $0xac] sm:$0xf] }
 0x493   :  { %4298 = vmatpush.bf16.msra.mxu3 %v8899_v49  ;;  %v10237_v49 = vld [vmem:[#allocation8 + $0x6c] sm:$0xf0] }
 0x497   :  { %4299 = vmatpush.bf16.msra.mxu3 %v8883_v23  ;;  %v8987_v23 = vor.u32 %v10235_v39, %v8984_v27  ;;  %v10273_v27 = vld [vmem:[#allocation8 + $0x18c] sm:$0xf0] }
 0x499   :  { %v4177_v26 = vpop.f32.mrf.mxu1  ;;  %4737 = vmatpush.bf16.msrb.mxu2 %v8987_v23  ;;  %v10271_v23 = vld [vmem:[#allocation8 + $0x184] sm:$0xf] }
 0x49a   :  { %v10285_v26 = vld [vmem:[#allocation8 + $0x1ec] sm:$0xf0] }
 0x49b   :  { %4300 = vmatpush.bf16.msra.mxu3 %v8867_v29  ;;  %v8967_v29 = vor.u32 %v10233_v8, %v8966_v54  ;;  %v9175_v11 = vor.u32 %v10285_v26, %v9174_v51  ;;  %v9128_v8 = vld [vmem:[#allocation8 + $0x190] sm:$0xf0]  ;;  %v8990_v51 = vld [vmem:[#allocation8 + $0x68] sm:$0xf] }
 0x49c   :  { %v9131_v48 = vor.u32 %v10271_v23, %v9128_v8  ;;  %v8944_v23 = vld [vmem:[#allocation8 + $0x18] sm:$0xf0]  ;;  %v10284_v8 = vld [vmem:[#allocation8 + $0x1ec] sm:$0xf] }
 0x49d   :  { %4738 = vmatpush.bf16.msrb.mxu2 %v8971_v2  ;;  %4720 = vmatpush.bf16.msra.mxu1 %v9175_v11  ;;  %v8992_v11 = vld [vmem:[#allocation8 + $0x78] sm:$0xf0] }
 0x49f   :  { %4301 = vmatpush.bf16.msra.mxu3 %v8851_v20  ;;  %v8950_v20 = vld [vmem:[#allocation8 + $0x20] sm:$0xf] }
 0x4a0   :  { %v8951_v45 = vor.u32 %v10229_v24, %v8950_v20  ;;  %v10240_v20 = vld [vmem:[#allocation8 + $0x8c] sm:$0xf]  ;;  %v9008_v24 = vld [vmem:[#allocation8 + $0x98] sm:$0xf0] }
 0x4a1   :  { %v4227_v60 = vpop.f32.mrf.mxu1 }
 0x4a2   :  { %v11301_v16 = vadd.f32 %v4227_v60, %v4214_v31  ;;  %v10223_v31 = vld [vmem:[#allocation8 + $0x4] sm:$0xf]  ;;  %v8936_v60 = vld [vmem:[#allocation8 + $0x10] sm:$0xf0] }
 0x4a3   :  { %4302 = vmatpush.bf16.msra.mxu3 %v8835_v12 }
 0x4a7   :  { %4303 = vmatpush.bf16.msra.mxu3 %v8819_v59  ;;  %v8935_v59 = vor.u32 %v10225_v19, %v8934_v3  ;;  %v9112_v19 = vld [vmem:[#allocation8 + $0x170] sm:$0xf0] }
 0x4a9   :  { %v4229_v61 = vpop.f32.mrf.mxu1  ;;  %v4266_v40 = vpop.f32.mrf.mxu0 }
 0x4aa   :  { %4304 = vmatmul.bf16.vlgmr.msra.gmra.mxu3 %v11294_v62  ;;  %v8939_v61 = vor.u32 %v10223_v31, %v8936_v60  ;;  %v10236_v60 = vld [vmem:[#allocation8 + $0x6c] sm:$0xf] }
 0x4b1   :  { %v4268_v6 = vpop.f32.mrf.mxu0 }
 0x4b6   :  { %v4136_v25 = vpop.f32.mrf.mxu2 }
 0x4b7   :  { %v11303_v15 = vadd.f32 %v4136_v25, %v4124_v1  ;;  %v8982_v1 = vld [vmem:[#allocation8 + $0x60] sm:$0xf]  ;;  %v10283_v25 = vld [vmem:[#allocation8 + $0x1e4] sm:$0xf] }
 0x4b8   :  { %v8983_v13 = vor.u32 %v10237_v49, %v8982_v1  ;;  %v9024_v1 = vld [vmem:[#allocation8 + $0xb8] sm:$0xf0] }
 0x4b9   :  { %v9027_v39 = vor.u32 %v10244_v58, %v9024_v1  ;;  %v8942_v58 = vld [vmem:[#allocation8 + $0x8] sm:$0xf]  ;;  %v10286_v1 = vld [vmem:[#allocation8 + $0x1f4] sm:$0xf0] }
 0x4ba   :  { %4711 = vmatpush.bf16.msrb.mxu0 %v8983_v13  ;;  %v9126_v13 = vld [vmem:[#allocation8 + $0x180] sm:$0xf] }
 0x4bb   :  { %v9127_v54 = vor.u32 %v10273_v27, %v9126_v13  ;;  %v10226_v13 = vld [vmem:[#allocation8 + $0x14] sm:$0xf0]  ;;  %v10224_v27 = vld [vmem:[#allocation8 + $0xc] sm:$0xf] }
 0x4be   :  { %v4138_v14 = vpop.f32.mrf.mxu2  ;;  %4712 = vmatpush.bf16.msrb.mxu0 %v8967_v29  ;;  %v10242_v29 = vld [vmem:[#allocation8 + $0x94] sm:$0xf0] }
 0x4bf   :  { %v9054_v14 = vld [vmem:[#allocation8 + $0xe8] sm:$0xf]  ;;  %v9007_v2 = vor.u32 %v10242_v29, %v9006_v35  ;;  %v9184_v35 = vld [vmem:[#allocation8 + $0x1f8] sm:$0xf0] }
 0x4c0   :  { %v9055_v37 = vor.u32 %v10254_v18, %v9054_v14  ;;  %v10265_v14 = vld [vmem:[#allocation8 + $0x14c] sm:$0xf0]  ;;  %v9096_v18 = vld [vmem:[#allocation8 + $0x150] sm:$0xf0] }
 0x4c1   :  { %v4279_v62 = vpop.f32.mrf.mxu1 }
 0x4c2   :  { %v11305_v43 = vadd.f32 %v4279_v62, %v4266_v40  ;;  %4713 = vmatpush.bf16.msrb.mxu0 %v8951_v45  ;;  %v9176_v40 = vld [vmem:[#allocation8 + $0x1f0] sm:$0xf0]  ;;  %v10281_v62 = vld [vmem:[#allocation8 + $0x1cc] sm:$0xf0]  ;;  %v9110_v45 = vld [vmem:[#allocation8 + $0x160] sm:$0xf] }
 0x4c3   :  { %v9179_v56 = vor.u32 %v10283_v25, %v9176_v40  ;;  %v9159_v63 = vor.u32 %v10281_v62, %v9158_v47  ;;  %v8995_v25 = vor.u32 %v10236_v60, %v8992_v11  ;;  %v9094_v40 = vld [vmem:[#allocation8 + $0x140] sm:$0xf]  ;;  %v8976_v47 = vld [vmem:[#allocation8 + $0x58] sm:$0xf0]  ;;  %v10276_v60 = vld [vmem:[#allocation8 + $0x1ac] sm:$0xf] }
 0x4c4   :  { %v9078_v62 = vld [vmem:[#allocation8 + $0x120] sm:$0xf] }
 0x4c5   :  { %4746 = vmatpush.bf16.msrb.mxu3 %v9179_v56  ;;  %4721 = vmatpush.bf16.msra.mxu1 %v9159_v63  ;;  %v9095_v56 = vor.u32 %v10265_v14, %v9094_v40  ;;  %v9134_v40 = vld [vmem:[#allocation8 + $0x188] sm:$0xf]  ;;  %v10274_v14 = vld [vmem:[#allocation8 + $0x194] sm:$0xf0] }
 0x4c6   :  { %v4188_v5 = vpop.f32.mrf.mxu2  ;;  %4714 = vmatpush.bf16.msrb.mxu0 %v8935_v59  ;;  %v10238_v59 = vld [vmem:[#allocation8 + $0x74] sm:$0xf0] }
 0x4c7   :  { %v11307_v36 = vadd.f32 %v4188_v5, %v4176_v17  ;;  %v8952_v17 = vld [vmem:[#allocation8 + $0x30] sm:$0xf0]  ;;  %v9163_v5 = vor.u32 %v10279_v30, %v9160_v42  ;;  %v8991_v31 = vor.u32 %v10238_v59, %v8990_v51  ;;  %v8975_v30 = vor.u32 %v10234_v41, %v8974_v52  ;;  %v10261_v42 = vld [vmem:[#allocation8 + $0x12c] sm:$0xf0]  ;;  %v9136_v52 = vld [vmem:[#allocation8 + $0x198] sm:$0xf0] }
 0x4c8   :  { %v8955_v12 = vor.u32 %v10227_v21, %v8952_v17  ;;  %v9011_v21 = vor.u32 %v10240_v20, %v9008_v24  ;;  %v10269_v17 = vld [vmem:[#allocation8 + $0x16c] sm:$0xf0]  ;;  %v8947_v20 = vor.u32 %v10224_v27, %v8944_v23  ;;  %v9187_v24 = vor.u32 %v10284_v8, %v9184_v35 }
 0x4c9   :  { %v4281_v34 = vpop.f32.mrf.mxu1  ;;  %4747 = vmatpush.bf16.msrb.mxu3 %v9163_v5  ;;  %v9111_v3 = vor.u32 %v10269_v17, %v9110_v45  ;;  %v8958_v5 = vld [vmem:[#allocation8 + $0x28] sm:$0xf]  ;;  %v10282_v17 = vld [vmem:[#allocation8 + $0x1d4] sm:$0xf0] }
 0x4ca   :  { %4739 = vmatpush.bf16.msrb.mxu2 %v8955_v12  ;;  %4759 = vmatpush.bf16.msra.mxu0 %v9055_v37  ;;  %v9142_v34 = vld [vmem:[#allocation8 + $0x1a0] sm:$0xf]  ;;  %v10267_v12 = vld [vmem:[#allocation8 + $0x164] sm:$0xf]  ;;  %v9166_v45 = vld [vmem:[#allocation8 + $0x1c8] sm:$0xf] }
 0x4cb   :  { %v9143_v32 = vor.u32 %v10277_v0, %v9142_v34  ;;  %v9115_v26 = vor.u32 %v10267_v12, %v9112_v19  ;;  %v9079_v34 = vor.u32 %v10261_v42, %v9078_v62  ;;  %v9062_v0 = vld [vmem:[#allocation8 + $0x100] sm:$0xf]  ;;  %v10280_v12 = vld [vmem:[#allocation8 + $0x1cc] sm:$0xf]  ;;  %v9168_v19 = vld [vmem:[#allocation8 + $0x1d8] sm:$0xf0] }
 0x4cc   :  { %v9171_v59 = vor.u32 %v10280_v12, %v9168_v19  ;;  %v9118_v62 = vld [vmem:[#allocation8 + $0x168] sm:$0xf]  ;;  %v9417_v12 = vld [vmem:[#allocation10 + $0x1c0] sm:$0xf]  ;;  %v10343_v19 = vld [vmem:[#allocation10 + $0x1c4] sm:$0xf] }
 0x4cd   :  { %4722 = vmatpush.bf16.msra.mxu1 %v9143_v32  ;;  %4748 = vmatpush.bf16.msrb.mxu3 %v9147_v10  ;;  %v10255_v32 = vld [vmem:[#allocation8 + $0x104] sm:$0xf]  ;;  %v9064_v10 = vld [vmem:[#allocation8 + $0x110] sm:$0xf0] }
 0x4ce   :  { %v4190_v33 = vpop.f32.mrf.mxu2  ;;  %4740 = vmatpush.bf16.msrb.mxu2 %v8939_v61  ;;  %4760 = vmatpush.bf16.msra.mxu0 %v9039_v28  ;;  %v10230_v28 = vld [vmem:[#allocation8 + $0x34] sm:$0xf0]  ;;  %v9067_v29 = vor.u32 %v10255_v32, %v9064_v10  ;;  %v9088_v32 = vld [vmem:[#allocation8 + $0x138] sm:$0xf0] }
 0x4cf   :  { %v9023_v33 = vor.u32 %v10246_v50, %v9022_v57  ;;  %v8959_v57 = vor.u32 %v10230_v28, %v8958_v5 }
 0x4d1   :  { %4723 = vmatpush.bf16.msra.mxu1 %v9127_v54  ;;  %4749 = vmatpush.bf16.msrb.mxu3 %v9131_v48  ;;  %v9063_v54 = vor.u32 %v10257_v55, %v9062_v0  ;;  %v10260_v55 = vld [vmem:[#allocation8 + $0x12c] sm:$0xf] }
 0x4d2   :  { %4785 = vmatpush.bf16.msra.mxu2 %v9059_v38  ;;  %4761 = vmatpush.bf16.msra.mxu0 %v9023_v33  ;;  %v10232_v38 = vld [vmem:[#allocation8 + $0x4c] sm:$0xf]  ;;  %v9182_v33 = vld [vmem:[#allocation8 + $0x1e8] sm:$0xf] }
 0x4d3   :  { %v8979_v63 = vor.u32 %v10232_v38, %v8976_v47  ;;  %v9183_v48 = vor.u32 %v10286_v1, %v9182_v33  ;;  %v10256_v33 = vld [vmem:[#allocation8 + $0x10c] sm:$0xf]  ;;  %v9072_v1 = vld [vmem:[#allocation8 + $0x118] sm:$0xf0] }
 0x4d4   :  { %v9075_v27 = vor.u32 %v10256_v33, %v9072_v1  ;;  %v10371_v33 = vld [vmem:[#allocation10 + $0x29c] sm:$0xf0]  ;;  %v10375_v1 = vld [vmem:[#allocation10 + $0x2c4] sm:$0xf] }
 0x4d5   :  { %4724 = vmatpush.bf16.msra.mxu1 %v9111_v3  ;;  %4750 = vmatpush.bf16.msrb.mxu3 %v9115_v26  ;;  %v9167_v3 = vor.u32 %v10282_v17, %v9166_v45  ;;  %v9150_v26 = vld [vmem:[#allocation8 + $0x1a8] sm:$0xf]  ;;  %v9641_v45 = vld [vmem:[#allocation10 + $0x380] sm:$0xf] }
 0x4d6   :  { %v11309_v22 = vpop.f32.mrf.mxu2  ;;  %4786 = vmatpush.bf16.msra.mxu2 %v9043_v9  ;;  %4762 = vmatpush.bf16.msra.mxu0 %v9007_v2  ;;  %v8960_v9 = vld [vmem:[#allocation8 + $0x38] sm:$0xf0]  ;;  %v8943_v2 = vor.u32 %v10226_v13, %v8942_v58  ;;  %v9091_v58 = vor.u32 %v10260_v55, %v9088_v32  ;;  %v10323_v55 = vld [vmem:[#allocation10 + $0x11c] sm:$0xf0]  ;;  %v10319_v32 = vld [vmem:[#allocation10 + $0x104] sm:$0xf] }
 0x4d7   :  { %v8963_v50 = vor.u32 %v10228_v53, %v8960_v9  ;;  %v10264_v53 = vld [vmem:[#allocation8 + $0x14c] sm:$0xf]  ;;  %v9104_v9 = vld [vmem:[#allocation8 + $0x158] sm:$0xf0] }
 0x4d9   :  { %4725 = vmatpush.bf16.msra.mxu1 %v9095_v56  ;;  %v4241_v56 = vadd.f32 %v11309_v22, %v11301_v16  ;;  %v9102_v16 = vld [vmem:[#allocation8 + $0x148] sm:$0xf]  ;;  %v10266_v22 = vld [vmem:[#allocation8 + $0x154] sm:$0xf0] }
 0x4da   :  { %4787 = vmatpush.bf16.msra.mxu2 %v9027_v39  ;;  %4763 = vmatpush.bf16.msra.mxu0 %v8991_v31  ;;  %v10278_v31 = vld [vmem:[#allocation8 + $0x1b4] sm:$0xf0] }
 0x4db   :  { %v9151_v11 = vor.u32 %v10278_v31, %v9150_v26  ;;  %v9609_v31 = vld [vmem:[#allocation10 + $0x340] sm:$0xf] }
 0x4dd   :  { %4726 = vmatpush.bf16.msra.mxu1 %v9079_v34  ;;  %v9103_v34 = vor.u32 %v10266_v22, %v9102_v16  ;;  %v9545_v22 = vld [vmem:[#allocation10 + $0x2c0] sm:$0xf] }
 0x4de   :  { %v4242_v6 = vpop.f32.mrf.mxu2  ;;  %4788 = vmatpush.bf16.msra.mxu2 %v9011_v21  ;;  %4764 = vmatpush.bf16.msra.mxu0 %v8975_v30  ;;  %v10270_v30 = vld [vmem:[#allocation8 + $0x174] sm:$0xf0] }
 0x4df   :  { %v10263_v6 = vld [vmem:[#allocation8 + $0x144] sm:$0xf]  ;;  %v9119_v44 = vor.u32 %v10270_v30, %v9118_v62 }
 0x4e0   :  { %v9099_v37 = vor.u32 %v10263_v6, %v9096_v18  ;;  %v10272_v6 = vld [vmem:[#allocation8 + $0x18c] sm:$0xf]  ;;  %v9135_v18 = vor.u32 %v10274_v14, %v9134_v40  ;;  %v9385_v14 = vld [vmem:[#allocation10 + $0x180] sm:$0xf]  ;;  %v9611_v30 = vld [vmem:[#allocation10 + $0x360] sm:$0xf0] }
 0x4e1   :  { %4727 = vmatpush.bf16.msra.mxu1 %v9063_v54 }
 0x4e2   :  { %4789 = vmatpush.bf16.msra.mxu2 %v8995_v25  ;;  %4751 = vmatpush.bf16.msrb.mxu3 %v9099_v37  ;;  %v9139_v37 = vor.u32 %v10272_v6, %v9136_v52  ;;  %v10339_v6 = vld [vmem:[#allocation10 + $0x19c] sm:$0xf0]  ;;  %v9387_v52 = vld [vmem:[#allocation10 + $0x1a0] sm:$0xf0] }
 0x4e3   :  { %4765 = vmatpush.bf16.msra.mxu0 %v8959_v57  ;;  %v9070_v57 = vld [vmem:[#allocation8 + $0x108] sm:$0xf] }
 0x4e5   :  { %4772 = vmatpush.bf16.msrb.mxu1 %v9183_v48 }
 0x4e6   :  { %4790 = vmatpush.bf16.msra.mxu2 %v8979_v63  ;;  %4752 = vmatpush.bf16.msrb.mxu3 %v9083_v7  ;;  %v10268_v63 = vld [vmem:[#allocation8 + $0x16c] sm:$0xf]  ;;  %v9107_v7 = vor.u32 %v10264_v53, %v9104_v9  ;;  %v10379_v53 = vld [vmem:[#allocation10 + $0x2dc] sm:$0xf0] }
 0x4e7   :  { %4766 = vmatpush.bf16.msra.mxu0 %v8943_v2  ;;  %v9123_v5 = vor.u32 %v10268_v63, %v9120_v4  ;;  %v10327_v4 = vld [vmem:[#allocation10 + $0x144] sm:$0xf]  ;;  %v11363_v9 = vor.u32 %v10379_v53, %v9545_v22 }
 0x4e8   :  { %v9227_v53 = vld [vmem:[#allocation10 + $0x60] sm:$0xf0] }
 0x4e9   :  { %4773 = vmatpush.bf16.msrb.mxu1 %v9167_v3  ;;  %v10347_v3 = vld [vmem:[#allocation10 + $0x1dc] sm:$0xf0]  ;;  %12617 = vst [vmem:[#allocation26_spill] sm:$0xff] %v11363_v9 }
 0x4ea   :  { %4791 = vmatpush.bf16.msra.mxu2 %v8963_v50  ;;  %4753 = vmatpush.bf16.msrb.mxu3 %v9067_v29  ;;  %v10258_v50 = vld [vmem:[#allocation8 + $0x114] sm:$0xf0] }
 0x4eb   :  { %v9071_v13 = vor.u32 %v10258_v50, %v9070_v57  ;;  %v9323_v57 = vld [vmem:[#allocation10 + $0x120] sm:$0xf0] }
 0x4ec   :  { %v11374_v50 = vor.u32 %v10319_v32, %v9323_v57  ;;  %v9649_v57 = vld [vmem:[#allocation10 + $0x388] sm:$0xf] }
 0x4ed   :  { %v11311_v49 = vpop.f32.mrf.mxu3  ;;  %4774 = vmatpush.bf16.msrb.mxu1 %v9151_v11  ;;  %v10399_v11 = vld [vmem:[#allocation10 + $0x384] sm:$0xf] }
 0x4ee   :  { %4792 = vmatpush.bf16.msra.mxu2 %v8947_v20  ;;  %4798 = vmatpush.bf16.msra.mxu3 %v9187_v24  ;;  %v4150_v38 = vadd.f32 %v11311_v49, %v11303_v15  ;;  %v9086_v15 = vld [vmem:[#allocation8 + $0x128] sm:$0xf]  ;;  %v10262_v49 = vld [vmem:[#allocation8 + $0x134] sm:$0xf0]  ;;  %v9673_v20 = vld [vmem:[#allocation10 + $0x3c0] sm:$0xf] }
 0x4ef   :  { %v9087_v10 = vor.u32 %v10262_v49, %v9086_v15  ;;  %v10411_v24 = vld [vmem:[#allocation10 + $0x3dc] sm:$0xf0]  ;;  %v9579_v15 = vld [vmem:[#allocation10 + $0x320] sm:$0xf0]  ;;  %12620 = vst [vmem:[#allocation29_spill] sm:$0xff] %v11374_v50 }
 0x4f1   :  { %4775 = vmatpush.bf16.msrb.mxu1 %v9135_v18  ;;  %v11345_v18 = vor.u32 %v10339_v6, %v9385_v14  ;;  %v9449_v14 = vld [vmem:[#allocation10 + $0x200] sm:$0xf] }
 0x4f2   :  { %4799 = vmatpush.bf16.msra.mxu3 %v9171_v59  ;;  %v9419_v59 = vld [vmem:[#allocation10 + $0x1e0] sm:$0xf0]  ;;  %v10355_v6 = vld [vmem:[#allocation10 + $0x21c] sm:$0xf0] }
 0x4f3   :  { %v11336_v26 = vor.u32 %v10343_v19, %v9419_v59  ;;  %12611 = vst [vmem:[#allocation20_spill] sm:$0xff] %v11345_v18  ;;  %v9257_v19 = vld [vmem:[#allocation10 + $0x80] sm:$0xf] }
 0x4f4   :  { %v10307_v59 = vld [vmem:[#allocation10 + $0x9c] sm:$0xf0] }
 0x4f5   :  { %v4151_v61 = vpop.f32.mrf.mxu3  ;;  %4776 = vmatpush.bf16.msrb.mxu1 %v9119_v44  ;;  %12609 = vst [vmem:[#allocation18_spill] sm:$0xff] %v11336_v26  ;;  %v10331_v44 = vld [vmem:[#allocation10 + $0x15c] sm:$0xf0] }
 0x4f6   :  { %v11313_v46 = vpop.f32.mrf.mxu2  ;;  %v9152_v61 = vld [vmem:[#allocation8 + $0x1b8] sm:$0xf0] }
 0x4f7   :  { %v9155_v25 = vor.u32 %v10276_v60, %v9152_v61  ;;  %v4293_v23 = vadd.f32 %v11313_v46, %v11305_v43  ;;  %v10403_v43 = vld [vmem:[#allocation10 + $0x39c] sm:$0xf0]  ;;  %v10407_v46 = vld [vmem:[#allocation10 + $0x3c4] sm:$0xf] }
 0x4f8   :  { %v11328_v17 = vor.u32 %v10403_v43, %v9641_v45  ;;  %v10395_v60 = vld [vmem:[#allocation10 + $0x35c] sm:$0xf0]  ;;  %v10367_v43 = vld [vmem:[#allocation10 + $0x284] sm:$0xf] }
 0x4f9   :  { %4800 = vmatpush.bf16.msra.mxu3 %v9155_v25  ;;  %4777 = vmatpush.bf16.msrb.mxu1 %v9103_v34  ;;  %v11339_v61 = vor.u32 %v10395_v60, %v9609_v31  ;;  %v9643_v25 = vld [vmem:[#allocation10 + $0x3a0] sm:$0xf0]  ;;  %v10363_v45 = vld [vmem:[#allocation10 + $0x25c] sm:$0xf0]  ;;  %v11397_v60 = vor.u32 %v10307_v59, %v9257_v19 }
 0x4fa   :  { %v11342_v40 = vor.u32 %v10399_v11, %v9643_v25  ;;  %v10383_v34 = vld [vmem:[#allocation10 + $0x304] sm:$0xf]  ;;  %v11434_v19 = vld [vmem:[%s12362_s10] sm:$0xf] }
 0x4fb   :  { %12610 = vst [vmem:[#allocation19_spill] sm:$0xff] %v11339_v61  ;;  %v10303_v31 = vld [vmem:[#allocation10 + $0x84] sm:$0xf] }
 0x4fc   :  { %12627 = vst [vmem:[#allocation36_spill] sm:$0xff] %v11397_v60  ;;  %v9259_v11 = vld [vmem:[#allocation10 + $0xa0] sm:$0xf0] }
 0x4fd   :  { %v11315_v39 = vpop.f32.mrf.mxu3  ;;  %4801 = vmatpush.bf16.msra.mxu3 %v9139_v37  ;;  %4778 = vmatpush.bf16.msrb.mxu1 %v9087_v10  ;;  %v9577_v37 = vld [vmem:[#allocation10 + $0x300] sm:$0xf]  ;;  %v11400_v25 = vor.u32 %v10303_v31, %v9259_v11  ;;  %v10344_v11 = vld [vmem:[#allocation10 + $0x1cc] sm:$0xf] }
 0x4fe   :  { %v4294_v21 = vpop.f32.mrf.mxu2  ;;  %v4202_v8 = vadd.f32 %v11315_v39, %v11307_v36  ;;  %v9675_v36 = vld [vmem:[#allocation10 + $0x3e0] sm:$0xf0] }
 0x4ff   :  { %v11325_v21 = vor.u32 %v10411_v24, %v9673_v20  ;;  %v11330_v39 = vor.u32 %v10407_v46, %v9675_v36  ;;  %v9481_v24 = vld [vmem:[#allocation10 + $0x240] sm:$0xf]  ;;  %v9515_v36 = vld [vmem:[#allocation10 + $0x2a0] sm:$0xf0]  ;;  %12628 = vst [vmem:[#allocation37_spill] sm:$0xff] %v11400_v25 }
 0x500   :  { %v11391_v46 = vor.u32 %v10363_v45, %v9481_v24  ;;  %v10287_v24 = vld [vmem:[#allocation10 + $0x4] sm:$0xf] }
 0x501   :  { %4802 = vmatpush.bf16.msra.mxu3 %v9123_v5  ;;  %4779 = vmatpush.bf16.msrb.mxu1 %v9071_v13  ;;  %12607 = vst [vmem:[#allocation16_spill] sm:$0xff] %v11325_v21 }
 0x502   :  { %12625 = vst [vmem:[#allocation34_spill] sm:$0xff] %v11391_v46 }
 0x505   :  { %v4203_v51 = vpop.f32.mrf.mxu3  ;;  %4803 = vmatpush.bf16.msra.mxu3 %v9107_v7  ;;  %v9321_v7 = vld [vmem:[#allocation10 + $0x100] sm:$0xf] }
 0x506   :  { %v11334_v51 = vor.u32 %v10347_v3, %v9417_v12  ;;  %v11371_v10 = vor.u32 %v10323_v55, %v9321_v7  ;;  %v11394_v3 = vor.u32 %v10367_v43, %v9515_v36  ;;  %v10351_v7 = vld [vmem:[#allocation10 + $0x204] sm:$0xf]  ;;  %v9425_v36 = vld [vmem:[#allocation10 + $0x1c8] sm:$0xf] }
 0x507   :  { %v9451_v55 = vld [vmem:[#allocation10 + $0x220] sm:$0xf0] }
 0x508   :  { %12608 = vst [vmem:[#allocation17_spill] sm:$0xff] %v11334_v51  ;;  %v11418_v32 = vor.u32 %v10351_v7, %v9451_v55  ;;  %v9195_v43 = vld [vmem:[#allocation10 + $0x20] sm:$0xf0]  ;;  %v10336_v7 = vld [vmem:[#allocation10 + $0x18c] sm:$0xf]  ;;  %v4379_v55 = vperm.slane %v11434_v19, 0 }
 0x509   :  { %4804 = vmatpush.bf16.msra.mxu3 %v9091_v58  ;;  %12619 = vst [vmem:[#allocation28_spill] sm:$0xff] %v11371_v10  ;;  %v9513_v58 = vld [vmem:[#allocation10 + $0x280] sm:$0xf]  ;;  %v11437_v59 = vor.u32 %v10287_v24, %v9195_v43  ;;  %v10392_v24 = vld [vmem:[#allocation10 + $0x34c] sm:$0xf] }
 0x50a   :  { %v11377_v13 = vor.u32 %v10371_v33, %v9513_v58  ;;  %12626 = vst [vmem:[#allocation35_spill] sm:$0xff] %v11394_v3  ;;  %v10404_v58 = vld [vmem:[#allocation10 + $0x3a4] sm:$0xf0]  ;;  %v10408_v33 = vld [vmem:[#allocation10 + $0x3cc] sm:$0xf] }
 0x50b   :  { %12634 = vst [vmem:[#allocation43_spill] sm:$0xff] %v11418_v32 }
 0x50c   :  { %12621 = vst [vmem:[#allocation30_spill] sm:$0xff] %v11377_v13 }
 0x50d   :  { %v4253_v41 = vpop.f32.mrf.mxu3  ;;  %4805 = vmatpush.bf16.msra.mxu3 %v9075_v27  ;;  %v9547_v27 = vld [vmem:[#allocation10 + $0x2e0] sm:$0xf0]  ;;  %12638 = vst [vmem:[#allocation47_spill] sm:$0xff] %v11437_v59 }
 0x50e   :  { %v4254_v47 = vadd.f32 %v4253_v41, %v4241_v56  ;;  %v10335_v56 = vld [vmem:[#allocation10 + $0x184] sm:$0xf] }
 0x50f   :  { %v11348_v41 = vor.u32 %v10335_v56, %v9387_v52  ;;  %v10359_v56 = vld [vmem:[#allocation10 + $0x244] sm:$0xf]  ;;  %v11403_v52 = vor.u32 %v10355_v6, %v9449_v14  ;;  %v9427_v14 = vld [vmem:[#allocation10 + $0x1e8] sm:$0xf0] }
 0x510   :  { %v4309_v42 = vmax.f32 %v4150_v38, %v4254_v47  ;;  %v10387_v38 = vld [vmem:[#allocation10 + $0x31c] sm:$0xf0]  ;;  %v10391_v47 = vld [vmem:[#allocation10 + $0x344] sm:$0xf]  ;;  %v11442_v6 = vor.u32 %v10344_v11, %v9427_v14  ;;  %v9361_v11 = vld [vmem:[#allocation10 + $0x148] sm:$0xf] }
 0x511   :  { %12612 = vst [vmem:[#allocation21_spill] sm:$0xff] %v11348_v41  ;;  %v11351_v62 = vor.u32 %v10387_v38, %v9577_v37  ;;  %v11354_v63 = vor.u32 %v10391_v47, %v9611_v30  ;;  %v9483_v37 = vld [vmem:[#allocation10 + $0x260] sm:$0xf0]  ;;  %v9681_v38 = vld [vmem:[#allocation10 + $0x3c8] sm:$0xf] }
 0x512   :  { %v4375_v28 = vpack.c.bf16 %v4309_v42, %v4309_v42  ;;  %v9353_v42 = vld [vmem:[#allocation10 + $0x140] sm:$0xf]  ;;  %12629 = vst [vmem:[#allocation38_spill] sm:$0xff] %v11403_v52  ;;  %v10412_v47 = vld [vmem:[#allocation10 + $0x3e4] sm:$0xf0]  ;;  %v11406_v30 = vor.u32 %v10359_v56, %v9483_v37 }
 0x513   :  { %12613 = vst [vmem:[#allocation22_spill] sm:$0xff] %v11351_v62  ;;  %v11357_v5 = vor.u32 %v10331_v44, %v9353_v42  ;;  %v11408_v42 = vor.u32 %v10412_v47, %v9681_v38  ;;  %v9225_v44 = vld [vmem:[#allocation10 + $0x40] sm:$0xf]  ;;  %v9617_v56 = vld [vmem:[#allocation10 + $0x348] sm:$0xf] }
 0x514   :  { %4715 = vmatmul.bf16.vlgmr.msrb.gmra.mxu0 %v4375_v28  ;;  %4741 = vmatmul.bf16.vlgmr.msrb.gmra.mxu2 %v4375_v28  ;;  %12614 = vst [vmem:[#allocation23_spill] sm:$0xff] %v11354_v63  ;;  %v10396_v37 = vld [vmem:[#allocation10 + $0x364] sm:$0xf0]  ;;  %v10400_v38 = vld [vmem:[#allocation10 + $0x38c] sm:$0xf] }
 0x515   :  { %v4255_v0 = vpop.f32.mrf.mxu3  ;;  %5666 = vmatpush.bf16.msrb.mxu0 %v11334_v51  ;;  %5692 = vmatpush.bf16.msrb.mxu2 %v11336_v26  ;;  %12615 = vst [vmem:[#allocation24_spill] sm:$0xff] %v11357_v5  ;;  %v11446_v47 = vor.u32 %v10396_v37, %v9617_v56  ;;  %v10332_v14 = vld [vmem:[#allocation10 + $0x164] sm:$0xf0]  ;;  %v10328_v56 = vld [vmem:[#allocation10 + $0x14c] sm:$0xf] }
 0x516   :  { %v11368_v0 = vor.u32 %v10383_v34, %v9579_v15  ;;  %12630 = vst [vmem:[#allocation39_spill] sm:$0xff] %v11406_v30  ;;  %v11467_v37 = vor.u32 %v10332_v14, %v9361_v11  ;;  %v10324_v14 = vld [vmem:[#allocation10 + $0x124] sm:$0xf0] }
 0x517   :  { %12631 = vst [vmem:[#allocation40_spill] sm:$0xff] %v11408_v42 }
 0x518   :  { %12618 = vst [vmem:[#allocation27_spill] sm:$0xff] %v11368_v0 }
 0x519   :  { %5667 = vmatpush.bf16.msrb.mxu0 %v11345_v18  ;;  %5693 = vmatpush.bf16.msrb.mxu2 %v11348_v41  ;;  %12640 = vst [vmem:[#allocation49_spill] sm:$0xff] %v11442_v6 }
 0x51a   :  { %12641 = vst [vmem:[#allocation50_spill] sm:$0xff] %v11446_v47 }
 0x51b   :  { %12647 = vst [vmem:[#allocation56_spill] sm:$0xff] %v11467_v37 }
 0x51d   :  { %5668 = vmatpush.bf16.msrb.mxu0 %v11357_v5 }
 0x521   :  { %5669 = vmatpush.bf16.msrb.mxu0 %v11371_v10 }
 0x524   :  { %4767 = vmatmul.bf16.vlgmr.msra.gmra.mxu0 %v4375_v28  ;;  %4793 = vmatmul.bf16.vlgmr.msra.gmra.mxu2 %v4375_v28  ;;  %v9355_v28 = vld [vmem:[#allocation10 + $0x160] sm:$0xf0] }
 0x525   :  { %v11360_v16 = vor.u32 %v10327_v4, %v9355_v28  ;;  %v10299_v4 = vld [vmem:[#allocation10 + $0x5c] sm:$0xf0]  ;;  %v10295_v28 = vld [vmem:[#allocation10 + $0x44] sm:$0xf] }
 0x526   :  { %v11411_v22 = vor.u32 %v10299_v4, %v9225_v44  ;;  %v11415_v15 = vor.u32 %v10295_v28, %v9227_v53  ;;  %v9651_v44 = vld [vmem:[#allocation10 + $0x3a8] sm:$0xf0]  ;;  %v9393_v53 = vld [vmem:[#allocation10 + $0x188] sm:$0xf] }
 0x527   :  { %12616 = vst [vmem:[#allocation25_spill] sm:$0xff] %v11360_v16  ;;  %5694 = vmatpush.bf16.msrb.mxu2 %v11360_v16  ;;  %v11451_v28 = vor.u32 %v10400_v38, %v9651_v44  ;;  %v9363_v38 = vld [vmem:[#allocation10 + $0x168] sm:$0xf0] }
 0x528   :  { %12632 = vst [vmem:[#allocation41_spill] sm:$0xff] %v11411_v22 }
 0x529   :  { %12633 = vst [vmem:[#allocation42_spill] sm:$0xff] %v11415_v15 }
 0x52a   :  { %12642 = vst [vmem:[#allocation51_spill] sm:$0xff] %v11451_v28 }
 0x52b   :  { %5695 = vmatpush.bf16.msrb.mxu2 %v11374_v50 }
 0x52d   :  { %v4305_v54 = vpop.f32.mrf.mxu3 }
 0x52e   :  { %v4306_v35 = vadd.f32 %v4305_v54, %v4293_v23  ;;  %v11380_v23 = vor.u32 %v10375_v1, %v9547_v27  ;;  %v9289_v54 = vld [vmem:[#allocation10 + $0xc0] sm:$0xf]  ;;  %v11423_v27 = vor.u32 %v10404_v58, %v9649_v57  ;;  %v9395_v58 = vld [vmem:[#allocation10 + $0x1a8] sm:$0xf0] }
 0x530   :  { %v4310_v29 = vmax.f32 %v4202_v8, %v4306_v35  ;;  %12622 = vst [vmem:[#allocation31_spill] sm:$0xff] %v11380_v23  ;;  %v10315_v8 = vld [vmem:[#allocation10 + $0xdc] sm:$0xf0]  ;;  %v10311_v35 = vld [vmem:[#allocation10 + $0xc4] sm:$0xf] }
 0x531   :  { %12635 = vst [vmem:[#allocation44_spill] sm:$0xff] %v11423_v27 }
 0x532   :  { %v4376_v48 = vpack.c.bf16 %v4310_v29, %v4310_v29  ;;  %v11383_v29 = vor.u32 %v10315_v8, %v9289_v54  ;;  %v9683_v54 = vld [vmem:[#allocation10 + $0x3e8] sm:$0xf0] }
 0x533   :  { %v11425_v8 = vor.u32 %v10408_v33, %v9683_v54  ;;  %v11458_v54 = vor.u32 %v10336_v7, %v9395_v58  ;;  %v10380_v7 = vld [vmem:[#allocation10 + $0x2e4] sm:$0xf0]  ;;  %v10384_v58 = vld [vmem:[#allocation10 + $0x30c] sm:$0xf] }
 0x534   :  { %4728 = vmatmul.bf16.vlgmr.msra.gmra.mxu1 %v4376_v48  ;;  %4754 = vmatmul.bf16.vlgmr.msrb.gmra.mxu3 %v4376_v48  ;;  %12623 = vst [vmem:[#allocation32_spill] sm:$0xff] %v11383_v29 }
 0x535   :  { %v4307_v2 = vpop.f32.mrf.mxu3  ;;  %5679 = vmatpush.bf16.msra.mxu1 %v11325_v21  ;;  %5705 = vmatpush.bf16.msrb.mxu3 %v11330_v39  ;;  %12636 = vst [vmem:[#allocation45_spill] sm:$0xff] %v11425_v8 }
 0x536   :  { %5670 = vmatpush.bf16.msrb.mxu0 %v11383_v29  ;;  %12644 = vst [vmem:[#allocation53_spill] sm:$0xff] %v11458_v54 }
 0x539   :  { %5680 = vmatpush.bf16.msra.mxu1 %v11328_v17  ;;  %5706 = vmatpush.bf16.msrb.mxu3 %v11342_v40 }
 0x53a   :  { %5671 = vmatpush.bf16.msrb.mxu0 %v11397_v60 }
 0x53d   :  { %5681 = vmatpush.bf16.msra.mxu1 %v11339_v61  ;;  %5707 = vmatpush.bf16.msrb.mxu3 %v11354_v63 }
 0x53e   :  { %5672 = vmatpush.bf16.msrb.mxu0 %v11411_v22 }
 0x541   :  { %5682 = vmatpush.bf16.msra.mxu1 %v11351_v62  ;;  %5708 = vmatpush.bf16.msrb.mxu3 %v11368_v0 }
 0x544   :  { %4780 = vmatmul.bf16.vlgmr.msrb.gmra.mxu1 %v4376_v48  ;;  %4806 = vmatmul.bf16.vlgmr.msra.gmra.mxu3 %v4376_v48  ;;  %v9291_v48 = vld [vmem:[#allocation10 + $0xe0] sm:$0xf0] }
 0x545   :  { %5683 = vmatpush.bf16.msra.mxu1 %v11363_v9  ;;  %5709 = vmatpush.bf16.msrb.mxu3 %v11380_v23  ;;  %v11388_v20 = vor.u32 %v10311_v35, %v9291_v48  ;;  %v9193_v35 = vld [vmem:[#allocation10] sm:$0xf] }
 0x546   :  { %v10291_v48 = vld [vmem:[#allocation10 + $0x1c] sm:$0xf0] }
 0x547   :  { %12624 = vst [vmem:[#allocation33_spill] sm:$0xff] %v11388_v20  ;;  %5696 = vmatpush.bf16.msrb.mxu2 %v11388_v20  ;;  %v11429_v45 = vor.u32 %v10291_v48, %v9193_v35  ;;  %v9585_v35 = vld [vmem:[#allocation10 + $0x308] sm:$0xf] }
 0x548   :  { %v10388_v48 = vld [vmem:[#allocation10 + $0x324] sm:$0xf0] }
 0x549   :  { %5684 = vmatpush.bf16.msra.mxu1 %v11377_v13  ;;  %5710 = vmatpush.bf16.msrb.mxu3 %v11394_v3  ;;  %12637 = vst [vmem:[#allocation46_spill] sm:$0xff] %v11429_v45  ;;  %v11461_v43 = vor.u32 %v10388_v48, %v9585_v35 }
 0x54a   :  { %5673 = vmatpush.bf16.msrb.mxu0 %v11429_v45 }
 0x54b   :  { %5697 = vmatpush.bf16.msrb.mxu2 %v11400_v25  ;;  %12645 = vst [vmem:[#allocation54_spill] sm:$0xff] %v11461_v43  ;;  %v12683_v25 = vmov 0.0|0.0  }
 0x54d   :  { %5685 = vmatpush.bf16.msra.mxu1 %v11391_v46  ;;  %5711 = vmatpush.bf16.msrb.mxu3 %v11406_v30 }
 0x54f   :  { %5698 = vmatpush.bf16.msrb.mxu2 %v11415_v15  ;;  %v9657_v15 = vld [vmem:[#allocation10 + $0x390] sm:$0xf] }
 0x551   :  { %5686 = vmatpush.bf16.msra.mxu1 %v11403_v52  ;;  %5712 = vmatpush.bf16.msrb.mxu3 %v11418_v32 }
 0x553   :  { %5699 = vmatpush.bf16.msrb.mxu2 %v11437_v59  ;;  %v10300_v59 = vld [vmem:[#allocation10 + $0x64] sm:$0xf0] }
 0x555   :  { %5731 = vmatpush.bf16.msrb.mxu1 %v11408_v42  ;;  %5757 = vmatpush.bf16.msra.mxu3 %v11425_v8 }
 0x557   :  { %5744 = vmatpush.bf16.msra.mxu2 %v11442_v6  ;;  %v9491_v6 = vld [vmem:[#allocation10 + $0x268] sm:$0xf0] }
 0x559   :  { %5732 = vmatpush.bf16.msrb.mxu1 %v11423_v27  ;;  %5758 = vmatpush.bf16.msra.mxu3 %v11451_v28 }
 0x55b   :  { %5745 = vmatpush.bf16.msra.mxu2 %v11458_v54  ;;  %v9331_v54 = vld [vmem:[#allocation10 + $0x128] sm:$0xf0] }
 0x55d   :  { %5733 = vmatpush.bf16.msrb.mxu1 %v11446_v47 }
 0x561   :  { %5734 = vmatpush.bf16.msrb.mxu1 %v11461_v43 }
 0x591   :  { %v11365_v49 = vpop.f32.mrf.mxu0 }
 0x592   :  { %v4717_v44 = vadd.f32 %v11365_v49, %v4379_v55  ;;  %v9329_v55 = vld [vmem:[#allocation10 + $0x108] sm:$0xf] }
 0x597   :  { %v11385_v2 = vpop.f32.mrf.mxu2 }
 0x599   :  { %v4718_v12 = vpop.f32.mrf.mxu0 }
 0x59a   :  { %v10348_v12 = vld [vmem:[#allocation10 + $0x1e4] sm:$0xf0] }
 0x59b   :  { %v11439_v31 = vor.u32 %v10348_v12, %v9425_v36  ;;  %v9619_v36 = vld [vmem:[#allocation10 + $0x368] sm:$0xf0] }
 0x59c   :  { %v11464_v12 = vor.u32 %v10392_v24, %v9619_v36  ;;  %v9587_v24 = vld [vmem:[#allocation10 + $0x328] sm:$0xf0] }
 0x59d   :  { %12639 = vst [vmem:[#allocation48_spill] sm:$0xff] %v11439_v31  ;;  %5718 = vmatpush.bf16.msra.mxu0 %v11439_v31  ;;  %v11480_v49 = vor.u32 %v10384_v58, %v9587_v24  ;;  %v9555_v24 = vld [vmem:[#allocation10 + $0x2e8] sm:$0xf0]  ;;  %v9233_v31 = vld [vmem:[#allocation10 + $0x48] sm:$0xf] }
 0x59e   :  { %12646 = vst [vmem:[#allocation55_spill] sm:$0xff] %v11464_v12  ;;  %5759 = vmatpush.bf16.msra.mxu3 %v11464_v12 }
 0x59f   :  { %v4744_v34 = vpop.f32.mrf.mxu2  ;;  %12651 = vst [vmem:[#allocation60_spill] sm:$0xff] %v11480_v49 }
 0x5a0   :  { %v10340_v34 = vld [vmem:[#allocation10 + $0x1a4] sm:$0xf0] }
 0x5a1   :  { %v11420_v1 = vpop.f32.mrf.mxu0  ;;  %v11455_v57 = vor.u32 %v10340_v34, %v9393_v53  ;;  %v11471_v53 = vor.u32 %v10328_v56, %v9363_v38  ;;  %v9553_v34 = vld [vmem:[#allocation10 + $0x2c8] sm:$0xf]  ;;  %v10320_v56 = vld [vmem:[#allocation10 + $0x10c] sm:$0xf]  ;;  %v11483_v38 = vor.u32 %v10324_v14, %v9329_v55 }
 0x5a2   :  { %v11475_v48 = vor.u32 %v10380_v7, %v9553_v34  ;;  %5760 = vmatpush.bf16.msra.mxu3 %v11480_v49  ;;  %v11487_v34 = vor.u32 %v10320_v56, %v9331_v54  ;;  %v10372_v7 = vld [vmem:[#allocation10 + $0x2a4] sm:$0xf0] }
 0x5a3   :  { %12643 = vst [vmem:[#allocation52_spill] sm:$0xff] %v11455_v57  ;;  %5719 = vmatpush.bf16.msra.mxu0 %v11455_v57  ;;  %5746 = vmatpush.bf16.msra.mxu2 %v11471_v53  ;;  %v9297_v14 = vld [vmem:[#allocation10 + $0xc8] sm:$0xf] }
 0x5a4   :  { %12648 = vst [vmem:[#allocation57_spill] sm:$0xff] %v11471_v53  ;;  %5735 = vmatpush.bf16.msrb.mxu1 %v11475_v48  ;;  %v10312_v53 = vld [vmem:[#allocation10 + $0xcc] sm:$0xf] }
 0x5a5   :  { %12649 = vst [vmem:[#allocation58_spill] sm:$0xff] %v11475_v48 }
 0x5a6   :  { %12652 = vst [vmem:[#allocation61_spill] sm:$0xff] %v11483_v38 }
 0x5a7   :  { %v11448_v4 = vpop.f32.mrf.mxu2  ;;  %5720 = vmatpush.bf16.msra.mxu0 %v11467_v37  ;;  %12653 = vst [vmem:[#allocation62_spill] sm:$0xff] %v11487_v34  ;;  %5747 = vmatpush.bf16.msra.mxu2 %v11487_v34  ;;  %v9523_v34 = vld [vmem:[#allocation10 + $0x2a8] sm:$0xf0] }
 0x5a9   :  { %v4770_v33 = vpop.f32.mrf.mxu0 }
 0x5aa   :  { %v4380_v33 = vperm.slane %v11434_v19, 1 }
 0x5ab   :  { %5721 = vmatpush.bf16.msra.mxu0 %v11483_v38  ;;  %v9299_v38 = vld [vmem:[#allocation10 + $0xe8] sm:$0xf0] }
 0x5af   :  { %v4796_v11 = vpop.f32.mrf.mxu2 }
 0x5b0   :  { %v4743_v11 = vadd.f32 %v11385_v2, %v4380_v33  ;;  %v9489_v2 = vld [vmem:[#allocation10 + $0x248] sm:$0xf]  ;;  %v10368_v33 = vld [vmem:[#allocation10 + $0x28c] sm:$0xf] }
 0x5b1   :  { %v4729_v35 = vpop.f32.mrf.mxu1 }
 0x5b2   :  { %v11477_v36 = vadd.f32 %v4729_v35, %v4717_v44  ;;  %v9521_v44 = vld [vmem:[#allocation10 + $0x288] sm:$0xf]  ;;  %v10376_v35 = vld [vmem:[#allocation10 + $0x2cc] sm:$0xf] }
 0x5b3   :  { %v11490_v58 = vor.u32 %v10372_v7, %v9521_v44  ;;  %v11494_v55 = vor.u32 %v10376_v35, %v9555_v24  ;;  %v11502_v7 = vor.u32 %v10312_v53, %v9299_v38  ;;  %v4381_v53 = vperm.slane %v11434_v19, 2 }
 0x5b4   :  { %12650 = vst [vmem:[#allocation59_spill] sm:$0xff] %v11477_v36  ;;  %v9188_v37 = vmul.f32 -1.442695, %v11477_v36  ;;  %v10316_v36 = vld [vmem:[#allocation10 + $0xe4] sm:$0xf0] }
 0x5b5   :  { %12654 = vst [vmem:[#allocation63_spill] sm:$0xff] %v11490_v58  ;;  %5736 = vmatpush.bf16.msrb.mxu1 %v11490_v58  ;;  %v11497_v56 = vor.u32 %v10316_v36, %v9297_v14  ;;  %5761 = vmatpush.bf16.msra.mxu3 %v11494_v55  ;;  %v11509_v36 = vor.u32 %v10368_v33, %v9523_v34  ;;  %v10308_v14 = vld [vmem:[#allocation10 + $0xa4] sm:$0xf0]  ;;  %v10360_v34 = vld [vmem:[#allocation10 + $0x24c] sm:$0xf] }
 0x5b6   :  { %10438 = vpow2.f32 %v9188_v37  ;;  %12655 = vst [vmem:[#allocation64_spill] sm:$0xff] %v11494_v55  ;;  %v10364_v37 = vld [vmem:[#allocation10 + $0x264] sm:$0xf0]  ;;  %5748 = vmatpush.bf16.msra.mxu2 %v11502_v7 }
 0x5b7   :  { %v4755_v54 = vpop.f32.mrf.mxu3  ;;  %12656 = vst [vmem:[#allocation65_spill] sm:$0xff] %v11497_v56  ;;  %5722 = vmatpush.bf16.msra.mxu0 %v11497_v56  ;;  %v11505_v24 = vor.u32 %v10364_v37, %v9489_v2  ;;  %v9457_v37 = vld [vmem:[#allocation10 + $0x208] sm:$0xf] }
 0x5b8   :  { %v11499_v44 = vadd.f32 %v4755_v54, %v4743_v11  ;;  %12658 = vst [vmem:[#allocation67_spill] sm:$0xff] %v11502_v7  ;;  %v9265_v11 = vld [vmem:[#allocation10 + $0x88] sm:$0xf]  ;;  %v10304_v54 = vld [vmem:[#allocation10 + $0x8c] sm:$0xf] }
 0x5b9   :  { %v4731_v35 = vpop.f32.mrf.mxu1  ;;  %12659 = vst [vmem:[#allocation68_spill] sm:$0xff] %v11505_v24  ;;  %5737 = vmatpush.bf16.msrb.mxu1 %v11505_v24  ;;  %v11513_v38 = vor.u32 %v10308_v14, %v9265_v11  ;;  %5762 = vmatpush.bf16.msra.mxu3 %v11509_v36  ;;  %v9689_v11 = vld [vmem:[#allocation10 + $0x3d0] sm:$0xf]  ;;  %v11524_v14 = vor.u32 %v10360_v34, %v9491_v6  ;;  %v10352_v6 = vld [vmem:[#allocation10 + $0x20c] sm:$0xf] }
 0x5ba   :  { %12657 = vst [vmem:[#allocation66_spill] sm:$0xff] %v11499_v44  ;;  %v9189_v57 = vmul.f32 -1.442695, %v11499_v44  ;;  %v9267_v35 = vld [vmem:[#allocation10 + $0xa8] sm:$0xf0] }
 0x5bb   :  { %12660 = vst [vmem:[#allocation69_spill] sm:$0xff] %v11509_v36  ;;  %v11516_v2 = vor.u32 %v10304_v54, %v9267_v35  ;;  %v10356_v44 = vld [vmem:[#allocation10 + $0x224] sm:$0xf0]  ;;  %5723 = vmatpush.bf16.msra.mxu0 %v11513_v38  ;;  %v4769_v35 = vadd.f32 %v11420_v1, %v4381_v53  ;;  %v10409_v53 = vld [vmem:[#allocation10 + $0x3d4] sm:$0xf] }
 0x5bc   :  { %12661 = vst [vmem:[#allocation70_spill] sm:$0xff] %v11513_v38  ;;  %v10439_v56 = vpop.eup %10438  ;;  %10440 = vpow2.f32 %v9189_v57  ;;  %v11521_v7 = vor.u32 %v10356_v44, %v9457_v37  ;;  %v10413_v57 = vld [vmem:[#allocation10 + $0x3ec] sm:$0xf0]  ;;  %v11532_v37 = vor.u32 %v10300_v59, %v9233_v31  ;;  %v12404_v38 = vmov 0.0|0.0  }
 0x5bd   :  { %12662 = vst [vmem:[#allocation71_spill] sm:$0xff] %v11516_v2  ;;  %v11518_v33 = vadd.f32 1.0, %v10439_v56  ;;  %5749 = vmatpush.bf16.msra.mxu2 %v11516_v2  ;;  %v10296_v56 = vld [vmem:[#allocation10 + $0x4c] sm:$0xf]  ;;  %5763 = vmatpush.bf16.msra.mxu3 %v11524_v14  ;;  %v11530_v44 = vor.u32 %v10413_v57, %v9689_v11  ;;  %v10405_v31 = vld [vmem:[#allocation10 + $0x3ac] sm:$0xf0] }
 0x5be   :  { %12663 = vst [vmem:[#allocation72_spill] sm:$0xff] %v11521_v7  ;;  %5738 = vmatpush.bf16.msrb.mxu1 %v11521_v7  ;;  %v9235_v2 = vld [vmem:[#allocation10 + $0x68] sm:$0xf0]  ;;  %5713 = vmatmul.bf16.vlgmr.msrb.gmra.mxu3 %v12404_v38  ;;  %v9691_v11 = vld [vmem:[#allocation10 + $0x3f0] sm:$0xf0]  ;;  %v4382_v57 = vperm.slane %v11434_v19, 3 }
 0x5bf   :  { %12664 = vst [vmem:[#allocation73_spill] sm:$0xff] %v11524_v14  ;;  %10442 = vrcp.f32 %v11518_v33  ;;  %v4757_v54 = vpop.f32.mrf.mxu3  ;;  %5687 = vmatmul.bf16.vlgmr.msra.gmra.mxu1 %v12404_v38  ;;  %v11535_v45 = vor.u32 %v10296_v56, %v9235_v2  ;;  %5724 = vmatpush.bf16.msra.mxu0 %v11532_v37  ;;  %v11548_v56 = vor.u32 %v10405_v31, %v9657_v15  ;;  %vm4961_vm4 = vweird.f32 %v11518_v33  ;;  %v10365_v7 = vld [vmem:[#allocation10 + $0x26c] sm:$0xf0] }
 0x5c0   :  { %12665 = vst [vmem:[#allocation74_spill] sm:$0xff] %v11530_v44  ;;  %v9459_v54 = vld [vmem:[#allocation10 + $0x228] sm:$0xf0]  ;;  %v11550_v38 = vor.u32 %v10409_v53, %v9691_v11  ;;  %v4795_v19 = vadd.f32 %v11448_v4, %v4382_v57  ;;  %v9625_v53 = vld [vmem:[#allocation10 + $0x350] sm:$0xf] }
 0x5c1   :  { %12666 = vst [vmem:[#allocation75_spill] sm:$0xff] %v11532_v37  ;;  %v4781_v34 = vpop.f32.mrf.mxu1  ;;  %v11542_v59 = vor.u32 %v10352_v6, %v9459_v54  ;;  %5750 = vmatpush.bf16.msra.mxu2 %v11535_v45  ;;  %v10288_v54 = vld [vmem:[#allocation10 + $0xc] sm:$0xf]  ;;  %v10397_v11 = vld [vmem:[#allocation10 + $0x36c] sm:$0xf0] }
 0x5c2   :  { %12667 = vst [vmem:[#allocation76_spill] sm:$0xff] %v11535_v45  ;;  %v10441_v22 = vpop.eup %10440  ;;  %v11538_v1 = vadd.f32 %v4781_v34, %v4769_v35  ;;  %5783 = vmatpush.bf16.msra.mxu1 %v11530_v44  ;;  %v9201_v35 = vld [vmem:[#allocation10 + $0x8] sm:$0xf]  ;;  %v9203_v37 = vld [vmem:[#allocation10 + $0x28] sm:$0xf0] }
 0x5c3   :  { %12669 = vst [vmem:[#allocation78_spill] sm:$0xff] %v11542_v59  ;;  %v11545_v2 = vadd.f32 1.0, %v10441_v22  ;;  %v10292_v34 = vld [vmem:[#allocation10 + $0x24] sm:$0xf0]  ;;  %5764 = vmatpush.bf16.msra.mxu3 %v11542_v59  ;;  %v11564_v15 = vor.u32 %v10288_v54, %v9203_v37  ;;  %v9593_v4 = vld [vmem:[#allocation10 + $0x310] sm:$0xf] }
 0x5c4   :  { %12668 = vst [vmem:[#allocation77_spill] sm:$0xff] %v11538_v1  ;;  %v9190_v44 = vmul.f32 -1.442695, %v11538_v1  ;;  %v11554_v6 = vor.u32 %v10292_v34, %v9201_v35  ;;  %v11568_v34 = vor.u32 %v10397_v11, %v9625_v53  ;;  %v10401_v1 = vld [vmem:[#allocation10 + $0x394] sm:$0xf] }
 0x5c5   :  { %12670 = vst [vmem:[#allocation79_spill] sm:$0xff] %v11548_v56  ;;  %v11556_v14 = vpop.eup %10442  ;;  %10444 = vrcp.f32 %v11545_v2  ;;  %5751 = vmatpush.bf16.msra.mxu2 %v11564_v15  ;;  %v10389_v57 = vld [vmem:[#allocation10 + $0x32c] sm:$0xf0]  ;;  %v10393_v11 = vld [vmem:[#allocation10 + $0x354] sm:$0xf]  ;;  %vm4976_vm7 = vweird.f32 %v11545_v2 }
 0x5c6   :  { %12671 = vst [vmem:[#allocation80_spill] sm:$0xff] %v11550_v38  ;;  %v4957_v22 = vmul.f32 %v11556_v14, %v11518_v33  ;;  %10446 = vpow2.f32 %v9190_v44  ;;  %5784 = vmatpush.bf16.msra.mxu1 %v11548_v56  ;;  %5725 = vmatpush.bf16.msra.mxu0 %v11554_v6  ;;  %v11578_v53 = vor.u32 %v10389_v57, %v9593_v4  ;;  %vm4962_vm3 = vweird.f32 %v11556_v14  ;;  %v10381_v4 = vld [vmem:[#allocation10 + $0x2ec] sm:$0xf0] }
 0x5c7   :  { %12672 = vst [vmem:[#allocation81_spill] sm:$0xff] %v11554_v6  ;;  %5809 = vmatpush.bf16.msrb.mxu3 %v11550_v38  ;;  %v4807_v31 = vpop.f32.mrf.mxu3  ;;  %v9659_v38 = vld [vmem:[#allocation10 + $0x3b0] sm:$0xf0]  ;;  %vm11597_vm5 = vmor %vm4961_vm4, %vm4962_vm3  ;;  %v10373_v59 = vld [vmem:[#allocation10 + $0x2ac] sm:$0xf0] }
 0x5c8   :  { %12673 = vst [vmem:[#allocation82_spill] sm:$0xff] %v11564_v15  ;;  %v4958_v35 = vsub.f32 1.0, %v4957_v22  ;;  %v11570_v45 = vadd.f32 %v4807_v31, %v4795_v19  ;;  %v11572_v56 = vor.u32 %v10401_v1, %v9659_v38  ;;  %v4965_v22 = vand.u32 2147483647, %v11518_v33  ;;  %v9627_v15 = vld [vmem:[#allocation10 + $0x370] sm:$0xf0] }
 0x5c9   :  { %12674 = vst [vmem:[#allocation83_spill] sm:$0xff] %v11568_v34  ;;  %v4783_v44 = vpop.f32.mrf.mxu1  ;;  %v11583_v1 = vor.u32 %v10393_v11, %v9627_v15  ;;  %v9595_v6 = vld [vmem:[#allocation10 + $0x330] sm:$0xf0]  ;;  %v4982_v15 = vand.u32 2147483648, %v11545_v2 }
 0x5ca   :  { %12675 = vst [vmem:[#allocation84_spill] sm:$0xff] %v11570_v45  ;;  %v4959_v37 = vmul.f32 %v11556_v14, %v4958_v35  ;;  %5785 = vmatpush.bf16.msra.mxu1 %v11568_v34  ;;  %v4967_v44 = vand.u32 2147483648, %v11518_v33  ;;  %10448 = vtanh.f32 %v11570_v45  ;;  %v9561_v34 = vld [vmem:[#allocation10 + $0x2d0] sm:$0xf]  ;;  %vm4966_vm8 = vcmp.eq.f32.partialorder %v4965_v22, 8.507059e+37 }
 0x5cb   :  { %12676 = vst [vmem:[#allocation85_spill] sm:$0xff] %v11572_v56  ;;  %v10445_v54 = vpop.eup %10444  ;;  %5810 = vmatpush.bf16.msrb.mxu3 %v11572_v56  ;;  %v11591_v56 = vor.u32 %v10381_v4, %v9561_v34  ;;  %v10377_v11 = vld [vmem:[#allocation10 + $0x2d4] sm:$0xf] }
 0x5cc   :  { %12677 = vst [vmem:[#allocation86_spill] sm:$0xff] %v11578_v53  ;;  %v10447_v19 = vpop.eup %10446  ;;  %v4972_v31 = vmul.f32 %v10445_v54, %v11545_v2  ;;  %v4960_v38 = vadd.f32 %v11556_v14, %v4959_v37  ;;  %v10385_v37 = vld [vmem:[#allocation10 + $0x314] sm:$0xf]  ;;  %vm4977_vm6 = vweird.f32 %v10445_v54  ;;  %v4968_v45 = vor.u32 1.1754944e-38, %v4967_v44 }
 0x5cd   :  { %12678 = vst [vmem:[#allocation87_spill] sm:$0xff] %v11583_v1  ;;  %v11585_v35 = vadd.f32 1.0, %v10447_v19  ;;  %v4980_v19 = vand.u32 2147483647, %v11545_v2  ;;  %v11606_v4 = vor.u32 %v10385_v37, %v9595_v6  ;;  %v4983_v6 = vor.u32 1.1754944e-38, %v4982_v15  ;;  %vm4978_vm9 = vmor %vm4976_vm7, %vm4977_vm6 }
 0x5ce   :  { %v4973_v57 = vsub.f32 1.0, %v4972_v31  ;;  %5786 = vmatpush.bf16.msra.mxu1 %v11578_v53  ;;  %12679 = vst [vmem:[#allocation88_spill] sm:$0xff] %v11591_v56  ;;  %v4964_v34 = vsel %vm11597_vm5, %v11556_v14, %v4960_v38  ;;  %v9529_v53 = vld [vmem:[#allocation10 + $0x290] sm:$0xf]  ;;  %5765 = vmatmul.bf16.vlgmr.msra.gmra.mxu3 %v12683_v25  ;;  %v9563_v14 = vld [vmem:[#allocation10 + $0x2f0] sm:$0xf0] }
 0x5cf   :  { %10450 = vrcp.f32 %v11585_v35  ;;  %v4809_v31 = vpop.f32.mrf.mxu3  ;;  %5811 = vmatpush.bf16.msrb.mxu3 %v11583_v1  ;;  %12682 = vst [vmem:[#allocation89_spill] sm:$0xff] %v11606_v4  ;;  %5739 = vmatmul.bf16.vlgmr.msrb.gmra.mxu1 %v12683_v25  ;;  %v4969_v37 = vsel %vm4966_vm8, %v4968_v45, %v4964_v34  ;;  %v11616_v44 = vor.u32 %v10377_v11, %v9563_v14  ;;  %vm4981_vm10 = vcmp.eq.f32.partialorder %v4980_v19, 8.507059e+37  ;;  %v9531_v15 = vld [vmem:[#allocation10 + $0x2b0] sm:$0xf0]  ;;  %v9465_v11 = vld [vmem:[#allocation10 + $0x210] sm:$0xf] }
 0x5d0   :  { %v4974_v33 = vmul.f32 %v10445_v54, %v4973_v57  ;;  %v11612_v57 = vor.u32 %v10373_v59, %v9529_v53  ;;  %v10449_v38 = vpop.eup %10448  ;;  %v4995_v19 = vand.u32 2147483647, %v11585_v35  ;;  %v10357_v14 = vld [vmem:[#allocation10 + $0x22c] sm:$0xf0]  ;;  %vm4991_vm12 = vweird.f32 %v11585_v35 }
 0x5d1   :  { %12685 = vst [vmem:[#allocation91_spill] sm:$0xff] %v11616_v44  ;;  %v5003_v60 = vmul.f32 %v10449_v38, %v4969_v37  ;;  %v9697_v37 = vld [vmem:[#allocation10 + $0x3d8] sm:$0xf] }
 0x5d2   :  { %v4975_v31 = vadd.f32 %v10445_v54, %v4974_v33  ;;  %5787 = vmatpush.bf16.msra.mxu1 %v11591_v56  ;;  %12684 = vst [vmem:[#allocation90_spill] sm:$0xff] %v11612_v57  ;;  %v9497_v33 = vld [vmem:[#allocation10 + $0x250] sm:$0xf]  ;;  %v10369_v56 = vld [vmem:[#allocation10 + $0x294] sm:$0xf]  ;;  %vm4996_vm14 = vcmp.eq.f32.partialorder %v4995_v19, 8.507059e+37 }
 0x5d3   :  { %5812 = vmatpush.bf16.msrb.mxu3 %v11606_v4  ;;  %v11620_v45 = vor.u32 %v10365_v7, %v9497_v33  ;;  %v11623_v34 = vor.u32 %v10369_v56, %v9531_v15  ;;  %v11631_v7 = vor.u32 %v10357_v14, %v9465_v11  ;;  %v9499_v56 = vld [vmem:[#allocation10 + $0x270] sm:$0xf0]  ;;  %v9433_v15 = vld [vmem:[#allocation10 + $0x1d0] sm:$0xf] }
 0x5d4   :  { %v4979_v1 = vsel %vm4978_vm9, %v10445_v54, %v4975_v31  ;;  %v9467_v11 = vld [vmem:[#allocation10 + $0x230] sm:$0xf0] }
 0x5d5   :  { %v10451_v2 = vpop.eup %10450  ;;  %v4984_v22 = vsel %vm4981_vm10, %v4983_v6, %v4979_v1  ;;  %12686 = vst [vmem:[#allocation92_spill] sm:$0xff] %v11620_v45  ;;  %v4997_v1 = vand.u32 2147483648, %v11585_v35  ;;  %v10361_v6 = vld [vmem:[#allocation10 + $0x254] sm:$0xf] }
 0x5d6   :  { %v4987_v59 = vmul.f32 %v10451_v2, %v11585_v35  ;;  %v5002_v53 = vmul.f32 0.0, %v4984_v22  ;;  %5788 = vmatpush.bf16.msra.mxu1 %v11612_v57  ;;  %12687 = vst [vmem:[#allocation93_spill] sm:$0xff] %v11623_v34  ;;  %vm4992_vm11 = vweird.f32 %v10451_v2  ;;  %v10414_v22 = vld [vmem:[#allocation10 + $0x3f4] sm:$0xf0]  ;;  %v11634_v33 = vor.u32 %v10361_v6, %v9499_v56  ;;  %v10345_v56 = vld [vmem:[#allocation10 + $0x1d4] sm:$0xf] }
 0x5d7   :  { %5813 = vmatpush.bf16.msrb.mxu3 %v11616_v44  ;;  %12689 = vst [vmem:[#allocation95_spill] sm:$0xff] %v11631_v7  ;;  %vm4993_vm13 = vmor %vm4991_vm12, %vm4992_vm11  ;;  %v10406_v57 = vld [vmem:[#allocation10 + $0x3b4] sm:$0xf0] }
 0x5d8   :  { %v4988_v54 = vsub.f32 1.0, %v4987_v59  ;;  %v11627_v31 = vadd.f32 %v5003_v60, %v5002_v53  ;;  %12690 = vst [vmem:[#allocation96_spill] sm:$0xff] %v11634_v33  ;;  %v11636_v60 = vor.u32 %v10414_v22, %v9697_v37  ;;  %v4998_v53 = vor.u32 1.1754944e-38, %v4997_v1  ;;  %v9435_v37 = vld [vmem:[#allocation10 + $0x1f0] sm:$0xf0] }
 0x5d9   :  { %v9699_v1 = vld [vmem:[#allocation10 + $0x3f8] sm:$0xf0]  ;;  %v10398_v44 = vld [vmem:[#allocation10 + $0x374] sm:$0xf0] }
 0x5da   :  { %12688 = vst [vmem:[#allocation94_spill] sm:$0xff] %v11627_v31  ;;  %v4989_v38 = vmul.f32 %v10451_v2, %v4988_v54  ;;  %10452 = vtanh.f32 %v11627_v31  ;;  %5789 = vmatpush.bf16.msra.mxu1 %v11620_v45  ;;  %v10349_v54 = vld [vmem:[#allocation10 + $0x1ec] sm:$0xf0]  ;;  %v10353_v45 = vld [vmem:[#allocation10 + $0x214] sm:$0xf] }
 0x5db   :  { %5814 = vmatpush.bf16.msrb.mxu3 %v11623_v34  ;;  %12691 = vst [vmem:[#allocation97_spill] sm:$0xff] %v11636_v60  ;;  %v9665_v31 = vld [vmem:[#allocation10 + $0x398] sm:$0xf]  ;;  %v10410_v34 = vld [vmem:[#allocation10 + $0x3dc] sm:$0xf]  ;;  %v11642_v35 = vor.u32 %v10353_v45, %v9467_v11 }
 0x5dc   :  { %v4990_v59 = vadd.f32 %v10451_v2, %v4989_v38  ;;  %v11644_v19 = vor.u32 %v10406_v57, %v9665_v31  ;;  %v11646_v22 = vor.u32 %v10410_v34, %v9699_v1  ;;  %v10337_v57 = vld [vmem:[#allocation10 + $0x194] sm:$0xf]  ;;  %v9667_v11 = vld [vmem:[#allocation10 + $0x3b8] sm:$0xf0] }
 0x5dd   :  { %v9403_v31 = vld [vmem:[#allocation10 + $0x1b0] sm:$0xf0]  ;;  %v10394_v1 = vld [vmem:[#allocation10 + $0x35c] sm:$0xf] }
 0x5de   :  { %v4994_v14 = vsel %vm4993_vm13, %v10451_v2, %v4990_v59  ;;  %5790 = vmatpush.bf16.msra.mxu1 %v11631_v7  ;;  %12692 = vst [vmem:[#allocation98_spill] sm:$0xff] %v11644_v19  ;;  %v9401_v59 = vld [vmem:[#allocation10 + $0x190] sm:$0xf] }
 0x5df   :  { %v4999_v6 = vsel %vm4996_vm14, %v4998_v53, %v4994_v14  ;;  %5815 = vmatpush.bf16.msrb.mxu3 %v11634_v33  ;;  %12693 = vst [vmem:[#allocation99_spill] sm:$0xff] %v11646_v22  ;;  %v10341_v7 = vld [vmem:[#allocation10 + $0x1ac] sm:$0xf0]  ;;  %v11649_v53 = vor.u32 %v10349_v54, %v9433_v15  ;;  %v11651_v14 = vor.u32 %v10345_v56, %v9435_v37  ;;  %v9633_v33 = vld [vmem:[#allocation10 + $0x358] sm:$0xf] }
 0x5e0   :  { %v10453_v38 = vpop.eup %10452  ;;  %v11657_v34 = vor.u32 %v10398_v44, %v9633_v33  ;;  %v9369_v54 = vld [vmem:[#allocation10 + $0x150] sm:$0xf]  ;;  %v11666_v56 = vor.u32 %v10341_v7, %v9401_v59  ;;  %v11668_v37 = vor.u32 %v10337_v57, %v9403_v31  ;;  %v9601_v44 = vld [vmem:[#allocation10 + $0x318] sm:$0xf] }
 0x5e1   :  { %v5006_v2 = vmul.f32 %v10453_v38, %v4999_v6  ;;  %5791 = vmatmul.bf16.vlgmr.msra.gmra.mxu1 %v12683_v25  ;;  %12694 = vst [vmem:[#allocation100_spill] sm:$0xff] %v11649_v53  ;;  %v10333_v6 = vld [vmem:[#allocation10 + $0x16c] sm:$0xf0]  ;;  %v10390_v33 = vld [vmem:[#allocation10 + $0x334] sm:$0xf0] }
 0x5e2   :  { %5835 = vmatpush.bf16.msrb.mxu1 %v11636_v60  ;;  %12695 = vst [vmem:[#allocation101_spill] sm:$0xff] %v11651_v14  ;;  %v10402_v60 = vld [vmem:[#allocation10 + $0x39c] sm:$0xf]  ;;  %v10329_v38 = vld [vmem:[#allocation10 + $0x154] sm:$0xf]  ;;  %v11679_v57 = vor.u32 %v10333_v6, %v9369_v54 }
 0x5e3   :  { %v11653_v45 = vpack.c.bf16 %v5006_v2, %v5006_v2  ;;  %5816 = vmatpush.bf16.msrb.mxu3 %v11642_v35  ;;  %12696 = vst [vmem:[#allocation102_spill] sm:$0xff] %v11657_v34  ;;  %v11660_v15 = vor.u32 %v10402_v60, %v9667_v11  ;;  %v9371_v60 = vld [vmem:[#allocation10 + $0x170] sm:$0xf0]  ;;  %v11672_v2 = vor.u32 %v10390_v33, %v9601_v44  ;;  %v9635_v11 = vld [vmem:[#allocation10 + $0x378] sm:$0xf0] }
 0x5e4   :  { %12698 = vst [vmem:[#allocation104_spill] sm:$0xff] %v11666_v56  ;;  %v9337_v7 = vld [vmem:[#allocation10 + $0x110] sm:$0xf]  ;;  %v11681_v31 = vor.u32 %v10329_v38, %v9371_v60  ;;  %v10321_v44 = vld [vmem:[#allocation10 + $0x114] sm:$0xf] }
 0x5e5   :  { %12697 = vst [vmem:[#allocation103_spill] sm:$0xff] %v11660_v15  ;;  %5674 = vmatmul.bf16.vlgmr.msrb.gmra.mxu0 %v11653_v45  ;;  %5700 = vmatmul.bf16.vlgmr.msrb.gmra.mxu2 %v11653_v45  ;;  %v10325_v59 = vld [vmem:[#allocation10 + $0x12c] sm:$0xf0]  ;;  %v9339_v33 = vld [vmem:[#allocation10 + $0x130] sm:$0xf0] }
 0x5e6   :  { %5836 = vmatpush.bf16.msrb.mxu1 %v11644_v19  ;;  %5770 = vmatpush.bf16.msrb.mxu0 %v11649_v53  ;;  %12699 = vst [vmem:[#allocation105_spill] sm:$0xff] %v11668_v37  ;;  %v11675_v53 = vor.u32 %v10394_v1, %v9635_v11  ;;  %v10386_v19 = vld [vmem:[#allocation10 + $0x31c] sm:$0xf]  ;;  %v11691_v54 = vor.u32 %v10325_v59, %v9337_v7  ;;  %v9537_v38 = vld [vmem:[#allocation10 + $0x298] sm:$0xf] }
 0x5e7   :  { %5861 = vmatpush.bf16.msra.mxu3 %v11646_v22  ;;  %5796 = vmatpush.bf16.msrb.mxu2 %v11651_v14  ;;  %12700 = vst [vmem:[#allocation106_spill] sm:$0xff] %v11672_v2  ;;  %v9569_v14 = vld [vmem:[#allocation10 + $0x2d8] sm:$0xf]  ;;  %v9603_v1 = vld [vmem:[#allocation10 + $0x338] sm:$0xf0]  ;;  %v11693_v6 = vor.u32 %v10321_v44, %v9339_v33 }
 0x5e8   :  { %5817 = vmatmul.bf16.vlgmr.msrb.gmra.mxu3 %v12683_v25  ;;  %12701 = vst [vmem:[#allocation107_spill] sm:$0xff] %v11675_v53  ;;  %v11687_v11 = vor.u32 %v10386_v19, %v9603_v1  ;;  %v10374_v60 = vld [vmem:[#allocation10 + $0x2b4] sm:$0xf0]  ;;  %v9571_v19 = vld [vmem:[#allocation10 + $0x2f8] sm:$0xf0] }
 0x5e9   :  { %12702 = vst [vmem:[#allocation108_spill] sm:$0xff] %v11679_v57  ;;  %v9505_v44 = vld [vmem:[#allocation10 + $0x258] sm:$0xf] }
 0x5ea   :  { %5837 = vmatpush.bf16.msrb.mxu1 %v11657_v34  ;;  %5771 = vmatpush.bf16.msrb.mxu0 %v11666_v56  ;;  %12703 = vst [vmem:[#allocation109_spill] sm:$0xff] %v11681_v31  ;;  %v10382_v34 = vld [vmem:[#allocation10 + $0x2f4] sm:$0xf0]  ;;  %v9305_v56 = vld [vmem:[#allocation10 + $0xd0] sm:$0xf] }
 0x5eb   :  { %5862 = vmatpush.bf16.msra.mxu3 %v11660_v15  ;;  %5797 = vmatpush.bf16.msrb.mxu2 %v11668_v37  ;;  %v11684_v15 = vor.u32 %v10382_v34, %v9569_v14  ;;  %12705 = vst [vmem:[#allocation111_spill] sm:$0xff] %v11687_v11  ;;  %v10317_v37 = vld [vmem:[#allocation10 + $0xec] sm:$0xf0]  ;;  %v10313_v14 = vld [vmem:[#allocation10 + $0xd4] sm:$0xf] }
 0x5ec   :  { %12706 = vst [vmem:[#allocation112_spill] sm:$0xff] %v11691_v54  ;;  %v9307_v34 = vld [vmem:[#allocation10 + $0xf0] sm:$0xf0]  ;;  %v11703_v7 = vor.u32 %v10317_v37, %v9305_v56  ;;  %v10366_v33 = vld [vmem:[#allocation10 + $0x274] sm:$0xf0] }
 0x5ed   :  { %12704 = vst [vmem:[#allocation110_spill] sm:$0xff] %v11684_v15  ;;  %v11705_v59 = vor.u32 %v10313_v14, %v9307_v34  ;;  %v9241_v56 = vld [vmem:[#allocation10 + $0x50] sm:$0xf] }
 0x5ee   :  { %5838 = vmatpush.bf16.msrb.mxu1 %v11672_v2  ;;  %5772 = vmatpush.bf16.msrb.mxu0 %v11679_v57  ;;  %12707 = vst [vmem:[#allocation113_spill] sm:$0xff] %v11693_v6  ;;  %v10378_v2 = vld [vmem:[#allocation10 + $0x2dc] sm:$0xf]  ;;  %v9273_v57 = vld [vmem:[#allocation10 + $0x90] sm:$0xf] }
 0x5ef   :  { %5863 = vmatpush.bf16.msra.mxu3 %v11675_v53  ;;  %5798 = vmatpush.bf16.msrb.mxu2 %v11681_v31  ;;  %v11696_v53 = vor.u32 %v10374_v60, %v9537_v38  ;;  %v11699_v1 = vor.u32 %v10378_v2, %v9571_v19  ;;  %v10309_v31 = vld [vmem:[#allocation10 + $0xac] sm:$0xf0]  ;;  %12710 = vst [vmem:[#allocation116_spill] sm:$0xff] %v11703_v7  ;;  %v10305_v38 = vld [vmem:[#allocation10 + $0x94] sm:$0xf] }
 0x5f0   :  { %12711 = vst [vmem:[#allocation117_spill] sm:$0xff] %v11705_v59  ;;  %v9275_v60 = vld [vmem:[#allocation10 + $0xb0] sm:$0xf0]  ;;  %v9539_v2 = vld [vmem:[#allocation10 + $0x2b8] sm:$0xf0]  ;;  %v11717_v14 = vor.u32 %v10309_v31, %v9273_v57 }
 0x5f1   :  { %12708 = vst [vmem:[#allocation114_spill] sm:$0xff] %v11696_v53  ;;  %v10301_v37 = vld [vmem:[#allocation10 + $0x6c] sm:$0xf0]  ;;  %v11719_v34 = vor.u32 %v10305_v38, %v9275_v60  ;;  %v10354_v60 = vld [vmem:[#allocation10 + $0x21c] sm:$0xf] }
 0x5f2   :  { %5839 = vmatpush.bf16.msrb.mxu1 %v11684_v15  ;;  %12709 = vst [vmem:[#allocation115_spill] sm:$0xff] %v11699_v1  ;;  %5773 = vmatpush.bf16.msrb.mxu0 %v11691_v54  ;;  %v10370_v15 = vld [vmem:[#allocation10 + $0x29c] sm:$0xf]  ;;  %v10297_v54 = vld [vmem:[#allocation10 + $0x54] sm:$0xf]  ;;  %v11729_v57 = vor.u32 %v10301_v37, %v9241_v56 }
 0x5f3   :  { %5864 = vmatpush.bf16.msra.mxu3 %v11687_v11  ;;  %5799 = vmatpush.bf16.msrb.mxu2 %v11693_v6  ;;  %v11708_v11 = vor.u32 %v10366_v33, %v9505_v44  ;;  %v11711_v19 = vor.u32 %v10370_v15, %v9539_v2  ;;  %12714 = vst [vmem:[#allocation120_spill] sm:$0xff] %v11717_v14  ;;  %v9473_v44 = vld [vmem:[#allocation10 + $0x218] sm:$0xf]  ;;  %v10362_v6 = vld [vmem:[#allocation10 + $0x25c] sm:$0xf] }
 0x5f4   :  { %12715 = vst [vmem:[#allocation121_spill] sm:$0xff] %v11719_v34  ;;  %v10358_v33 = vld [vmem:[#allocation10 + $0x234] sm:$0xf0]  ;;  %v9243_v15 = vld [vmem:[#allocation10 + $0x70] sm:$0xf0] }
 0x5f5   :  { %12712 = vst [vmem:[#allocation118_spill] sm:$0xff] %v11708_v11  ;;  %5726 = vmatmul.bf16.vlgmr.msra.gmra.mxu0 %v11653_v45  ;;  %5752 = vmatmul.bf16.vlgmr.msra.gmra.mxu2 %v11653_v45  ;;  %v11722_v2 = vor.u32 %v10358_v33, %v9473_v44  ;;  %v11731_v31 = vor.u32 %v10297_v54, %v9243_v15  ;;  %v10293_v38 = vld [vmem:[#allocation10 + $0x2c] sm:$0xf0]  ;;  %v9211_v44 = vld [vmem:[#allocation10 + $0x30] sm:$0xf0] }
 0x5f6   :  { %5840 = vmatpush.bf16.msrb.mxu1 %v11696_v53  ;;  %12713 = vst [vmem:[#allocation119_spill] sm:$0xff] %v11711_v19  ;;  %5774 = vmatpush.bf16.msrb.mxu0 %v11703_v7  ;;  %v9507_v53 = vld [vmem:[#allocation10 + $0x278] sm:$0xf0]  ;;  %v9209_v7 = vld [vmem:[#allocation10 + $0x10] sm:$0xf] }
 0x5f7   :  { %5865 = vmatpush.bf16.msra.mxu3 %v11699_v1  ;;  %5800 = vmatpush.bf16.msrb.mxu2 %v11705_v59  ;;  %12716 = vst [vmem:[#allocation122_spill] sm:$0xff] %v11722_v2  ;;  %v11725_v1 = vor.u32 %v10362_v6, %v9507_v53  ;;  %v9475_v59 = vld [vmem:[#allocation10 + $0x238] sm:$0xf0]  ;;  %v9441_v33 = vld [vmem:[#allocation10 + $0x1d8] sm:$0xf]  ;;  %v11740_v54 = vor.u32 %v10293_v38, %v9209_v7 }
 0x5f8   :  { %12717 = vst [vmem:[#allocation123_spill] sm:$0xff] %v11729_v57  ;;  %v10346_v53 = vld [vmem:[#allocation10 + $0x1dc] sm:$0xf]  ;;  %v10334_v38 = vld [vmem:[#allocation10 + $0x174] sm:$0xf0] }
 0x5f9   :  { %12718 = vst [vmem:[#allocation124_spill] sm:$0xff] %v11731_v31  ;;  %v9443_v6 = vld [vmem:[#allocation10 + $0x1f8] sm:$0xf0] }
 0x5fa   :  { %5841 = vmatpush.bf16.msrb.mxu1 %v11708_v11  ;;  %5775 = vmatpush.bf16.msrb.mxu0 %v11717_v14  ;;  %v10289_v11 = vld [vmem:[#allocation10 + $0x14] sm:$0xf]  ;;  %v11735_v14 = vor.u32 %v10354_v60, %v9475_v59  ;;  %12719 = vst [vmem:[#allocation125_spill] sm:$0xff] %v11740_v54  ;;  %v11746_v15 = vor.u32 %v10346_v53, %v9443_v6  ;;  %v10338_v59 = vld [vmem:[#allocation10 + $0x19c] sm:$0xf] }
 0x5fb   :  { %5866 = vmatpush.bf16.msra.mxu3 %v11711_v19  ;;  %5801 = vmatpush.bf16.msrb.mxu2 %v11719_v34  ;;  %v10350_v19 = vld [vmem:[#allocation10 + $0x1f4] sm:$0xf0]  ;;  %v11742_v56 = vor.u32 %v10289_v11, %v9211_v44  ;;  %v9411_v60 = vld [vmem:[#allocation10 + $0x1b8] sm:$0xf0] }
 0x5fc   :  { %v11744_v37 = vor.u32 %v10350_v19, %v9441_v33  ;;  %12722 = vst [vmem:[#allocation128_spill] sm:$0xff] %v11746_v15  ;;  %v9409_v34 = vld [vmem:[#allocation10 + $0x198] sm:$0xf]  ;;  %v11758_v7 = vor.u32 %v10338_v59, %v9411_v60  ;;  %v10330_v44 = vld [vmem:[#allocation10 + $0x15c] sm:$0xf] }
 0x5fd   :  { %12720 = vst [vmem:[#allocation126_spill] sm:$0xff] %v11742_v56  ;;  %v9377_v19 = vld [vmem:[#allocation10 + $0x158] sm:$0xf]  ;;  %v9379_v33 = vld [vmem:[#allocation10 + $0x178] sm:$0xf0] }
 0x5fe   :  { %5842 = vmatpush.bf16.msrb.mxu1 %v11722_v2  ;;  %5776 = vmatpush.bf16.msrb.mxu0 %v11729_v57  ;;  %12721 = vst [vmem:[#allocation127_spill] sm:$0xff] %v11744_v37  ;;  %v10342_v2 = vld [vmem:[#allocation10 + $0x1b4] sm:$0xf0]  ;;  %v10322_v59 = vld [vmem:[#allocation10 + $0x11c] sm:$0xf] }
 0x5ff   :  { %5867 = vmatpush.bf16.msra.mxu3 %v11725_v1  ;;  %5802 = vmatpush.bf16.msrb.mxu2 %v11731_v31  ;;  %v11756_v11 = vor.u32 %v10342_v2, %v9409_v34  ;;  %12724 = vst [vmem:[#allocation130_spill] sm:$0xff] %v11758_v7  ;;  %v11767_v34 = vor.u32 %v10334_v38, %v9377_v19  ;;  %v9345_v53 = vld [vmem:[#allocation10 + $0x118] sm:$0xf] }
 0x600   :  { %v11769_v2 = vor.u32 %v10330_v44, %v9379_v33  ;;  %v10326_v6 = vld [vmem:[#allocation10 + $0x134] sm:$0xf0]  ;;  %v10314_v44 = vld [vmem:[#allocation10 + $0xdc] sm:$0xf] }
 0x601   :  { %5843 = vmatmul.bf16.vlgmr.msrb.gmra.mxu1 %v12683_v25  ;;  %12723 = vst [vmem:[#allocation129_spill] sm:$0xff] %v11756_v11  ;;  %v11775_v60 = vor.u32 %v10326_v6, %v9345_v53  ;;  %v9313_v19 = vld [vmem:[#allocation10 + $0xd8] sm:$0xf]  ;;  %v9315_v33 = vld [vmem:[#allocation10 + $0xf8] sm:$0xf0] }
 0x602   :  { %6043 = vmatpush.bf16.msra.mxu1 %v11325_v21  ;;  %5777 = vmatpush.bf16.msrb.mxu0 %v11740_v54  ;;  %12725 = vst [vmem:[#allocation131_spill] sm:$0xff] %v11767_v34  ;;  %v10318_v38 = vld [vmem:[#allocation10 + $0xf4] sm:$0xf0] }
 0x603   :  { %5868 = vmatpush.bf16.msra.mxu3 %v11735_v14  ;;  %5803 = vmatpush.bf16.msrb.mxu2 %v11742_v56  ;;  %12726 = vst [vmem:[#allocation132_spill] sm:$0xff] %v11769_v2  ;;  %v9281_v53 = vld [vmem:[#allocation10 + $0x98] sm:$0xf] }
 0x604   :  { %12727 = vst [vmem:[#allocation133_spill] sm:$0xff] %v11775_v60  ;;  %v10310_v6 = vld [vmem:[#allocation10 + $0xb4] sm:$0xf0] }
 0x605   :  { %5778 = vmatmul.bf16.vlgmr.msrb.gmra.mxu0 %v11653_v45 }
 0x606   :  { %6044 = vmatpush.bf16.msra.mxu1 %v11328_v17  ;;  %5822 = vmatpush.bf16.msra.mxu0 %v11744_v37 }
 0x607   :  { %6069 = vmatpush.bf16.msrb.mxu3 %v11330_v39  ;;  %5848 = vmatpush.bf16.msra.mxu2 %v11746_v15 }
 0x608   :  { %5869 = vmatmul.bf16.vlgmr.msra.gmra.mxu3 %v12683_v25  ;;  %5804 = vmatmul.bf16.vlgmr.msrb.gmra.mxu2 %v11653_v45  ;;  %v9347_v25 = vld [vmem:[#allocation10 + $0x138] sm:$0xf0] }
 0x60a   :  { %6045 = vmatpush.bf16.msra.mxu1 %v11339_v61  ;;  %5823 = vmatpush.bf16.msra.mxu0 %v11756_v11  ;;  %v11777_v11 = vor.u32 %v10322_v59, %v9347_v25  ;;  %v10306_v59 = vld [vmem:[#allocation10 + $0x9c] sm:$0xf] }
 0x60b   :  { %6070 = vmatpush.bf16.msrb.mxu3 %v11342_v40  ;;  %5849 = vmatpush.bf16.msra.mxu2 %v11758_v7  ;;  %v11783_v7 = vor.u32 %v10318_v38, %v9313_v19  ;;  %v9283_v25 = vld [vmem:[#allocation10 + $0xb8] sm:$0xf0]  ;;  %v9249_v19 = vld [vmem:[#allocation10 + $0x58] sm:$0xf] }
 0x60c   :  { %12728 = vst [vmem:[#allocation134_spill] sm:$0xff] %v11777_v11  ;;  %v10302_v38 = vld [vmem:[#allocation10 + $0x74] sm:$0xf0] }
 0x60d   :  { %12729 = vst [vmem:[#allocation135_spill] sm:$0xff] %v11783_v7 }
 0x60e   :  { %6046 = vmatpush.bf16.msra.mxu1 %v11351_v62  ;;  %5824 = vmatpush.bf16.msra.mxu0 %v11767_v34  ;;  %v11785_v34 = vor.u32 %v10314_v44, %v9315_v33  ;;  %v10298_v44 = vld [vmem:[#allocation10 + $0x5c] sm:$0xf] }
 0x60f   :  { %6071 = vmatpush.bf16.msrb.mxu3 %v11354_v63  ;;  %5850 = vmatpush.bf16.msra.mxu2 %v11769_v2  ;;  %v11791_v2 = vor.u32 %v10310_v6, %v9281_v53  ;;  %v9251_v33 = vld [vmem:[#allocation10 + $0x78] sm:$0xf0]  ;;  %v9217_v53 = vld [vmem:[#allocation10 + $0x18] sm:$0xf] }
 0x610   :  { %12730 = vst [vmem:[#allocation136_spill] sm:$0xff] %v11785_v34  ;;  %v10294_v6 = vld [vmem:[#allocation10 + $0x34] sm:$0xf0] }
 0x611   :  { %12731 = vst [vmem:[#allocation137_spill] sm:$0xff] %v11791_v2 }
 0x612   :  { %6047 = vmatpush.bf16.msra.mxu1 %v11363_v9  ;;  %5825 = vmatpush.bf16.msra.mxu0 %v11775_v60  ;;  %v11793_v60 = vor.u32 %v10306_v59, %v9283_v25  ;;  %v10290_v59 = vld [vmem:[#allocation10 + $0x1c] sm:$0xf] }
 0x613   :  { %6072 = vmatpush.bf16.msrb.mxu3 %v11368_v0  ;;  %5851 = vmatpush.bf16.msra.mxu2 %v11777_v11  ;;  %v11799_v11 = vor.u32 %v10302_v38, %v9249_v19  ;;  %v9219_v25 = vld [vmem:[#allocation10 + $0x38] sm:$0xf0]  ;;  %v12738_v38 = vld [vmem:[#allocation72_spill] sm:$0xff] }
 0x614   :  { %12732 = vst [vmem:[#allocation138_spill] sm:$0xff] %v11793_v60  ;;  %v11810_v19 = vor.u32 %v10290_v59, %v9219_v25  ;;  %v12743_v59 = vld [vmem:[#allocation78_spill] sm:$0xff] }
 0x615   :  { %12733 = vst [vmem:[#allocation139_spill] sm:$0xff] %v11799_v11  ;;  %v12744_v25 = vld [vmem:[#allocation46_spill] sm:$0xff] }
 0x616   :  { %6048 = vmatpush.bf16.msra.mxu1 %v11377_v13  ;;  %5826 = vmatpush.bf16.msra.mxu0 %v11783_v7  ;;  %v11801_v7 = vor.u32 %v10298_v44, %v9251_v33  ;;  %12736 = vst [vmem:[#allocation142_spill] sm:$0xff] %v11810_v19  ;;  %v12739_v44 = vld [vmem:[#allocation37_spill] sm:$0xff] }
 0x617   :  { %6073 = vmatpush.bf16.msrb.mxu3 %v11380_v23  ;;  %5852 = vmatpush.bf16.msra.mxu2 %v11785_v34  ;;  %v12740_v33 = vld [vmem:[#allocation73_spill] sm:$0xff] }
 0x618   :  { %12734 = vst [vmem:[#allocation140_spill] sm:$0xff] %v11801_v7 }
 0x61a   :  { %6049 = vmatpush.bf16.msra.mxu1 %v11391_v46  ;;  %5827 = vmatpush.bf16.msra.mxu0 %v11791_v2  ;;  %v11808_v2 = vor.u32 %v10294_v6, %v9217_v53  ;;  %v12741_v53 = vld [vmem:[#allocation41_spill] sm:$0xff]  ;;  %v12742_v6 = vld [vmem:[#allocation42_spill] sm:$0xff] }
 0x61b   :  { %6074 = vmatpush.bf16.msrb.mxu3 %v11394_v3  ;;  %5853 = vmatpush.bf16.msra.mxu2 %v11793_v60 }
 0x61c   :  { %12735 = vst [vmem:[#allocation141_spill] sm:$0xff] %v11808_v2 }
 0x61e   :  { %6050 = vmatpush.bf16.msra.mxu1 %v11403_v52  ;;  %5828 = vmatpush.bf16.msra.mxu0 %v11799_v11 }
 0x61f   :  { %6075 = vmatpush.bf16.msrb.mxu3 %v11406_v30  ;;  %5854 = vmatpush.bf16.msra.mxu2 %v11801_v7 }
 0x622   :  { %6095 = vmatpush.bf16.msrb.mxu1 %v11408_v42  ;;  %5829 = vmatpush.bf16.msra.mxu0 %v11808_v2 }
 0x623   :  { %6076 = vmatpush.bf16.msrb.mxu3 %v11418_v32  ;;  %5855 = vmatpush.bf16.msra.mxu2 %v11810_v19 }
 0x625   :  { %5830 = vmatmul.bf16.vlgmr.msra.gmra.mxu0 %v11653_v45 }
 0x626   :  { %6096 = vmatpush.bf16.msrb.mxu1 %v11423_v27  ;;  %6030 = vmatpush.bf16.msrb.mxu0 %v11334_v51 }
 0x627   :  { %6121 = vmatpush.bf16.msra.mxu3 %v11425_v8  ;;  %6056 = vmatpush.bf16.msrb.mxu2 %v11336_v26 }
 0x628   :  { %5856 = vmatmul.bf16.vlgmr.msra.gmra.mxu2 %v11653_v45  ;;  %v12737_v45 = vld [vmem:[#allocation36_spill] sm:$0xff] }
 0x62a   :  { %6097 = vmatpush.bf16.msrb.mxu1 %v11446_v47  ;;  %6031 = vmatpush.bf16.msrb.mxu0 %v11345_v18 }
 0x62b   :  { %6122 = vmatpush.bf16.msra.mxu3 %v11451_v28  ;;  %6057 = vmatpush.bf16.msrb.mxu2 %v11348_v41 }
 0x62e   :  { %6098 = vmatpush.bf16.msrb.mxu1 %v11461_v43  ;;  %6032 = vmatpush.bf16.msrb.mxu0 %v11357_v5 }
 0x62f   :  { %6123 = vmatpush.bf16.msra.mxu3 %v11464_v12  ;;  %6058 = vmatpush.bf16.msrb.mxu2 %v11360_v16  ;;  %v12758_v16 = vld [vmem:[#allocation75_spill] sm:$0xff] }
 0x632   :  { %6099 = vmatpush.bf16.msrb.mxu1 %v11475_v48  ;;  %6033 = vmatpush.bf16.msrb.mxu0 %v11371_v10  ;;  %v12750_v10 = vld [vmem:[#allocation56_spill] sm:$0xff] }
 0x633   :  { %6124 = vmatpush.bf16.msra.mxu3 %v11480_v49  ;;  %6059 = vmatpush.bf16.msrb.mxu2 %v11374_v50 }
 0x636   :  { %6100 = vmatpush.bf16.msrb.mxu1 %v11490_v58  ;;  %6034 = vmatpush.bf16.msrb.mxu0 %v11383_v29  ;;  %v12745_v29 = vld [vmem:[#allocation47_spill] sm:$0xff] }
 0x637   :  { %6125 = vmatpush.bf16.msra.mxu3 %v11494_v55  ;;  %6060 = vmatpush.bf16.msrb.mxu2 %v11388_v20  ;;  %v12746_v20 = vld [vmem:[#allocation48_spill] sm:$0xff] }
 0x63a   :  { %6101 = vmatpush.bf16.msrb.mxu1 %v11505_v24  ;;  %6035 = vmatpush.bf16.msrb.mxu0 %v12737_v45  ;;  %v12747_v45 = vld [vmem:[#allocation49_spill] sm:$0xff] }
 0x63b   :  { %6126 = vmatpush.bf16.msra.mxu3 %v11509_v36  ;;  %6061 = vmatpush.bf16.msrb.mxu2 %v12739_v44  ;;  %v12749_v44 = vld [vmem:[#allocation53_spill] sm:$0xff] }
 0x63c   :  { %v5688_v50 = vpop.f32.mrf.mxu1 }
 0x63e   :  { %6102 = vmatpush.bf16.msrb.mxu1 %v12738_v38  ;;  %6036 = vmatpush.bf16.msrb.mxu0 %v12741_v53  ;;  %v12748_v38 = vld [vmem:[#allocation52_spill] sm:$0xff] }
 0x63f   :  { %6127 = vmatpush.bf16.msra.mxu3 %v12740_v33  ;;  %6062 = vmatpush.bf16.msrb.mxu2 %v12742_v6  ;;  %v12751_v33 = vld [vmem:[#allocation57_spill] sm:$0xff] }
 0x641   :  { %v5714_v6 = vpop.f32.mrf.mxu3 }
 0x642   :  { %6037 = vmatpush.bf16.msrb.mxu0 %v12744_v25  ;;  %v12753_v25 = vld [vmem:[#allocation62_spill] sm:$0xff] }
 0x643   :  { %6128 = vmatpush.bf16.msra.mxu3 %v12743_v59  ;;  %6063 = vmatpush.bf16.msrb.mxu2 %v12745_v29  ;;  %v12752_v59 = vld [vmem:[#allocation61_spill] sm:$0xff] }
 0x644   :  { %v5690_v53 = vpop.f32.mrf.mxu1  ;;  %v12754_v29 = vld [vmem:[#allocation65_spill] sm:$0xff] }
 0x645   :  { %v12759_v53 = vld [vmem:[#allocation76_spill] sm:$0xff] }
 0x646   :  { %6082 = vmatpush.bf16.msra.mxu0 %v12746_v20  ;;  %v12755_v20 = vld [vmem:[#allocation67_spill] sm:$0xff] }
 0x647   :  { %6108 = vmatpush.bf16.msra.mxu2 %v12747_v45  ;;  %v12756_v45 = vld [vmem:[#allocation70_spill] sm:$0xff] }
 0x649   :  { %v5716_v24 = vpop.f32.mrf.mxu3 }
 0x64a   :  { %6083 = vmatpush.bf16.msra.mxu0 %v12748_v38  ;;  %v12757_v38 = vld [vmem:[#allocation71_spill] sm:$0xff] }
 0x64b   :  { %6109 = vmatpush.bf16.msra.mxu2 %v12749_v44 }
 0x64c   :  { %v5740_v44 = vpop.f32.mrf.mxu1 }
 0x64e   :  { %6084 = vmatpush.bf16.msra.mxu0 %v12750_v10  ;;  %v12761_v10 = vld [vmem:[#allocation82_spill] sm:$0xff] }
 0x64f   :  { %6110 = vmatpush.bf16.msra.mxu2 %v12751_v33  ;;  %v12760_v33 = vld [vmem:[#allocation81_spill] sm:$0xff] }
 0x652   :  { %6085 = vmatpush.bf16.msra.mxu0 %v12752_v59  ;;  %v5766_v59 = vpop.f32.mrf.mxu3 }
 0x653   :  { %6111 = vmatpush.bf16.msra.mxu2 %v12753_v25 }
 0x654   :  { %v5742_v24 = vpop.f32.mrf.mxu1 }
 0x656   :  { %6086 = vmatpush.bf16.msra.mxu0 %v12754_v29  ;;  %v11867_v29 = vld [vmem:[%s12364_s12] sm:$0xff] }
 0x657   :  { %6112 = vmatpush.bf16.msra.mxu2 %v12755_v20  ;;  %v11900_v7 = vperm.slane %v11867_v29, 5 }
 0x65a   :  { %6087 = vmatpush.bf16.msra.mxu0 %v12756_v45  ;;  %v11870_v45 = vperm.slane %v11867_v29, 0 }
 0x65b   :  { %6113 = vmatpush.bf16.msra.mxu2 %v12757_v38 }
 0x65c   :  { %12762 = vst [vmem:[#allocation143_spill] sm:$0xff] %v11870_v45 }
 0x65e   :  { %6088 = vmatpush.bf16.msra.mxu0 %v12758_v16  ;;  %v5768_v16 = vpop.f32.mrf.mxu3 }
 0x65f   :  { %6114 = vmatpush.bf16.msra.mxu2 %v12759_v53  ;;  %v11874_v53 = vperm.slane %v11867_v29, 1  ;;  %v11880_v16 = vperm.slane %v11867_v29, 2 }
 0x661   :  { %12763 = vst [vmem:[#allocation144_spill] sm:$0xff] %v11874_v53 }
 0x662   :  { %6089 = vmatpush.bf16.msra.mxu0 %v12760_v33  ;;  %v5675_v38 = vpop.f32.mrf.mxu0  ;;  %v5792_v33 = vpop.f32.mrf.mxu1  ;;  %12764 = vst [vmem:[#allocation145_spill] sm:$0xff] %v11880_v16 }
 0x663   :  { %6115 = vmatpush.bf16.msra.mxu2 %v12761_v10  ;;  %v5676_v20 = vadd.f32 %v5675_v38, %v11870_v45 }
 0x665   :  { %v5689_v25 = vadd.f32 %v5688_v50, %v5676_v20 }
 0x667   :  { %v9703_v10 = vmul.f32 -1.442695, %v5689_v25 }
 0x668   :  { %v5701_v5 = vpop.f32.mrf.mxu2 }
 0x669   :  { %10454 = vpow2.f32 %v9703_v10  ;;  %v5702_v36 = vadd.f32 %v5701_v5, %v11874_v53 }
 0x66a   :  { %v5677_v58 = vpop.f32.mrf.mxu0  ;;  %v5794_v55 = vpop.f32.mrf.mxu1 }
 0x66b   :  { %v5715_v41 = vadd.f32 %v5714_v6, %v5702_v36  ;;  %v11877_v24 = vpop.f32.mrf.mxu3  ;;  %v11884_v58 = vperm.slane %v11867_v29, 3 }
 0x66d   :  { %v9704_v18 = vmul.f32 -1.442695, %v5715_v41  ;;  %12765 = vst [vmem:[#allocation146_spill] sm:$0xff] %v11884_v58 }
 0x66f   :  { %v10455_v48 = vpop.eup %10454  ;;  %10456 = vpow2.f32 %v9704_v18 }
 0x670   :  { %v5883_v50 = vadd.f32 1.0, %v10455_v48  ;;  %v5703_v20 = vpop.f32.mrf.mxu2 }
 0x672   :  { %10458 = vrcp.f32 %v5883_v50  ;;  %v5727_v38 = vpop.f32.mrf.mxu0  ;;  %v5897_v19 = vand.u32 2147483648, %v5883_v50  ;;  %vm5891_vm0 = vweird.f32 %v5883_v50 }
 0x673   :  { %v5728_v25 = vadd.f32 %v5727_v38, %v11880_v16  ;;  %v5820_v10 = vpop.f32.mrf.mxu3 }
 0x675   :  { %v10457_v45 = vpop.eup %10456  ;;  %v5741_v5 = vadd.f32 %v5740_v44, %v5728_v25 }
 0x676   :  { %v5884_v36 = vadd.f32 1.0, %v10457_v45  ;;  %v11890_v45 = vperm.slane %v11867_v29, 4 }
 0x677   :  { %v9705_v41 = vmul.f32 -1.442695, %v5741_v5 }
 0x678   :  { %v10459_v55 = vpop.eup %10458  ;;  %10460 = vrcp.f32 %v5884_v36  ;;  %v5753_v18 = vpop.f32.mrf.mxu2  ;;  %12766 = vst [vmem:[#allocation147_spill] sm:$0xff] %v11890_v45  ;;  %vm5906_vm4 = vweird.f32 %v5884_v36 }
 0x679   :  { %v5887_v6 = vmul.f32 %v10459_v55, %v5883_v50  ;;  %10462 = vpow2.f32 %v9705_v41  ;;  %v5754_v48 = vadd.f32 %v5753_v18, %v11884_v58  ;;  %vm5892_vm15 = vweird.f32 %v10459_v55 }
 0x67a   :  { %v5729_v20 = vpop.f32.mrf.mxu0  ;;  %v5895_v18 = vand.u32 2147483647, %v5883_v50  ;;  %vm11892_vm1 = vmor %vm5891_vm0, %vm5892_vm15 }
 0x67b   :  { %v5888_v53 = vsub.f32 1.0, %v5887_v6  ;;  %v5767_v26 = vadd.f32 %v5766_v59, %v5754_v48  ;;  %v5912_v6 = vand.u32 2147483648, %v5884_v36 }
 0x67c   :  { %vm5896_vm3 = vcmp.eq.f32.partialorder %v5895_v18, 8.507059e+37 }
 0x67d   :  { %v5889_v38 = vmul.f32 %v10459_v55, %v5888_v53  ;;  %10464 = vtanh.f32 %v5767_v26  ;;  %v5910_v53 = vand.u32 2147483647, %v5884_v36  ;;  %v5898_v26 = vor.u32 1.1754944e-38, %v5897_v19 }
 0x67e   :  { %v11887_v51 = vpop.f32.mrf.mxu1  ;;  %v10461_v10 = vpop.eup %10460  ;;  %v5913_v43 = vor.u32 1.1754944e-38, %v5912_v6 }
 0x67f   :  { %v10463_v44 = vpop.eup %10462  ;;  %v5902_v25 = vmul.f32 %v10461_v10, %v5884_v36  ;;  %v5890_v16 = vadd.f32 %v10459_v55, %v5889_v38  ;;  %vm5907_vm2 = vweird.f32 %v10461_v10  ;;  %vm5911_vm6 = vcmp.eq.f32.partialorder %v5910_v53, 8.507059e+37  ;;  %v12769_v36 = vld [vmem:[#allocation59_spill] sm:$0xff] }
 0x680   :  { %v5885_v5 = vadd.f32 1.0, %v10463_v44  ;;  %v5755_v41 = vpop.f32.mrf.mxu2  ;;  %vm5908_vm5 = vmor %vm5906_vm4, %vm5907_vm2 }
 0x681   :  { %v5903_v2 = vsub.f32 1.0, %v5902_v25  ;;  %v5894_v38 = vsel %vm11892_vm1, %v10459_v55, %v5890_v16 }
 0x682   :  { %10466 = vrcp.f32 %v5885_v5  ;;  %v5779_v48 = vpop.f32.mrf.mxu0  ;;  %v5899_v49 = vsel %vm5896_vm3, %v5898_v26, %v5894_v38  ;;  %vm5921_vm8 = vweird.f32 %v5885_v5 }
 0x683   :  { %v5904_v20 = vmul.f32 %v10461_v10, %v5903_v2  ;;  %v5780_v44 = vadd.f32 %v5779_v48, %v11890_v45  ;;  %v10465_v58 = vpop.eup %10464 }
 0x685   :  { %v5905_v25 = vadd.f32 %v10461_v10, %v5904_v20  ;;  %v5793_v50 = vadd.f32 %v5792_v33, %v5780_v44  ;;  %v5933_v20 = vmul.f32 %v10465_v58, %v5899_v49 }
 0x686   :  { %v5846_v41 = vpop.f32.mrf.mxu1 }
 0x687   :  { %v5909_v2 = vsel %vm5908_vm5, %v10461_v10, %v5905_v25  ;;  %v5941_v59 = vrot.slane %v5793_v50, 6  ;;  %v5927_v10 = vand.u32 2147483648, %v5885_v5  ;;  %v5925_v50 = vand.u32 2147483647, %v5885_v5 }
 0x688   :  { %v10467_v55 = vpop.eup %10466  ;;  %v5914_v48 = vsel %vm5911_vm6, %v5913_v43, %v5909_v2 }
 0x689   :  { %v5917_v41 = vmul.f32 %v10467_v55, %v5885_v5  ;;  %v5932_v18 = vmul.f32 0.0, %v5914_v48  ;;  %v5949_v33 = vadd.f32 %v5941_v59, %v12769_v36  ;;  %vm5922_vm7 = vweird.f32 %v10467_v55  ;;  %v12770_v59 = vld [vmem:[#allocation66_spill] sm:$0xff] }
 0x68a   :  { %v5781_v44 = vpop.f32.mrf.mxu0  ;;  %vm5923_vm9 = vmor %vm5921_vm8, %vm5922_vm7  ;;  %v5928_v2 = vor.u32 1.1754944e-38, %v5927_v10  ;;  %vm5926_vm10 = vcmp.eq.f32.partialorder %v5925_v50, 8.507059e+37  ;;  %v12773_v50 = vld [vmem:[#allocation80_spill] sm:$0xff] }
 0x68b   :  { %v11902_v16 = vpop.f32.mrf.mxu3  ;;  %v5805_v19 = vpop.f32.mrf.mxu2  ;;  %v5918_v6 = vsub.f32 1.0, %v5917_v41  ;;  %v11906_v26 = vadd.f32 %v5933_v20, %v5932_v18  ;;  %v9706_v45 = vmul.f32 -1.442695, %v5949_v33 }
 0x68c   :  { %v5806_v38 = vadd.f32 %v5805_v19, %v11900_v7 }
 0x68d   :  { %v5919_v25 = vmul.f32 %v10467_v55, %v5918_v6  ;;  %10468 = vtanh.f32 %v11906_v26 }
 0x68e   :  { %v5819_v53 = vadd.f32 %v11877_v24, %v5806_v38  ;;  %10470 = vpow2.f32 %v9706_v45 }
 0x68f   :  { %v5920_v49 = vadd.f32 %v10467_v55, %v5919_v25  ;;  %v12772_v25 = vld [vmem:[#allocation74_spill] sm:$0xff] }
 0x690   :  { %v5942_v43 = vrot.slane %v5819_v53, 6 }
 0x691   :  { %v5924_v41 = vsel %vm5923_vm9, %v10467_v55, %v5920_v49  ;;  %v11919_v55 = vperm.slane %v11867_v29, 6 }
 0x692   :  { %v5950_v48 = vadd.f32 %v5942_v43, %v12770_v59  ;;  %v5929_v18 = vsel %vm5926_vm10, %v5928_v2, %v5924_v41  ;;  %v12780_v59 = vld [vmem:[#allocation86_spill] sm:$0xff] }
 0x693   :  { %v5872_v58 = vpop.f32.mrf.mxu3  ;;  %v5807_v19 = vpop.f32.mrf.mxu2  ;;  %12771 = vst [vmem:[#allocation59_spill] sm:$0xff] %v11919_v55 }
 0x694   :  { %v9707_v20 = vmul.f32 -1.442695, %v5950_v48  ;;  %v10469_v24 = vpop.eup %10468  ;;  %v12774_v48 = vld [vmem:[#allocation79_spill] sm:$0xff]  ;;  %v12775_v19 = vld [vmem:[#allocation85_spill] sm:$0xff] }
 0x695   :  { %v10471_v33 = vpop.eup %10470  ;;  %v5936_v38 = vmul.f32 %v10469_v24, %v5929_v18  ;;  %v11929_v18 = vperm.slane %v11867_v29, 7 }
 0x696   :  { %10472 = vpow2.f32 %v9707_v20  ;;  %v11911_v44 = vadd.f32 1.0, %v10471_v33 }
 0x697   :  { %v6020_v45 = vrot.slane %v5936_v38, 6  ;;  %12776 = vst [vmem:[#allocation148_spill] sm:$0xff] %v11929_v18 }
 0x698   :  { %10474 = vrcp.f32 %v11911_v44  ;;  %vm5970_vm13 = vweird.f32 %v11911_v44 }
 0x699   :  { %v6023_v6 = vpack.c.bf16 %v6020_v45, %v6020_v45 }
 0x69b   :  { %v11914_v53 = vrot.slane %v6023_v6, 1  ;;  %v12777_v6 = vld [vmem:[#allocation83_spill] sm:$0xff] }
 0x69c   :  { %v10473_v5 = vpop.eup %10472 }
 0x69d   :  { %v5963_v10 = vadd.f32 1.0, %v10473_v5  ;;  %6051 = vmatmul.bf16.vlgmr.msra.gmra.mxu1 %v11914_v53  ;;  %6077 = vmatmul.bf16.vlgmr.msrb.gmra.mxu3 %v11914_v53  ;;  %v12778_v5 = vld [vmem:[#allocation87_spill] sm:$0xff] }
 0x69e   :  { %6147 = vmatpush.bf16.msra.mxu1 %v12772_v25  ;;  %6173 = vmatpush.bf16.msrb.mxu3 %v12773_v50  ;;  %v10475_v43 = vpop.eup %10474 }
 0x69f   :  { %10476 = vrcp.f32 %v5963_v10  ;;  %v5966_v2 = vmul.f32 %v10475_v43, %v11911_v44  ;;  %vm5971_vm11 = vweird.f32 %v10475_v43  ;;  %vm5985_vm14 = vweird.f32 %v5963_v10 }
 0x6a0   :  { %vm11946_vm15 = vmor %vm5970_vm13, %vm5971_vm11 }
 0x6a1   :  { %v5967_v38 = vsub.f32 1.0, %v5966_v2 }
 0x6a2   :  { %v5831_v49 = vpop.f32.mrf.mxu0  ;;  %6148 = vmatpush.bf16.msra.mxu1 %v12774_v48  ;;  %6174 = vmatpush.bf16.msrb.mxu3 %v12775_v19 }
 0x6a3   :  { %v5832_v58 = vadd.f32 %v5831_v49, %v11919_v55  ;;  %v12779_v55 = vld [vmem:[#allocation77_spill] sm:$0xff]  ;;  %v5968_v29 = vmul.f32 %v10475_v43, %v5967_v38  ;;  %v5989_v38 = vand.u32 2147483647, %v5963_v10 }
 0x6a5   :  { %v5845_v41 = vadd.f32 %v11887_v51, %v5832_v58  ;;  %v10477_v20 = vpop.eup %10476  ;;  %vm5990_vm1 = vcmp.eq.f32.partialorder %v5989_v38, 8.507059e+37 }
 0x6a6   :  { %v5981_v24 = vmul.f32 %v10477_v20, %v5963_v10  ;;  %6149 = vmatpush.bf16.msra.mxu1 %v12777_v6  ;;  %6175 = vmatpush.bf16.msrb.mxu3 %v12778_v5  ;;  %vm5986_vm12 = vweird.f32 %v10477_v20 }
 0x6a7   :  { %v5943_v33 = vrot.slane %v5845_v41, 6  ;;  %v12781_v41 = vld [vmem:[#allocation84_spill] sm:$0xff]  ;;  %vm5987_vm0 = vmor %vm5985_vm14, %vm5986_vm12 }
 0x6a8   :  { %v5982_v49 = vsub.f32 1.0, %v5981_v24 }
 0x6a9   :  { %v5951_v50 = vadd.f32 %v5943_v33, %v12779_v55  ;;  %v5991_v33 = vand.u32 2147483648, %v5963_v10 }
 0x6aa   :  { %v5833_v19 = vpop.f32.mrf.mxu0  ;;  %v5983_v58 = vmul.f32 %v10477_v20, %v5982_v49  ;;  %6150 = vmatpush.bf16.msra.mxu1 %v12780_v59  ;;  %6176 = vmatpush.bf16.msrb.mxu3 %v11606_v4  ;;  %v5974_v49 = vand.u32 2147483647, %v11911_v44 }
 0x6ab   :  { %v5857_v45 = vpop.f32.mrf.mxu2  ;;  %v9708_v25 = vmul.f32 -1.442695, %v5951_v50  ;;  %v5969_v50 = vadd.f32 %v10475_v43, %v5968_v29 }
 0x6ac   :  { %v5858_v48 = vadd.f32 %v5857_v45, %v11929_v18  ;;  %v5984_v24 = vadd.f32 %v10477_v20, %v5983_v58  ;;  %vm5975_vm2 = vcmp.eq.f32.partialorder %v5974_v49, 8.507059e+37  ;;  %v12790_v45 = vld [vmem:[#allocation96_spill] sm:$0xff] }
 0x6ad   :  { %10478 = vpow2.f32 %v9708_v25  ;;  %6103 = vmatmul.bf16.vlgmr.msrb.gmra.mxu1 %v11914_v53  ;;  %6129 = vmatmul.bf16.vlgmr.msra.gmra.mxu3 %v11914_v53  ;;  %v5976_v25 = vand.u32 2147483648, %v11911_v44  ;;  %v5973_v58 = vsel %vm11946_vm15, %v10475_v43, %v5969_v50  ;;  %v12788_v44 = vld [vmem:[#allocation94_spill] sm:$0xff]  ;;  %v12791_v50 = vld [vmem:[#allocation95_spill] sm:$0xff] }
 0x6ae   :  { %v5871_v51 = vadd.f32 %v11902_v16, %v5858_v48  ;;  %v12782_v16 = vld [vmem:[#allocation88_spill] sm:$0xff]  ;;  %v12783_v48 = vld [vmem:[#allocation91_spill] sm:$0xff]  ;;  %v6012_v59 = vrot.slane %v12788_v44, 6 }
 0x6af   :  { %6151 = vmatpush.bf16.msra.mxu1 %v12782_v16  ;;  %6177 = vmatpush.bf16.msrb.mxu3 %v12783_v48  ;;  %v12787_v48 = vld [vmem:[#allocation93_spill] sm:$0xff]  ;;  %v5977_v10 = vor.u32 1.1754944e-38, %v5976_v25 }
 0x6b0   :  { %v5944_v2 = vrot.slane %v5871_v51, 6 }
 0x6b2   :  { %v5952_v6 = vadd.f32 %v5944_v2, %v12781_v41  ;;  %v5988_v2 = vsel %vm5987_vm0, %v10477_v20, %v5984_v24  ;;  %v5978_v41 = vsel %vm5975_vm2, %v5977_v10, %v5973_v58  ;;  %v12796_v10 = vld [vmem:[#allocation107_spill] sm:$0xff] }
 0x6b3   :  { %v5859_v19 = vpop.f32.mrf.mxu2  ;;  %v10479_v51 = vpop.eup %10478  ;;  %6178 = vmatpush.bf16.msrb.mxu3 %v12787_v48 }
 0x6b4   :  { %10480 = vtanh.f32 %v5952_v6  ;;  %v5964_v29 = vadd.f32 1.0, %v10479_v51  ;;  %v12786_v19 = vld [vmem:[#allocation90_spill] sm:$0xff]  ;;  %v5992_v6 = vor.u32 1.1754944e-38, %v5991_v33  ;;  %v12789_v51 = vld [vmem:[#allocation92_spill] sm:$0xff]  ;;  %v12792_v33 = vld [vmem:[#allocation97_spill] sm:$0xff] }
 0x6b5   :  { %6152 = vmatpush.bf16.msra.mxu1 %v12786_v19 }
 0x6b6   :  { %10482 = vrcp.f32 %v5964_v29  ;;  %v5993_v4 = vsel %vm5990_vm1, %v5992_v6, %v5988_v2  ;;  %vm6000_vm4 = vweird.f32 %v5964_v29  ;;  %v12795_v6 = vld [vmem:[#allocation102_spill] sm:$0xff] }
 0x6b7   :  { %6179 = vmatpush.bf16.msrb.mxu3 %v12790_v45  ;;  %v6014_v43 = vmul.f32 %v6012_v59, %v5993_v4  ;;  %v6004_v59 = vand.u32 2147483647, %v5964_v29 }
 0x6b9   :  { %6153 = vmatpush.bf16.msra.mxu1 %v12789_v51  ;;  %vm6005_vm6 = vcmp.eq.f32.partialorder %v6004_v59, 8.507059e+37  ;;  %v12803_v59 = vld [vmem:[#allocation104_spill] sm:$0xff] }
 0x6ba   :  { %v10481_v16 = vpop.eup %10480 }
 0x6bb   :  { %v6015_v18 = vmul.f32 %v10481_v16, %v5978_v41  ;;  %6180 = vmatpush.bf16.msrb.mxu3 %v11642_v35  ;;  %v6006_v41 = vand.u32 2147483648, %v5964_v29  ;;  %v12794_v16 = vld [vmem:[#allocation103_spill] sm:$0xff] }
 0x6bc   :  { %v10483_v20 = vpop.eup %10482 }
 0x6bd   :  { %v11958_v24 = vadd.f32 %v6015_v18, %v6014_v43  ;;  %6154 = vmatpush.bf16.msra.mxu1 %v12791_v50  ;;  %v5996_v25 = vmul.f32 %v10483_v20, %v5964_v29  ;;  %vm6001_vm3 = vweird.f32 %v10483_v20  ;;  %v12793_v18 = vld [vmem:[#allocation98_spill] sm:$0xff]  ;;  %v6007_v58 = vor.u32 1.1754944e-38, %v6006_v41  ;;  %v12799_v29 = vld [vmem:[#allocation100_spill] sm:$0xff] }
 0x6be   :  { %6181 = vmatmul.bf16.vlgmr.msrb.gmra.mxu3 %v11914_v53  ;;  %vm6002_vm5 = vmor %vm6000_vm4, %vm6001_vm3  ;;  %v12801_v41 = vld [vmem:[#allocation110_spill] sm:$0xff] }
 0x6bf   :  { %6225 = vmatpush.bf16.msra.mxu3 %v11646_v22  ;;  %v5997_v38 = vsub.f32 1.0, %v5996_v25  ;;  %10484 = vtanh.f32 %v11958_v24  ;;  %v12797_v22 = vld [vmem:[#allocation106_spill] sm:$0xff] }
 0x6c0   :  { %6155 = vmatmul.bf16.vlgmr.msra.gmra.mxu1 %v11914_v53 }
 0x6c1   :  { %6199 = vmatpush.bf16.msrb.mxu1 %v12792_v33  ;;  %v5998_v4 = vmul.f32 %v10483_v20, %v5997_v38  ;;  %v12798_v33 = vld [vmem:[#allocation111_spill] sm:$0xff] }
 0x6c3   :  { %6226 = vmatpush.bf16.msra.mxu3 %v12794_v16  ;;  %v5999_v49 = vadd.f32 %v10483_v20, %v5998_v4  ;;  %v12802_v4 = vld [vmem:[#allocation115_spill] sm:$0xff] }
 0x6c5   :  { %6200 = vmatpush.bf16.msrb.mxu1 %v12793_v18  ;;  %v6003_v2 = vsel %vm6002_vm5, %v10483_v20, %v5999_v49  ;;  %v10485_v44 = vpop.eup %10484  ;;  %v12800_v20 = vld [vmem:[#allocation101_spill] sm:$0xff] }
 0x6c6   :  { %v6008_v43 = vsel %vm6005_vm6, %v6007_v58, %v6003_v2  ;;  %v12804_v49 = vld [vmem:[#allocation105_spill] sm:$0xff]  ;;  %v12805_v58 = vld [vmem:[#allocation114_spill] sm:$0xff]  ;;  %v12806_v2 = vld [vmem:[#allocation119_spill] sm:$0xff] }
 0x6c7   :  { %6227 = vmatpush.bf16.msra.mxu3 %v12796_v10  ;;  %v6018_v25 = vmul.f32 %v10485_v44, %v6008_v43  ;;  %v12807_v44 = vld [vmem:[#allocation108_spill] sm:$0xff]  ;;  %v12808_v43 = vld [vmem:[#allocation109_spill] sm:$0xff] }
 0x6c9   :  { %6201 = vmatpush.bf16.msrb.mxu1 %v12795_v6  ;;  %v6022_v38 = vpack.c.bf16 %v6018_v25, %v6018_v25  ;;  %v12809_v25 = vld [vmem:[#allocation118_spill] sm:$0xff] }
 0x6cb   :  { %6228 = vmatpush.bf16.msra.mxu3 %v12798_v33  ;;  %v11973_v18 = vrot.slane %v6022_v38, 1  ;;  %v12810_v38 = vld [vmem:[#allocation112_spill] sm:$0xff] }
 0x6cd   :  { %6202 = vmatpush.bf16.msrb.mxu1 %v12797_v22  ;;  %6038 = vmatmul.bf16.vlgmr.msrb.gmra.mxu0 %v11973_v18 }
 0x6ce   :  { %6064 = vmatmul.bf16.vlgmr.msrb.gmra.mxu2 %v11973_v18  ;;  %6134 = vmatpush.bf16.msrb.mxu0 %v12799_v29  ;;  %v12812_v29 = vld [vmem:[#allocation122_spill] sm:$0xff] }
 0x6cf   :  { %6160 = vmatpush.bf16.msrb.mxu2 %v12800_v20  ;;  %6229 = vmatpush.bf16.msra.mxu3 %v12802_v4  ;;  %v12811_v20 = vld [vmem:[#allocation113_spill] sm:$0xff] }
 0x6d1   :  { %6203 = vmatpush.bf16.msrb.mxu1 %v12801_v41 }
 0x6d2   :  { %6135 = vmatpush.bf16.msrb.mxu0 %v12803_v59 }
 0x6d3   :  { %6161 = vmatpush.bf16.msrb.mxu2 %v12804_v49  ;;  %6230 = vmatpush.bf16.msra.mxu3 %v12806_v2 }
 0x6d5   :  { %6204 = vmatpush.bf16.msrb.mxu1 %v12805_v58 }
 0x6d6   :  { %6136 = vmatpush.bf16.msrb.mxu0 %v12807_v44 }
 0x6d7   :  { %6162 = vmatpush.bf16.msrb.mxu2 %v12808_v43  ;;  %6231 = vmatpush.bf16.msra.mxu3 %v11725_v1  ;;  %v12813_v43 = vld [vmem:[#allocation116_spill] sm:$0xff] }
 0x6d9   :  { %6205 = vmatpush.bf16.msrb.mxu1 %v12809_v25 }
 0x6da   :  { %6137 = vmatpush.bf16.msrb.mxu0 %v12810_v38  ;;  %v12814_v38 = vld [vmem:[#allocation117_spill] sm:$0xff] }
 0x6db   :  { %6163 = vmatpush.bf16.msrb.mxu2 %v12811_v20  ;;  %6232 = vmatpush.bf16.msra.mxu3 %v11735_v14  ;;  %v12815_v20 = vld [vmem:[#allocation120_spill] sm:$0xff] }
 0x6dd   :  { %6206 = vmatpush.bf16.msrb.mxu1 %v12812_v29  ;;  %6090 = vmatmul.bf16.vlgmr.msra.gmra.mxu0 %v11973_v18 }
 0x6de   :  { %6116 = vmatmul.bf16.vlgmr.msra.gmra.mxu2 %v11973_v18  ;;  %6233 = vmatmul.bf16.vlgmr.msra.gmra.mxu3 %v11914_v53 }
 0x6df   :  { %6433 = vmatpush.bf16.msrb.mxu3 %v11330_v39  ;;  %6138 = vmatpush.bf16.msrb.mxu0 %v12813_v43 }
 0x6e0   :  { %6207 = vmatmul.bf16.vlgmr.msrb.gmra.mxu1 %v11914_v53  ;;  %6164 = vmatpush.bf16.msrb.mxu2 %v12814_v38  ;;  %v12817_v53 = vld [vmem:[#allocation129_spill] sm:$0xff] }
 0x6e1   :  { %6407 = vmatpush.bf16.msra.mxu1 %v11325_v21  ;;  %v12816_v21 = vld [vmem:[#allocation121_spill] sm:$0xff] }
 0x6e3   :  { %6434 = vmatpush.bf16.msrb.mxu3 %v11342_v40  ;;  %6139 = vmatpush.bf16.msrb.mxu0 %v12815_v20 }
 0x6e4   :  { %6165 = vmatpush.bf16.msrb.mxu2 %v12816_v21 }
 0x6e5   :  { %6408 = vmatpush.bf16.msra.mxu1 %v11328_v17 }
 0x6e7   :  { %6435 = vmatpush.bf16.msrb.mxu3 %v11354_v63  ;;  %6140 = vmatpush.bf16.msrb.mxu0 %v11729_v57 }
 0x6e8   :  { %6166 = vmatpush.bf16.msrb.mxu2 %v11731_v31 }
 0x6e9   :  { %6409 = vmatpush.bf16.msra.mxu1 %v11339_v61 }
 0x6eb   :  { %6436 = vmatpush.bf16.msrb.mxu3 %v11368_v0  ;;  %6141 = vmatpush.bf16.msrb.mxu0 %v11740_v54 }
 0x6ec   :  { %6167 = vmatpush.bf16.msrb.mxu2 %v11742_v56  ;;  %v12819_v56 = vld [vmem:[#allocation131_spill] sm:$0xff] }
 0x6ed   :  { %6410 = vmatpush.bf16.msra.mxu1 %v11351_v62  ;;  %v12818_v62 = vld [vmem:[#allocation130_spill] sm:$0xff] }
 0x6ee   :  { %6142 = vmatmul.bf16.vlgmr.msrb.gmra.mxu0 %v11973_v18 }
 0x6ef   :  { %6186 = vmatpush.bf16.msra.mxu0 %v11744_v37  ;;  %6437 = vmatpush.bf16.msrb.mxu3 %v11380_v23  ;;  %v12820_v37 = vld [vmem:[#allocation132_spill] sm:$0xff]  ;;  %v12821_v23 = vld [vmem:[#allocation133_spill] sm:$0xff] }
 0x6f0   :  { %6212 = vmatpush.bf16.msra.mxu2 %v11746_v15 }
 0x6f1   :  { %6411 = vmatpush.bf16.msra.mxu1 %v11363_v9  ;;  %6168 = vmatmul.bf16.vlgmr.msrb.gmra.mxu2 %v11973_v18  ;;  %v12822_v9 = vld [vmem:[#allocation134_spill] sm:$0xff] }
 0x6f3   :  { %6187 = vmatpush.bf16.msra.mxu0 %v12817_v53  ;;  %6438 = vmatpush.bf16.msrb.mxu3 %v11394_v3  ;;  %v12823_v3 = vld [vmem:[#allocation135_spill] sm:$0xff] }
 0x6f4   :  { %6213 = vmatpush.bf16.msra.mxu2 %v12818_v62 }
 0x6f5   :  { %6412 = vmatpush.bf16.msra.mxu1 %v11377_v13 }
 0x6f7   :  { %6188 = vmatpush.bf16.msra.mxu0 %v12819_v56  ;;  %6439 = vmatpush.bf16.msrb.mxu3 %v11406_v30  ;;  %v12824_v30 = vld [vmem:[#allocation137_spill] sm:$0xff]  ;;  %v12871_v56 = vld [vmem:[#allocation144_spill] sm:$0xff] }
 0x6f8   :  { %6214 = vmatpush.bf16.msra.mxu2 %v12820_v37 }
 0x6f9   :  { %6413 = vmatpush.bf16.msra.mxu1 %v11391_v46 }
 0x6fb   :  { %6189 = vmatpush.bf16.msra.mxu0 %v12821_v23  ;;  %6440 = vmatpush.bf16.msrb.mxu3 %v11418_v32  ;;  %v12856_v32 = vld [vmem:[#allocation52_spill] sm:$0xff] }
 0x6fc   :  { %6215 = vmatpush.bf16.msra.mxu2 %v12822_v9  ;;  %v12862_v9 = vld [vmem:[#allocation65_spill] sm:$0xff] }
 0x6fd   :  { %6414 = vmatpush.bf16.msra.mxu1 %v11403_v52  ;;  %v12858_v52 = vld [vmem:[#allocation56_spill] sm:$0xff] }
 0x6ff   :  { %6485 = vmatpush.bf16.msra.mxu3 %v11425_v8  ;;  %6190 = vmatpush.bf16.msra.mxu0 %v12823_v3  ;;  %v12826_v8 = vld [vmem:[#allocation54_spill] sm:$0xff]  ;;  %v12827_v3 = vld [vmem:[#allocation60_spill] sm:$0xff] }
 0x700   :  { %6216 = vmatpush.bf16.msra.mxu2 %v11785_v34  ;;  %v12828_v34 = vld [vmem:[#allocation141_spill] sm:$0xff] }
 0x701   :  { %6459 = vmatpush.bf16.msrb.mxu1 %v11408_v42  ;;  %v12825_v42 = vld [vmem:[#allocation140_spill] sm:$0xff] }
 0x703   :  { %6486 = vmatpush.bf16.msra.mxu3 %v11451_v28  ;;  %6191 = vmatpush.bf16.msra.mxu0 %v12824_v30  ;;  %v12830_v28 = vld [vmem:[#allocation17_spill] sm:$0xff]  ;;  %v12831_v30 = vld [vmem:[#allocation18_spill] sm:$0xff] }
 0x704   :  { %6217 = vmatpush.bf16.msra.mxu2 %v11793_v60  ;;  %v12832_v60 = vld [vmem:[#allocation58_spill] sm:$0xff] }
 0x705   :  { %6460 = vmatpush.bf16.msrb.mxu1 %v11423_v27  ;;  %v12829_v27 = vld [vmem:[#allocation142_spill] sm:$0xff] }
 0x707   :  { %6487 = vmatpush.bf16.msra.mxu3 %v11464_v12  ;;  %6192 = vmatpush.bf16.msra.mxu0 %v11799_v11  ;;  %v12843_v11 = vld [vmem:[#allocation29_spill] sm:$0xff] }
 0x708   :  { %6218 = vmatpush.bf16.msra.mxu2 %v12825_v42  ;;  %v12834_v42 = vld [vmem:[#allocation20_spill] sm:$0xff] }
 0x709   :  { %6461 = vmatpush.bf16.msrb.mxu1 %v11446_v47  ;;  %v12833_v47 = vld [vmem:[#allocation64_spill] sm:$0xff] }
 0x70b   :  { %6488 = vmatpush.bf16.msra.mxu3 %v12827_v3  ;;  %6193 = vmatpush.bf16.msra.mxu0 %v12828_v34  ;;  %v12836_v3 = vld [vmem:[#allocation63_spill] sm:$0xff]  ;;  %v12837_v34 = vld [vmem:[#allocation69_spill] sm:$0xff] }
 0x70c   :  { %6219 = vmatpush.bf16.msra.mxu2 %v12829_v27  ;;  %v12838_v27 = vld [vmem:[#allocation24_spill] sm:$0xff] }
 0x70d   :  { %6462 = vmatpush.bf16.msrb.mxu1 %v12826_v8  ;;  %v12835_v8 = vld [vmem:[#allocation21_spill] sm:$0xff] }
 0x70e   :  { %6194 = vmatmul.bf16.vlgmr.msra.gmra.mxu0 %v11973_v18 }
 0x70f   :  { %6394 = vmatpush.bf16.msrb.mxu0 %v12830_v28  ;;  %6489 = vmatpush.bf16.msra.mxu3 %v12833_v47  ;;  %v12839_v28 = vld [vmem:[#allocation25_spill] sm:$0xff]  ;;  %v12842_v47 = vld [vmem:[#allocation28_spill] sm:$0xff] }
 0x710   :  { %6420 = vmatpush.bf16.msrb.mxu2 %v12831_v30  ;;  %v12840_v30 = vld [vmem:[#allocation68_spill] sm:$0xff] }
 0x711   :  { %6463 = vmatpush.bf16.msrb.mxu1 %v12832_v60  ;;  %6220 = vmatmul.bf16.vlgmr.msra.gmra.mxu2 %v11973_v18  ;;  %v12841_v60 = vld [vmem:[#allocation73_spill] sm:$0xff]  ;;  %v12844_v18 = vld [vmem:[#allocation72_spill] sm:$0xff] }
 0x713   :  { %6395 = vmatpush.bf16.msrb.mxu0 %v12834_v42  ;;  %6490 = vmatpush.bf16.msra.mxu3 %v12837_v34  ;;  %v12845_v42 = vld [vmem:[#allocation78_spill] sm:$0xff] }
 0x714   :  { %6421 = vmatpush.bf16.msrb.mxu2 %v12835_v8  ;;  %v12846_v8 = vld [vmem:[#allocation32_spill] sm:$0xff] }
 0x715   :  { %6464 = vmatpush.bf16.msrb.mxu1 %v12836_v3  ;;  %v12847_v3 = vld [vmem:[#allocation33_spill] sm:$0xff] }
 0x717   :  { %6396 = vmatpush.bf16.msrb.mxu0 %v12838_v27  ;;  %6491 = vmatpush.bf16.msra.mxu3 %v12841_v60  ;;  %v12848_v27 = vld [vmem:[#allocation36_spill] sm:$0xff]  ;;  %v12851_v60 = vld [vmem:[#allocation42_spill] sm:$0xff] }
 0x718   :  { %6422 = vmatpush.bf16.msrb.mxu2 %v12839_v28  ;;  %v12849_v28 = vld [vmem:[#allocation37_spill] sm:$0xff] }
 0x719   :  { %6465 = vmatpush.bf16.msrb.mxu1 %v12840_v30  ;;  %v12850_v30 = vld [vmem:[#allocation41_spill] sm:$0xff] }
 0x71a   :  { %v6052_v34 = vpop.f32.mrf.mxu1 }
 0x71b   :  { %6397 = vmatpush.bf16.msrb.mxu0 %v12842_v47  ;;  %6492 = vmatpush.bf16.msra.mxu3 %v12845_v42  ;;  %v12854_v42 = vld [vmem:[#allocation48_spill] sm:$0xff] }
 0x71c   :  { %6423 = vmatpush.bf16.msrb.mxu2 %v12843_v11  ;;  %v12852_v11 = vld [vmem:[#allocation46_spill] sm:$0xff] }
 0x71d   :  { %6466 = vmatpush.bf16.msrb.mxu1 %v12844_v18  ;;  %v12853_v18 = vld [vmem:[#allocation47_spill] sm:$0xff] }
 0x71f   :  { %6398 = vmatpush.bf16.msrb.mxu0 %v12846_v8  ;;  %v12855_v8 = vld [vmem:[#allocation49_spill] sm:$0xff] }
 0x720   :  { %6424 = vmatpush.bf16.msrb.mxu2 %v12847_v3  ;;  %v6078_v47 = vpop.f32.mrf.mxu3 }
 0x722   :  { %v6054_v12 = vpop.f32.mrf.mxu1 }
 0x723   :  { %6399 = vmatpush.bf16.msrb.mxu0 %v12848_v27  ;;  %v12857_v27 = vld [vmem:[#allocation53_spill] sm:$0xff] }
 0x724   :  { %6425 = vmatpush.bf16.msrb.mxu2 %v12849_v28  ;;  %v12860_v12 = vld [vmem:[#allocation61_spill] sm:$0xff] }
 0x727   :  { %6400 = vmatpush.bf16.msrb.mxu0 %v12850_v30  ;;  %v12859_v30 = vld [vmem:[#allocation57_spill] sm:$0xff] }
 0x728   :  { %6426 = vmatpush.bf16.msrb.mxu2 %v12851_v60  ;;  %v6080_v3 = vpop.f32.mrf.mxu3 }
 0x72a   :  { %v6104_v28 = vpop.f32.mrf.mxu1 }
 0x72b   :  { %6401 = vmatpush.bf16.msrb.mxu0 %v12852_v11  ;;  %v12861_v11 = vld [vmem:[#allocation62_spill] sm:$0xff] }
 0x72c   :  { %6427 = vmatpush.bf16.msrb.mxu2 %v12853_v18 }
 0x72f   :  { %6446 = vmatpush.bf16.msra.mxu0 %v12854_v42  ;;  %v12863_v42 = vld [vmem:[#allocation67_spill] sm:$0xff] }
 0x730   :  { %6472 = vmatpush.bf16.msra.mxu2 %v12855_v8  ;;  %v6130_v60 = vpop.f32.mrf.mxu3  ;;  %v12864_v8 = vld [vmem:[#allocation70_spill] sm:$0xff] }
 0x732   :  { %v6106_v18 = vpop.f32.mrf.mxu1 }
 0x733   :  { %6447 = vmatpush.bf16.msra.mxu0 %v12856_v32  ;;  %v12865_v32 = vld [vmem:[#allocation71_spill] sm:$0xff]  ;;  %v12869_v18 = vld [vmem:[#allocation82_spill] sm:$0xff] }
 0x734   :  { %6473 = vmatpush.bf16.msra.mxu2 %v12857_v27 }
 0x737   :  { %6448 = vmatpush.bf16.msra.mxu0 %v12858_v52  ;;  %v12866_v52 = vld [vmem:[#allocation75_spill] sm:$0xff] }
 0x738   :  { %6474 = vmatpush.bf16.msra.mxu2 %v12859_v30  ;;  %v6132_v3 = vpop.f32.mrf.mxu3  ;;  %v12867_v30 = vld [vmem:[#allocation76_spill] sm:$0xff] }
 0x739   :  { %v12870_v3 = vld [vmem:[#allocation143_spill] sm:$0xff] }
 0x73b   :  { %6449 = vmatpush.bf16.msra.mxu0 %v12860_v12  ;;  %v12868_v12 = vld [vmem:[#allocation81_spill] sm:$0xff] }
 0x73c   :  { %6475 = vmatpush.bf16.msra.mxu2 %v12861_v11 }
 0x73d   :  { %v12085_v27 = vpop.f32.mrf.mxu1 }
 0x73f   :  { %6450 = vmatpush.bf16.msra.mxu0 %v12862_v9 }
 0x740   :  { %6476 = vmatpush.bf16.msra.mxu2 %v12863_v42 }
 0x741   :  { %v12089_v23 = vpop.f32.mrf.mxu3 }
 0x743   :  { %6451 = vmatpush.bf16.msra.mxu0 %v12864_v8 }
 0x744   :  { %6477 = vmatpush.bf16.msra.mxu2 %v12865_v32 }
 0x745   :  { %v6158_v9 = vpop.f32.mrf.mxu1 }
 0x747   :  { %6452 = vmatpush.bf16.msra.mxu0 %v12866_v52 }
 0x748   :  { %6478 = vmatpush.bf16.msra.mxu2 %v12867_v30 }
 0x749   :  { %v6184_v42 = vpop.f32.mrf.mxu3 }
 0x74a   :  { %v6039_v11 = vpop.f32.mrf.mxu0  ;;  %v12872_v42 = vld [vmem:[#allocation145_spill] sm:$0xff] }
 0x74b   :  { %6453 = vmatpush.bf16.msra.mxu0 %v12868_v12  ;;  %v6040_v46 = vadd.f32 %v6039_v11, %v12870_v3 }
 0x74c   :  { %6479 = vmatpush.bf16.msra.mxu2 %v12869_v18 }
 0x74d   :  { %v6053_v8 = vadd.f32 %v6052_v34, %v6040_v46 }
 0x74f   :  { %v9709_v37 = vmul.f32 -1.442695, %v6053_v8 }
 0x751   :  { %v6065_v32 = vpop.f32.mrf.mxu2  ;;  %10486 = vpow2.f32 %v9709_v37 }
 0x752   :  { %v6066_v13 = vadd.f32 %v6065_v32, %v12871_v56  ;;  %v6041_v52 = vpop.f32.mrf.mxu0 }
 0x754   :  { %v6079_v62 = vadd.f32 %v6078_v47, %v6066_v13  ;;  %v12873_v13 = vld [vmem:[#allocation146_spill] sm:$0xff] }
 0x756   :  { %v9710_v30 = vmul.f32 -1.442695, %v6079_v62 }
 0x757   :  { %v10487_v53 = vpop.eup %10486 }
 0x758   :  { %10488 = vpow2.f32 %v9710_v30  ;;  %v6247_v15 = vadd.f32 1.0, %v10487_v53 }
 0x759   :  { %v6067_v12 = vpop.f32.mrf.mxu2 }
 0x75a   :  { %10490 = vrcp.f32 %v6247_v15  ;;  %v6091_v18 = vpop.f32.mrf.mxu0  ;;  %vm6255_vm8 = vweird.f32 %v6247_v15 }
 0x75b   :  { %v6092_v54 = vadd.f32 %v6091_v18, %v12872_v42 }
 0x75d   :  { %v12095_v9 = vpop.f32.mrf.mxu1  ;;  %v6105_v46 = vadd.f32 %v6104_v28, %v6092_v54 }
 0x75e   :  { %v10489_v11 = vpop.eup %10488 }
 0x75f   :  { %v6248_v8 = vadd.f32 1.0, %v10489_v11  ;;  %v9711_v34 = vmul.f32 -1.442695, %v6105_v46  ;;  %v6261_v11 = vand.u32 2147483648, %v6247_v15 }
 0x760   :  { %v10491_v37 = vpop.eup %10490 }
 0x761   :  { %10492 = vrcp.f32 %v6248_v8  ;;  %v6117_v32 = vpop.f32.mrf.mxu2  ;;  %v6251_v52 = vmul.f32 %v10491_v37, %v6247_v15  ;;  %v12098_v62 = vpop.f32.mrf.mxu3  ;;  %vm6256_vm7 = vweird.f32 %v10491_v37  ;;  %v6276_v63 = vand.u32 2147483648, %v6248_v8 }
 0x762   :  { %10494 = vpow2.f32 %v9711_v34  ;;  %v6118_v30 = vadd.f32 %v6117_v32, %v12873_v13  ;;  %v6093_v47 = vpop.f32.mrf.mxu0  ;;  %v6259_v34 = vand.u32 2147483647, %v6247_v15  ;;  %vm6257_vm9 = vmor %vm6255_vm8, %vm6256_vm7  ;;  %vm6270_vm11 = vweird.f32 %v6248_v8 }
 0x763   :  { %v6252_v53 = vsub.f32 1.0, %v6251_v52  ;;  %v6274_v52 = vand.u32 2147483647, %v6248_v8  ;;  %v6262_v47 = vor.u32 1.1754944e-38, %v6261_v11 }
 0x764   :  { %v6131_v56 = vadd.f32 %v6130_v60, %v6118_v30  ;;  %vm6260_vm12 = vcmp.eq.f32.partialorder %v6259_v34, 8.507059e+37 }
 0x765   :  { %v6210_v12 = vpop.f32.mrf.mxu1  ;;  %v6253_v3 = vmul.f32 %v10491_v37, %v6252_v53  ;;  %v12874_v53 = vld [vmem:[#allocation147_spill] sm:$0xff]  ;;  %vm6275_vm14 = vcmp.eq.f32.partialorder %v6274_v52, 8.507059e+37 }
 0x766   :  { %10496 = vtanh.f32 %v6131_v56 }
 0x767   :  { %v10493_v0 = vpop.eup %10492  ;;  %v6254_v28 = vadd.f32 %v10491_v37, %v6253_v3 }
 0x768   :  { %v10495_v18 = vpop.eup %10494  ;;  %v6266_v42 = vmul.f32 %v10493_v0, %v6248_v8  ;;  %vm6271_vm10 = vweird.f32 %v10493_v0 }
 0x769   :  { %v6249_v54 = vadd.f32 1.0, %v10495_v18  ;;  %v6119_v46 = vpop.f32.mrf.mxu2  ;;  %v6236_v57 = vpop.f32.mrf.mxu3  ;;  %v6258_v60 = vsel %vm6257_vm9, %v10491_v37, %v6254_v28  ;;  %vm6272_vm13 = vmor %vm6270_vm11, %vm6271_vm10 }
 0x76a   :  { %v6267_v31 = vsub.f32 1.0, %v6266_v42  ;;  %v6277_v42 = vor.u32 1.1754944e-38, %v6276_v63  ;;  %v6263_v18 = vsel %vm6260_vm12, %v6262_v47, %v6258_v60 }
 0x76b   :  { %10498 = vrcp.f32 %v6249_v54  ;;  %v6143_v30 = vpop.f32.mrf.mxu0  ;;  %v6291_v60 = vand.u32 2147483648, %v6249_v54  ;;  %v6289_v47 = vand.u32 2147483647, %v6249_v54  ;;  %vm6285_vm0 = vweird.f32 %v6249_v54 }
 0x76c   :  { %v6268_v32 = vmul.f32 %v10493_v0, %v6267_v31  ;;  %v6144_v3 = vadd.f32 %v6143_v30, %v12874_v53  ;;  %v10497_v56 = vpop.eup %10496 }
 0x76d   :  { %v6297_v11 = vmul.f32 %v10497_v56, %v6263_v18  ;;  %vm6290_vm2 = vcmp.eq.f32.partialorder %v6289_v47, 8.507059e+37  ;;  %v12880_v47 = vld [vmem:[#allocation85_spill] sm:$0xff] }
 0x76e   :  { %v6269_v12 = vadd.f32 %v10493_v0, %v6268_v32  ;;  %v6157_v57 = vadd.f32 %v12085_v27, %v6144_v3 }
 0x770   :  { %v6273_v15 = vsel %vm6272_vm13, %v10493_v0, %v6269_v12  ;;  %v6305_v13 = vrot.slane %v6157_v57, 4 }
 0x771   :  { %v10499_v46 = vpop.eup %10498  ;;  %v6278_v31 = vsel %vm6275_vm14, %v6277_v42, %v6273_v15 }
 0x772   :  { %v6281_v37 = vmul.f32 %v10499_v46, %v6249_v54  ;;  %v6296_v28 = vmul.f32 %v6278_v31, %v11906_v26  ;;  %v6313_v8 = vadd.f32 %v6305_v13, %v12769_v36  ;;  %vm6286_vm15 = vweird.f32 %v10499_v46 }
 0x773   :  { %v6145_v63 = vpop.f32.mrf.mxu0  ;;  %vm6287_vm1 = vmor %vm6285_vm0, %vm6286_vm15  ;;  %v6292_v13 = vor.u32 1.1754944e-38, %v6291_v60 }
 0x774   :  { %v6169_v61 = vpop.f32.mrf.mxu2  ;;  %v6282_v32 = vsub.f32 1.0, %v6281_v37  ;;  %v12106_v30 = vadd.f32 %v6297_v11, %v6296_v28  ;;  %v9712_v27 = vmul.f32 -1.442695, %v6313_v8 }
 0x775   :  { %v6170_v34 = vadd.f32 %v6169_v61, %v11900_v7  ;;  %v12875_v61 = vld [vmem:[#allocation66_spill] sm:$0xff] }
 0x776   :  { %v6283_v52 = vmul.f32 %v10499_v46, %v6282_v32  ;;  %10500 = vtanh.f32 %v12106_v30  ;;  %v12877_v32 = vld [vmem:[#allocation80_spill] sm:$0xff] }
 0x777   :  { %v6183_v0 = vadd.f32 %v12089_v23, %v6170_v34  ;;  %10502 = vpow2.f32 %v9712_v27  ;;  %v12878_v27 = vld [vmem:[#allocation59_spill] sm:$0xff] }
 0x778   :  { %v6284_v3 = vadd.f32 %v10499_v46, %v6283_v52  ;;  %v12879_v52 = vld [vmem:[#allocation79_spill] sm:$0xff] }
 0x779   :  { %v6306_v26 = vrot.slane %v6183_v0, 4 }
 0x77a   :  { %v6288_v56 = vsel %vm6287_vm1, %v10499_v46, %v6284_v3  ;;  %v12876_v46 = vld [vmem:[#allocation74_spill] sm:$0xff] }
 0x77b   :  { %v6314_v12 = vadd.f32 %v6306_v26, %v12875_v61  ;;  %v6293_v18 = vsel %vm6290_vm2, %v6292_v13, %v6288_v56 }
 0x77c   :  { %v6171_v42 = vpop.f32.mrf.mxu2  ;;  %v10501_v15 = vpop.eup %10500 }
 0x77d   :  { %v9713_v57 = vmul.f32 -1.442695, %v6314_v12  ;;  %v10503_v23 = vpop.eup %10502  ;;  %v6300_v31 = vmul.f32 %v10501_v15, %v6293_v18  ;;  %v12881_v42 = vld [vmem:[#allocation83_spill] sm:$0xff] }
 0x77e   :  { %v12111_v37 = vadd.f32 1.0, %v10503_v23 }
 0x77f   :  { %10504 = vpow2.f32 %v9713_v57  ;;  %v6384_v28 = vrot.slane %v6300_v31, 4  ;;  %v12882_v31 = vld [vmem:[#allocation148_spill] sm:$0xff] }
 0x780   :  { %10506 = vrcp.f32 %v12111_v37  ;;  %vm6334_vm7 = vweird.f32 %v12111_v37 }
 0x781   :  { %v6387_v11 = vpack.c.bf16 %v6384_v28, %v6384_v28 }
 0x783   :  { %v12114_v8 = vrot.slane %v6387_v11, 2 }
 0x785   :  { %v10505_v54 = vpop.eup %10504  ;;  %6415 = vmatmul.bf16.vlgmr.msra.gmra.mxu1 %v12114_v8  ;;  %6441 = vmatmul.bf16.vlgmr.msrb.gmra.mxu3 %v12114_v8 }
 0x786   :  { %v6327_v34 = vadd.f32 1.0, %v10505_v54  ;;  %6511 = vmatpush.bf16.msra.mxu1 %v12876_v46  ;;  %6537 = vmatpush.bf16.msrb.mxu3 %v12877_v32  ;;  %v10507_v63 = vpop.eup %10506 }
 0x787   :  { %v6330_v26 = vmul.f32 %v10507_v63, %v12111_v37  ;;  %vm6335_vm5 = vweird.f32 %v10507_v63 }
 0x788   :  { %10508 = vrcp.f32 %v6327_v34  ;;  %vm6349_vm4 = vweird.f32 %v6327_v34  ;;  %vm6336_vm8 = vmor %vm6334_vm7, %vm6335_vm5 }
 0x789   :  { %v6331_v18 = vsub.f32 1.0, %v6330_v26  ;;  %v12885_v26 = vld [vmem:[#allocation84_spill] sm:$0xff] }
 0x78a   :  { %6512 = vmatpush.bf16.msra.mxu1 %v12879_v52  ;;  %6538 = vmatpush.bf16.msrb.mxu3 %v12880_v47  ;;  %v6355_v47 = vand.u32 2147483648, %v6327_v34 }
 0x78b   :  { %v6195_v60 = vpop.f32.mrf.mxu0 }
 0x78c   :  { %v6196_v0 = vadd.f32 %v6195_v60, %v12878_v27  ;;  %v12883_v60 = vld [vmem:[#allocation86_spill] sm:$0xff] }
 0x78e   :  { %v10509_v3 = vpop.eup %10508  ;;  %v6209_v13 = vadd.f32 %v12095_v9, %v6196_v0  ;;  %6513 = vmatpush.bf16.msra.mxu1 %v12881_v42  ;;  %6539 = vmatpush.bf16.msrb.mxu3 %v12778_v5  ;;  %v12884_v9 = vld [vmem:[#allocation89_spill] sm:$0xff]  ;;  %v6332_v0 = vmul.f32 %v10507_v63, %v6331_v18  ;;  %v6353_v42 = vand.u32 2147483647, %v6327_v34 }
 0x78f   :  { %v6345_v12 = vmul.f32 %v10509_v3, %v6327_v34  ;;  %vm6350_vm3 = vweird.f32 %v10509_v3 }
 0x790   :  { %v6307_v56 = vrot.slane %v6209_v13, 4  ;;  %vm12137_vm6 = vmor %vm6349_vm4, %vm6350_vm3  ;;  %vm6354_vm9 = vcmp.eq.f32.partialorder %v6353_v42, 8.507059e+37 }
 0x791   :  { %v6346_v57 = vsub.f32 1.0, %v6345_v12  ;;  %v12886_v12 = vld [vmem:[#allocation88_spill] sm:$0xff] }
 0x792   :  { %v6315_v23 = vadd.f32 %v6307_v56, %v12779_v55  ;;  %6514 = vmatpush.bf16.msra.mxu1 %v12883_v60  ;;  %6540 = vmatpush.bf16.msrb.mxu3 %v12884_v9  ;;  %v12887_v56 = vld [vmem:[#allocation91_spill] sm:$0xff]  ;;  %v6376_v9 = vrot.slane %v11958_v24, 6 }
 0x793   :  { %v6347_v11 = vmul.f32 %v10509_v3, %v6346_v57  ;;  %v6197_v54 = vpop.f32.mrf.mxu0  ;;  %v12891_v24 = vld [vmem:[#allocation99_spill] sm:$0xff] }
 0x794   :  { %v6221_v15 = vpop.f32.mrf.mxu2  ;;  %v9714_v46 = vmul.f32 -1.442695, %v6315_v23  ;;  %v6338_v23 = vand.u32 2147483647, %v12111_v37  ;;  %v6356_v54 = vor.u32 1.1754944e-38, %v6355_v47  ;;  %v12892_v47 = vld [vmem:[#allocation98_spill] sm:$0xff] }
 0x795   :  { %v6222_v28 = vadd.f32 %v6221_v15, %v12882_v31  ;;  %v6348_v5 = vadd.f32 %v10509_v3, %v6347_v11  ;;  %6467 = vmatmul.bf16.vlgmr.msrb.gmra.mxu1 %v12114_v8  ;;  %6493 = vmatmul.bf16.vlgmr.msra.gmra.mxu3 %v12114_v8  ;;  %v6340_v15 = vand.u32 2147483648, %v12111_v37 }
 0x796   :  { %10510 = vpow2.f32 %v9714_v46  ;;  %6515 = vmatpush.bf16.msra.mxu1 %v12886_v12  ;;  %6541 = vmatpush.bf16.msrb.mxu3 %v12887_v56  ;;  %vm6339_vm10 = vcmp.eq.f32.partialorder %v6338_v23, 8.507059e+37  ;;  %v12917_v23 = vld [vmem:[#allocation34_spill] sm:$0xff] }
 0x797   :  { %v6235_v32 = vadd.f32 %v12098_v62, %v6222_v28  ;;  %v6333_v62 = vadd.f32 %v10507_v63, %v6332_v0  ;;  %v6352_v28 = vsel %vm12137_vm6, %v10509_v3, %v6348_v5 }
 0x798   :  { %v6357_v60 = vsel %vm6354_vm9, %v6356_v54, %v6352_v28  ;;  %v12918_v28 = vld [vmem:[#allocation39_spill] sm:$0xff]  ;;  %v12920_v54 = vld [vmem:[#allocation134_spill] sm:$0xff] }
 0x799   :  { %v6308_v52 = vrot.slane %v6235_v32, 4  ;;  %v6337_v46 = vsel %vm6336_vm8, %v10507_v63, %v6333_v62  ;;  %v6341_v32 = vor.u32 1.1754944e-38, %v6340_v15  ;;  %v6378_v3 = vmul.f32 %v6376_v9, %v6357_v60  ;;  %v12890_v63 = vld [vmem:[#allocation97_spill] sm:$0xff]  ;;  %v12916_v15 = vld [vmem:[#allocation132_spill] sm:$0xff]  ;;  %v12925_v9 = vld [vmem:[#allocation135_spill] sm:$0xff] }
 0x79a   :  { %6516 = vmatpush.bf16.msra.mxu1 %v12786_v19  ;;  %6542 = vmatpush.bf16.msrb.mxu3 %v12787_v48  ;;  %v12924_v60 = vld [vmem:[#allocation45_spill] sm:$0xff] }
 0x79b   :  { %v6316_v13 = vadd.f32 %v6308_v52, %v12885_v26  ;;  %v6342_v0 = vsel %vm6339_vm10, %v6341_v32, %v6337_v46  ;;  %v12922_v46 = vld [vmem:[#allocation43_spill] sm:$0xff]  ;;  %v12923_v32 = vld [vmem:[#allocation40_spill] sm:$0xff] }
 0x79c   :  { %v6223_v18 = vpop.f32.mrf.mxu2  ;;  %v10511_v11 = vpop.eup %10510 }
 0x79d   :  { %10512 = vtanh.f32 %v6316_v13  ;;  %v6328_v34 = vadd.f32 1.0, %v10511_v11  ;;  %v12919_v11 = vld [vmem:[#allocation133_spill] sm:$0xff] }
 0x79e   :  { %6517 = vmatpush.bf16.msra.mxu1 %v12789_v51  ;;  %6543 = vmatpush.bf16.msrb.mxu3 %v12790_v45 }
 0x79f   :  { %10514 = vrcp.f32 %v6328_v34  ;;  %v6370_v45 = vand.u32 2147483648, %v6328_v34  ;;  %vm6364_vm12 = vweird.f32 %v6328_v34 }
 0x7a1   :  { %v6371_v12 = vor.u32 1.1754944e-38, %v6370_v45  ;;  %v12935_v45 = vld [vmem:[#allocation54_spill] sm:$0xff] }
 0x7a2   :  { %6518 = vmatpush.bf16.msra.mxu1 %v12791_v50  ;;  %6544 = vmatpush.bf16.msrb.mxu3 %v11642_v35  ;;  %v6368_v35 = vand.u32 2147483647, %v6328_v34 }
 0x7a3   :  { %v10513_v37 = vpop.eup %10512 }
 0x7a4   :  { %v6379_v52 = vmul.f32 %v10513_v37, %v6342_v0  ;;  %vm6369_vm14 = vcmp.eq.f32.partialorder %v6368_v35, 8.507059e+37  ;;  %v12926_v37 = vld [vmem:[#allocation136_spill] sm:$0xff]  ;;  %v12938_v35 = vld [vmem:[#allocation142_spill] sm:$0xff] }
 0x7a5   :  { %v10515_v48 = vpop.eup %10514  ;;  %6519 = vmatmul.bf16.vlgmr.msra.gmra.mxu1 %v12114_v8  ;;  %6545 = vmatmul.bf16.vlgmr.msrb.gmra.mxu3 %v12114_v8  ;;  %v12927_v0 = vld [vmem:[#allocation44_spill] sm:$0xff] }
 0x7a6   :  { %v12151_v19 = vadd.f32 %v6379_v52, %v6378_v3  ;;  %6563 = vmatpush.bf16.msrb.mxu1 %v12890_v63  ;;  %6589 = vmatpush.bf16.msra.mxu3 %v12891_v24  ;;  %v6360_v5 = vmul.f32 %v10515_v48, %v6328_v34  ;;  %vm6365_vm11 = vweird.f32 %v10515_v48  ;;  %v12921_v34 = vld [vmem:[#allocation38_spill] sm:$0xff]  ;;  %v12928_v3 = vld [vmem:[#allocation51_spill] sm:$0xff]  ;;  %v12929_v52 = vld [vmem:[#allocation137_spill] sm:$0xff] }
 0x7a7   :  { %vm6366_vm13 = vmor %vm6364_vm12, %vm6365_vm11  ;;  %v12931_v63 = vld [vmem:[#allocation50_spill] sm:$0xff]  ;;  %v12932_v24 = vld [vmem:[#allocation55_spill] sm:$0xff] }
 0x7a8   :  { %v6361_v51 = vsub.f32 1.0, %v6360_v5  ;;  %10516 = vtanh.f32 %v12151_v19  ;;  %v12933_v5 = vld [vmem:[#allocation139_spill] sm:$0xff] }
 0x7aa   :  { %6564 = vmatpush.bf16.msrb.mxu1 %v12892_v47  ;;  %6590 = vmatpush.bf16.msra.mxu3 %v12794_v16  ;;  %v6362_v50 = vmul.f32 %v10515_v48, %v6361_v51  ;;  %v12934_v51 = vld [vmem:[#allocation140_spill] sm:$0xff] }
 0x7ab   :  { %v12936_v47 = vld [vmem:[#allocation60_spill] sm:$0xff] }
 0x7ac   :  { %v6363_v13 = vadd.f32 %v10515_v48, %v6362_v50  ;;  %v12937_v50 = vld [vmem:[#allocation141_spill] sm:$0xff] }
 0x7ae   :  { %6565 = vmatpush.bf16.msrb.mxu1 %v12795_v6  ;;  %6591 = vmatpush.bf16.msra.mxu3 %v12796_v10  ;;  %v6367_v56 = vsel %vm6366_vm13, %v10515_v48, %v6363_v13  ;;  %v10517_v62 = vpop.eup %10516  ;;  %v12893_v6 = vld [vmem:[#allocation100_spill] sm:$0xff]  ;;  %v12894_v10 = vld [vmem:[#allocation101_spill] sm:$0xff]  ;;  %v12930_v48 = vld [vmem:[#allocation138_spill] sm:$0xff] }
 0x7af   :  { %v6372_v42 = vsel %vm6369_vm14, %v6371_v12, %v6367_v56  ;;  %v12939_v13 = vld [vmem:[#allocation17_spill] sm:$0xff]  ;;  %v12940_v12 = vld [vmem:[#allocation18_spill] sm:$0xff] }
 0x7b0   :  { %v6382_v18 = vmul.f32 %v10517_v62, %v6372_v42  ;;  %v12941_v56 = vld [vmem:[#allocation58_spill] sm:$0xff]  ;;  %v12942_v62 = vld [vmem:[#allocation64_spill] sm:$0xff] }
 0x7b1   :  { %v12943_v42 = vld [vmem:[#allocation20_spill] sm:$0xff] }
 0x7b2   :  { %6566 = vmatpush.bf16.msrb.mxu1 %v12797_v22  ;;  %6592 = vmatpush.bf16.msra.mxu3 %v12798_v33  ;;  %v6386_v16 = vpack.c.bf16 %v6382_v18, %v6382_v18  ;;  %v12895_v22 = vld [vmem:[#allocation109_spill] sm:$0xff]  ;;  %v12896_v33 = vld [vmem:[#allocation16_spill] sm:$0xff] }
 0x7b3   :  { %v12944_v18 = vld [vmem:[#allocation21_spill] sm:$0xff] }
 0x7b4   :  { %v12166_v57 = vrot.slane %v6386_v16, 2  ;;  %v12945_v16 = vld [vmem:[#allocation63_spill] sm:$0xff] }
 0x7b6   :  { %6567 = vmatpush.bf16.msrb.mxu1 %v12801_v41  ;;  %6593 = vmatpush.bf16.msra.mxu3 %v12802_v4  ;;  %v12897_v41 = vld [vmem:[#allocation112_spill] sm:$0xff]  ;;  %v12898_v4 = vld [vmem:[#allocation113_spill] sm:$0xff] }
 0x7b7   :  { %6402 = vmatmul.bf16.vlgmr.msrb.gmra.mxu0 %v12166_v57  ;;  %6428 = vmatmul.bf16.vlgmr.msrb.gmra.mxu2 %v12166_v57 }
 0x7b8   :  { %6498 = vmatpush.bf16.msrb.mxu0 %v12893_v6  ;;  %6524 = vmatpush.bf16.msrb.mxu2 %v12894_v10  ;;  %v12946_v6 = vld [vmem:[#allocation69_spill] sm:$0xff]  ;;  %v12947_v10 = vld [vmem:[#allocation24_spill] sm:$0xff] }
 0x7ba   :  { %6568 = vmatpush.bf16.msrb.mxu1 %v12805_v58  ;;  %6594 = vmatpush.bf16.msra.mxu3 %v12806_v2  ;;  %v12905_v58 = vld [vmem:[#allocation125_spill] sm:$0xff]  ;;  %v12910_v2 = vld [vmem:[#allocation31_spill] sm:$0xff] }
 0x7bc   :  { %6499 = vmatpush.bf16.msrb.mxu0 %v12803_v59  ;;  %6525 = vmatpush.bf16.msrb.mxu2 %v12804_v49  ;;  %v12903_v59 = vld [vmem:[#allocation22_spill] sm:$0xff]  ;;  %v12904_v49 = vld [vmem:[#allocation27_spill] sm:$0xff] }
 0x7be   :  { %6569 = vmatpush.bf16.msrb.mxu1 %v12809_v25  ;;  %6595 = vmatpush.bf16.msra.mxu3 %v11725_v1  ;;  %v12900_v1 = vld [vmem:[#allocation23_spill] sm:$0xff]  ;;  %v12913_v25 = vld [vmem:[#allocation30_spill] sm:$0xff] }
 0x7c0   :  { %6500 = vmatpush.bf16.msrb.mxu0 %v12807_v44  ;;  %6526 = vmatpush.bf16.msrb.mxu2 %v12895_v22  ;;  %v12911_v44 = vld [vmem:[#allocation129_spill] sm:$0xff] }
 0x7c1   :  { %v12948_v22 = vld [vmem:[#allocation25_spill] sm:$0xff] }
 0x7c2   :  { %6570 = vmatpush.bf16.msrb.mxu1 %v12812_v29  ;;  %6596 = vmatpush.bf16.msra.mxu3 %v11735_v14  ;;  %v12901_v14 = vld [vmem:[#allocation123_spill] sm:$0xff]  ;;  %v12902_v29 = vld [vmem:[#allocation124_spill] sm:$0xff] }
 0x7c4   :  { %6501 = vmatpush.bf16.msrb.mxu0 %v12897_v41  ;;  %6527 = vmatpush.bf16.msrb.mxu2 %v12898_v4  ;;  %v12950_v41 = vld [vmem:[#allocation73_spill] sm:$0xff]  ;;  %v12951_v4 = vld [vmem:[#allocation28_spill] sm:$0xff] }
 0x7c5   :  { %6571 = vmatmul.bf16.vlgmr.msrb.gmra.mxu1 %v12114_v8  ;;  %6597 = vmatmul.bf16.vlgmr.msra.gmra.mxu3 %v12114_v8  ;;  %v12915_v8 = vld [vmem:[#allocation131_spill] sm:$0xff] }
 0x7c6   :  { %6771 = vmatpush.bf16.msra.mxu1 %v12896_v33  ;;  %6797 = vmatpush.bf16.msrb.mxu3 %v11330_v39  ;;  %v12899_v39 = vld [vmem:[#allocation19_spill] sm:$0xff]  ;;  %v12949_v33 = vld [vmem:[#allocation68_spill] sm:$0xff] }
 0x7c7   :  { %6454 = vmatmul.bf16.vlgmr.msra.gmra.mxu0 %v12166_v57  ;;  %6480 = vmatmul.bf16.vlgmr.msra.gmra.mxu2 %v12166_v57 }
 0x7c8   :  { %6502 = vmatpush.bf16.msrb.mxu0 %v12813_v43  ;;  %6528 = vmatpush.bf16.msrb.mxu2 %v12814_v38  ;;  %v12912_v43 = vld [vmem:[#allocation130_spill] sm:$0xff]  ;;  %v12914_v38 = vld [vmem:[#allocation35_spill] sm:$0xff] }
 0x7ca   :  { %6772 = vmatpush.bf16.msra.mxu1 %v11328_v17  ;;  %6798 = vmatpush.bf16.msrb.mxu3 %v11342_v40  ;;  %v12906_v17 = vld [vmem:[#allocation126_spill] sm:$0xff]  ;;  %v12907_v40 = vld [vmem:[#allocation127_spill] sm:$0xff] }
 0x7cc   :  { %6503 = vmatpush.bf16.msrb.mxu0 %v12815_v20  ;;  %6529 = vmatpush.bf16.msrb.mxu2 %v12816_v21  ;;  %v12908_v20 = vld [vmem:[#allocation128_spill] sm:$0xff]  ;;  %v12909_v21 = vld [vmem:[#allocation26_spill] sm:$0xff] }
 0x7ce   :  { %6773 = vmatpush.bf16.msra.mxu1 %v12899_v39  ;;  %6799 = vmatpush.bf16.msrb.mxu3 %v12900_v1  ;;  %v12952_v39 = vld [vmem:[#allocation29_spill] sm:$0xff]  ;;  %v12954_v1 = vld [vmem:[#allocation78_spill] sm:$0xff] }
 0x7d0   :  { %6504 = vmatpush.bf16.msrb.mxu0 %v12901_v14  ;;  %6530 = vmatpush.bf16.msrb.mxu2 %v12902_v29  ;;  %v12955_v14 = vld [vmem:[#allocation32_spill] sm:$0xff]  ;;  %v12956_v29 = vld [vmem:[#allocation33_spill] sm:$0xff] }
 0x7d2   :  { %6774 = vmatpush.bf16.msra.mxu1 %v12903_v59  ;;  %6800 = vmatpush.bf16.msrb.mxu3 %v12904_v49  ;;  %v12957_v49 = vld [vmem:[#allocation36_spill] sm:$0xff] }
 0x7d4   :  { %6505 = vmatpush.bf16.msrb.mxu0 %v12905_v58  ;;  %6531 = vmatpush.bf16.msrb.mxu2 %v12906_v17  ;;  %v12958_v58 = vld [vmem:[#allocation37_spill] sm:$0xff] }
 0x7d5   :  { %v12959_v17 = vld [vmem:[#allocation41_spill] sm:$0xff] }
 0x7d6   :  { %6775 = vmatpush.bf16.msra.mxu1 %v12909_v21  ;;  %6801 = vmatpush.bf16.msrb.mxu3 %v12910_v2  ;;  %v12961_v2 = vld [vmem:[#allocation46_spill] sm:$0xff] }
 0x7d7   :  { %6506 = vmatmul.bf16.vlgmr.msrb.gmra.mxu0 %v12166_v57  ;;  %6532 = vmatmul.bf16.vlgmr.msrb.gmra.mxu2 %v12166_v57 }
 0x7d8   :  { %6550 = vmatpush.bf16.msra.mxu0 %v12907_v40  ;;  %6576 = vmatpush.bf16.msra.mxu2 %v12908_v20  ;;  %v12960_v40 = vld [vmem:[#allocation42_spill] sm:$0xff] }
 0x7da   :  { %6776 = vmatpush.bf16.msra.mxu1 %v12913_v25  ;;  %6802 = vmatpush.bf16.msrb.mxu3 %v12914_v38  ;;  %v12964_v25 = vld [vmem:[#allocation49_spill] sm:$0xff] }
 0x7dc   :  { %6551 = vmatpush.bf16.msra.mxu0 %v12911_v44  ;;  %6577 = vmatpush.bf16.msra.mxu2 %v12912_v43  ;;  %v12962_v44 = vld [vmem:[#allocation47_spill] sm:$0xff]  ;;  %v12963_v43 = vld [vmem:[#allocation48_spill] sm:$0xff] }
 0x7de   :  { %6777 = vmatpush.bf16.msra.mxu1 %v12917_v23  ;;  %6803 = vmatpush.bf16.msrb.mxu3 %v12918_v28  ;;  %v12967_v28 = vld [vmem:[#allocation56_spill] sm:$0xff] }
 0x7e0   :  { %6552 = vmatpush.bf16.msra.mxu0 %v12915_v8  ;;  %6578 = vmatpush.bf16.msra.mxu2 %v12916_v15  ;;  %v12965_v8 = vld [vmem:[#allocation52_spill] sm:$0xff]  ;;  %v12966_v15 = vld [vmem:[#allocation53_spill] sm:$0xff] }
 0x7e2   :  { %6778 = vmatpush.bf16.msra.mxu1 %v12921_v34  ;;  %6804 = vmatpush.bf16.msrb.mxu3 %v12922_v46  ;;  %v12969_v34 = vld [vmem:[#allocation61_spill] sm:$0xff]  ;;  %v12970_v46 = vld [vmem:[#allocation62_spill] sm:$0xff] }
 0x7e4   :  { %6553 = vmatpush.bf16.msra.mxu0 %v12919_v11  ;;  %6579 = vmatpush.bf16.msra.mxu2 %v12920_v54  ;;  %v12968_v11 = vld [vmem:[#allocation57_spill] sm:$0xff] }
 0x7e6   :  { %6823 = vmatpush.bf16.msrb.mxu1 %v12923_v32  ;;  %6849 = vmatpush.bf16.msra.mxu3 %v12924_v60  ;;  %v12971_v60 = vld [vmem:[#allocation65_spill] sm:$0xff] }
 0x7e8   :  { %6554 = vmatpush.bf16.msra.mxu0 %v12925_v9  ;;  %6580 = vmatpush.bf16.msra.mxu2 %v12926_v37  ;;  %v12972_v9 = vld [vmem:[#allocation67_spill] sm:$0xff] }
 0x7ea   :  { %6824 = vmatpush.bf16.msrb.mxu1 %v12927_v0  ;;  %6850 = vmatpush.bf16.msra.mxu3 %v12928_v3  ;;  %v12973_v0 = vld [vmem:[#allocation70_spill] sm:$0xff]  ;;  %v12974_v3 = vld [vmem:[#allocation71_spill] sm:$0xff] }
 0x7ec   :  { %6555 = vmatpush.bf16.msra.mxu0 %v12929_v52  ;;  %6581 = vmatpush.bf16.msra.mxu2 %v12930_v48  ;;  %v12975_v48 = vld [vmem:[#allocation75_spill] sm:$0xff] }
 0x7ee   :  { %6825 = vmatpush.bf16.msrb.mxu1 %v12931_v63  ;;  %6851 = vmatpush.bf16.msra.mxu3 %v12932_v24  ;;  %v12976_v63 = vld [vmem:[#allocation76_spill] sm:$0xff] }
 0x7f0   :  { %6556 = vmatpush.bf16.msra.mxu0 %v12933_v5  ;;  %6582 = vmatpush.bf16.msra.mxu2 %v12934_v51  ;;  %v12977_v5 = vld [vmem:[#allocation81_spill] sm:$0xff]  ;;  %v12978_v51 = vld [vmem:[#allocation82_spill] sm:$0xff] }
 0x7f2   :  { %6826 = vmatpush.bf16.msrb.mxu1 %v12935_v45  ;;  %6852 = vmatpush.bf16.msra.mxu3 %v12936_v47 }
 0x7f4   :  { %6557 = vmatpush.bf16.msra.mxu0 %v12937_v50  ;;  %6583 = vmatpush.bf16.msra.mxu2 %v12938_v35  ;;  %v12979_v35 = vld [vmem:[#allocation143_spill] sm:$0xff] }
 0x7f6   :  { %6827 = vmatpush.bf16.msrb.mxu1 %v12941_v56  ;;  %6853 = vmatpush.bf16.msra.mxu3 %v12942_v62 }
 0x7f7   :  { %6558 = vmatmul.bf16.vlgmr.msra.gmra.mxu0 %v12166_v57  ;;  %6584 = vmatmul.bf16.vlgmr.msra.gmra.mxu2 %v12166_v57  ;;  %v12953_v57 = vld [vmem:[#allocation72_spill] sm:$0xff] }
 0x7f8   :  { %6758 = vmatpush.bf16.msrb.mxu0 %v12939_v13  ;;  %6784 = vmatpush.bf16.msrb.mxu2 %v12940_v12 }
 0x7fa   :  { %6828 = vmatpush.bf16.msrb.mxu1 %v12945_v16  ;;  %6854 = vmatpush.bf16.msra.mxu3 %v12946_v6 }
 0x7fc   :  { %6759 = vmatpush.bf16.msrb.mxu0 %v12943_v42  ;;  %6785 = vmatpush.bf16.msrb.mxu2 %v12944_v18  ;;  %v12980_v42 = vld [vmem:[#allocation144_spill] sm:$0xff] }
 0x7fe   :  { %6829 = vmatpush.bf16.msrb.mxu1 %v12949_v33  ;;  %6855 = vmatpush.bf16.msra.mxu3 %v12950_v41 }
 0x800   :  { %6760 = vmatpush.bf16.msrb.mxu0 %v12947_v10  ;;  %6786 = vmatpush.bf16.msrb.mxu2 %v12948_v22 }
 0x802   :  { %6830 = vmatpush.bf16.msrb.mxu1 %v12953_v57  ;;  %6856 = vmatpush.bf16.msra.mxu3 %v12954_v1  ;;  %v6416_v59 = vpop.f32.mrf.mxu1  ;;  %v12981_v57 = vld [vmem:[#allocation145_spill] sm:$0xff] }
 0x804   :  { %6761 = vmatpush.bf16.msrb.mxu0 %v12951_v4  ;;  %6787 = vmatpush.bf16.msrb.mxu2 %v12952_v39 }
 0x808   :  { %6762 = vmatpush.bf16.msrb.mxu0 %v12955_v14  ;;  %6788 = vmatpush.bf16.msrb.mxu2 %v12956_v29  ;;  %v6442_v20 = vpop.f32.mrf.mxu3 }
 0x80a   :  { %v6418_v21 = vpop.f32.mrf.mxu1 }
 0x80c   :  { %6763 = vmatpush.bf16.msrb.mxu0 %v12957_v49  ;;  %6789 = vmatpush.bf16.msrb.mxu2 %v12958_v58 }
 0x810   :  { %6764 = vmatpush.bf16.msrb.mxu0 %v12959_v17  ;;  %6790 = vmatpush.bf16.msrb.mxu2 %v12960_v40  ;;  %v6444_v38 = vpop.f32.mrf.mxu3 }
 0x812   :  { %v6468_v23 = vpop.f32.mrf.mxu1 }
 0x814   :  { %6765 = vmatpush.bf16.msrb.mxu0 %v12961_v2  ;;  %6791 = vmatpush.bf16.msrb.mxu2 %v12962_v44  ;;  %v12982_v2 = vld [vmem:[#allocation146_spill] sm:$0xff] }
 0x818   :  { %6810 = vmatpush.bf16.msra.mxu0 %v12963_v43  ;;  %6836 = vmatpush.bf16.msra.mxu2 %v12964_v25  ;;  %v6494_v54 = vpop.f32.mrf.mxu3 }
 0x81a   :  { %v6470_v32 = vpop.f32.mrf.mxu1 }
 0x81c   :  { %6811 = vmatpush.bf16.msra.mxu0 %v12965_v8  ;;  %6837 = vmatpush.bf16.msra.mxu2 %v12966_v15 }
 0x820   :  { %6812 = vmatpush.bf16.msra.mxu0 %v12967_v28  ;;  %6838 = vmatpush.bf16.msra.mxu2 %v12968_v11  ;;  %v6496_v37 = vpop.f32.mrf.mxu3 }
 0x822   :  { %v12278_v52 = vpop.f32.mrf.mxu1 }
 0x824   :  { %6813 = vmatpush.bf16.msra.mxu0 %v12969_v34  ;;  %6839 = vmatpush.bf16.msra.mxu2 %v12970_v46 }
 0x828   :  { %6814 = vmatpush.bf16.msra.mxu0 %v12971_v60  ;;  %6840 = vmatpush.bf16.msra.mxu2 %v12972_v9  ;;  %v12282_v24 = vpop.f32.mrf.mxu3 }
 0x82a   :  { %v6522_v45 = vpop.f32.mrf.mxu1 }
 0x82c   :  { %6815 = vmatpush.bf16.msra.mxu0 %v12973_v0  ;;  %6841 = vmatpush.bf16.msra.mxu2 %v12974_v3 }
 0x830   :  { %6816 = vmatpush.bf16.msra.mxu0 %v12975_v48  ;;  %6842 = vmatpush.bf16.msra.mxu2 %v12976_v63  ;;  %v6548_v47 = vpop.f32.mrf.mxu3 }
 0x834   :  { %6817 = vmatpush.bf16.msra.mxu0 %v12977_v5  ;;  %6843 = vmatpush.bf16.msra.mxu2 %v12978_v51  ;;  %v6403_v50 = vpop.f32.mrf.mxu0 }
 0x835   :  { %v6404_v13 = vadd.f32 %v6403_v50, %v12979_v35 }
 0x837   :  { %v6417_v12 = vadd.f32 %v6416_v59, %v6404_v13 }
 0x839   :  { %v9715_v56 = vmul.f32 -1.442695, %v6417_v12 }
 0x83a   :  { %v6429_v62 = vpop.f32.mrf.mxu2 }
 0x83b   :  { %10518 = vpow2.f32 %v9715_v56  ;;  %v6430_v18 = vadd.f32 %v6429_v62, %v12980_v42 }
 0x83c   :  { %v6405_v16 = vpop.f32.mrf.mxu0 }
 0x83d   :  { %v6443_v6 = vadd.f32 %v6442_v20, %v6430_v18 }
 0x83f   :  { %v9716_v10 = vmul.f32 -1.442695, %v6443_v6 }
 0x841   :  { %v10519_v22 = vpop.eup %10518  ;;  %10520 = vpow2.f32 %v9716_v10 }
 0x842   :  { %v6611_v33 = vadd.f32 1.0, %v10519_v22  ;;  %v6431_v41 = vpop.f32.mrf.mxu2  ;;  %v12288_v4 = vpop.f32.mrf.mxu1 }
 0x844   :  { %10522 = vrcp.f32 %v6611_v33  ;;  %v6455_v39 = vpop.f32.mrf.mxu0  ;;  %v6625_v32 = vand.u32 2147483648, %v6611_v33  ;;  %vm6619_vm0 = vweird.f32 %v6611_v33  ;;  %v6623_v37 = vand.u32 2147483647, %v6611_v33 }
 0x845   :  { %v6456_v1 = vadd.f32 %v6455_v39, %v12981_v57 }
 0x846   :  { %v6626_v45 = vor.u32 1.1754944e-38, %v6625_v32  ;;  %vm6624_vm4 = vcmp.eq.f32.partialorder %v6623_v37, 8.507059e+37 }
 0x847   :  { %v10521_v14 = vpop.eup %10520  ;;  %v6469_v29 = vadd.f32 %v6468_v23, %v6456_v1 }
 0x848   :  { %v6612_v59 = vadd.f32 1.0, %v10521_v14  ;;  %v12291_v49 = vpop.f32.mrf.mxu3 }
 0x849   :  { %v9717_v58 = vmul.f32 -1.442695, %v6469_v29 }
 0x84a   :  { %v10523_v17 = vpop.eup %10522  ;;  %10524 = vrcp.f32 %v6612_v59  ;;  %v6481_v40 = vpop.f32.mrf.mxu2  ;;  %v6640_v0 = vand.u32 2147483648, %v6612_v59  ;;  %vm6634_vm3 = vweird.f32 %v6612_v59 }
 0x84b   :  { %v6574_v20 = vpop.f32.mrf.mxu1  ;;  %v6615_v21 = vmul.f32 %v10523_v17, %v6611_v33  ;;  %10526 = vpow2.f32 %v9717_v58  ;;  %v6482_v44 = vadd.f32 %v6481_v40, %v12982_v2  ;;  %vm6620_vm15 = vweird.f32 %v10523_v17 }
 0x84c   :  { %v6457_v43 = vpop.f32.mrf.mxu0  ;;  %vm12294_vm1 = vmor %vm6619_vm0, %vm6620_vm15  ;;  %v6641_v12 = vor.u32 1.1754944e-38, %v6640_v0 }
 0x84d   :  { %v6616_v25 = vsub.f32 1.0, %v6615_v21  ;;  %v6495_v38 = vadd.f32 %v6494_v54, %v6482_v44  ;;  %v6638_v54 = vand.u32 2147483647, %v6612_v59 }
 0x84f   :  { %v6617_v8 = vmul.f32 %v10523_v17, %v6616_v25  ;;  %10528 = vtanh.f32 %v6495_v38  ;;  %vm6639_vm6 = vcmp.eq.f32.partialorder %v6638_v54, 8.507059e+37 }
 0x850   :  { %v10525_v15 = vpop.eup %10524  ;;  %v6600_v28 = vpop.f32.mrf.mxu3 }
 0x851   :  { %v10527_v11 = vpop.eup %10526  ;;  %v6630_v23 = vmul.f32 %v10525_v15, %v6612_v59  ;;  %v6618_v34 = vadd.f32 %v10523_v17, %v6617_v8  ;;  %vm6635_vm2 = vweird.f32 %v10525_v15 }
 0x852   :  { %v6613_v46 = vadd.f32 1.0, %v10527_v11  ;;  %v6483_v60 = vpop.f32.mrf.mxu2  ;;  %vm6636_vm5 = vmor %vm6634_vm3, %vm6635_vm2 }
 0x853   :  { %v6631_v9 = vsub.f32 1.0, %v6630_v23  ;;  %v6622_v5 = vsel %vm12294_vm1, %v10523_v17, %v6618_v34 }
 0x854   :  { %10530 = vrcp.f32 %v6613_v46  ;;  %v6507_v48 = vpop.f32.mrf.mxu0  ;;  %v6627_v56 = vsel %vm6624_vm4, %v6626_v45, %v6622_v5  ;;  %v6655_v59 = vand.u32 2147483648, %v6613_v46  ;;  %v6653_v40 = vand.u32 2147483647, %v6613_v46 }
 0x855   :  { %v6632_v63 = vmul.f32 %v10525_v15, %v6631_v9  ;;  %v6508_v51 = vadd.f32 %v6507_v48, %v12874_v53  ;;  %v10529_v13 = vpop.eup %10528  ;;  %vm6649_vm8 = vweird.f32 %v6613_v46 }
 0x856   :  { %v6661_v53 = vmul.f32 %v10529_v13, %v6627_v56  ;;  %vm6654_vm10 = vcmp.eq.f32.partialorder %v6653_v40, 8.507059e+37 }
 0x857   :  { %v6633_v47 = vadd.f32 %v10525_v15, %v6632_v63  ;;  %v6521_v50 = vadd.f32 %v12278_v52, %v6508_v51 }
 0x859   :  { %v6637_v62 = vsel %vm6636_vm5, %v10525_v15, %v6633_v47  ;;  %v6669_v18 = vrot.slane %v6521_v50, 2 }
 0x85a   :  { %v10531_v16 = vpop.eup %10530  ;;  %v6642_v6 = vsel %vm6639_vm6, %v6641_v12, %v6637_v62  ;;  %v6533_v10 = vpop.f32.mrf.mxu2 }
 0x85b   :  { %v6645_v22 = vmul.f32 %v10531_v16, %v6613_v46  ;;  %v6660_v33 = vmul.f32 %v6642_v6, %v12106_v30  ;;  %v6677_v41 = vadd.f32 %v6669_v18, %v12769_v36  ;;  %v6534_v39 = vadd.f32 %v6533_v10, %v11900_v7 }
 0x85c   :  { %v6509_v1 = vpop.f32.mrf.mxu0  ;;  %vm6650_vm7 = vweird.f32 %v10531_v16  ;;  %v6656_v36 = vor.u32 1.1754944e-38, %v6655_v59 }
 0x85d   :  { %v6646_v52 = vsub.f32 1.0, %v6645_v22  ;;  %v12305_v14 = vadd.f32 %v6661_v53, %v6660_v33  ;;  %v9718_v29 = vmul.f32 -1.442695, %v6677_v41  ;;  %v6547_v58 = vadd.f32 %v12282_v24, %v6534_v39  ;;  %vm6651_vm9 = vmor %vm6649_vm8, %vm6650_vm7 }
 0x85e   :  { %v6740_v1 = vrot.slane %v12151_v19, 6 }
 0x85f   :  { %v6647_v17 = vmul.f32 %v10531_v16, %v6646_v52  ;;  %10532 = vtanh.f32 %v12305_v14  ;;  %v6670_v30 = vrot.slane %v6547_v58, 2 }
 0x860   :  { %10534 = vpow2.f32 %v9718_v29 }
 0x861   :  { %v6648_v20 = vadd.f32 %v10531_v16, %v6647_v17  ;;  %v6678_v7 = vadd.f32 %v6670_v30, %v12875_v61 }
 0x862   :  { %v6535_v21 = vpop.f32.mrf.mxu2 }
 0x863   :  { %v6652_v44 = vsel %vm6651_vm9, %v10531_v16, %v6648_v20  ;;  %v9719_v43 = vmul.f32 -1.442695, %v6678_v7 }
 0x864   :  { %v6657_v25 = vsel %vm6654_vm10, %v6656_v36, %v6652_v44 }
 0x865   :  { %v10533_v38 = vpop.eup %10532  ;;  %10536 = vpow2.f32 %v9719_v43 }
 0x866   :  { %v10535_v24 = vpop.eup %10534  ;;  %v6664_v8 = vmul.f32 %v10533_v38, %v6657_v25 }
 0x867   :  { %v6690_v15 = vadd.f32 1.0, %v10535_v24 }
 0x868   :  { %v6748_v28 = vrot.slane %v6664_v8, 2 }
 0x869   :  { %10538 = vrcp.f32 %v6690_v15  ;;  %v6704_v6 = vand.u32 2147483648, %v6690_v15  ;;  %vm6698_vm15 = vweird.f32 %v6690_v15 }
 0x86a   :  { %v6751_v11 = vpack.c.bf16 %v6748_v28, %v6748_v28 }
 0x86b   :  { %v10537_v23 = vpop.eup %10536 }
 0x86c   :  { %v6755_v34 = vrot.slane %v6751_v11, 3  ;;  %v6691_v46 = vadd.f32 1.0, %v10537_v23 }
 0x86e   :  { %6779 = vmatmul.bf16.vlgmr.msra.gmra.mxu1 %v6755_v34  ;;  %6805 = vmatmul.bf16.vlgmr.msrb.gmra.mxu3 %v6755_v34  ;;  %10540 = vrcp.f32 %v6691_v46  ;;  %v6719_v62 = vand.u32 2147483648, %v6691_v46  ;;  %vm6713_vm12 = vweird.f32 %v6691_v46 }
 0x86f   :  { %v10539_v61 = vpop.eup %10538 }
 0x870   :  { %v6694_v9 = vmul.f32 %v10539_v61, %v6690_v15  ;;  %vm6699_vm13 = vweird.f32 %v10539_v61  ;;  %v6720_v33 = vor.u32 1.1754944e-38, %v6719_v62 }
 0x871   :  { %vm6700_vm0 = vmor %vm6698_vm15, %vm6699_vm13 }
 0x872   :  { %v6695_v48 = vsub.f32 1.0, %v6694_v9  ;;  %v10422_v9 = vld [vmem:[%s12365_s13 + $0x38] sm:$0xff] }
 0x874   :  { %v6559_v32 = vpop.f32.mrf.mxu0  ;;  %v10541_v0 = vpop.eup %10540  ;;  %v6696_v56 = vmul.f32 %v10539_v61, %v6695_v48  ;;  %v10419_v48 = vld [vmem:[%s12365_s13 + $0x20] sm:$0xff] }
 0x875   :  { %v6560_v60 = vadd.f32 %v6559_v32, %v12878_v27  ;;  %v6709_v3 = vmul.f32 %v10541_v0, %v6691_v46  ;;  %vm6714_vm11 = vweird.f32 %v10541_v0 }
 0x876   :  { %v6697_v16 = vadd.f32 %v10539_v61, %v6696_v56  ;;  %vm6715_vm14 = vmor %vm6713_vm12, %vm6714_vm11  ;;  %v10416_v56 = vld [vmem:[%s12365_s13 + $0x8] sm:$0xff] }
 0x877   :  { %v6573_v37 = vadd.f32 %v12288_v4, %v6560_v60  ;;  %v6710_v5 = vsub.f32 1.0, %v6709_v3 }
 0x878   :  { %v6701_v41 = vsel %vm6700_vm0, %v10539_v61, %v6697_v16 }
 0x879   :  { %v6671_v54 = vrot.slane %v6573_v37, 2  ;;  %v6711_v50 = vmul.f32 %v10541_v0, %v6710_v5  ;;  %v10421_v37 = vld [vmem:[%s12365_s13 + $0x30] sm:$0xff] }
 0x87a   :  { %v6585_v63 = vpop.f32.mrf.mxu2 }
 0x87b   :  { %v6679_v51 = vadd.f32 %v6671_v54, %v12779_v55  ;;  %v6586_v45 = vadd.f32 %v6585_v63, %v12882_v31  ;;  %v6712_v4 = vadd.f32 %v10541_v0, %v6711_v50  ;;  %v6717_v55 = vand.u32 2147483647, %v6691_v46 }
 0x87c   :  { %v6561_v47 = vpop.f32.mrf.mxu0 }
 0x87d   :  { %v9720_v13 = vmul.f32 -1.442695, %v6679_v51  ;;  %v6599_v12 = vadd.f32 %v12291_v49, %v6586_v45  ;;  %v6702_v49 = vand.u32 2147483647, %v6690_v15  ;;  %v6716_v10 = vsel %vm6715_vm14, %v10541_v0, %v6712_v4  ;;  %v10420_v0 = vld [vmem:[%s12365_s13 + $0x28] sm:$0xff]  ;;  %v10418_v51 = vld [vmem:[%s12365_s13 + $0x18] sm:$0xff] }
 0x87e   :  { %6831 = vmatmul.bf16.vlgmr.msrb.gmra.mxu1 %v6755_v34  ;;  %6857 = vmatmul.bf16.vlgmr.msra.gmra.mxu3 %v6755_v34  ;;  %vm6718_vm1 = vcmp.eq.f32.partialorder %v6717_v55, 8.507059e+37 }
 0x87f   :  { %10542 = vpow2.f32 %v9720_v13  ;;  %v6672_v27 = vrot.slane %v6599_v12, 2  ;;  %v6721_v39 = vsel %vm6718_vm1, %v6720_v33, %v6716_v10  ;;  %vm6703_vm2 = vcmp.eq.f32.partialorder %v6702_v49, 8.507059e+37 }
 0x880   :  { %v6742_v59 = vmul.f32 %v6740_v1, %v6721_v39 }
 0x881   :  { %v6680_v18 = vadd.f32 %v6672_v27, %v12885_v26  ;;  %v6705_v26 = vor.u32 1.1754944e-38, %v6704_v6 }
 0x882   :  { %v6587_v31 = vpop.f32.mrf.mxu2 }
 0x883   :  { %10544 = vtanh.f32 %v6680_v18  ;;  %v6706_v29 = vsel %vm6703_vm2, %v6705_v26, %v6701_v41 }
 0x885   :  { %v10543_v22 = vpop.eup %10542 }
 0x886   :  { %v6692_v53 = vadd.f32 1.0, %v10543_v22 }
 0x888   :  { %10546 = vrcp.f32 %v6692_v53  ;;  %v6734_v36 = vand.u32 2147483648, %v6692_v53  ;;  %v6732_v21 = vand.u32 2147483647, %v6692_v53  ;;  %vm6728_vm4 = vweird.f32 %v6692_v53 }
 0x889   :  { %v10545_v52 = vpop.eup %10544 }
 0x88a   :  { %v6743_v58 = vmul.f32 %v10545_v52, %v6706_v29  ;;  %v6735_v43 = vor.u32 1.1754944e-38, %v6734_v36  ;;  %vm6733_vm6 = vcmp.eq.f32.partialorder %v6732_v21, 8.507059e+37 }
 0x88c   :  { %v6744_v17 = vadd.f32 %v6743_v58, %v6742_v59 }
 0x88e   :  { %v10547_v40 = vpop.eup %10546  ;;  %10548 = vtanh.f32 %v6744_v17 }
 0x88f   :  { %v6724_v30 = vmul.f32 %v10547_v40, %v6692_v53  ;;  %vm6729_vm3 = vweird.f32 %v10547_v40 }
 0x890   :  { %vm6730_vm5 = vmor %vm6728_vm4, %vm6729_vm3  ;;  %vm7007_vm3 = vcmask 9216  }
 0x891   :  { %v6725_v20 = vsub.f32 1.0, %v6724_v30 }
 0x893   :  { %v6726_v7 = vmul.f32 %v10547_v40, %v6725_v20 }
 0x894   :  { %v10549_v25 = vpop.eup %10548 }
 0x895   :  { %v6727_v44 = vadd.f32 %v10547_v40, %v6726_v7 }
 0x897   :  { %v6731_v19 = vsel %vm6730_vm5, %v10547_v40, %v6727_v44 }
 0x898   :  { %v6736_v38 = vsel %vm6733_vm6, %v6735_v43, %v6731_v19 }
 0x899   :  { %v6746_v24 = vmul.f32 %v10549_v25, %v6736_v38 }
 0x89b   :  { %v6750_v8 = vpack.c.bf16 %v6746_v24, %v6746_v24 }
 0x89d   :  { %v6754_v15 = vrot.slane %v6750_v8, 3 }
 0x89f   :  { %6766 = vmatmul.bf16.vlgmr.msrb.gmra.mxu0 %v6754_v15  ;;  %6792 = vmatmul.bf16.vlgmr.msrb.gmra.mxu2 %v6754_v15 }
 0x8a0   :  { %6994 = vmatpush.bf16.msrb.mxu0 %v10422_v9 }
 0x8a4   :  { %6995 = vmatpush.bf16.msrb.mxu0 %v10421_v37 }
 0x8a8   :  { %6996 = vmatpush.bf16.msrb.mxu0 %v10420_v0 }
 0x8ac   :  { %6997 = vmatpush.bf16.msrb.mxu0 %v10419_v48 }
 0x8af   :  { %6818 = vmatmul.bf16.vlgmr.msra.gmra.mxu0 %v6754_v15  ;;  %6844 = vmatmul.bf16.vlgmr.msra.gmra.mxu2 %v6754_v15 }
 0x8b0   :  { %6998 = vmatpush.bf16.msrb.mxu0 %v10418_v51 }
 0x8eb   :  { %v6780_v28 = vpop.f32.mrf.mxu1 }
 0x8f1   :  { %v6806_v11 = vpop.f32.mrf.mxu3 }
 0x8f3   :  { %v6782_v23 = vpop.f32.mrf.mxu1 }
 0x8f9   :  { %v6808_v34 = vpop.f32.mrf.mxu3 }
 0x8fb   :  { %v6832_v46 = vpop.f32.mrf.mxu1 }
 0x901   :  { %v6858_v61 = vpop.f32.mrf.mxu3 }
 0x903   :  { %v6834_v32 = vpop.f32.mrf.mxu1 }
 0x909   :  { %v6860_v60 = vpop.f32.mrf.mxu3 }
 0x91c   :  { %v6767_v3 = vpop.f32.mrf.mxu0 }
 0x91d   :  { %v6768_v54 = vadd.f32 %v6767_v3, %v12979_v35  ;;  %v10417_v35 = vld [vmem:[%s12365_s13 + $0x10] sm:$0xff] }
 0x91e   :  { %6999 = vmatpush.bf16.msrb.mxu0 %v10417_v35 }
 0x91f   :  { %v6781_v63 = vadd.f32 %v6780_v28, %v6768_v54 }
 0x921   :  { %v9721_v5 = vmul.f32 -1.442695, %v6781_v63 }
 0x922   :  { %v6793_v45 = vpop.f32.mrf.mxu2  ;;  %7000 = vmatpush.bf16.msrb.mxu0 %v10416_v56 }
 0x923   :  { %10550 = vpow2.f32 %v9721_v5  ;;  %v6794_v47 = vadd.f32 %v6793_v45, %v12980_v42  ;;  %v10415_v42 = vld [vmem:[%s12365_s13] sm:$0xff] }
 0x924   :  { %v6769_v50 = vpop.f32.mrf.mxu0 }
 0x925   :  { %v6807_v13 = vadd.f32 %v6806_v11, %v6794_v47 }
 0x926   :  { %7001 = vmatpush.bf16.msrb.mxu0 %v10415_v42 }
 0x927   :  { %v9722_v12 = vmul.f32 -1.442695, %v6807_v13 }
 0x929   :  { %v10551_v27 = vpop.eup %10550  ;;  %10552 = vpow2.f32 %v9722_v12 }
 0x92a   :  { %v6871_v4 = vadd.f32 1.0, %v10551_v27  ;;  %v6795_v62 = vpop.f32.mrf.mxu2 }
 0x92c   :  { %10554 = vrcp.f32 %v6871_v4  ;;  %v6819_v18 = vpop.f32.mrf.mxu0  ;;  %v6885_v17 = vand.u32 2147483648, %v6871_v4  ;;  %vm6879_vm8 = vweird.f32 %v6871_v4  ;;  %v6883_v20 = vand.u32 2147483647, %v6871_v4 }
 0x92d   :  { %v6820_v16 = vadd.f32 %v6819_v18, %v12981_v57 }
 0x92e   :  { %v6886_v44 = vor.u32 1.1754944e-38, %v6885_v17  ;;  %vm6884_vm12 = vcmp.eq.f32.partialorder %v6883_v20, 8.507059e+37 }
 0x92f   :  { %v10553_v55 = vpop.eup %10552  ;;  %v6833_v31 = vadd.f32 %v6832_v46, %v6820_v16 }
 0x930   :  { %v6872_v6 = vadd.f32 1.0, %v10553_v55 }
 0x931   :  { %v9723_v49 = vmul.f32 -1.442695, %v6833_v31 }
 0x932   :  { %v10555_v10 = vpop.eup %10554  ;;  %10556 = vrcp.f32 %v6872_v6  ;;  %v6845_v22 = vpop.f32.mrf.mxu2  ;;  %v6900_v36 = vand.u32 2147483648, %v6872_v6  ;;  %v6898_v21 = vand.u32 2147483647, %v6872_v6  ;;  %vm6894_vm11 = vweird.f32 %v6872_v6 }
 0x933   :  { %v6875_v33 = vmul.f32 %v10555_v10, %v6871_v4  ;;  %10558 = vpow2.f32 %v9723_v49  ;;  %v6846_v53 = vadd.f32 %v6845_v22, %v12982_v2  ;;  %vm6880_vm7 = vweird.f32 %v10555_v10 }
 0x934   :  { %v6821_v41 = vpop.f32.mrf.mxu0  ;;  %vm6881_vm9 = vmor %vm6879_vm8, %vm6880_vm7  ;;  %v6901_v25 = vor.u32 1.1754944e-38, %v6900_v36  ;;  %vm6899_vm14 = vcmp.eq.f32.partialorder %v6898_v21, 8.507059e+37 }
 0x935   :  { %v6876_v26 = vsub.f32 1.0, %v6875_v33  ;;  %v6859_v39 = vadd.f32 %v6858_v61, %v6846_v53 }
 0x937   :  { %v6877_v1 = vmul.f32 %v10555_v10, %v6876_v26  ;;  %10560 = vtanh.f32 %v6859_v39 }
 0x938   :  { %v10557_v52 = vpop.eup %10556 }
 0x939   :  { %v10559_v29 = vpop.eup %10558  ;;  %v6890_v59 = vmul.f32 %v10557_v52, %v6872_v6  ;;  %v6878_v57 = vadd.f32 %v10555_v10, %v6877_v1  ;;  %vm6895_vm10 = vweird.f32 %v10557_v52 }
 0x93a   :  { %v6873_v58 = vadd.f32 1.0, %v10559_v29  ;;  %v6847_v40 = vpop.f32.mrf.mxu2  ;;  %vm6896_vm13 = vmor %vm6894_vm11, %vm6895_vm10 }
 0x93b   :  { %v6891_v30 = vsub.f32 1.0, %v6890_v59  ;;  %v6882_v7 = vsel %vm6881_vm9, %v10555_v10, %v6878_v57 }
 0x93c   :  { %10562 = vrcp.f32 %v6873_v58  ;;  %v6887_v38 = vsel %vm6884_vm12, %v6886_v44, %v6882_v7  ;;  %v6915_v61 = vand.u32 2147483648, %v6873_v58  ;;  %v6913_v60 = vand.u32 2147483647, %v6873_v58 }
 0x93d   :  { %v6892_v2 = vmul.f32 %v10557_v52, %v6891_v30  ;;  %v10561_v19 = vpop.eup %10560  ;;  %vm6909_vm0 = vweird.f32 %v6873_v58 }
 0x93e   :  { %v6921_v23 = vmul.f32 %v10561_v19, %v6887_v38  ;;  %v6916_v37 = vor.u32 1.1754944e-38, %v6915_v61  ;;  %vm6914_vm2 = vcmp.eq.f32.partialorder %v6913_v60, 8.507059e+37 }
 0x93f   :  { %v6893_v43 = vadd.f32 %v10557_v52, %v6892_v2 }
 0x941   :  { %v6897_v24 = vsel %vm6896_vm13, %v10557_v52, %v6893_v43 }
 0x942   :  { %v10563_v8 = vpop.eup %10562  ;;  %v6902_v15 = vsel %vm6899_vm14, %v6901_v25, %v6897_v24 }
 0x943   :  { %v6905_v28 = vmul.f32 %v10563_v8, %v6873_v58  ;;  %v6920_v11 = vmul.f32 %v6902_v15, %v12305_v14  ;;  %vm6910_vm15 = vweird.f32 %v10563_v8  ;;  %v10437_v14 = vld [vmem:[%s12366_s14] ss:$0 sm:$0xff] }
 0x944   :  { %vm6911_vm1 = vmor %vm6909_vm0, %vm6910_vm15 }
 0x945   :  { %v6906_v34 = vsub.f32 1.0, %v6905_v28  ;;  %v6922_v46 = vadd.f32 %v6921_v23, %v6920_v11 }
 0x947   :  { %v6907_v32 = vmul.f32 %v10563_v8, %v6906_v34  ;;  %10564 = vtanh.f32 %v6922_v46 }
 0x949   :  { %v6908_v9 = vadd.f32 %v10563_v8, %v6907_v32 }
 0x94b   :  { %v6912_v0 = vsel %vm6911_vm1, %v10563_v8, %v6908_v9 }
 0x94c   :  { %v6917_v3 = vsel %vm6914_vm2, %v6916_v37, %v6912_v0 }
 0x94d   :  { %v10565_v54 = vpop.eup %10564 }
 0x94e   :  { %v6924_v48 = vmul.f32 %v10565_v54, %v6917_v3 }
 0x950   :  { %v6941_v63 = vpack.c.bf16 %v6924_v48, %v6924_v48 }
 0x952   :  { %7002 = vmatmul.bf16.vlgmr.msrb.gmra.mxu0 %v6941_v63 }
 0x9cf   :  { %v7003_v5 = vpop.f32.mrf.mxu0 }
 0x9d0   :  { %v7004_v51 = vadd.f32 %v10437_v14, %v7003_v5 }
 0x9d2   :  { %7008 = vst.msk [vmem:[#allocation11] sm:$0x3] %vm7007_vm3, %v7004_v51 }
 0x9d3   :  { %7019 = dma.vmem_to_hbm [thread:$0]  %s7015_s27, 32, %s7017_s18, [#allocation4]  }
 0x9d7   :  { %v7005_v45 = vpop.f32.mrf.mxu0 }
 0x9d8   :  { %10716 = dma.done.wait [#allocation4], 32  }
 0x9d9   :  { %10717 = vsyncadd [#allocation4], 4294967264 }
 0x9da   :  { %7024 = vsyncpa [#allocation3], 1 }
 0x9db   :  { %7025 = vsyncpa [#allocation6], 1 }
 0x9dc   :  { %7026 = vsyncpa [#allocation9], 1 }
 0x9dd   :  { %7027 = vsyncpa [#allocation4], 1 }

</bundles_post_ra>
